<compile_context>
chip_gen: v6e
topology: v6e:2x2x1
jax: 0.10.0
libtpu: 0.0.40
codegen_flags: <defaults>
</compile_context>

<pallas_src>
import functools
import math

import jax
import jax.numpy as jnp
from jax.experimental import pallas as pl
from jax.experimental.pallas import tpu as pltpu

# ----------------------------- hyper-parameters (small) -----------------------------
IMG_SIZE = 16
PATCH = 4
IMG_CH = 3
VIT_DIM = 32
VIT_HEADS = 4
VIT_DH = VIT_DIM // VIT_HEADS
VIT_MLP = 64
VIT_DEPTH = 2
VIT_VECW = max(VIT_DIM, VIT_MLP)            # width of the ViT bias/LN slab rows

BERT_HID = 32
BERT_HEADS = 4
BERT_DH = BERT_HID // BERT_HEADS
BERT_INTER = 64
BERT_LAYERS = 2
VOCAB = 64
MAX_POS = 16
TYPE_VOCAB = 2
BERT_VECW = max(BERT_HID, BERT_INTER, 16)   # width of the BERT bias/LN slab rows

N_HIDDENS = 2
OUT_FEATURES = 16

_INV_SQRT2 = 0.7071067811865476
_NEG_BIG = -1e9
_NT = (((1,), (1,)), ((), ()))              # "NT" matmul: contract dim 1 of both


# ----------------------------- in-kernel helper functions -----------------------------


def _gelu(x):
    # exact (erf) GELU, matching nn.GELU / HF "gelu"
    return 0.5 * x * (1.0 + jax.lax.erf(x * _INV_SQRT2))


def _ln(x, g, b, eps):
    mu = jnp.mean(x, axis=-1, keepdims=True)
    c = x - mu
    var = jnp.mean(c * c, axis=-1, keepdims=True)
    return c * jax.lax.rsqrt(var + eps) * g + b


def _mha(x, aw_ref, ab_ref, aow_ref, layer, mask, heads, scale):
    """Multi-head self-attention with host-side head-split weights.

    x        : (R, D) activations (vregs)
    aw_ref   : (3*depth, heads, dh, D)  -- q/k/v weights, transposed per head
    ab_ref   : (3*depth, heads, dh)     -- q/k/v biases per head
    aow_ref  : (depth, heads, dh, D)    -- output-proj row-block per head
    mask     : (R, R) additive bias

    Only dense 2-D matmuls; no lane slicing of activations, no VMEM scratch,
    no masked partial stores.  Per-head proj outputs are summed in vregs.
    """
    out = None
    for hd in range(heads):
        q = jax.lax.dot_general(x, aw_ref[3 * layer + 0, hd], _NT,
                                preferred_element_type=jnp.float32)
        q = q + ab_ref[3 * layer + 0, hd:hd + 1, :]
        k = jax.lax.dot_general(x, aw_ref[3 * layer + 1, hd], _NT,
                                preferred_element_type=jnp.float32)
        k = k + ab_ref[3 * layer + 1, hd:hd + 1, :]
        v = jax.lax.dot_general(x, aw_ref[3 * layer + 2, hd], _NT,
                                preferred_element_type=jnp.float32)
        v = v + ab_ref[3 * layer + 2, hd:hd + 1, :]

        s = jax.lax.dot_general(q, k, _NT,
                                preferred_element_type=jnp.float32) * scale + mask
        s = s - jnp.max(s, axis=-1, keepdims=True)
        p = jnp.exp(s)
        p = p * pl.reciprocal(jnp.sum(p, axis=-1, keepdims=True), approx=True)

        ctx = jnp.dot(p, v, preferred_element_type=jnp.float32)
        o = jnp.dot(ctx, aow_ref[layer, hd], preferred_element_type=jnp.float32)
        out = o if out is None else out + o
    return out


# ----------------------------------- Pallas kernels ----------------------------------


def _vit_tower_kernel(mask_ref, patches_ref, pw_ref, base_ref,
                      aw_ref, ab_ref, aow_ref, mlp_ref, vec_ref,
                      out_ref, *, depth, heads, batch, cls_start):
    dim = base_ref.shape[-1]
    mlp = mlp_ref.shape[-1]
    scale = 1.0 / math.sqrt(dim // heads)
    mask = mask_ref[...]

    def vrow(r, n):                      # one (1, n) bias / LN row from the slab
        return vec_ref[r:r + 1, 0:n]

    # Patch embedding + CLS / positional assembly, entirely in registers:
    # padded patches have zero rows at CLS/pad positions; `base` carries
    # pos-emb + patch-bias for patch rows, cls+pos[0] for CLS rows, 0 for pads.
    x = jnp.dot(patches_ref[...], pw_ref[...],
                preferred_element_type=jnp.float32) + base_ref[...]

    for l in range(depth):               # pre-LN ViT blocks (unrolled)
        vb = 7 * l
        h = _ln(x, vrow(vb + 0, dim), vrow(vb + 1, dim), 1e-6)
        a = _mha(h, aw_ref, ab_ref, aow_ref, l, mask, heads, scale)
        x = x + a + vrow(vb + 4, dim)                       # + proj bias
        h = _ln(x, vrow(vb + 2, dim), vrow(vb + 3, dim), 1e-6)
        h = _gelu(jnp.dot(h, mlp_ref[l, 0:dim, :],
                          preferred_element_type=jnp.float32) + vrow(vb + 5, mlp))
        h = jnp.dot(h, mlp_ref[l, dim:dim + mlp, 0:dim],
                    preferred_element_type=jnp.float32) + vrow(vb + 6, dim)
        x = x + h

    vb = 7 * depth
    xf = _ln(x, vrow(vb, dim), vrow(vb + 1, dim), 1e-6)
    out_ref[...] = xf[cls_start:cls_start + batch, :]       # CLS tokens


def _bert_text_kernel(emb_ref, mask_ref, pool_ref, aw_ref, ab_ref, aow_ref,
                      mlp_ref, vec_ref, txtw_ref, out_ref, *, layers, heads):
    hid = emb_ref.shape[-1]
    inter = mlp_ref.shape[-1]
    nout = txtw_ref.shape[-1]
    scale = 1.0 / math.sqrt(hid // heads)
    mask = mask_ref[...]

    def vrow(r, n):
        return vec_ref[r:r + 1, 0:n]

    eb = 7 * layers
    h0 = _ln(emb_ref[...], vrow(eb, hid), vrow(eb + 1, hid), 1e-12)  # hidden_states[0]
    x = h0
    for l in range(layers):              # post-LN BERT layers (unrolled)
        vb = 7 * l
        a = _mha(x, aw_ref, ab_ref, aow_ref, l, mask, heads, scale) + vrow(vb + 4, hid)
        x = _ln(x + a, vrow(vb + 0, hid), vrow(vb + 1, hid), 1e-12)
        h = _gelu(jnp.dot(x, mlp_ref[l, 0:hid, :],
                          preferred_element_type=jnp.float32) + vrow(vb + 5, inter))
        o = jnp.dot(h, mlp_ref[l, hid:hid + inter, 0:hid],
                    preferred_element_type=jnp.float32) + vrow(vb + 6, hid)
        x = _ln(x + o, vrow(vb + 2, hid), vrow(vb + 3, hid), 1e-12)

    # Text head.  PyTorch quirk: [hs[-i] for i in range(2)] == [hs[0], hs[-1]].
    # torch.mean pools over ALL positions (incl. padding) -> pool matrix /seq.
    # The feature concat is realised by splitting the classifier weight rows.
    pool = pool_ref[...]
    feat0 = jnp.dot(pool, h0, preferred_element_type=jnp.float32)
    featl = jnp.dot(pool, x, preferred_element_type=jnp.float32)
    y = (jnp.dot(feat0, txtw_ref[0:hid, :], preferred_element_type=jnp.float32)
         + jnp.dot(featl, txtw_ref[hid:2 * hid, :], preferred_element_type=jnp.float32)
         + vrow(eb + 2, nout))
    inv = jax.lax.rsqrt(jnp.maximum(jnp.sum(y * y, axis=-1, keepdims=True), 1e-24))
    out_ref[...] = y * inv               # F.normalize(p=2, dim=1)


# ----------------------------------- kernel wrappers ----------------------------------


def _run_vit_towers(mask, patches, base, tp, batch, rows_pad, cls_start):
    pdim = patches.shape[-1]
    kernel = functools.partial(_vit_tower_kernel, depth=VIT_DEPTH, heads=VIT_HEADS,
                               batch=batch, cls_start=cls_start)
    return pl.pallas_call(
        kernel,
        out_shape=jax.ShapeDtypeStruct((2, batch, VIT_DIM), jnp.float32),
        grid=(2,),
        in_specs=[
            pl.BlockSpec((rows_pad, rows_pad), lambda t: (0, 0)),          # mask (shared)
            pl.BlockSpec((rows_pad, pdim), lambda t: (t, 0)),              # padded patches
            pl.BlockSpec((pdim, VIT_DIM), lambda t: (t, 0)),               # patch_w
            pl.BlockSpec((rows_pad, VIT_DIM), lambda t: (t, 0)),           # pos/cls base
            pl.BlockSpec((3 * VIT_DEPTH, VIT_HEADS, VIT_DH, VIT_DIM),
                         lambda t: (t, 0, 0, 0)),                          # q/k/v weights
            pl.BlockSpec((3 * VIT_DEPTH, VIT_HEADS, VIT_DH),
                         lambda t: (t, 0, 0)),                             # q/k/v biases
            pl.BlockSpec((VIT_DEPTH, VIT_HEADS, VIT_DH, VIT_DIM),
                         lambda t: (t, 0, 0, 0)),                          # proj row-blocks
            pl.BlockSpec((VIT_DEPTH, VIT_DIM + VIT_MLP, VIT_MLP),
                         lambda t: (t, 0, 0)),                             # mlp slab
            pl.BlockSpec((7 * VIT_DEPTH + 2, VIT_VECW), lambda t: (t, 0)), # bias/LN slab
        ],
        out_specs=pl.BlockSpec((None, batch, VIT_DIM), lambda t: (t, 0, 0)),
        compiler_params=pltpu.CompilerParams(dimension_semantics=("parallel",)),
    )(mask, patches, tp["patch_w"], base, tp["aw"], tp["ab"], tp["aow"],
      tp["mlpw"], tp["vec"])


def _run_bert_text(emb, mask, pool, bp, txt_w, batch, seq):
    rows = batch * seq
    kernel = functools.partial(_bert_text_kernel, layers=BERT_LAYERS, heads=BERT_HEADS)
    return pl.pallas_call(
        kernel,
        out_shape=jax.ShapeDtypeStruct((2, batch, OUT_FEATURES), jnp.float32),
        grid=(2,),
        in_specs=[
            pl.BlockSpec((rows, BERT_HID), lambda g: (g, 0)),              # embeddings
            pl.BlockSpec((rows, rows), lambda g: (g, 0)),                  # additive mask
            pl.BlockSpec((batch, rows), lambda g: (0, 0)),                 # mean-pool matrix
            pl.BlockSpec((3 * BERT_LAYERS, BERT_HEADS, BERT_DH, BERT_HID),
                         lambda g: (0, 0, 0, 0)),                          # q/k/v weights
            pl.BlockSpec((3 * BERT_LAYERS, BERT_HEADS, BERT_DH),
                         lambda g: (0, 0, 0)),                             # q/k/v biases
            pl.BlockSpec((BERT_LAYERS, BERT_HEADS, BERT_DH, BERT_HID),
                         lambda g: (0, 0, 0, 0)),                          # attn-out rows
            pl.BlockSpec((BERT_LAYERS, BERT_HID + BERT_INTER, BERT_INTER),
                         lambda g: (0, 0, 0)),                             # mlp slab
            pl.BlockSpec((7 * BERT_LAYERS + 3, BERT_VECW), lambda g: (0, 0)),
            pl.BlockSpec((2 * BERT_HID, OUT_FEATURES), lambda g: (0, 0)),  # text classifier
        ],
        out_specs=pl.BlockSpec((None, batch, OUT_FEATURES), lambda g: (g, 0, 0)),
        compiler_params=pltpu.CompilerParams(dimension_semantics=("parallel",)),
    )(emb, mask, pool, bp["aw"], bp["ab"], bp["aow"], bp["mlpw"], bp["vec"], txt_w)


# ------------------------------------- packing helpers -------------------------------------


def _row(v, width):
    return jnp.pad(v.astype(jnp.float32), (0, width - v.shape[0]))


def _split_heads_t(w, heads, dh):
    # (D_in, heads*dh) -> (heads, dh, D_in); head h slab == w[:, h*dh:(h+1)*dh].T
    return w.reshape(w.shape[0], heads, dh).transpose(1, 2, 0)


def _pack_vit_tower(p):
    aw, ab, aow, mlpw, vec = [], [], [], [], []
    for blk in p["blocks"]:
        for j in range(3):
            w = blk["qkv_w"][:, j * VIT_DIM:(j + 1) * VIT_DIM]
            b = blk["qkv_b"][j * VIT_DIM:(j + 1) * VIT_DIM]
            aw.append(_split_heads_t(w, VIT_HEADS, VIT_DH))
            ab.append(b.reshape(VIT_HEADS, VIT_DH))
        aow.append(blk["proj_w"].reshape(VIT_HEADS, VIT_DH, VIT_DIM))
        m = jnp.zeros((VIT_DIM + VIT_MLP, VIT_MLP), jnp.float32)
        m = m.at[:VIT_DIM, :].set(blk["fc1_w"]).at[VIT_DIM:, :VIT_DIM].set(blk["fc2_w"])
        mlpw.append(m)
        for v in (blk["ln1_g"], blk["ln1_b"], blk["ln2_g"], blk["ln2_b"],
                  blk["proj_b"], blk["fc1_b"], blk["fc2_b"]):
            vec.append(_row(v, VIT_VECW))
    vec.append(_row(p["norm_g"], VIT_VECW))
    vec.append(_row(p["norm_b"], VIT_VECW))
    return dict(patch_w=p["patch_w"], aw=jnp.stack(aw), ab=jnp.stack(ab),
                aow=jnp.stack(aow), mlpw=jnp.stack(mlpw), vec=jnp.stack(vec))


def _tower_base(p, batch, n_patch, rows_pad):
    body = jnp.tile(p["pos"][0, 1:, :], (batch, 1)) + p["patch_b"][None, :]
    cls = jnp.broadcast_to(p["cls"].reshape(1, VIT_DIM) + p["pos"][0, 0:1, :],
                           (batch, VIT_DIM))
    pad = jnp.zeros((rows_pad - batch * n_patch - batch, VIT_DIM), jnp.float32)
    return jnp.concatenate([body, cls, pad], axis=0)


def _pack_bert(p, txt_b):
    aw, ab, aow, mlpw, vec = [], [], [], [], []
    for l in p["layers"]:
        for name in ("q", "k", "v"):
            aw.append(_split_heads_t(l[name + "_w"], BERT_HEADS, BERT_DH))
            ab.append(l[name + "_b"].reshape(BERT_HEADS, BERT_DH))
        aow.append(l["ao_w"].reshape(BERT_HEADS, BERT_DH, BERT_HID))
        m = jnp.zeros((BERT_HID + BERT_INTER, BERT_INTER), jnp.float32)
        m = m.at[:BERT_HID, :].set(l["i_w"]).at[BERT_HID:, :BERT_HID].set(l["o_w"])
        mlpw.append(m)
        for v in (l["ao_ln_g"], l["ao_ln_b"], l["o_ln_g"], l["o_ln_b"],
                  l["ao_b"], l["i_b"], l["o_b"]):
            vec.append(_row(v, BERT_VECW))
    vec.append(_row(p["emb_ln_g"], BERT_VECW))
    vec.append(_row(p["emb_ln_b"], BERT_VECW))
    vec.append(_row(txt_b, BERT_VECW))
    return dict(aw=jnp.stack(aw), ab=jnp.stack(ab), aow=jnp.stack(aow),
                mlpw=jnp.stack(mlpw), vec=jnp.stack(vec))


# ------------------------------------- model glue -------------------------------------


def _extract_patches(img):
    b, c, hgt, wid = img.shape
    nh, nw = hgt // PATCH, wid // PATCH
    p = img.reshape(b, c, nh, PATCH, nw, PATCH)
    return p.transpose(0, 2, 4, 1, 3, 5).reshape(b * nh * nw, c * PATCH * PATCH)


def forward_image(params, background_image, cropped_image):
    batch = background_image.shape[0]
    n_patch = (IMG_SIZE // PATCH) ** 2
    rows = batch * (n_patch + 1)
    rows_pad = ((rows + 7) // 8) * 8          # sublane-align the merged token rows
    cls_start = batch * n_patch

    def prep(img, p):
        pt = _extract_patches(img)
        pt = jnp.pad(pt, ((0, rows_pad - cls_start), (0, 0)))  # zero CLS/pad rows
        return pt, _tower_base(p, batch, n_patch, rows_pad), _pack_vit_tower(p)

    pt_bg, base_bg, tp_bg = prep(background_image, params["bg_vit"])
    pt_cr, base_cr, tp_cr = prep(cropped_image, params["crop_vit"])

    cat = lambda a, b: jnp.concatenate([a, b], axis=0)
    patches = cat(pt_bg, pt_cr)
    base = cat(base_bg, base_cr)
    tp = jax.tree_util.tree_map(cat, tp_bg, tp_cr)

    # token layout: patch tokens (batch-major), then B CLS tokens, then pad rows.
    row_id = jnp.concatenate([jnp.repeat(jnp.arange(batch), n_patch),
                              jnp.arange(batch),
                              jnp.full((rows_pad - rows,), -1, jnp.int32)])
    mask = jnp.where(row_id[:, None] == row_id[None, :], 0.0,
                     _NEG_BIG).astype(jnp.float32)

    cls_feats = _run_vit_towers(mask, patches, base, tp, batch, rows_pad, cls_start)

    # Tiny image classifier + L2-normalise in plain XLA (cheaper than a 3rd launch,
    # keeps the size-2 "parallel" tower axis intact for v7x megacore).
    y = (jnp.concatenate([cls_feats[0], cls_feats[1]], axis=-1)
         @ params["img_cls_w"] + params["img_cls_b"])
    return y / jnp.maximum(jnp.sqrt(jnp.sum(y * y, axis=-1, keepdims=True)), 1e-12)


def forward_text(params, input_ids, attention_mask, token_type_ids):
    # inputs are (2, B, L): pos / neg stacked along the leading group axis.
    bert = params["bert"]
    groups, batch, seq = input_ids.shape
    rows = batch * seq

    emb = (bert["word_emb"][input_ids]
           + bert["pos_emb"][:seq][None, None]
           + bert["type_emb"][token_type_ids])                 # (2, B, L, H)
    emb = emb.reshape(groups * rows, BERT_HID)

    row_id = jnp.repeat(jnp.arange(batch), seq)
    same = row_id[:, None] == row_id[None, :]
    key_bias = (1.0 - attention_mask.reshape(groups, rows).astype(jnp.float32)) * -10000.0
    # single constant per position: 0 | -10000 (padded key) | -1e9 (cross-batch)
    mask = jnp.where(same[None], key_bias[:, None, :], _NEG_BIG).astype(jnp.float32)
    mask = mask.reshape(groups * rows, rows)

    pool = (row_id[None, :] == jnp.arange(batch)[:, None]).astype(jnp.float32) / seq

    bp = _pack_bert(bert, params["txt_cls_b"])
    out = _run_bert_text(emb, mask, pool, bp, params["txt_cls_w"], batch, seq)
    return out[0], out[1]


@jax.jit
def model_forward(params, background_image, cropped_image,
                  pos_input_ids, pos_attention_mask, pos_token_type_ids,
                  neg_input_ids, neg_attention_mask, neg_token_type_ids):
    input_ids = jnp.stack([pos_input_ids, neg_input_ids])
    attention_mask = jnp.stack([pos_attention_mask, neg_attention_mask])
    token_type_ids = jnp.stack([pos_token_type_ids, neg_token_type_ids])
    pos_output_text, neg_output_text = forward_text(
        params, input_ids, attention_mask, token_type_ids)
    output_image = forward_image(params, background_image, cropped_image)
    return output_image, pos_output_text, neg_output_text


# ------------------------------- deterministic parameters -------------------------------


def _normal(key, shape, scale=0.02):
    return scale * jax.random.normal(key, shape, dtype=jnp.float32)


def init_params(key):
    keys = iter(jax.random.split(key, 128))
    nk = lambda: next(keys)

    def vit_params():
        n_patches = (IMG_SIZE // PATCH) ** 2
        blocks = []
        for _ in range(VIT_DEPTH):
            blocks.append(dict(
                ln1_g=jnp.ones((VIT_DIM,), jnp.float32), ln1_b=jnp.zeros((VIT_DIM,), jnp.float32),
                qkv_w=_normal(nk(), (VIT_DIM, 3 * VIT_DIM)), qkv_b=jnp.zeros((3 * VIT_DIM,), jnp.float32),
                proj_w=_normal(nk(), (VIT_DIM, VIT_DIM)), proj_b=jnp.zeros((VIT_DIM,), jnp.float32),
                ln2_g=jnp.ones((VIT_DIM,), jnp.float32), ln2_b=jnp.zeros((VIT_DIM,), jnp.float32),
                fc1_w=_normal(nk(), (VIT_DIM, VIT_MLP)), fc1_b=jnp.zeros((VIT_MLP,), jnp.float32),
                fc2_w=_normal(nk(), (VIT_MLP, VIT_DIM)), fc2_b=jnp.zeros((VIT_DIM,), jnp.float32),
            ))
        return dict(
            patch_w=_normal(nk(), (IMG_CH * PATCH * PATCH, VIT_DIM)),
            patch_b=jnp.zeros((VIT_DIM,), jnp.float32),
            cls=_normal(nk(), (1, 1, VIT_DIM)),
            pos=_normal(nk(), (1, n_patches + 1, VIT_DIM)),
            blocks=blocks,
            norm_g=jnp.ones((VIT_DIM,), jnp.float32), norm_b=jnp.zeros((VIT_DIM,), jnp.float32),
        )

    def bert_params():
        layers = []
        for _ in range(BERT_LAYERS):
            layers.append(dict(
                q_w=_normal(nk(), (BERT_HID, BERT_HID)), q_b=jnp.zeros((BERT_HID,), jnp.float32),
                k_w=_normal(nk(), (BERT_HID, BERT_HID)), k_b=jnp.zeros((BERT_HID,), jnp.float32),
                v_w=_normal(nk(), (BERT_HID, BERT_HID)), v_b=jnp.zeros((BERT_HID,), jnp.float32),
                ao_w=_normal(nk(), (BERT_HID, BERT_HID)), ao_b=jnp.zeros((BERT_HID,), jnp.float32),
                ao_ln_g=jnp.ones((BERT_HID,), jnp.float32), ao_ln_b=jnp.zeros((BERT_HID,), jnp.float32),
                i_w=_normal(nk(), (BERT_HID, BERT_INTER)), i_b=jnp.zeros((BERT_INTER,), jnp.float32),
                o_w=_normal(nk(), (BERT_INTER, BERT_HID)), o_b=jnp.zeros((BERT_HID,), jnp.float32),
                o_ln_g=jnp.ones((BERT_HID,), jnp.float32), o_ln_b=jnp.zeros((BERT_HID,), jnp.float32),
            ))
        return dict(
            word_emb=_normal(nk(), (VOCAB, BERT_HID)),
            pos_emb=_normal(nk(), (MAX_POS, BERT_HID)),
            type_emb=_normal(nk(), (TYPE_VOCAB, BERT_HID)),
            emb_ln_g=jnp.ones((BERT_HID,), jnp.float32), emb_ln_b=jnp.zeros((BERT_HID,), jnp.float32),
            layers=layers,
        )

    return dict(
        bg_vit=vit_params(),
        crop_vit=vit_params(),
        bert=bert_params(),
        img_cls_w=_normal(nk(), (2 * VIT_DIM, OUT_FEATURES)),
        img_cls_b=jnp.zeros((OUT_FEATURES,), jnp.float32),
        txt_cls_w=_normal(nk(), (BERT_HID * N_HIDDENS, OUT_FEATURES)),
        txt_cls_b=jnp.zeros((OUT_FEATURES,), jnp.float32),
    )


# ------------------------------------------ main ------------------------------------------

if __name__ == "__main__":
    root = jax.random.PRNGKey(0)
    kp, ki = jax.random.split(root)
    params = init_params(kp)

    B, L = 2, 8
    k1, k2, k3, k4, k5, k6 = jax.random.split(ki, 6)
    background_image = jax.random.normal(k1, (B, IMG_CH, IMG_SIZE, IMG_SIZE), jnp.float32)
    cropped_image = jax.random.normal(k2, (B, IMG_CH, IMG_SIZE, IMG_SIZE), jnp.float32)

    pos_input_ids = jax.random.randint(k3, (B, L), 0, VOCAB, dtype=jnp.int32)
    neg_input_ids = jax.random.randint(k4, (B, L), 0, VOCAB, dtype=jnp.int32)
    pos_attention_mask = jnp.ones((B, L), jnp.int32).at[1, L - 2:].set(0)
    neg_attention_mask = jnp.ones((B, L), jnp.int32).at[0, L - 3:].set(0)
    pos_token_type_ids = jax.random.randint(k5, (B, L), 0, TYPE_VOCAB, dtype=jnp.int32)
    neg_token_type_ids = jax.random.randint(k6, (B, L), 0, TYPE_VOCAB, dtype=jnp.int32)

    out_img, out_pos, out_neg = model_forward(
        params, background_image, cropped_image,
        pos_input_ids, pos_attention_mask, pos_token_type_ids,
        neg_input_ids, neg_attention_mask, neg_token_type_ids)

    jax.block_until_ready((out_img, out_pos, out_neg))
    assert out_img.shape == (B, OUT_FEATURES)
    assert out_pos.shape == (B, OUT_FEATURES)
    assert out_neg.shape == (B, OUT_FEATURES)
    assert bool(jnp.all(jnp.isfinite(out_img)))
    assert bool(jnp.all(jnp.isfinite(out_pos)))
    assert bool(jnp.all(jnp.isfinite(out_neg)))
    print("KERNEL_OK")
</pallas_src>

<mosaic_0001>
module attributes {stable_mosaic.version = 11 : i64} {
  func.func @_vit_tower_kernel(%arg0: i32, %arg1: memref<40x40xf32, #tpu.memory_space<vmem>>, %arg2: memref<40x48xf32, #tpu.memory_space<vmem>>, %arg3: memref<48x32xf32, #tpu.memory_space<vmem>>, %arg4: memref<40x32xf32, #tpu.memory_space<vmem>>, %arg5: memref<6x4x8x32xf32, #tpu.memory_space<vmem>>, %arg6: memref<6x4x8xf32, #tpu.memory_space<vmem>>, %arg7: memref<2x4x8x32xf32, #tpu.memory_space<vmem>>, %arg8: memref<2x96x64xf32, #tpu.memory_space<vmem>>, %arg9: memref<16x64xf32, #tpu.memory_space<vmem>>, %arg10: memref<1x2x32xf32, #tpu.memory_space<vmem>>) attributes {dimension_semantics = [#tpu.dimension_semantics<parallel>], iteration_bounds = array<i64: 2>, scalar_prefetch = 0 : i64, scratch_operands = 0 : i64, tpu.core_type = #tpu.core_type<tc>, window_params = [{pipeline_mode = #tpu.pipeline_mode<synchronous>, transform_indices = @transform_0, window_bounds = array<i64: 40, 40>}, {transform_indices = @transform_1, window_bounds = array<i64: 40, 48>}, {transform_indices = @transform_2, window_bounds = array<i64: 48, 32>}, {transform_indices = @transform_3, window_bounds = array<i64: 40, 32>}, {transform_indices = @transform_4, window_bounds = array<i64: 6, 4, 8, 32>}, {transform_indices = @transform_5, window_bounds = array<i64: 6, 4, 8>}, {transform_indices = @transform_6, window_bounds = array<i64: 2, 4, 8, 32>}, {transform_indices = @transform_7, window_bounds = array<i64: 2, 96, 64>}, {transform_indices = @transform_8, window_bounds = array<i64: 16, 64>}, {transform_indices = @transform_9, window_bounds = array<i64: 1, 2, 32>}]} {
    %c0 = arith.constant 0 : index
    %c0_0 = arith.constant 0 : index
    %0 = vector.load %arg1[%c0, %c0_0] : memref<40x40xf32, #tpu.memory_space<vmem>>, vector<40x40xf32>
    %c0_1 = arith.constant 0 : index
    %c0_2 = arith.constant 0 : index
    %1 = vector.load %arg2[%c0_1, %c0_2] : memref<40x48xf32, #tpu.memory_space<vmem>>, vector<40x48xf32>
    %c0_3 = arith.constant 0 : index
    %c0_4 = arith.constant 0 : index
    %2 = vector.load %arg3[%c0_3, %c0_4] : memref<48x32xf32, #tpu.memory_space<vmem>>, vector<48x32xf32>
    %cst = arith.constant dense<0.000000e+00> : vector<40x32xf32>
    %3 = tpu.matmul %1, %2, %cst {dimension_numbers = #tpu.dot_dimension_numbers<[1], [0], [0], [1], [0, 0, 1, 1], [], []>} : vector<40x48xf32>, vector<48x32xf32>, vector<40x32xf32> -> vector<40x32xf32>
    %c0_5 = arith.constant 0 : index
    %c0_6 = arith.constant 0 : index
    %4 = vector.load %arg4[%c0_5, %c0_6] : memref<40x32xf32, #tpu.memory_space<vmem>>, vector<40x32xf32>
    %5 = arith.addf %3, %4 : vector<40x32xf32>
    %c0_7 = arith.constant 0 : index
    %c0_8 = arith.constant 0 : index
    %6 = vector.load %arg9[%c0_7, %c0_8] : memref<16x64xf32, #tpu.memory_space<vmem>>, vector<1x32xf32>
    %c1 = arith.constant 1 : index
    %c0_9 = arith.constant 0 : index
    %7 = vector.load %arg9[%c1, %c0_9] : memref<16x64xf32, #tpu.memory_space<vmem>>, vector<1x32xf32>
    %cst_10 = arith.constant dense<0.000000e+00> : vector<40xf32>
    %8 = vector.multi_reduction <add>, %5, %cst_10 [1] : vector<40x32xf32> to vector<40xf32>
    %9 = vector.shape_cast %8 : vector<40xf32> to vector<40x1xf32>
    %cst_11 = arith.constant 3.200000e+01 : f32
    %10 = vector.broadcast %cst_11 : f32 to vector<40x1xf32>
    %11 = arith.divf %9, %10 : vector<40x1xf32>
    %12 = vector.broadcast %11 : vector<40x1xf32> to vector<40x32xf32>
    %13 = arith.subf %5, %12 : vector<40x32xf32>
    %14 = arith.mulf %13, %13 : vector<40x32xf32>
    %cst_12 = arith.constant dense<0.000000e+00> : vector<40xf32>
    %15 = vector.multi_reduction <add>, %14, %cst_12 [1] : vector<40x32xf32> to vector<40xf32>
    %16 = vector.shape_cast %15 : vector<40xf32> to vector<40x1xf32>
    %cst_13 = arith.constant 3.200000e+01 : f32
    %17 = vector.broadcast %cst_13 : f32 to vector<40x1xf32>
    %18 = arith.divf %16, %17 : vector<40x1xf32>
    %cst_14 = arith.constant 9.99999997E-7 : f32
    %19 = vector.broadcast %cst_14 : f32 to vector<40x1xf32>
    %20 = arith.addf %18, %19 : vector<40x1xf32>
    %21 = math.rsqrt %20 : vector<40x1xf32>
    %22 = vector.broadcast %21 : vector<40x1xf32> to vector<40x32xf32>
    %23 = arith.mulf %13, %22 : vector<40x32xf32>
    %24 = vector.broadcast %6 : vector<1x32xf32> to vector<40x32xf32>
    %25 = arith.mulf %23, %24 : vector<40x32xf32>
    %26 = vector.broadcast %7 : vector<1x32xf32> to vector<40x32xf32>
    %27 = arith.addf %25, %26 : vector<40x32xf32>
    %c0_15 = arith.constant 0 : index
    %c0_16 = arith.constant 0 : index
    %c0_17 = arith.constant 0 : index
    %c0_18 = arith.constant 0 : index
    %28 = vector.load %arg5[%c0_15, %c0_16, %c0_17, %c0_18] : memref<6x4x8x32xf32, #tpu.memory_space<vmem>>, vector<1x1x8x32xf32>
    %29 = vector.shape_cast %28 : vector<1x1x8x32xf32> to vector<8x32xf32>
    %cst_19 = arith.constant dense<0.000000e+00> : vector<40x8xf32>
    %30 = tpu.matmul %27, %29, %cst_19 {dimension_numbers = #tpu.dot_dimension_numbers<[1], [1], [0], [0], [0, 0, 1, 0], [], []>} : vector<40x32xf32>, vector<8x32xf32>, vector<40x8xf32> -> vector<40x8xf32>
    %c0_20 = arith.constant 0 : index
    %c0_21 = arith.constant 0 : index
    %c0_22 = arith.constant 0 : index
    %31 = vector.load %arg6[%c0_20, %c0_21, %c0_22] : memref<6x4x8xf32, #tpu.memory_space<vmem>>, vector<1x1x8xf32>
    %32 = vector.shape_cast %31 : vector<1x1x8xf32> to vector<1x8xf32>
    %33 = vector.broadcast %32 : vector<1x8xf32> to vector<40x8xf32>
    %34 = arith.addf %30, %33 : vector<40x8xf32>
    %c1_23 = arith.constant 1 : index
    %c0_24 = arith.constant 0 : index
    %c0_25 = arith.constant 0 : index
    %c0_26 = arith.constant 0 : index
    %35 = vector.load %arg5[%c1_23, %c0_24, %c0_25, %c0_26] : memref<6x4x8x32xf32, #tpu.memory_space<vmem>>, vector<1x1x8x32xf32>
    %36 = vector.shape_cast %35 : vector<1x1x8x32xf32> to vector<8x32xf32>
    %cst_27 = arith.constant dense<0.000000e+00> : vector<40x8xf32>
    %37 = tpu.matmul %27, %36, %cst_27 {dimension_numbers = #tpu.dot_dimension_numbers<[1], [1], [0], [0], [0, 0, 1, 0], [], []>} : vector<40x32xf32>, vector<8x32xf32>, vector<40x8xf32> -> vector<40x8xf32>
    %c1_28 = arith.constant 1 : index
    %c0_29 = arith.constant 0 : index
    %c0_30 = arith.constant 0 : index
    %38 = vector.load %arg6[%c1_28, %c0_29, %c0_30] : memref<6x4x8xf32, #tpu.memory_space<vmem>>, vector<1x1x8xf32>
    %39 = vector.shape_cast %38 : vector<1x1x8xf32> to vector<1x8xf32>
    %40 = vector.broadcast %39 : vector<1x8xf32> to vector<40x8xf32>
    %41 = arith.addf %37, %40 : vector<40x8xf32>
    %c2 = arith.constant 2 : index
    %c0_31 = arith.constant 0 : index
    %c0_32 = arith.constant 0 : index
    %c0_33 = arith.constant 0 : index
    %42 = vector.load %arg5[%c2, %c0_31, %c0_32, %c0_33] : memref<6x4x8x32xf32, #tpu.memory_space<vmem>>, vector<1x1x8x32xf32>
    %43 = vector.shape_cast %42 : vector<1x1x8x32xf32> to vector<8x32xf32>
    %cst_34 = arith.constant dense<0.000000e+00> : vector<40x8xf32>
    %44 = tpu.matmul %27, %43, %cst_34 {dimension_numbers = #tpu.dot_dimension_numbers<[1], [1], [0], [0], [0, 0, 1, 0], [], []>} : vector<40x32xf32>, vector<8x32xf32>, vector<40x8xf32> -> vector<40x8xf32>
    %c2_35 = arith.constant 2 : index
    %c0_36 = arith.constant 0 : index
    %c0_37 = arith.constant 0 : index
    %45 = vector.load %arg6[%c2_35, %c0_36, %c0_37] : memref<6x4x8xf32, #tpu.memory_space<vmem>>, vector<1x1x8xf32>
    %46 = vector.shape_cast %45 : vector<1x1x8xf32> to vector<1x8xf32>
    %47 = vector.broadcast %46 : vector<1x8xf32> to vector<40x8xf32>
    %48 = arith.addf %44, %47 : vector<40x8xf32>
    %cst_38 = arith.constant dense<0.000000e+00> : vector<40x40xf32>
    %49 = tpu.matmul %34, %41, %cst_38 {dimension_numbers = #tpu.dot_dimension_numbers<[1], [1], [0], [0], [0, 0, 1, 0], [], []>} : vector<40x8xf32>, vector<40x8xf32>, vector<40x40xf32> -> vector<40x40xf32>
    %cst_39 = arith.constant 0.353553385 : f32
    %50 = vector.broadcast %cst_39 : f32 to vector<40x40xf32>
    %51 = arith.mulf %49, %50 : vector<40x40xf32>
    %52 = arith.addf %51, %0 : vector<40x40xf32>
    %cst_40 = arith.constant dense<0xFF800000> : vector<40xf32>
    %53 = vector.multi_reduction <maximumf>, %52, %cst_40 [1] : vector<40x40xf32> to vector<40xf32>
    %54 = vector.shape_cast %53 : vector<40xf32> to vector<40x1xf32>
    %55 = vector.broadcast %54 : vector<40x1xf32> to vector<40x40xf32>
    %56 = arith.subf %52, %55 : vector<40x40xf32>
    %57 = math.exp %56 : vector<40x40xf32>
    %cst_41 = arith.constant dense<0.000000e+00> : vector<40xf32>
    %58 = vector.multi_reduction <add>, %57, %cst_41 [1] : vector<40x40xf32> to vector<40xf32>
    %59 = vector.shape_cast %58 : vector<40xf32> to vector<40x1xf32>
    %60 = tpu.reciprocal %59 {approx = true} : vector<40x1xf32> -> vector<40x1xf32>
    %61 = vector.broadcast %60 : vector<40x1xf32> to vector<40x40xf32>
    %62 = arith.mulf %57, %61 : vector<40x40xf32>
    %cst_42 = arith.constant dense<0.000000e+00> : vector<40x8xf32>
    %63 = tpu.matmul %62, %48, %cst_42 {dimension_numbers = #tpu.dot_dimension_numbers<[1], [0], [0], [1], [0, 0, 1, 1], [], []>} : vector<40x40xf32>, vector<40x8xf32>, vector<40x8xf32> -> vector<40x8xf32>
    %c0_43 = arith.constant 0 : index
    %c0_44 = arith.constant 0 : index
    %c0_45 = arith.constant 0 : index
    %c0_46 = arith.constant 0 : index
    %64 = vector.load %arg7[%c0_43, %c0_44, %c0_45, %c0_46] : memref<2x4x8x32xf32, #tpu.memory_space<vmem>>, vector<1x1x8x32xf32>
    %65 = vector.shape_cast %64 : vector<1x1x8x32xf32> to vector<8x32xf32>
    %cst_47 = arith.constant dense<0.000000e+00> : vector<40x32xf32>
    %66 = tpu.matmul %63, %65, %cst_47 {dimension_numbers = #tpu.dot_dimension_numbers<[1], [0], [0], [1], [0, 0, 1, 1], [], []>} : vector<40x8xf32>, vector<8x32xf32>, vector<40x32xf32> -> vector<40x32xf32>
    %c0_48 = arith.constant 0 : index
    %c1_49 = arith.constant 1 : index
    %c0_50 = arith.constant 0 : index
    %c0_51 = arith.constant 0 : index
    %67 = vector.load %arg5[%c0_48, %c1_49, %c0_50, %c0_51] : memref<6x4x8x32xf32, #tpu.memory_space<vmem>>, vector<1x1x8x32xf32>
    %68 = vector.shape_cast %67 : vector<1x1x8x32xf32> to vector<8x32xf32>
    %cst_52 = arith.constant dense<0.000000e+00> : vector<40x8xf32>
    %69 = tpu.matmul %27, %68, %cst_52 {dimension_numbers = #tpu.dot_dimension_numbers<[1], [1], [0], [0], [0, 0, 1, 0], [], []>} : vector<40x32xf32>, vector<8x32xf32>, vector<40x8xf32> -> vector<40x8xf32>
    %c0_53 = arith.constant 0 : index
    %c1_54 = arith.constant 1 : index
    %c0_55 = arith.constant 0 : index
    %70 = vector.load %arg6[%c0_53, %c1_54, %c0_55] : memref<6x4x8xf32, #tpu.memory_space<vmem>>, vector<1x1x8xf32>
    %71 = vector.shape_cast %70 : vector<1x1x8xf32> to vector<1x8xf32>
    %72 = vector.broadcast %71 : vector<1x8xf32> to vector<40x8xf32>
    %73 = arith.addf %69, %72 : vector<40x8xf32>
    %c1_56 = arith.constant 1 : index
    %c1_57 = arith.constant 1 : index
    %c0_58 = arith.constant 0 : index
    %c0_59 = arith.constant 0 : index
    %74 = vector.load %arg5[%c1_56, %c1_57, %c0_58, %c0_59] : memref<6x4x8x32xf32, #tpu.memory_space<vmem>>, vector<1x1x8x32xf32>
    %75 = vector.shape_cast %74 : vector<1x1x8x32xf32> to vector<8x32xf32>
    %cst_60 = arith.constant dense<0.000000e+00> : vector<40x8xf32>
    %76 = tpu.matmul %27, %75, %cst_60 {dimension_numbers = #tpu.dot_dimension_numbers<[1], [1], [0], [0], [0, 0, 1, 0], [], []>} : vector<40x32xf32>, vector<8x32xf32>, vector<40x8xf32> -> vector<40x8xf32>
    %c1_61 = arith.constant 1 : index
    %c1_62 = arith.constant 1 : index
    %c0_63 = arith.constant 0 : index
    %77 = vector.load %arg6[%c1_61, %c1_62, %c0_63] : memref<6x4x8xf32, #tpu.memory_space<vmem>>, vector<1x1x8xf32>
    %78 = vector.shape_cast %77 : vector<1x1x8xf32> to vector<1x8xf32>
    %79 = vector.broadcast %78 : vector<1x8xf32> to vector<40x8xf32>
    %80 = arith.addf %76, %79 : vector<40x8xf32>
    %c2_64 = arith.constant 2 : index
    %c1_65 = arith.constant 1 : index
    %c0_66 = arith.constant 0 : index
    %c0_67 = arith.constant 0 : index
    %81 = vector.load %arg5[%c2_64, %c1_65, %c0_66, %c0_67] : memref<6x4x8x32xf32, #tpu.memory_space<vmem>>, vector<1x1x8x32xf32>
    %82 = vector.shape_cast %81 : vector<1x1x8x32xf32> to vector<8x32xf32>
    %cst_68 = arith.constant dense<0.000000e+00> : vector<40x8xf32>
    %83 = tpu.matmul %27, %82, %cst_68 {dimension_numbers = #tpu.dot_dimension_numbers<[1], [1], [0], [0], [0, 0, 1, 0], [], []>} : vector<40x32xf32>, vector<8x32xf32>, vector<40x8xf32> -> vector<40x8xf32>
    %c2_69 = arith.constant 2 : index
    %c1_70 = arith.constant 1 : index
    %c0_71 = arith.constant 0 : index
    %84 = vector.load %arg6[%c2_69, %c1_70, %c0_71] : memref<6x4x8xf32, #tpu.memory_space<vmem>>, vector<1x1x8xf32>
    %85 = vector.shape_cast %84 : vector<1x1x8xf32> to vector<1x8xf32>
    %86 = vector.broadcast %85 : vector<1x8xf32> to vector<40x8xf32>
    %87 = arith.addf %83, %86 : vector<40x8xf32>
    %cst_72 = arith.constant dense<0.000000e+00> : vector<40x40xf32>
    %88 = tpu.matmul %73, %80, %cst_72 {dimension_numbers = #tpu.dot_dimension_numbers<[1], [1], [0], [0], [0, 0, 1, 0], [], []>} : vector<40x8xf32>, vector<40x8xf32>, vector<40x40xf32> -> vector<40x40xf32>
    %cst_73 = arith.constant 0.353553385 : f32
    %89 = vector.broadcast %cst_73 : f32 to vector<40x40xf32>
    %90 = arith.mulf %88, %89 : vector<40x40xf32>
    %91 = arith.addf %90, %0 : vector<40x40xf32>
    %cst_74 = arith.constant dense<0xFF800000> : vector<40xf32>
    %92 = vector.multi_reduction <maximumf>, %91, %cst_74 [1] : vector<40x40xf32> to vector<40xf32>
    %93 = vector.shape_cast %92 : vector<40xf32> to vector<40x1xf32>
    %94 = vector.broadcast %93 : vector<40x1xf32> to vector<40x40xf32>
    %95 = arith.subf %91, %94 : vector<40x40xf32>
    %96 = math.exp %95 : vector<40x40xf32>
    %cst_75 = arith.constant dense<0.000000e+00> : vector<40xf32>
    %97 = vector.multi_reduction <add>, %96, %cst_75 [1] : vector<40x40xf32> to vector<40xf32>
    %98 = vector.shape_cast %97 : vector<40xf32> to vector<40x1xf32>
    %99 = tpu.reciprocal %98 {approx = true} : vector<40x1xf32> -> vector<40x1xf32>
    %100 = vector.broadcast %99 : vector<40x1xf32> to vector<40x40xf32>
    %101 = arith.mulf %96, %100 : vector<40x40xf32>
    %cst_76 = arith.constant dense<0.000000e+00> : vector<40x8xf32>
    %102 = tpu.matmul %101, %87, %cst_76 {dimension_numbers = #tpu.dot_dimension_numbers<[1], [0], [0], [1], [0, 0, 1, 1], [], []>} : vector<40x40xf32>, vector<40x8xf32>, vector<40x8xf32> -> vector<40x8xf32>
    %c0_77 = arith.constant 0 : index
    %c1_78 = arith.constant 1 : index
    %c0_79 = arith.constant 0 : index
    %c0_80 = arith.constant 0 : index
    %103 = vector.load %arg7[%c0_77, %c1_78, %c0_79, %c0_80] : memref<2x4x8x32xf32, #tpu.memory_space<vmem>>, vector<1x1x8x32xf32>
    %104 = vector.shape_cast %103 : vector<1x1x8x32xf32> to vector<8x32xf32>
    %cst_81 = arith.constant dense<0.000000e+00> : vector<40x32xf32>
    %105 = tpu.matmul %102, %104, %cst_81 {dimension_numbers = #tpu.dot_dimension_numbers<[1], [0], [0], [1], [0, 0, 1, 1], [], []>} : vector<40x8xf32>, vector<8x32xf32>, vector<40x32xf32> -> vector<40x32xf32>
    %106 = arith.addf %66, %105 : vector<40x32xf32>
    %c0_82 = arith.constant 0 : index
    %c2_83 = arith.constant 2 : index
    %c0_84 = arith.constant 0 : index
    %c0_85 = arith.constant 0 : index
    %107 = vector.load %arg5[%c0_82, %c2_83, %c0_84, %c0_85] : memref<6x4x8x32xf32, #tpu.memory_space<vmem>>, vector<1x1x8x32xf32>
    %108 = vector.shape_cast %107 : vector<1x1x8x32xf32> to vector<8x32xf32>
    %cst_86 = arith.constant dense<0.000000e+00> : vector<40x8xf32>
    %109 = tpu.matmul %27, %108, %cst_86 {dimension_numbers = #tpu.dot_dimension_numbers<[1], [1], [0], [0], [0, 0, 1, 0], [], []>} : vector<40x32xf32>, vector<8x32xf32>, vector<40x8xf32> -> vector<40x8xf32>
    %c0_87 = arith.constant 0 : index
    %c2_88 = arith.constant 2 : index
    %c0_89 = arith.constant 0 : index
    %110 = vector.load %arg6[%c0_87, %c2_88, %c0_89] : memref<6x4x8xf32, #tpu.memory_space<vmem>>, vector<1x1x8xf32>
    %111 = vector.shape_cast %110 : vector<1x1x8xf32> to vector<1x8xf32>
    %112 = vector.broadcast %111 : vector<1x8xf32> to vector<40x8xf32>
    %113 = arith.addf %109, %112 : vector<40x8xf32>
    %c1_90 = arith.constant 1 : index
    %c2_91 = arith.constant 2 : index
    %c0_92 = arith.constant 0 : index
    %c0_93 = arith.constant 0 : index
    %114 = vector.load %arg5[%c1_90, %c2_91, %c0_92, %c0_93] : memref<6x4x8x32xf32, #tpu.memory_space<vmem>>, vector<1x1x8x32xf32>
    %115 = vector.shape_cast %114 : vector<1x1x8x32xf32> to vector<8x32xf32>
    %cst_94 = arith.constant dense<0.000000e+00> : vector<40x8xf32>
    %116 = tpu.matmul %27, %115, %cst_94 {dimension_numbers = #tpu.dot_dimension_numbers<[1], [1], [0], [0], [0, 0, 1, 0], [], []>} : vector<40x32xf32>, vector<8x32xf32>, vector<40x8xf32> -> vector<40x8xf32>
    %c1_95 = arith.constant 1 : index
    %c2_96 = arith.constant 2 : index
    %c0_97 = arith.constant 0 : index
    %117 = vector.load %arg6[%c1_95, %c2_96, %c0_97] : memref<6x4x8xf32, #tpu.memory_space<vmem>>, vector<1x1x8xf32>
    %118 = vector.shape_cast %117 : vector<1x1x8xf32> to vector<1x8xf32>
    %119 = vector.broadcast %118 : vector<1x8xf32> to vector<40x8xf32>
    %120 = arith.addf %116, %119 : vector<40x8xf32>
    %c2_98 = arith.constant 2 : index
    %c2_99 = arith.constant 2 : index
    %c0_100 = arith.constant 0 : index
    %c0_101 = arith.constant 0 : index
    %121 = vector.load %arg5[%c2_98, %c2_99, %c0_100, %c0_101] : memref<6x4x8x32xf32, #tpu.memory_space<vmem>>, vector<1x1x8x32xf32>
    %122 = vector.shape_cast %121 : vector<1x1x8x32xf32> to vector<8x32xf32>
    %cst_102 = arith.constant dense<0.000000e+00> : vector<40x8xf32>
    %123 = tpu.matmul %27, %122, %cst_102 {dimension_numbers = #tpu.dot_dimension_numbers<[1], [1], [0], [0], [0, 0, 1, 0], [], []>} : vector<40x32xf32>, vector<8x32xf32>, vector<40x8xf32> -> vector<40x8xf32>
    %c2_103 = arith.constant 2 : index
    %c2_104 = arith.constant 2 : index
    %c0_105 = arith.constant 0 : index
    %124 = vector.load %arg6[%c2_103, %c2_104, %c0_105] : memref<6x4x8xf32, #tpu.memory_space<vmem>>, vector<1x1x8xf32>
    %125 = vector.shape_cast %124 : vector<1x1x8xf32> to vector<1x8xf32>
    %126 = vector.broadcast %125 : vector<1x8xf32> to vector<40x8xf32>
    %127 = arith.addf %123, %126 : vector<40x8xf32>
    %cst_106 = arith.constant dense<0.000000e+00> : vector<40x40xf32>
    %128 = tpu.matmul %113, %120, %cst_106 {dimension_numbers = #tpu.dot_dimension_numbers<[1], [1], [0], [0], [0, 0, 1, 0], [], []>} : vector<40x8xf32>, vector<40x8xf32>, vector<40x40xf32> -> vector<40x40xf32>
    %cst_107 = arith.constant 0.353553385 : f32
    %129 = vector.broadcast %cst_107 : f32 to vector<40x40xf32>
    %130 = arith.mulf %128, %129 : vector<40x40xf32>
    %131 = arith.addf %130, %0 : vector<40x40xf32>
    %cst_108 = arith.constant dense<0xFF800000> : vector<40xf32>
    %132 = vector.multi_reduction <maximumf>, %131, %cst_108 [1] : vector<40x40xf32> to vector<40xf32>
    %133 = vector.shape_cast %132 : vector<40xf32> to vector<40x1xf32>
    %134 = vector.broadcast %133 : vector<40x1xf32> to vector<40x40xf32>
    %135 = arith.subf %131, %134 : vector<40x40xf32>
    %136 = math.exp %135 : vector<40x40xf32>
    %cst_109 = arith.constant dense<0.000000e+00> : vector<40xf32>
    %137 = vector.multi_reduction <add>, %136, %cst_109 [1] : vector<40x40xf32> to vector<40xf32>
    %138 = vector.shape_cast %137 : vector<40xf32> to vector<40x1xf32>
    %139 = tpu.reciprocal %138 {approx = true} : vector<40x1xf32> -> vector<40x1xf32>
    %140 = vector.broadcast %139 : vector<40x1xf32> to vector<40x40xf32>
    %141 = arith.mulf %136, %140 : vector<40x40xf32>
    %cst_110 = arith.constant dense<0.000000e+00> : vector<40x8xf32>
    %142 = tpu.matmul %141, %127, %cst_110 {dimension_numbers = #tpu.dot_dimension_numbers<[1], [0], [0], [1], [0, 0, 1, 1], [], []>} : vector<40x40xf32>, vector<40x8xf32>, vector<40x8xf32> -> vector<40x8xf32>
    %c0_111 = arith.constant 0 : index
    %c2_112 = arith.constant 2 : index
    %c0_113 = arith.constant 0 : index
    %c0_114 = arith.constant 0 : index
    %143 = vector.load %arg7[%c0_111, %c2_112, %c0_113, %c0_114] : memref<2x4x8x32xf32, #tpu.memory_space<vmem>>, vector<1x1x8x32xf32>
    %144 = vector.shape_cast %143 : vector<1x1x8x32xf32> to vector<8x32xf32>
    %cst_115 = arith.constant dense<0.000000e+00> : vector<40x32xf32>
    %145 = tpu.matmul %142, %144, %cst_115 {dimension_numbers = #tpu.dot_dimension_numbers<[1], [0], [0], [1], [0, 0, 1, 1], [], []>} : vector<40x8xf32>, vector<8x32xf32>, vector<40x32xf32> -> vector<40x32xf32>
    %146 = arith.addf %106, %145 : vector<40x32xf32>
    %c0_116 = arith.constant 0 : index
    %c3 = arith.constant 3 : index
    %c0_117 = arith.constant 0 : index
    %c0_118 = arith.constant 0 : index
    %147 = vector.load %arg5[%c0_116, %c3, %c0_117, %c0_118] : memref<6x4x8x32xf32, #tpu.memory_space<vmem>>, vector<1x1x8x32xf32>
    %148 = vector.shape_cast %147 : vector<1x1x8x32xf32> to vector<8x32xf32>
    %cst_119 = arith.constant dense<0.000000e+00> : vector<40x8xf32>
    %149 = tpu.matmul %27, %148, %cst_119 {dimension_numbers = #tpu.dot_dimension_numbers<[1], [1], [0], [0], [0, 0, 1, 0], [], []>} : vector<40x32xf32>, vector<8x32xf32>, vector<40x8xf32> -> vector<40x8xf32>
    %c0_120 = arith.constant 0 : index
    %c3_121 = arith.constant 3 : index
    %c0_122 = arith.constant 0 : index
    %150 = vector.load %arg6[%c0_120, %c3_121, %c0_122] : memref<6x4x8xf32, #tpu.memory_space<vmem>>, vector<1x1x8xf32>
    %151 = vector.shape_cast %150 : vector<1x1x8xf32> to vector<1x8xf32>
    %152 = vector.broadcast %151 : vector<1x8xf32> to vector<40x8xf32>
    %153 = arith.addf %149, %152 : vector<40x8xf32>
    %c1_123 = arith.constant 1 : index
    %c3_124 = arith.constant 3 : index
    %c0_125 = arith.constant 0 : index
    %c0_126 = arith.constant 0 : index
    %154 = vector.load %arg5[%c1_123, %c3_124, %c0_125, %c0_126] : memref<6x4x8x32xf32, #tpu.memory_space<vmem>>, vector<1x1x8x32xf32>
    %155 = vector.shape_cast %154 : vector<1x1x8x32xf32> to vector<8x32xf32>
    %cst_127 = arith.constant dense<0.000000e+00> : vector<40x8xf32>
    %156 = tpu.matmul %27, %155, %cst_127 {dimension_numbers = #tpu.dot_dimension_numbers<[1], [1], [0], [0], [0, 0, 1, 0], [], []>} : vector<40x32xf32>, vector<8x32xf32>, vector<40x8xf32> -> vector<40x8xf32>
    %c1_128 = arith.constant 1 : index
    %c3_129 = arith.constant 3 : index
    %c0_130 = arith.constant 0 : index
    %157 = vector.load %arg6[%c1_128, %c3_129, %c0_130] : memref<6x4x8xf32, #tpu.memory_space<vmem>>, vector<1x1x8xf32>
    %158 = vector.shape_cast %157 : vector<1x1x8xf32> to vector<1x8xf32>
    %159 = vector.broadcast %158 : vector<1x8xf32> to vector<40x8xf32>
    %160 = arith.addf %156, %159 : vector<40x8xf32>
    %c2_131 = arith.constant 2 : index
    %c3_132 = arith.constant 3 : index
    %c0_133 = arith.constant 0 : index
    %c0_134 = arith.constant 0 : index
    %161 = vector.load %arg5[%c2_131, %c3_132, %c0_133, %c0_134] : memref<6x4x8x32xf32, #tpu.memory_space<vmem>>, vector<1x1x8x32xf32>
    %162 = vector.shape_cast %161 : vector<1x1x8x32xf32> to vector<8x32xf32>
    %cst_135 = arith.constant dense<0.000000e+00> : vector<40x8xf32>
    %163 = tpu.matmul %27, %162, %cst_135 {dimension_numbers = #tpu.dot_dimension_numbers<[1], [1], [0], [0], [0, 0, 1, 0], [], []>} : vector<40x32xf32>, vector<8x32xf32>, vector<40x8xf32> -> vector<40x8xf32>
    %c2_136 = arith.constant 2 : index
    %c3_137 = arith.constant 3 : index
    %c0_138 = arith.constant 0 : index
    %164 = vector.load %arg6[%c2_136, %c3_137, %c0_138] : memref<6x4x8xf32, #tpu.memory_space<vmem>>, vector<1x1x8xf32>
    %165 = vector.shape_cast %164 : vector<1x1x8xf32> to vector<1x8xf32>
    %166 = vector.broadcast %165 : vector<1x8xf32> to vector<40x8xf32>
    %167 = arith.addf %163, %166 : vector<40x8xf32>
    %cst_139 = arith.constant dense<0.000000e+00> : vector<40x40xf32>
    %168 = tpu.matmul %153, %160, %cst_139 {dimension_numbers = #tpu.dot_dimension_numbers<[1], [1], [0], [0], [0, 0, 1, 0], [], []>} : vector<40x8xf32>, vector<40x8xf32>, vector<40x40xf32> -> vector<40x40xf32>
    %cst_140 = arith.constant 0.353553385 : f32
    %169 = vector.broadcast %cst_140 : f32 to vector<40x40xf32>
    %170 = arith.mulf %168, %169 : vector<40x40xf32>
    %171 = arith.addf %170, %0 : vector<40x40xf32>
    %cst_141 = arith.constant dense<0xFF800000> : vector<40xf32>
    %172 = vector.multi_reduction <maximumf>, %171, %cst_141 [1] : vector<40x40xf32> to vector<40xf32>
    %173 = vector.shape_cast %172 : vector<40xf32> to vector<40x1xf32>
    %174 = vector.broadcast %173 : vector<40x1xf32> to vector<40x40xf32>
    %175 = arith.subf %171, %174 : vector<40x40xf32>
    %176 = math.exp %175 : vector<40x40xf32>
    %cst_142 = arith.constant dense<0.000000e+00> : vector<40xf32>
    %177 = vector.multi_reduction <add>, %176, %cst_142 [1] : vector<40x40xf32> to vector<40xf32>
    %178 = vector.shape_cast %177 : vector<40xf32> to vector<40x1xf32>
    %179 = tpu.reciprocal %178 {approx = true} : vector<40x1xf32> -> vector<40x1xf32>
    %180 = vector.broadcast %179 : vector<40x1xf32> to vector<40x40xf32>
    %181 = arith.mulf %176, %180 : vector<40x40xf32>
    %cst_143 = arith.constant dense<0.000000e+00> : vector<40x8xf32>
    %182 = tpu.matmul %181, %167, %cst_143 {dimension_numbers = #tpu.dot_dimension_numbers<[1], [0], [0], [1], [0, 0, 1, 1], [], []>} : vector<40x40xf32>, vector<40x8xf32>, vector<40x8xf32> -> vector<40x8xf32>
    %c0_144 = arith.constant 0 : index
    %c3_145 = arith.constant 3 : index
    %c0_146 = arith.constant 0 : index
    %c0_147 = arith.constant 0 : index
    %183 = vector.load %arg7[%c0_144, %c3_145, %c0_146, %c0_147] : memref<2x4x8x32xf32, #tpu.memory_space<vmem>>, vector<1x1x8x32xf32>
    %184 = vector.shape_cast %183 : vector<1x1x8x32xf32> to vector<8x32xf32>
    %cst_148 = arith.constant dense<0.000000e+00> : vector<40x32xf32>
    %185 = tpu.matmul %182, %184, %cst_148 {dimension_numbers = #tpu.dot_dimension_numbers<[1], [0], [0], [1], [0, 0, 1, 1], [], []>} : vector<40x8xf32>, vector<8x32xf32>, vector<40x32xf32> -> vector<40x32xf32>
    %186 = arith.addf %146, %185 : vector<40x32xf32>
    %187 = arith.addf %5, %186 : vector<40x32xf32>
    %c4 = arith.constant 4 : index
    %c0_149 = arith.constant 0 : index
    %188 = vector.load %arg9[%c4, %c0_149] : memref<16x64xf32, #tpu.memory_space<vmem>>, vector<1x32xf32>
    %189 = vector.broadcast %188 : vector<1x32xf32> to vector<40x32xf32>
    %190 = arith.addf %187, %189 : vector<40x32xf32>
    %c2_150 = arith.constant 2 : index
    %c0_151 = arith.constant 0 : index
    %191 = vector.load %arg9[%c2_150, %c0_151] : memref<16x64xf32, #tpu.memory_space<vmem>>, vector<1x32xf32>
    %c3_152 = arith.constant 3 : index
    %c0_153 = arith.constant 0 : index
    %192 = vector.load %arg9[%c3_152, %c0_153] : memref<16x64xf32, #tpu.memory_space<vmem>>, vector<1x32xf32>
    %cst_154 = arith.constant dense<0.000000e+00> : vector<40xf32>
    %193 = vector.multi_reduction <add>, %190, %cst_154 [1] : vector<40x32xf32> to vector<40xf32>
    %194 = vector.shape_cast %193 : vector<40xf32> to vector<40x1xf32>
    %cst_155 = arith.constant 3.200000e+01 : f32
    %195 = vector.broadcast %cst_155 : f32 to vector<40x1xf32>
    %196 = arith.divf %194, %195 : vector<40x1xf32>
    %197 = vector.broadcast %196 : vector<40x1xf32> to vector<40x32xf32>
    %198 = arith.subf %190, %197 : vector<40x32xf32>
    %199 = arith.mulf %198, %198 : vector<40x32xf32>
    %cst_156 = arith.constant dense<0.000000e+00> : vector<40xf32>
    %200 = vector.multi_reduction <add>, %199, %cst_156 [1] : vector<40x32xf32> to vector<40xf32>
    %201 = vector.shape_cast %200 : vector<40xf32> to vector<40x1xf32>
    %cst_157 = arith.constant 3.200000e+01 : f32
    %202 = vector.broadcast %cst_157 : f32 to vector<40x1xf32>
    %203 = arith.divf %201, %202 : vector<40x1xf32>
    %cst_158 = arith.constant 9.99999997E-7 : f32
    %204 = vector.broadcast %cst_158 : f32 to vector<40x1xf32>
    %205 = arith.addf %203, %204 : vector<40x1xf32>
    %206 = math.rsqrt %205 : vector<40x1xf32>
    %207 = vector.broadcast %206 : vector<40x1xf32> to vector<40x32xf32>
    %208 = arith.mulf %198, %207 : vector<40x32xf32>
    %209 = vector.broadcast %191 : vector<1x32xf32> to vector<40x32xf32>
    %210 = arith.mulf %208, %209 : vector<40x32xf32>
    %211 = vector.broadcast %192 : vector<1x32xf32> to vector<40x32xf32>
    %212 = arith.addf %210, %211 : vector<40x32xf32>
    %c0_159 = arith.constant 0 : index
    %c0_160 = arith.constant 0 : index
    %c0_161 = arith.constant 0 : index
    %213 = vector.load %arg8[%c0_159, %c0_160, %c0_161] : memref<2x96x64xf32, #tpu.memory_space<vmem>>, vector<1x32x64xf32>
    %214 = vector.shape_cast %213 : vector<1x32x64xf32> to vector<32x64xf32>
    %cst_162 = arith.constant dense<0.000000e+00> : vector<40x64xf32>
    %215 = tpu.matmul %212, %214, %cst_162 {dimension_numbers = #tpu.dot_dimension_numbers<[1], [0], [0], [1], [0, 0, 1, 1], [], []>} : vector<40x32xf32>, vector<32x64xf32>, vector<40x64xf32> -> vector<40x64xf32>
    %c5 = arith.constant 5 : index
    %c0_163 = arith.constant 0 : index
    %216 = vector.load %arg9[%c5, %c0_163] : memref<16x64xf32, #tpu.memory_space<vmem>>, vector<1x64xf32>
    %217 = vector.broadcast %216 : vector<1x64xf32> to vector<40x64xf32>
    %218 = arith.addf %215, %217 : vector<40x64xf32>
    %cst_164 = arith.constant 5.000000e-01 : f32
    %219 = vector.broadcast %cst_164 : f32 to vector<40x64xf32>
    %220 = arith.mulf %219, %218 : vector<40x64xf32>
    %cst_165 = arith.constant 0.707106769 : f32
    %221 = vector.broadcast %cst_165 : f32 to vector<40x64xf32>
    %222 = arith.mulf %218, %221 : vector<40x64xf32>
    %223 = math.erf %222 : vector<40x64xf32>
    %cst_166 = arith.constant 1.000000e+00 : f32
    %224 = vector.broadcast %cst_166 : f32 to vector<40x64xf32>
    %225 = arith.addf %224, %223 : vector<40x64xf32>
    %226 = arith.mulf %220, %225 : vector<40x64xf32>
    %c0_167 = arith.constant 0 : index
    %c32 = arith.constant 32 : index
    %c0_168 = arith.constant 0 : index
    %227 = vector.load %arg8[%c0_167, %c32, %c0_168] : memref<2x96x64xf32, #tpu.memory_space<vmem>>, vector<1x64x32xf32>
    %228 = vector.shape_cast %227 : vector<1x64x32xf32> to vector<64x32xf32>
    %cst_169 = arith.constant dense<0.000000e+00> : vector<40x32xf32>
    %229 = tpu.matmul %226, %228, %cst_169 {dimension_numbers = #tpu.dot_dimension_numbers<[1], [0], [0], [1], [0, 0, 1, 1], [], []>} : vector<40x64xf32>, vector<64x32xf32>, vector<40x32xf32> -> vector<40x32xf32>
    %c6 = arith.constant 6 : index
    %c0_170 = arith.constant 0 : index
    %230 = vector.load %arg9[%c6, %c0_170] : memref<16x64xf32, #tpu.memory_space<vmem>>, vector<1x32xf32>
    %231 = vector.broadcast %230 : vector<1x32xf32> to vector<40x32xf32>
    %232 = arith.addf %229, %231 : vector<40x32xf32>
    %233 = arith.addf %190, %232 : vector<40x32xf32>
    %c7 = arith.constant 7 : index
    %c0_171 = arith.constant 0 : index
    %234 = vector.load %arg9[%c7, %c0_171] : memref<16x64xf32, #tpu.memory_space<vmem>>, vector<1x32xf32>
    %c8 = arith.constant 8 : index
    %c0_172 = arith.constant 0 : index
    %235 = vector.load %arg9[%c8, %c0_172] : memref<16x64xf32, #tpu.memory_space<vmem>>, vector<1x32xf32>
    %cst_173 = arith.constant dense<0.000000e+00> : vector<40xf32>
    %236 = vector.multi_reduction <add>, %233, %cst_173 [1] : vector<40x32xf32> to vector<40xf32>
    %237 = vector.shape_cast %236 : vector<40xf32> to vector<40x1xf32>
    %cst_174 = arith.constant 3.200000e+01 : f32
    %238 = vector.broadcast %cst_174 : f32 to vector<40x1xf32>
    %239 = arith.divf %237, %238 : vector<40x1xf32>
    %240 = vector.broadcast %239 : vector<40x1xf32> to vector<40x32xf32>
    %241 = arith.subf %233, %240 : vector<40x32xf32>
    %242 = arith.mulf %241, %241 : vector<40x32xf32>
    %cst_175 = arith.constant dense<0.000000e+00> : vector<40xf32>
    %243 = vector.multi_reduction <add>, %242, %cst_175 [1] : vector<40x32xf32> to vector<40xf32>
    %244 = vector.shape_cast %243 : vector<40xf32> to vector<40x1xf32>
    %cst_176 = arith.constant 3.200000e+01 : f32
    %245 = vector.broadcast %cst_176 : f32 to vector<40x1xf32>
    %246 = arith.divf %244, %245 : vector<40x1xf32>
    %cst_177 = arith.constant 9.99999997E-7 : f32
    %247 = vector.broadcast %cst_177 : f32 to vector<40x1xf32>
    %248 = arith.addf %246, %247 : vector<40x1xf32>
    %249 = math.rsqrt %248 : vector<40x1xf32>
    %250 = vector.broadcast %249 : vector<40x1xf32> to vector<40x32xf32>
    %251 = arith.mulf %241, %250 : vector<40x32xf32>
    %252 = vector.broadcast %234 : vector<1x32xf32> to vector<40x32xf32>
    %253 = arith.mulf %251, %252 : vector<40x32xf32>
    %254 = vector.broadcast %235 : vector<1x32xf32> to vector<40x32xf32>
    %255 = arith.addf %253, %254 : vector<40x32xf32>
    %c3_178 = arith.constant 3 : index
    %c0_179 = arith.constant 0 : index
    %c0_180 = arith.constant 0 : index
    %c0_181 = arith.constant 0 : index
    %256 = vector.load %arg5[%c3_178, %c0_179, %c0_180, %c0_181] : memref<6x4x8x32xf32, #tpu.memory_space<vmem>>, vector<1x1x8x32xf32>
    %257 = vector.shape_cast %256 : vector<1x1x8x32xf32> to vector<8x32xf32>
    %cst_182 = arith.constant dense<0.000000e+00> : vector<40x8xf32>
    %258 = tpu.matmul %255, %257, %cst_182 {dimension_numbers = #tpu.dot_dimension_numbers<[1], [1], [0], [0], [0, 0, 1, 0], [], []>} : vector<40x32xf32>, vector<8x32xf32>, vector<40x8xf32> -> vector<40x8xf32>
    %c3_183 = arith.constant 3 : index
    %c0_184 = arith.constant 0 : index
    %c0_185 = arith.constant 0 : index
    %259 = vector.load %arg6[%c3_183, %c0_184, %c0_185] : memref<6x4x8xf32, #tpu.memory_space<vmem>>, vector<1x1x8xf32>
    %260 = vector.shape_cast %259 : vector<1x1x8xf32> to vector<1x8xf32>
    %261 = vector.broadcast %260 : vector<1x8xf32> to vector<40x8xf32>
    %262 = arith.addf %258, %261 : vector<40x8xf32>
    %c4_186 = arith.constant 4 : index
    %c0_187 = arith.constant 0 : index
    %c0_188 = arith.constant 0 : index
    %c0_189 = arith.constant 0 : index
    %263 = vector.load %arg5[%c4_186, %c0_187, %c0_188, %c0_189] : memref<6x4x8x32xf32, #tpu.memory_space<vmem>>, vector<1x1x8x32xf32>
    %264 = vector.shape_cast %263 : vector<1x1x8x32xf32> to vector<8x32xf32>
    %cst_190 = arith.constant dense<0.000000e+00> : vector<40x8xf32>
    %265 = tpu.matmul %255, %264, %cst_190 {dimension_numbers = #tpu.dot_dimension_numbers<[1], [1], [0], [0], [0, 0, 1, 0], [], []>} : vector<40x32xf32>, vector<8x32xf32>, vector<40x8xf32> -> vector<40x8xf32>
    %c4_191 = arith.constant 4 : index
    %c0_192 = arith.constant 0 : index
    %c0_193 = arith.constant 0 : index
    %266 = vector.load %arg6[%c4_191, %c0_192, %c0_193] : memref<6x4x8xf32, #tpu.memory_space<vmem>>, vector<1x1x8xf32>
    %267 = vector.shape_cast %266 : vector<1x1x8xf32> to vector<1x8xf32>
    %268 = vector.broadcast %267 : vector<1x8xf32> to vector<40x8xf32>
    %269 = arith.addf %265, %268 : vector<40x8xf32>
    %c5_194 = arith.constant 5 : index
    %c0_195 = arith.constant 0 : index
    %c0_196 = arith.constant 0 : index
    %c0_197 = arith.constant 0 : index
    %270 = vector.load %arg5[%c5_194, %c0_195, %c0_196, %c0_197] : memref<6x4x8x32xf32, #tpu.memory_space<vmem>>, vector<1x1x8x32xf32>
    %271 = vector.shape_cast %270 : vector<1x1x8x32xf32> to vector<8x32xf32>
    %cst_198 = arith.constant dense<0.000000e+00> : vector<40x8xf32>
    %272 = tpu.matmul %255, %271, %cst_198 {dimension_numbers = #tpu.dot_dimension_numbers<[1], [1], [0], [0], [0, 0, 1, 0], [], []>} : vector<40x32xf32>, vector<8x32xf32>, vector<40x8xf32> -> vector<40x8xf32>
    %c5_199 = arith.constant 5 : index
    %c0_200 = arith.constant 0 : index
    %c0_201 = arith.constant 0 : index
    %273 = vector.load %arg6[%c5_199, %c0_200, %c0_201] : memref<6x4x8xf32, #tpu.memory_space<vmem>>, vector<1x1x8xf32>
    %274 = vector.shape_cast %273 : vector<1x1x8xf32> to vector<1x8xf32>
    %275 = vector.broadcast %274 : vector<1x8xf32> to vector<40x8xf32>
    %276 = arith.addf %272, %275 : vector<40x8xf32>
    %cst_202 = arith.constant dense<0.000000e+00> : vector<40x40xf32>
    %277 = tpu.matmul %262, %269, %cst_202 {dimension_numbers = #tpu.dot_dimension_numbers<[1], [1], [0], [0], [0, 0, 1, 0], [], []>} : vector<40x8xf32>, vector<40x8xf32>, vector<40x40xf32> -> vector<40x40xf32>
    %cst_203 = arith.constant 0.353553385 : f32
    %278 = vector.broadcast %cst_203 : f32 to vector<40x40xf32>
    %279 = arith.mulf %277, %278 : vector<40x40xf32>
    %280 = arith.addf %279, %0 : vector<40x40xf32>
    %cst_204 = arith.constant dense<0xFF800000> : vector<40xf32>
    %281 = vector.multi_reduction <maximumf>, %280, %cst_204 [1] : vector<40x40xf32> to vector<40xf32>
    %282 = vector.shape_cast %281 : vector<40xf32> to vector<40x1xf32>
    %283 = vector.broadcast %282 : vector<40x1xf32> to vector<40x40xf32>
    %284 = arith.subf %280, %283 : vector<40x40xf32>
    %285 = math.exp %284 : vector<40x40xf32>
    %cst_205 = arith.constant dense<0.000000e+00> : vector<40xf32>
    %286 = vector.multi_reduction <add>, %285, %cst_205 [1] : vector<40x40xf32> to vector<40xf32>
    %287 = vector.shape_cast %286 : vector<40xf32> to vector<40x1xf32>
    %288 = tpu.reciprocal %287 {approx = true} : vector<40x1xf32> -> vector<40x1xf32>
    %289 = vector.broadcast %288 : vector<40x1xf32> to vector<40x40xf32>
    %290 = arith.mulf %285, %289 : vector<40x40xf32>
    %cst_206 = arith.constant dense<0.000000e+00> : vector<40x8xf32>
    %291 = tpu.matmul %290, %276, %cst_206 {dimension_numbers = #tpu.dot_dimension_numbers<[1], [0], [0], [1], [0, 0, 1, 1], [], []>} : vector<40x40xf32>, vector<40x8xf32>, vector<40x8xf32> -> vector<40x8xf32>
    %c1_207 = arith.constant 1 : index
    %c0_208 = arith.constant 0 : index
    %c0_209 = arith.constant 0 : index
    %c0_210 = arith.constant 0 : index
    %292 = vector.load %arg7[%c1_207, %c0_208, %c0_209, %c0_210] : memref<2x4x8x32xf32, #tpu.memory_space<vmem>>, vector<1x1x8x32xf32>
    %293 = vector.shape_cast %292 : vector<1x1x8x32xf32> to vector<8x32xf32>
    %cst_211 = arith.constant dense<0.000000e+00> : vector<40x32xf32>
    %294 = tpu.matmul %291, %293, %cst_211 {dimension_numbers = #tpu.dot_dimension_numbers<[1], [0], [0], [1], [0, 0, 1, 1], [], []>} : vector<40x8xf32>, vector<8x32xf32>, vector<40x32xf32> -> vector<40x32xf32>
    %c3_212 = arith.constant 3 : index
    %c1_213 = arith.constant 1 : index
    %c0_214 = arith.constant 0 : index
    %c0_215 = arith.constant 0 : index
    %295 = vector.load %arg5[%c3_212, %c1_213, %c0_214, %c0_215] : memref<6x4x8x32xf32, #tpu.memory_space<vmem>>, vector<1x1x8x32xf32>
    %296 = vector.shape_cast %295 : vector<1x1x8x32xf32> to vector<8x32xf32>
    %cst_216 = arith.constant dense<0.000000e+00> : vector<40x8xf32>
    %297 = tpu.matmul %255, %296, %cst_216 {dimension_numbers = #tpu.dot_dimension_numbers<[1], [1], [0], [0], [0, 0, 1, 0], [], []>} : vector<40x32xf32>, vector<8x32xf32>, vector<40x8xf32> -> vector<40x8xf32>
    %c3_217 = arith.constant 3 : index
    %c1_218 = arith.constant 1 : index
    %c0_219 = arith.constant 0 : index
    %298 = vector.load %arg6[%c3_217, %c1_218, %c0_219] : memref<6x4x8xf32, #tpu.memory_space<vmem>>, vector<1x1x8xf32>
    %299 = vector.shape_cast %298 : vector<1x1x8xf32> to vector<1x8xf32>
    %300 = vector.broadcast %299 : vector<1x8xf32> to vector<40x8xf32>
    %301 = arith.addf %297, %300 : vector<40x8xf32>
    %c4_220 = arith.constant 4 : index
    %c1_221 = arith.constant 1 : index
    %c0_222 = arith.constant 0 : index
    %c0_223 = arith.constant 0 : index
    %302 = vector.load %arg5[%c4_220, %c1_221, %c0_222, %c0_223] : memref<6x4x8x32xf32, #tpu.memory_space<vmem>>, vector<1x1x8x32xf32>
    %303 = vector.shape_cast %302 : vector<1x1x8x32xf32> to vector<8x32xf32>
    %cst_224 = arith.constant dense<0.000000e+00> : vector<40x8xf32>
    %304 = tpu.matmul %255, %303, %cst_224 {dimension_numbers = #tpu.dot_dimension_numbers<[1], [1], [0], [0], [0, 0, 1, 0], [], []>} : vector<40x32xf32>, vector<8x32xf32>, vector<40x8xf32> -> vector<40x8xf32>
    %c4_225 = arith.constant 4 : index
    %c1_226 = arith.constant 1 : index
    %c0_227 = arith.constant 0 : index
    %305 = vector.load %arg6[%c4_225, %c1_226, %c0_227] : memref<6x4x8xf32, #tpu.memory_space<vmem>>, vector<1x1x8xf32>
    %306 = vector.shape_cast %305 : vector<1x1x8xf32> to vector<1x8xf32>
    %307 = vector.broadcast %306 : vector<1x8xf32> to vector<40x8xf32>
    %308 = arith.addf %304, %307 : vector<40x8xf32>
    %c5_228 = arith.constant 5 : index
    %c1_229 = arith.constant 1 : index
    %c0_230 = arith.constant 0 : index
    %c0_231 = arith.constant 0 : index
    %309 = vector.load %arg5[%c5_228, %c1_229, %c0_230, %c0_231] : memref<6x4x8x32xf32, #tpu.memory_space<vmem>>, vector<1x1x8x32xf32>
    %310 = vector.shape_cast %309 : vector<1x1x8x32xf32> to vector<8x32xf32>
    %cst_232 = arith.constant dense<0.000000e+00> : vector<40x8xf32>
    %311 = tpu.matmul %255, %310, %cst_232 {dimension_numbers = #tpu.dot_dimension_numbers<[1], [1], [0], [0], [0, 0, 1, 0], [], []>} : vector<40x32xf32>, vector<8x32xf32>, vector<40x8xf32> -> vector<40x8xf32>
    %c5_233 = arith.constant 5 : index
    %c1_234 = arith.constant 1 : index
    %c0_235 = arith.constant 0 : index
    %312 = vector.load %arg6[%c5_233, %c1_234, %c0_235] : memref<6x4x8xf32, #tpu.memory_space<vmem>>, vector<1x1x8xf32>
    %313 = vector.shape_cast %312 : vector<1x1x8xf32> to vector<1x8xf32>
    %314 = vector.broadcast %313 : vector<1x8xf32> to vector<40x8xf32>
    %315 = arith.addf %311, %314 : vector<40x8xf32>
    %cst_236 = arith.constant dense<0.000000e+00> : vector<40x40xf32>
    %316 = tpu.matmul %301, %308, %cst_236 {dimension_numbers = #tpu.dot_dimension_numbers<[1], [1], [0], [0], [0, 0, 1, 0], [], []>} : vector<40x8xf32>, vector<40x8xf32>, vector<40x40xf32> -> vector<40x40xf32>
    %cst_237 = arith.constant 0.353553385 : f32
    %317 = vector.broadcast %cst_237 : f32 to vector<40x40xf32>
    %318 = arith.mulf %316, %317 : vector<40x40xf32>
    %319 = arith.addf %318, %0 : vector<40x40xf32>
    %cst_238 = arith.constant dense<0xFF800000> : vector<40xf32>
    %320 = vector.multi_reduction <maximumf>, %319, %cst_238 [1] : vector<40x40xf32> to vector<40xf32>
    %321 = vector.shape_cast %320 : vector<40xf32> to vector<40x1xf32>
    %322 = vector.broadcast %321 : vector<40x1xf32> to vector<40x40xf32>
    %323 = arith.subf %319, %322 : vector<40x40xf32>
    %324 = math.exp %323 : vector<40x40xf32>
    %cst_239 = arith.constant dense<0.000000e+00> : vector<40xf32>
    %325 = vector.multi_reduction <add>, %324, %cst_239 [1] : vector<40x40xf32> to vector<40xf32>
    %326 = vector.shape_cast %325 : vector<40xf32> to vector<40x1xf32>
    %327 = tpu.reciprocal %326 {approx = true} : vector<40x1xf32> -> vector<40x1xf32>
    %328 = vector.broadcast %327 : vector<40x1xf32> to vector<40x40xf32>
    %329 = arith.mulf %324, %328 : vector<40x40xf32>
    %cst_240 = arith.constant dense<0.000000e+00> : vector<40x8xf32>
    %330 = tpu.matmul %329, %315, %cst_240 {dimension_numbers = #tpu.dot_dimension_numbers<[1], [0], [0], [1], [0, 0, 1, 1], [], []>} : vector<40x40xf32>, vector<40x8xf32>, vector<40x8xf32> -> vector<40x8xf32>
    %c1_241 = arith.constant 1 : index
    %c1_242 = arith.constant 1 : index
    %c0_243 = arith.constant 0 : index
    %c0_244 = arith.constant 0 : index
    %331 = vector.load %arg7[%c1_241, %c1_242, %c0_243, %c0_244] : memref<2x4x8x32xf32, #tpu.memory_space<vmem>>, vector<1x1x8x32xf32>
    %332 = vector.shape_cast %331 : vector<1x1x8x32xf32> to vector<8x32xf32>
    %cst_245 = arith.constant dense<0.000000e+00> : vector<40x32xf32>
    %333 = tpu.matmul %330, %332, %cst_245 {dimension_numbers = #tpu.dot_dimension_numbers<[1], [0], [0], [1], [0, 0, 1, 1], [], []>} : vector<40x8xf32>, vector<8x32xf32>, vector<40x32xf32> -> vector<40x32xf32>
    %334 = arith.addf %294, %333 : vector<40x32xf32>
    %c3_246 = arith.constant 3 : index
    %c2_247 = arith.constant 2 : index
    %c0_248 = arith.constant 0 : index
    %c0_249 = arith.constant 0 : index
    %335 = vector.load %arg5[%c3_246, %c2_247, %c0_248, %c0_249] : memref<6x4x8x32xf32, #tpu.memory_space<vmem>>, vector<1x1x8x32xf32>
    %336 = vector.shape_cast %335 : vector<1x1x8x32xf32> to vector<8x32xf32>
    %cst_250 = arith.constant dense<0.000000e+00> : vector<40x8xf32>
    %337 = tpu.matmul %255, %336, %cst_250 {dimension_numbers = #tpu.dot_dimension_numbers<[1], [1], [0], [0], [0, 0, 1, 0], [], []>} : vector<40x32xf32>, vector<8x32xf32>, vector<40x8xf32> -> vector<40x8xf32>
    %c3_251 = arith.constant 3 : index
    %c2_252 = arith.constant 2 : index
    %c0_253 = arith.constant 0 : index
    %338 = vector.load %arg6[%c3_251, %c2_252, %c0_253] : memref<6x4x8xf32, #tpu.memory_space<vmem>>, vector<1x1x8xf32>
    %339 = vector.shape_cast %338 : vector<1x1x8xf32> to vector<1x8xf32>
    %340 = vector.broadcast %339 : vector<1x8xf32> to vector<40x8xf32>
    %341 = arith.addf %337, %340 : vector<40x8xf32>
    %c4_254 = arith.constant 4 : index
    %c2_255 = arith.constant 2 : index
    %c0_256 = arith.constant 0 : index
    %c0_257 = arith.constant 0 : index
    %342 = vector.load %arg5[%c4_254, %c2_255, %c0_256, %c0_257] : memref<6x4x8x32xf32, #tpu.memory_space<vmem>>, vector<1x1x8x32xf32>
    %343 = vector.shape_cast %342 : vector<1x1x8x32xf32> to vector<8x32xf32>
    %cst_258 = arith.constant dense<0.000000e+00> : vector<40x8xf32>
    %344 = tpu.matmul %255, %343, %cst_258 {dimension_numbers = #tpu.dot_dimension_numbers<[1], [1], [0], [0], [0, 0, 1, 0], [], []>} : vector<40x32xf32>, vector<8x32xf32>, vector<40x8xf32> -> vector<40x8xf32>
    %c4_259 = arith.constant 4 : index
    %c2_260 = arith.constant 2 : index
    %c0_261 = arith.constant 0 : index
    %345 = vector.load %arg6[%c4_259, %c2_260, %c0_261] : memref<6x4x8xf32, #tpu.memory_space<vmem>>, vector<1x1x8xf32>
    %346 = vector.shape_cast %345 : vector<1x1x8xf32> to vector<1x8xf32>
    %347 = vector.broadcast %346 : vector<1x8xf32> to vector<40x8xf32>
    %348 = arith.addf %344, %347 : vector<40x8xf32>
    %c5_262 = arith.constant 5 : index
    %c2_263 = arith.constant 2 : index
    %c0_264 = arith.constant 0 : index
    %c0_265 = arith.constant 0 : index
    %349 = vector.load %arg5[%c5_262, %c2_263, %c0_264, %c0_265] : memref<6x4x8x32xf32, #tpu.memory_space<vmem>>, vector<1x1x8x32xf32>
    %350 = vector.shape_cast %349 : vector<1x1x8x32xf32> to vector<8x32xf32>
    %cst_266 = arith.constant dense<0.000000e+00> : vector<40x8xf32>
    %351 = tpu.matmul %255, %350, %cst_266 {dimension_numbers = #tpu.dot_dimension_numbers<[1], [1], [0], [0], [0, 0, 1, 0], [], []>} : vector<40x32xf32>, vector<8x32xf32>, vector<40x8xf32> -> vector<40x8xf32>
    %c5_267 = arith.constant 5 : index
    %c2_268 = arith.constant 2 : index
    %c0_269 = arith.constant 0 : index
    %352 = vector.load %arg6[%c5_267, %c2_268, %c0_269] : memref<6x4x8xf32, #tpu.memory_space<vmem>>, vector<1x1x8xf32>
    %353 = vector.shape_cast %352 : vector<1x1x8xf32> to vector<1x8xf32>
    %354 = vector.broadcast %353 : vector<1x8xf32> to vector<40x8xf32>
    %355 = arith.addf %351, %354 : vector<40x8xf32>
    %cst_270 = arith.constant dense<0.000000e+00> : vector<40x40xf32>
    %356 = tpu.matmul %341, %348, %cst_270 {dimension_numbers = #tpu.dot_dimension_numbers<[1], [1], [0], [0], [0, 0, 1, 0], [], []>} : vector<40x8xf32>, vector<40x8xf32>, vector<40x40xf32> -> vector<40x40xf32>
    %cst_271 = arith.constant 0.353553385 : f32
    %357 = vector.broadcast %cst_271 : f32 to vector<40x40xf32>
    %358 = arith.mulf %356, %357 : vector<40x40xf32>
    %359 = arith.addf %358, %0 : vector<40x40xf32>
    %cst_272 = arith.constant dense<0xFF800000> : vector<40xf32>
    %360 = vector.multi_reduction <maximumf>, %359, %cst_272 [1] : vector<40x40xf32> to vector<40xf32>
    %361 = vector.shape_cast %360 : vector<40xf32> to vector<40x1xf32>
    %362 = vector.broadcast %361 : vector<40x1xf32> to vector<40x40xf32>
    %363 = arith.subf %359, %362 : vector<40x40xf32>
    %364 = math.exp %363 : vector<40x40xf32>
    %cst_273 = arith.constant dense<0.000000e+00> : vector<40xf32>
    %365 = vector.multi_reduction <add>, %364, %cst_273 [1] : vector<40x40xf32> to vector<40xf32>
    %366 = vector.shape_cast %365 : vector<40xf32> to vector<40x1xf32>
    %367 = tpu.reciprocal %366 {approx = true} : vector<40x1xf32> -> vector<40x1xf32>
    %368 = vector.broadcast %367 : vector<40x1xf32> to vector<40x40xf32>
    %369 = arith.mulf %364, %368 : vector<40x40xf32>
    %cst_274 = arith.constant dense<0.000000e+00> : vector<40x8xf32>
    %370 = tpu.matmul %369, %355, %cst_274 {dimension_numbers = #tpu.dot_dimension_numbers<[1], [0], [0], [1], [0, 0, 1, 1], [], []>} : vector<40x40xf32>, vector<40x8xf32>, vector<40x8xf32> -> vector<40x8xf32>
    %c1_275 = arith.constant 1 : index
    %c2_276 = arith.constant 2 : index
    %c0_277 = arith.constant 0 : index
    %c0_278 = arith.constant 0 : index
    %371 = vector.load %arg7[%c1_275, %c2_276, %c0_277, %c0_278] : memref<2x4x8x32xf32, #tpu.memory_space<vmem>>, vector<1x1x8x32xf32>
    %372 = vector.shape_cast %371 : vector<1x1x8x32xf32> to vector<8x32xf32>
    %cst_279 = arith.constant dense<0.000000e+00> : vector<40x32xf32>
    %373 = tpu.matmul %370, %372, %cst_279 {dimension_numbers = #tpu.dot_dimension_numbers<[1], [0], [0], [1], [0, 0, 1, 1], [], []>} : vector<40x8xf32>, vector<8x32xf32>, vector<40x32xf32> -> vector<40x32xf32>
    %374 = arith.addf %334, %373 : vector<40x32xf32>
    %c3_280 = arith.constant 3 : index
    %c3_281 = arith.constant 3 : index
    %c0_282 = arith.constant 0 : index
    %c0_283 = arith.constant 0 : index
    %375 = vector.load %arg5[%c3_280, %c3_281, %c0_282, %c0_283] : memref<6x4x8x32xf32, #tpu.memory_space<vmem>>, vector<1x1x8x32xf32>
    %376 = vector.shape_cast %375 : vector<1x1x8x32xf32> to vector<8x32xf32>
    %cst_284 = arith.constant dense<0.000000e+00> : vector<40x8xf32>
    %377 = tpu.matmul %255, %376, %cst_284 {dimension_numbers = #tpu.dot_dimension_numbers<[1], [1], [0], [0], [0, 0, 1, 0], [], []>} : vector<40x32xf32>, vector<8x32xf32>, vector<40x8xf32> -> vector<40x8xf32>
    %c3_285 = arith.constant 3 : index
    %c3_286 = arith.constant 3 : index
    %c0_287 = arith.constant 0 : index
    %378 = vector.load %arg6[%c3_285, %c3_286, %c0_287] : memref<6x4x8xf32, #tpu.memory_space<vmem>>, vector<1x1x8xf32>
    %379 = vector.shape_cast %378 : vector<1x1x8xf32> to vector<1x8xf32>
    %380 = vector.broadcast %379 : vector<1x8xf32> to vector<40x8xf32>
    %381 = arith.addf %377, %380 : vector<40x8xf32>
    %c4_288 = arith.constant 4 : index
    %c3_289 = arith.constant 3 : index
    %c0_290 = arith.constant 0 : index
    %c0_291 = arith.constant 0 : index
    %382 = vector.load %arg5[%c4_288, %c3_289, %c0_290, %c0_291] : memref<6x4x8x32xf32, #tpu.memory_space<vmem>>, vector<1x1x8x32xf32>
    %383 = vector.shape_cast %382 : vector<1x1x8x32xf32> to vector<8x32xf32>
    %cst_292 = arith.constant dense<0.000000e+00> : vector<40x8xf32>
    %384 = tpu.matmul %255, %383, %cst_292 {dimension_numbers = #tpu.dot_dimension_numbers<[1], [1], [0], [0], [0, 0, 1, 0], [], []>} : vector<40x32xf32>, vector<8x32xf32>, vector<40x8xf32> -> vector<40x8xf32>
    %c4_293 = arith.constant 4 : index
    %c3_294 = arith.constant 3 : index
    %c0_295 = arith.constant 0 : index
    %385 = vector.load %arg6[%c4_293, %c3_294, %c0_295] : memref<6x4x8xf32, #tpu.memory_space<vmem>>, vector<1x1x8xf32>
    %386 = vector.shape_cast %385 : vector<1x1x8xf32> to vector<1x8xf32>
    %387 = vector.broadcast %386 : vector<1x8xf32> to vector<40x8xf32>
    %388 = arith.addf %384, %387 : vector<40x8xf32>
    %c5_296 = arith.constant 5 : index
    %c3_297 = arith.constant 3 : index
    %c0_298 = arith.constant 0 : index
    %c0_299 = arith.constant 0 : index
    %389 = vector.load %arg5[%c5_296, %c3_297, %c0_298, %c0_299] : memref<6x4x8x32xf32, #tpu.memory_space<vmem>>, vector<1x1x8x32xf32>
    %390 = vector.shape_cast %389 : vector<1x1x8x32xf32> to vector<8x32xf32>
    %cst_300 = arith.constant dense<0.000000e+00> : vector<40x8xf32>
    %391 = tpu.matmul %255, %390, %cst_300 {dimension_numbers = #tpu.dot_dimension_numbers<[1], [1], [0], [0], [0, 0, 1, 0], [], []>} : vector<40x32xf32>, vector<8x32xf32>, vector<40x8xf32> -> vector<40x8xf32>
    %c5_301 = arith.constant 5 : index
    %c3_302 = arith.constant 3 : index
    %c0_303 = arith.constant 0 : index
    %392 = vector.load %arg6[%c5_301, %c3_302, %c0_303] : memref<6x4x8xf32, #tpu.memory_space<vmem>>, vector<1x1x8xf32>
    %393 = vector.shape_cast %392 : vector<1x1x8xf32> to vector<1x8xf32>
    %394 = vector.broadcast %393 : vector<1x8xf32> to vector<40x8xf32>
    %395 = arith.addf %391, %394 : vector<40x8xf32>
    %cst_304 = arith.constant dense<0.000000e+00> : vector<40x40xf32>
    %396 = tpu.matmul %381, %388, %cst_304 {dimension_numbers = #tpu.dot_dimension_numbers<[1], [1], [0], [0], [0, 0, 1, 0], [], []>} : vector<40x8xf32>, vector<40x8xf32>, vector<40x40xf32> -> vector<40x40xf32>
    %cst_305 = arith.constant 0.353553385 : f32
    %397 = vector.broadcast %cst_305 : f32 to vector<40x40xf32>
    %398 = arith.mulf %396, %397 : vector<40x40xf32>
    %399 = arith.addf %398, %0 : vector<40x40xf32>
    %cst_306 = arith.constant dense<0xFF800000> : vector<40xf32>
    %400 = vector.multi_reduction <maximumf>, %399, %cst_306 [1] : vector<40x40xf32> to vector<40xf32>
    %401 = vector.shape_cast %400 : vector<40xf32> to vector<40x1xf32>
    %402 = vector.broadcast %401 : vector<40x1xf32> to vector<40x40xf32>
    %403 = arith.subf %399, %402 : vector<40x40xf32>
    %404 = math.exp %403 : vector<40x40xf32>
    %cst_307 = arith.constant dense<0.000000e+00> : vector<40xf32>
    %405 = vector.multi_reduction <add>, %404, %cst_307 [1] : vector<40x40xf32> to vector<40xf32>
    %406 = vector.shape_cast %405 : vector<40xf32> to vector<40x1xf32>
    %407 = tpu.reciprocal %406 {approx = true} : vector<40x1xf32> -> vector<40x1xf32>
    %408 = vector.broadcast %407 : vector<40x1xf32> to vector<40x40xf32>
    %409 = arith.mulf %404, %408 : vector<40x40xf32>
    %cst_308 = arith.constant dense<0.000000e+00> : vector<40x8xf32>
    %410 = tpu.matmul %409, %395, %cst_308 {dimension_numbers = #tpu.dot_dimension_numbers<[1], [0], [0], [1], [0, 0, 1, 1], [], []>} : vector<40x40xf32>, vector<40x8xf32>, vector<40x8xf32> -> vector<40x8xf32>
    %c1_309 = arith.constant 1 : index
    %c3_310 = arith.constant 3 : index
    %c0_311 = arith.constant 0 : index
    %c0_312 = arith.constant 0 : index
    %411 = vector.load %arg7[%c1_309, %c3_310, %c0_311, %c0_312] : memref<2x4x8x32xf32, #tpu.memory_space<vmem>>, vector<1x1x8x32xf32>
    %412 = vector.shape_cast %411 : vector<1x1x8x32xf32> to vector<8x32xf32>
    %cst_313 = arith.constant dense<0.000000e+00> : vector<40x32xf32>
    %413 = tpu.matmul %410, %412, %cst_313 {dimension_numbers = #tpu.dot_dimension_numbers<[1], [0], [0], [1], [0, 0, 1, 1], [], []>} : vector<40x8xf32>, vector<8x32xf32>, vector<40x32xf32> -> vector<40x32xf32>
    %414 = arith.addf %374, %413 : vector<40x32xf32>
    %415 = arith.addf %233, %414 : vector<40x32xf32>
    %c11 = arith.constant 11 : index
    %c0_314 = arith.constant 0 : index
    %416 = vector.load %arg9[%c11, %c0_314] : memref<16x64xf32, #tpu.memory_space<vmem>>, vector<1x32xf32>
    %417 = vector.broadcast %416 : vector<1x32xf32> to vector<40x32xf32>
    %418 = arith.addf %415, %417 : vector<40x32xf32>
    %c9 = arith.constant 9 : index
    %c0_315 = arith.constant 0 : index
    %419 = vector.load %arg9[%c9, %c0_315] : memref<16x64xf32, #tpu.memory_space<vmem>>, vector<1x32xf32>
    %c10 = arith.constant 10 : index
    %c0_316 = arith.constant 0 : index
    %420 = vector.load %arg9[%c10, %c0_316] : memref<16x64xf32, #tpu.memory_space<vmem>>, vector<1x32xf32>
    %cst_317 = arith.constant dense<0.000000e+00> : vector<40xf32>
    %421 = vector.multi_reduction <add>, %418, %cst_317 [1] : vector<40x32xf32> to vector<40xf32>
    %422 = vector.shape_cast %421 : vector<40xf32> to vector<40x1xf32>
    %cst_318 = arith.constant 3.200000e+01 : f32
    %423 = vector.broadcast %cst_318 : f32 to vector<40x1xf32>
    %424 = arith.divf %422, %423 : vector<40x1xf32>
    %425 = vector.broadcast %424 : vector<40x1xf32> to vector<40x32xf32>
    %426 = arith.subf %418, %425 : vector<40x32xf32>
    %427 = arith.mulf %426, %426 : vector<40x32xf32>
    %cst_319 = arith.constant dense<0.000000e+00> : vector<40xf32>
    %428 = vector.multi_reduction <add>, %427, %cst_319 [1] : vector<40x32xf32> to vector<40xf32>
    %429 = vector.shape_cast %428 : vector<40xf32> to vector<40x1xf32>
    %cst_320 = arith.constant 3.200000e+01 : f32
    %430 = vector.broadcast %cst_320 : f32 to vector<40x1xf32>
    %431 = arith.divf %429, %430 : vector<40x1xf32>
    %cst_321 = arith.constant 9.99999997E-7 : f32
    %432 = vector.broadcast %cst_321 : f32 to vector<40x1xf32>
    %433 = arith.addf %431, %432 : vector<40x1xf32>
    %434 = math.rsqrt %433 : vector<40x1xf32>
    %435 = vector.broadcast %434 : vector<40x1xf32> to vector<40x32xf32>
    %436 = arith.mulf %426, %435 : vector<40x32xf32>
    %437 = vector.broadcast %419 : vector<1x32xf32> to vector<40x32xf32>
    %438 = arith.mulf %436, %437 : vector<40x32xf32>
    %439 = vector.broadcast %420 : vector<1x32xf32> to vector<40x32xf32>
    %440 = arith.addf %438, %439 : vector<40x32xf32>
    %c1_322 = arith.constant 1 : index
    %c0_323 = arith.constant 0 : index
    %c0_324 = arith.constant 0 : index
    %441 = vector.load %arg8[%c1_322, %c0_323, %c0_324] : memref<2x96x64xf32, #tpu.memory_space<vmem>>, vector<1x32x64xf32>
    %442 = vector.shape_cast %441 : vector<1x32x64xf32> to vector<32x64xf32>
    %cst_325 = arith.constant dense<0.000000e+00> : vector<40x64xf32>
    %443 = tpu.matmul %440, %442, %cst_325 {dimension_numbers = #tpu.dot_dimension_numbers<[1], [0], [0], [1], [0, 0, 1, 1], [], []>} : vector<40x32xf32>, vector<32x64xf32>, vector<40x64xf32> -> vector<40x64xf32>
    %c12 = arith.constant 12 : index
    %c0_326 = arith.constant 0 : index
    %444 = vector.load %arg9[%c12, %c0_326] : memref<16x64xf32, #tpu.memory_space<vmem>>, vector<1x64xf32>
    %445 = vector.broadcast %444 : vector<1x64xf32> to vector<40x64xf32>
    %446 = arith.addf %443, %445 : vector<40x64xf32>
    %cst_327 = arith.constant 5.000000e-01 : f32
    %447 = vector.broadcast %cst_327 : f32 to vector<40x64xf32>
    %448 = arith.mulf %447, %446 : vector<40x64xf32>
    %cst_328 = arith.constant 0.707106769 : f32
    %449 = vector.broadcast %cst_328 : f32 to vector<40x64xf32>
    %450 = arith.mulf %446, %449 : vector<40x64xf32>
    %451 = math.erf %450 : vector<40x64xf32>
    %cst_329 = arith.constant 1.000000e+00 : f32
    %452 = vector.broadcast %cst_329 : f32 to vector<40x64xf32>
    %453 = arith.addf %452, %451 : vector<40x64xf32>
    %454 = arith.mulf %448, %453 : vector<40x64xf32>
    %c1_330 = arith.constant 1 : index
    %c32_331 = arith.constant 32 : index
    %c0_332 = arith.constant 0 : index
    %455 = vector.load %arg8[%c1_330, %c32_331, %c0_332] : memref<2x96x64xf32, #tpu.memory_space<vmem>>, vector<1x64x32xf32>
    %456 = vector.shape_cast %455 : vector<1x64x32xf32> to vector<64x32xf32>
    %cst_333 = arith.constant dense<0.000000e+00> : vector<40x32xf32>
    %457 = tpu.matmul %454, %456, %cst_333 {dimension_numbers = #tpu.dot_dimension_numbers<[1], [0], [0], [1], [0, 0, 1, 1], [], []>} : vector<40x64xf32>, vector<64x32xf32>, vector<40x32xf32> -> vector<40x32xf32>
    %c13 = arith.constant 13 : index
    %c0_334 = arith.constant 0 : index
    %458 = vector.load %arg9[%c13, %c0_334] : memref<16x64xf32, #tpu.memory_space<vmem>>, vector<1x32xf32>
    %459 = vector.broadcast %458 : vector<1x32xf32> to vector<40x32xf32>
    %460 = arith.addf %457, %459 : vector<40x32xf32>
    %461 = arith.addf %418, %460 : vector<40x32xf32>
    %c14 = arith.constant 14 : index
    %c0_335 = arith.constant 0 : index
    %462 = vector.load %arg9[%c14, %c0_335] : memref<16x64xf32, #tpu.memory_space<vmem>>, vector<1x32xf32>
    %c15 = arith.constant 15 : index
    %c0_336 = arith.constant 0 : index
    %463 = vector.load %arg9[%c15, %c0_336] : memref<16x64xf32, #tpu.memory_space<vmem>>, vector<1x32xf32>
    %cst_337 = arith.constant dense<0.000000e+00> : vector<40xf32>
    %464 = vector.multi_reduction <add>, %461, %cst_337 [1] : vector<40x32xf32> to vector<40xf32>
    %465 = vector.shape_cast %464 : vector<40xf32> to vector<40x1xf32>
    %cst_338 = arith.constant 3.200000e+01 : f32
    %466 = vector.broadcast %cst_338 : f32 to vector<40x1xf32>
    %467 = arith.divf %465, %466 : vector<40x1xf32>
    %468 = vector.broadcast %467 : vector<40x1xf32> to vector<40x32xf32>
    %469 = arith.subf %461, %468 : vector<40x32xf32>
    %470 = arith.mulf %469, %469 : vector<40x32xf32>
    %cst_339 = arith.constant dense<0.000000e+00> : vector<40xf32>
    %471 = vector.multi_reduction <add>, %470, %cst_339 [1] : vector<40x32xf32> to vector<40xf32>
    %472 = vector.shape_cast %471 : vector<40xf32> to vector<40x1xf32>
    %cst_340 = arith.constant 3.200000e+01 : f32
    %473 = vector.broadcast %cst_340 : f32 to vector<40x1xf32>
    %474 = arith.divf %472, %473 : vector<40x1xf32>
    %cst_341 = arith.constant 9.99999997E-7 : f32
    %475 = vector.broadcast %cst_341 : f32 to vector<40x1xf32>
    %476 = arith.addf %474, %475 : vector<40x1xf32>
    %477 = math.rsqrt %476 : vector<40x1xf32>
    %478 = vector.broadcast %477 : vector<40x1xf32> to vector<40x32xf32>
    %479 = arith.mulf %469, %478 : vector<40x32xf32>
    %480 = vector.broadcast %462 : vector<1x32xf32> to vector<40x32xf32>
    %481 = arith.mulf %479, %480 : vector<40x32xf32>
    %482 = vector.broadcast %463 : vector<1x32xf32> to vector<40x32xf32>
    %483 = arith.addf %481, %482 : vector<40x32xf32>
    %484 = vector.extract_strided_slice %483 {offsets = [32, 0], sizes = [2, 32], strides = [1, 1]} : vector<40x32xf32> to vector<2x32xf32>
    %c0_342 = arith.constant 0 : index
    %c0_343 = arith.constant 0 : index
    %c0_344 = arith.constant 0 : index
    %485 = vector.load %arg10[%c0_342, %c0_343, %c0_344] : memref<1x2x32xf32, #tpu.memory_space<vmem>>, vector<1x2x32xf32>
    %486 = vector.shape_cast %485 : vector<1x2x32xf32> to vector<2x32xf32>
    %487 = vector.shape_cast %484 : vector<2x32xf32> to vector<1x2x32xf32>
    tpu.vector_store %arg10[%c0_342, %c0_343, %c0_344], %487 {strides = array<i32>} : memref<1x2x32xf32, #tpu.memory_space<vmem>>, vector<1x2x32xf32>,
    return
  }
  func.func @transform_0(%arg0: i32) -> (i32, i32) {
    %c0_i32 = arith.constant 0 : i32
    %c0_i32_0 = arith.constant 0 : i32
    %c0_i32_1 = arith.constant 0 : i32
    return %c0_i32, %c0_i32_0 : i32, i32
  }
  func.func @transform_1(%arg0: i32) -> (i32, i32) {
    %c0_i32 = arith.constant 0 : i32
    %c0_i32_0 = arith.constant 0 : i32
    return %arg0, %c0_i32 : i32, i32
  }
  func.func @transform_2(%arg0: i32) -> (i32, i32) {
    %c0_i32 = arith.constant 0 : i32
    %c0_i32_0 = arith.constant 0 : i32
    return %arg0, %c0_i32 : i32, i32
  }
  func.func @transform_3(%arg0: i32) -> (i32, i32) {
    %c0_i32 = arith.constant 0 : i32
    %c0_i32_0 = arith.constant 0 : i32
    return %arg0, %c0_i32 : i32, i32
  }
  func.func @transform_4(%arg0: i32) -> (i32, i32, i32, i32) {
    %c0_i32 = arith.constant 0 : i32
    %c0_i32_0 = arith.constant 0 : i32
    %c0_i32_1 = arith.constant 0 : i32
    %c0_i32_2 = arith.constant 0 : i32
    return %arg0, %c0_i32, %c0_i32_0, %c0_i32_1 : i32, i32, i32, i32
  }
  func.func @transform_5(%arg0: i32) -> (i32, i32, i32) {
    %c0_i32 = arith.constant 0 : i32
    %c0_i32_0 = arith.constant 0 : i32
    %c0_i32_1 = arith.constant 0 : i32
    return %arg0, %c0_i32, %c0_i32_0 : i32, i32, i32
  }
  func.func @transform_6(%arg0: i32) -> (i32, i32, i32, i32) {
    %c0_i32 = arith.constant 0 : i32
    %c0_i32_0 = arith.constant 0 : i32
    %c0_i32_1 = arith.constant 0 : i32
    %c0_i32_2 = arith.constant 0 : i32
    return %arg0, %c0_i32, %c0_i32_0, %c0_i32_1 : i32, i32, i32, i32
  }
  func.func @transform_7(%arg0: i32) -> (i32, i32, i32) {
    %c0_i32 = arith.constant 0 : i32
    %c0_i32_0 = arith.constant 0 : i32
    %c0_i32_1 = arith.constant 0 : i32
    return %arg0, %c0_i32, %c0_i32_0 : i32, i32, i32
  }
  func.func @transform_8(%arg0: i32) -> (i32, i32) {
    %c0_i32 = arith.constant 0 : i32
    %c0_i32_0 = arith.constant 0 : i32
    return %arg0, %c0_i32 : i32, i32
  }
  func.func @transform_9(%arg0: i32) -> (i32, i32, i32) {
    %c0_i32 = arith.constant 0 : i32
    %c0_i32_0 = arith.constant 0 : i32
    %c0_i32_1 = arith.constant 0 : i32
    return %arg0, %c0_i32, %c0_i32_0 : i32, i32, i32
  }
}

module attributes {stable_mosaic.version = 11 : i64} {
  func.func @_bert_text_kernel(%arg0: i32, %arg1: memref<16x32xf32, #tpu.memory_space<vmem>>, %arg2: memref<16x16xf32, #tpu.memory_space<vmem>>, %arg3: memref<2x16xf32, #tpu.memory_space<vmem>>, %arg4: memref<6x4x8x32xf32, #tpu.memory_space<vmem>>, %arg5: memref<6x4x8xf32, #tpu.memory_space<vmem>>, %arg6: memref<2x4x8x32xf32, #tpu.memory_space<vmem>>, %arg7: memref<2x96x64xf32, #tpu.memory_space<vmem>>, %arg8: memref<17x64xf32, #tpu.memory_space<vmem>>, %arg9: memref<64x16xf32, #tpu.memory_space<vmem>>, %arg10: memref<1x2x16xf32, #tpu.memory_space<vmem>>) attributes {dimension_semantics = [#tpu.dimension_semantics<parallel>], iteration_bounds = array<i64: 2>, scalar_prefetch = 0 : i64, scratch_operands = 0 : i64, tpu.core_type = #tpu.core_type<tc>, window_params = [{transform_indices = @transform_0, window_bounds = array<i64: 16, 32>}, {transform_indices = @transform_1, window_bounds = array<i64: 16, 16>}, {pipeline_mode = #tpu.pipeline_mode<synchronous>, transform_indices = @transform_2, window_bounds = array<i64: 2, 16>}, {pipeline_mode = #tpu.pipeline_mode<synchronous>, transform_indices = @transform_3, window_bounds = array<i64: 6, 4, 8, 32>}, {pipeline_mode = #tpu.pipeline_mode<synchronous>, transform_indices = @transform_4, window_bounds = array<i64: 6, 4, 8>}, {pipeline_mode = #tpu.pipeline_mode<synchronous>, transform_indices = @transform_5, window_bounds = array<i64: 2, 4, 8, 32>}, {pipeline_mode = #tpu.pipeline_mode<synchronous>, transform_indices = @transform_6, window_bounds = array<i64: 2, 96, 64>}, {pipeline_mode = #tpu.pipeline_mode<synchronous>, transform_indices = @transform_7, window_bounds = array<i64: 17, 64>}, {pipeline_mode = #tpu.pipeline_mode<synchronous>, transform_indices = @transform_8, window_bounds = array<i64: 64, 16>}, {transform_indices = @transform_9, window_bounds = array<i64: 1, 2, 16>}]} {
    %c0 = arith.constant 0 : index
    %c0_0 = arith.constant 0 : index
    %0 = vector.load %arg2[%c0, %c0_0] : memref<16x16xf32, #tpu.memory_space<vmem>>, vector<16x16xf32>
    %c0_1 = arith.constant 0 : index
    %c0_2 = arith.constant 0 : index
    %1 = vector.load %arg1[%c0_1, %c0_2] : memref<16x32xf32, #tpu.memory_space<vmem>>, vector<16x32xf32>
    %c14 = arith.constant 14 : index
    %c0_3 = arith.constant 0 : index
    %2 = vector.load %arg8[%c14, %c0_3] : memref<17x64xf32, #tpu.memory_space<vmem>>, vector<1x32xf32>
    %c15 = arith.constant 15 : index
    %c0_4 = arith.constant 0 : index
    %3 = vector.load %arg8[%c15, %c0_4] : memref<17x64xf32, #tpu.memory_space<vmem>>, vector<1x32xf32>
    %cst = arith.constant dense<0.000000e+00> : vector<16xf32>
    %4 = vector.multi_reduction <add>, %1, %cst [1] : vector<16x32xf32> to vector<16xf32>
    %5 = vector.shape_cast %4 : vector<16xf32> to vector<16x1xf32>
    %cst_5 = arith.constant 3.200000e+01 : f32
    %6 = vector.broadcast %cst_5 : f32 to vector<16x1xf32>
    %7 = arith.divf %5, %6 : vector<16x1xf32>
    %8 = vector.broadcast %7 : vector<16x1xf32> to vector<16x32xf32>
    %9 = arith.subf %1, %8 : vector<16x32xf32>
    %10 = arith.mulf %9, %9 : vector<16x32xf32>
    %cst_6 = arith.constant dense<0.000000e+00> : vector<16xf32>
    %11 = vector.multi_reduction <add>, %10, %cst_6 [1] : vector<16x32xf32> to vector<16xf32>
    %12 = vector.shape_cast %11 : vector<16xf32> to vector<16x1xf32>
    %cst_7 = arith.constant 3.200000e+01 : f32
    %13 = vector.broadcast %cst_7 : f32 to vector<16x1xf32>
    %14 = arith.divf %12, %13 : vector<16x1xf32>
    %cst_8 = arith.constant 9.99999996E-13 : f32
    %15 = vector.broadcast %cst_8 : f32 to vector<16x1xf32>
    %16 = arith.addf %14, %15 : vector<16x1xf32>
    %17 = math.rsqrt %16 : vector<16x1xf32>
    %18 = vector.broadcast %17 : vector<16x1xf32> to vector<16x32xf32>
    %19 = arith.mulf %9, %18 : vector<16x32xf32>
    %20 = vector.broadcast %2 : vector<1x32xf32> to vector<16x32xf32>
    %21 = arith.mulf %19, %20 : vector<16x32xf32>
    %22 = vector.broadcast %3 : vector<1x32xf32> to vector<16x32xf32>
    %23 = arith.addf %21, %22 : vector<16x32xf32>
    %c0_9 = arith.constant 0 : index
    %c0_10 = arith.constant 0 : index
    %c0_11 = arith.constant 0 : index
    %c0_12 = arith.constant 0 : index
    %24 = vector.load %arg4[%c0_9, %c0_10, %c0_11, %c0_12] : memref<6x4x8x32xf32, #tpu.memory_space<vmem>>, vector<1x1x8x32xf32>
    %25 = vector.shape_cast %24 : vector<1x1x8x32xf32> to vector<8x32xf32>
    %cst_13 = arith.constant dense<0.000000e+00> : vector<16x8xf32>
    %26 = tpu.matmul %23, %25, %cst_13 {dimension_numbers = #tpu.dot_dimension_numbers<[1], [1], [0], [0], [0, 0, 1, 0], [], []>} : vector<16x32xf32>, vector<8x32xf32>, vector<16x8xf32> -> vector<16x8xf32>
    %c0_14 = arith.constant 0 : index
    %c0_15 = arith.constant 0 : index
    %c0_16 = arith.constant 0 : index
    %27 = vector.load %arg5[%c0_14, %c0_15, %c0_16] : memref<6x4x8xf32, #tpu.memory_space<vmem>>, vector<1x1x8xf32>
    %28 = vector.shape_cast %27 : vector<1x1x8xf32> to vector<1x8xf32>
    %29 = vector.broadcast %28 : vector<1x8xf32> to vector<16x8xf32>
    %30 = arith.addf %26, %29 : vector<16x8xf32>
    %c1 = arith.constant 1 : index
    %c0_17 = arith.constant 0 : index
    %c0_18 = arith.constant 0 : index
    %c0_19 = arith.constant 0 : index
    %31 = vector.load %arg4[%c1, %c0_17, %c0_18, %c0_19] : memref<6x4x8x32xf32, #tpu.memory_space<vmem>>, vector<1x1x8x32xf32>
    %32 = vector.shape_cast %31 : vector<1x1x8x32xf32> to vector<8x32xf32>
    %cst_20 = arith.constant dense<0.000000e+00> : vector<16x8xf32>
    %33 = tpu.matmul %23, %32, %cst_20 {dimension_numbers = #tpu.dot_dimension_numbers<[1], [1], [0], [0], [0, 0, 1, 0], [], []>} : vector<16x32xf32>, vector<8x32xf32>, vector<16x8xf32> -> vector<16x8xf32>
    %c1_21 = arith.constant 1 : index
    %c0_22 = arith.constant 0 : index
    %c0_23 = arith.constant 0 : index
    %34 = vector.load %arg5[%c1_21, %c0_22, %c0_23] : memref<6x4x8xf32, #tpu.memory_space<vmem>>, vector<1x1x8xf32>
    %35 = vector.shape_cast %34 : vector<1x1x8xf32> to vector<1x8xf32>
    %36 = vector.broadcast %35 : vector<1x8xf32> to vector<16x8xf32>
    %37 = arith.addf %33, %36 : vector<16x8xf32>
    %c2 = arith.constant 2 : index
    %c0_24 = arith.constant 0 : index
    %c0_25 = arith.constant 0 : index
    %c0_26 = arith.constant 0 : index
    %38 = vector.load %arg4[%c2, %c0_24, %c0_25, %c0_26] : memref<6x4x8x32xf32, #tpu.memory_space<vmem>>, vector<1x1x8x32xf32>
    %39 = vector.shape_cast %38 : vector<1x1x8x32xf32> to vector<8x32xf32>
    %cst_27 = arith.constant dense<0.000000e+00> : vector<16x8xf32>
    %40 = tpu.matmul %23, %39, %cst_27 {dimension_numbers = #tpu.dot_dimension_numbers<[1], [1], [0], [0], [0, 0, 1, 0], [], []>} : vector<16x32xf32>, vector<8x32xf32>, vector<16x8xf32> -> vector<16x8xf32>
    %c2_28 = arith.constant 2 : index
    %c0_29 = arith.constant 0 : index
    %c0_30 = arith.constant 0 : index
    %41 = vector.load %arg5[%c2_28, %c0_29, %c0_30] : memref<6x4x8xf32, #tpu.memory_space<vmem>>, vector<1x1x8xf32>
    %42 = vector.shape_cast %41 : vector<1x1x8xf32> to vector<1x8xf32>
    %43 = vector.broadcast %42 : vector<1x8xf32> to vector<16x8xf32>
    %44 = arith.addf %40, %43 : vector<16x8xf32>
    %cst_31 = arith.constant dense<0.000000e+00> : vector<16x16xf32>
    %45 = tpu.matmul %30, %37, %cst_31 {dimension_numbers = #tpu.dot_dimension_numbers<[1], [1], [0], [0], [0, 0, 1, 0], [], []>} : vector<16x8xf32>, vector<16x8xf32>, vector<16x16xf32> -> vector<16x16xf32>
    %cst_32 = arith.constant 0.353553385 : f32
    %46 = vector.broadcast %cst_32 : f32 to vector<16x16xf32>
    %47 = arith.mulf %45, %46 : vector<16x16xf32>
    %48 = arith.addf %47, %0 : vector<16x16xf32>
    %cst_33 = arith.constant dense<0xFF800000> : vector<16xf32>
    %49 = vector.multi_reduction <maximumf>, %48, %cst_33 [1] : vector<16x16xf32> to vector<16xf32>
    %50 = vector.shape_cast %49 : vector<16xf32> to vector<16x1xf32>
    %51 = vector.broadcast %50 : vector<16x1xf32> to vector<16x16xf32>
    %52 = arith.subf %48, %51 : vector<16x16xf32>
    %53 = math.exp %52 : vector<16x16xf32>
    %cst_34 = arith.constant dense<0.000000e+00> : vector<16xf32>
    %54 = vector.multi_reduction <add>, %53, %cst_34 [1] : vector<16x16xf32> to vector<16xf32>
    %55 = vector.shape_cast %54 : vector<16xf32> to vector<16x1xf32>
    %56 = tpu.reciprocal %55 {approx = true} : vector<16x1xf32> -> vector<16x1xf32>
    %57 = vector.broadcast %56 : vector<16x1xf32> to vector<16x16xf32>
    %58 = arith.mulf %53, %57 : vector<16x16xf32>
    %cst_35 = arith.constant dense<0.000000e+00> : vector<16x8xf32>
    %59 = tpu.matmul %58, %44, %cst_35 {dimension_numbers = #tpu.dot_dimension_numbers<[1], [0], [0], [1], [0, 0, 1, 1], [], []>} : vector<16x16xf32>, vector<16x8xf32>, vector<16x8xf32> -> vector<16x8xf32>
    %c0_36 = arith.constant 0 : index
    %c0_37 = arith.constant 0 : index
    %c0_38 = arith.constant 0 : index
    %c0_39 = arith.constant 0 : index
    %60 = vector.load %arg6[%c0_36, %c0_37, %c0_38, %c0_39] : memref<2x4x8x32xf32, #tpu.memory_space<vmem>>, vector<1x1x8x32xf32>
    %61 = vector.shape_cast %60 : vector<1x1x8x32xf32> to vector<8x32xf32>
    %cst_40 = arith.constant dense<0.000000e+00> : vector<16x32xf32>
    %62 = tpu.matmul %59, %61, %cst_40 {dimension_numbers = #tpu.dot_dimension_numbers<[1], [0], [0], [1], [0, 0, 1, 1], [], []>} : vector<16x8xf32>, vector<8x32xf32>, vector<16x32xf32> -> vector<16x32xf32>
    %c0_41 = arith.constant 0 : index
    %c1_42 = arith.constant 1 : index
    %c0_43 = arith.constant 0 : index
    %c0_44 = arith.constant 0 : index
    %63 = vector.load %arg4[%c0_41, %c1_42, %c0_43, %c0_44] : memref<6x4x8x32xf32, #tpu.memory_space<vmem>>, vector<1x1x8x32xf32>
    %64 = vector.shape_cast %63 : vector<1x1x8x32xf32> to vector<8x32xf32>
    %cst_45 = arith.constant dense<0.000000e+00> : vector<16x8xf32>
    %65 = tpu.matmul %23, %64, %cst_45 {dimension_numbers = #tpu.dot_dimension_numbers<[1], [1], [0], [0], [0, 0, 1, 0], [], []>} : vector<16x32xf32>, vector<8x32xf32>, vector<16x8xf32> -> vector<16x8xf32>
    %c0_46 = arith.constant 0 : index
    %c1_47 = arith.constant 1 : index
    %c0_48 = arith.constant 0 : index
    %66 = vector.load %arg5[%c0_46, %c1_47, %c0_48] : memref<6x4x8xf32, #tpu.memory_space<vmem>>, vector<1x1x8xf32>
    %67 = vector.shape_cast %66 : vector<1x1x8xf32> to vector<1x8xf32>
    %68 = vector.broadcast %67 : vector<1x8xf32> to vector<16x8xf32>
    %69 = arith.addf %65, %68 : vector<16x8xf32>
    %c1_49 = arith.constant 1 : index
    %c1_50 = arith.constant 1 : index
    %c0_51 = arith.constant 0 : index
    %c0_52 = arith.constant 0 : index
    %70 = vector.load %arg4[%c1_49, %c1_50, %c0_51, %c0_52] : memref<6x4x8x32xf32, #tpu.memory_space<vmem>>, vector<1x1x8x32xf32>
    %71 = vector.shape_cast %70 : vector<1x1x8x32xf32> to vector<8x32xf32>
    %cst_53 = arith.constant dense<0.000000e+00> : vector<16x8xf32>
    %72 = tpu.matmul %23, %71, %cst_53 {dimension_numbers = #tpu.dot_dimension_numbers<[1], [1], [0], [0], [0, 0, 1, 0], [], []>} : vector<16x32xf32>, vector<8x32xf32>, vector<16x8xf32> -> vector<16x8xf32>
    %c1_54 = arith.constant 1 : index
    %c1_55 = arith.constant 1 : index
    %c0_56 = arith.constant 0 : index
    %73 = vector.load %arg5[%c1_54, %c1_55, %c0_56] : memref<6x4x8xf32, #tpu.memory_space<vmem>>, vector<1x1x8xf32>
    %74 = vector.shape_cast %73 : vector<1x1x8xf32> to vector<1x8xf32>
    %75 = vector.broadcast %74 : vector<1x8xf32> to vector<16x8xf32>
    %76 = arith.addf %72, %75 : vector<16x8xf32>
    %c2_57 = arith.constant 2 : index
    %c1_58 = arith.constant 1 : index
    %c0_59 = arith.constant 0 : index
    %c0_60 = arith.constant 0 : index
    %77 = vector.load %arg4[%c2_57, %c1_58, %c0_59, %c0_60] : memref<6x4x8x32xf32, #tpu.memory_space<vmem>>, vector<1x1x8x32xf32>
    %78 = vector.shape_cast %77 : vector<1x1x8x32xf32> to vector<8x32xf32>
    %cst_61 = arith.constant dense<0.000000e+00> : vector<16x8xf32>
    %79 = tpu.matmul %23, %78, %cst_61 {dimension_numbers = #tpu.dot_dimension_numbers<[1], [1], [0], [0], [0, 0, 1, 0], [], []>} : vector<16x32xf32>, vector<8x32xf32>, vector<16x8xf32> -> vector<16x8xf32>
    %c2_62 = arith.constant 2 : index
    %c1_63 = arith.constant 1 : index
    %c0_64 = arith.constant 0 : index
    %80 = vector.load %arg5[%c2_62, %c1_63, %c0_64] : memref<6x4x8xf32, #tpu.memory_space<vmem>>, vector<1x1x8xf32>
    %81 = vector.shape_cast %80 : vector<1x1x8xf32> to vector<1x8xf32>
    %82 = vector.broadcast %81 : vector<1x8xf32> to vector<16x8xf32>
    %83 = arith.addf %79, %82 : vector<16x8xf32>
    %cst_65 = arith.constant dense<0.000000e+00> : vector<16x16xf32>
    %84 = tpu.matmul %69, %76, %cst_65 {dimension_numbers = #tpu.dot_dimension_numbers<[1], [1], [0], [0], [0, 0, 1, 0], [], []>} : vector<16x8xf32>, vector<16x8xf32>, vector<16x16xf32> -> vector<16x16xf32>
    %cst_66 = arith.constant 0.353553385 : f32
    %85 = vector.broadcast %cst_66 : f32 to vector<16x16xf32>
    %86 = arith.mulf %84, %85 : vector<16x16xf32>
    %87 = arith.addf %86, %0 : vector<16x16xf32>
    %cst_67 = arith.constant dense<0xFF800000> : vector<16xf32>
    %88 = vector.multi_reduction <maximumf>, %87, %cst_67 [1] : vector<16x16xf32> to vector<16xf32>
    %89 = vector.shape_cast %88 : vector<16xf32> to vector<16x1xf32>
    %90 = vector.broadcast %89 : vector<16x1xf32> to vector<16x16xf32>
    %91 = arith.subf %87, %90 : vector<16x16xf32>
    %92 = math.exp %91 : vector<16x16xf32>
    %cst_68 = arith.constant dense<0.000000e+00> : vector<16xf32>
    %93 = vector.multi_reduction <add>, %92, %cst_68 [1] : vector<16x16xf32> to vector<16xf32>
    %94 = vector.shape_cast %93 : vector<16xf32> to vector<16x1xf32>
    %95 = tpu.reciprocal %94 {approx = true} : vector<16x1xf32> -> vector<16x1xf32>
    %96 = vector.broadcast %95 : vector<16x1xf32> to vector<16x16xf32>
    %97 = arith.mulf %92, %96 : vector<16x16xf32>
    %cst_69 = arith.constant dense<0.000000e+00> : vector<16x8xf32>
    %98 = tpu.matmul %97, %83, %cst_69 {dimension_numbers = #tpu.dot_dimension_numbers<[1], [0], [0], [1], [0, 0, 1, 1], [], []>} : vector<16x16xf32>, vector<16x8xf32>, vector<16x8xf32> -> vector<16x8xf32>
    %c0_70 = arith.constant 0 : index
    %c1_71 = arith.constant 1 : index
    %c0_72 = arith.constant 0 : index
    %c0_73 = arith.constant 0 : index
    %99 = vector.load %arg6[%c0_70, %c1_71, %c0_72, %c0_73] : memref<2x4x8x32xf32, #tpu.memory_space<vmem>>, vector<1x1x8x32xf32>
    %100 = vector.shape_cast %99 : vector<1x1x8x32xf32> to vector<8x32xf32>
    %cst_74 = arith.constant dense<0.000000e+00> : vector<16x32xf32>
    %101 = tpu.matmul %98, %100, %cst_74 {dimension_numbers = #tpu.dot_dimension_numbers<[1], [0], [0], [1], [0, 0, 1, 1], [], []>} : vector<16x8xf32>, vector<8x32xf32>, vector<16x32xf32> -> vector<16x32xf32>
    %102 = arith.addf %62, %101 : vector<16x32xf32>
    %c0_75 = arith.constant 0 : index
    %c2_76 = arith.constant 2 : index
    %c0_77 = arith.constant 0 : index
    %c0_78 = arith.constant 0 : index
    %103 = vector.load %arg4[%c0_75, %c2_76, %c0_77, %c0_78] : memref<6x4x8x32xf32, #tpu.memory_space<vmem>>, vector<1x1x8x32xf32>
    %104 = vector.shape_cast %103 : vector<1x1x8x32xf32> to vector<8x32xf32>
    %cst_79 = arith.constant dense<0.000000e+00> : vector<16x8xf32>
    %105 = tpu.matmul %23, %104, %cst_79 {dimension_numbers = #tpu.dot_dimension_numbers<[1], [1], [0], [0], [0, 0, 1, 0], [], []>} : vector<16x32xf32>, vector<8x32xf32>, vector<16x8xf32> -> vector<16x8xf32>
    %c0_80 = arith.constant 0 : index
    %c2_81 = arith.constant 2 : index
    %c0_82 = arith.constant 0 : index
    %106 = vector.load %arg5[%c0_80, %c2_81, %c0_82] : memref<6x4x8xf32, #tpu.memory_space<vmem>>, vector<1x1x8xf32>
    %107 = vector.shape_cast %106 : vector<1x1x8xf32> to vector<1x8xf32>
    %108 = vector.broadcast %107 : vector<1x8xf32> to vector<16x8xf32>
    %109 = arith.addf %105, %108 : vector<16x8xf32>
    %c1_83 = arith.constant 1 : index
    %c2_84 = arith.constant 2 : index
    %c0_85 = arith.constant 0 : index
    %c0_86 = arith.constant 0 : index
    %110 = vector.load %arg4[%c1_83, %c2_84, %c0_85, %c0_86] : memref<6x4x8x32xf32, #tpu.memory_space<vmem>>, vector<1x1x8x32xf32>
    %111 = vector.shape_cast %110 : vector<1x1x8x32xf32> to vector<8x32xf32>
    %cst_87 = arith.constant dense<0.000000e+00> : vector<16x8xf32>
    %112 = tpu.matmul %23, %111, %cst_87 {dimension_numbers = #tpu.dot_dimension_numbers<[1], [1], [0], [0], [0, 0, 1, 0], [], []>} : vector<16x32xf32>, vector<8x32xf32>, vector<16x8xf32> -> vector<16x8xf32>
    %c1_88 = arith.constant 1 : index
    %c2_89 = arith.constant 2 : index
    %c0_90 = arith.constant 0 : index
    %113 = vector.load %arg5[%c1_88, %c2_89, %c0_90] : memref<6x4x8xf32, #tpu.memory_space<vmem>>, vector<1x1x8xf32>
    %114 = vector.shape_cast %113 : vector<1x1x8xf32> to vector<1x8xf32>
    %115 = vector.broadcast %114 : vector<1x8xf32> to vector<16x8xf32>
    %116 = arith.addf %112, %115 : vector<16x8xf32>
    %c2_91 = arith.constant 2 : index
    %c2_92 = arith.constant 2 : index
    %c0_93 = arith.constant 0 : index
    %c0_94 = arith.constant 0 : index
    %117 = vector.load %arg4[%c2_91, %c2_92, %c0_93, %c0_94] : memref<6x4x8x32xf32, #tpu.memory_space<vmem>>, vector<1x1x8x32xf32>
    %118 = vector.shape_cast %117 : vector<1x1x8x32xf32> to vector<8x32xf32>
    %cst_95 = arith.constant dense<0.000000e+00> : vector<16x8xf32>
    %119 = tpu.matmul %23, %118, %cst_95 {dimension_numbers = #tpu.dot_dimension_numbers<[1], [1], [0], [0], [0, 0, 1, 0], [], []>} : vector<16x32xf32>, vector<8x32xf32>, vector<16x8xf32> -> vector<16x8xf32>
    %c2_96 = arith.constant 2 : index
    %c2_97 = arith.constant 2 : index
    %c0_98 = arith.constant 0 : index
    %120 = vector.load %arg5[%c2_96, %c2_97, %c0_98] : memref<6x4x8xf32, #tpu.memory_space<vmem>>, vector<1x1x8xf32>
    %121 = vector.shape_cast %120 : vector<1x1x8xf32> to vector<1x8xf32>
    %122 = vector.broadcast %121 : vector<1x8xf32> to vector<16x8xf32>
    %123 = arith.addf %119, %122 : vector<16x8xf32>
    %cst_99 = arith.constant dense<0.000000e+00> : vector<16x16xf32>
    %124 = tpu.matmul %109, %116, %cst_99 {dimension_numbers = #tpu.dot_dimension_numbers<[1], [1], [0], [0], [0, 0, 1, 0], [], []>} : vector<16x8xf32>, vector<16x8xf32>, vector<16x16xf32> -> vector<16x16xf32>
    %cst_100 = arith.constant 0.353553385 : f32
    %125 = vector.broadcast %cst_100 : f32 to vector<16x16xf32>
    %126 = arith.mulf %124, %125 : vector<16x16xf32>
    %127 = arith.addf %126, %0 : vector<16x16xf32>
    %cst_101 = arith.constant dense<0xFF800000> : vector<16xf32>
    %128 = vector.multi_reduction <maximumf>, %127, %cst_101 [1] : vector<16x16xf32> to vector<16xf32>
    %129 = vector.shape_cast %128 : vector<16xf32> to vector<16x1xf32>
    %130 = vector.broadcast %129 : vector<16x1xf32> to vector<16x16xf32>
    %131 = arith.subf %127, %130 : vector<16x16xf32>
    %132 = math.exp %131 : vector<16x16xf32>
    %cst_102 = arith.constant dense<0.000000e+00> : vector<16xf32>
    %133 = vector.multi_reduction <add>, %132, %cst_102 [1] : vector<16x16xf32> to vector<16xf32>
    %134 = vector.shape_cast %133 : vector<16xf32> to vector<16x1xf32>
    %135 = tpu.reciprocal %134 {approx = true} : vector<16x1xf32> -> vector<16x1xf32>
    %136 = vector.broadcast %135 : vector<16x1xf32> to vector<16x16xf32>
    %137 = arith.mulf %132, %136 : vector<16x16xf32>
    %cst_103 = arith.constant dense<0.000000e+00> : vector<16x8xf32>
    %138 = tpu.matmul %137, %123, %cst_103 {dimension_numbers = #tpu.dot_dimension_numbers<[1], [0], [0], [1], [0, 0, 1, 1], [], []>} : vector<16x16xf32>, vector<16x8xf32>, vector<16x8xf32> -> vector<16x8xf32>
    %c0_104 = arith.constant 0 : index
    %c2_105 = arith.constant 2 : index
    %c0_106 = arith.constant 0 : index
    %c0_107 = arith.constant 0 : index
    %139 = vector.load %arg6[%c0_104, %c2_105, %c0_106, %c0_107] : memref<2x4x8x32xf32, #tpu.memory_space<vmem>>, vector<1x1x8x32xf32>
    %140 = vector.shape_cast %139 : vector<1x1x8x32xf32> to vector<8x32xf32>
    %cst_108 = arith.constant dense<0.000000e+00> : vector<16x32xf32>
    %141 = tpu.matmul %138, %140, %cst_108 {dimension_numbers = #tpu.dot_dimension_numbers<[1], [0], [0], [1], [0, 0, 1, 1], [], []>} : vector<16x8xf32>, vector<8x32xf32>, vector<16x32xf32> -> vector<16x32xf32>
    %142 = arith.addf %102, %141 : vector<16x32xf32>
    %c0_109 = arith.constant 0 : index
    %c3 = arith.constant 3 : index
    %c0_110 = arith.constant 0 : index
    %c0_111 = arith.constant 0 : index
    %143 = vector.load %arg4[%c0_109, %c3, %c0_110, %c0_111] : memref<6x4x8x32xf32, #tpu.memory_space<vmem>>, vector<1x1x8x32xf32>
    %144 = vector.shape_cast %143 : vector<1x1x8x32xf32> to vector<8x32xf32>
    %cst_112 = arith.constant dense<0.000000e+00> : vector<16x8xf32>
    %145 = tpu.matmul %23, %144, %cst_112 {dimension_numbers = #tpu.dot_dimension_numbers<[1], [1], [0], [0], [0, 0, 1, 0], [], []>} : vector<16x32xf32>, vector<8x32xf32>, vector<16x8xf32> -> vector<16x8xf32>
    %c0_113 = arith.constant 0 : index
    %c3_114 = arith.constant 3 : index
    %c0_115 = arith.constant 0 : index
    %146 = vector.load %arg5[%c0_113, %c3_114, %c0_115] : memref<6x4x8xf32, #tpu.memory_space<vmem>>, vector<1x1x8xf32>
    %147 = vector.shape_cast %146 : vector<1x1x8xf32> to vector<1x8xf32>
    %148 = vector.broadcast %147 : vector<1x8xf32> to vector<16x8xf32>
    %149 = arith.addf %145, %148 : vector<16x8xf32>
    %c1_116 = arith.constant 1 : index
    %c3_117 = arith.constant 3 : index
    %c0_118 = arith.constant 0 : index
    %c0_119 = arith.constant 0 : index
    %150 = vector.load %arg4[%c1_116, %c3_117, %c0_118, %c0_119] : memref<6x4x8x32xf32, #tpu.memory_space<vmem>>, vector<1x1x8x32xf32>
    %151 = vector.shape_cast %150 : vector<1x1x8x32xf32> to vector<8x32xf32>
    %cst_120 = arith.constant dense<0.000000e+00> : vector<16x8xf32>
    %152 = tpu.matmul %23, %151, %cst_120 {dimension_numbers = #tpu.dot_dimension_numbers<[1], [1], [0], [0], [0, 0, 1, 0], [], []>} : vector<16x32xf32>, vector<8x32xf32>, vector<16x8xf32> -> vector<16x8xf32>
    %c1_121 = arith.constant 1 : index
    %c3_122 = arith.constant 3 : index
    %c0_123 = arith.constant 0 : index
    %153 = vector.load %arg5[%c1_121, %c3_122, %c0_123] : memref<6x4x8xf32, #tpu.memory_space<vmem>>, vector<1x1x8xf32>
    %154 = vector.shape_cast %153 : vector<1x1x8xf32> to vector<1x8xf32>
    %155 = vector.broadcast %154 : vector<1x8xf32> to vector<16x8xf32>
    %156 = arith.addf %152, %155 : vector<16x8xf32>
    %c2_124 = arith.constant 2 : index
    %c3_125 = arith.constant 3 : index
    %c0_126 = arith.constant 0 : index
    %c0_127 = arith.constant 0 : index
    %157 = vector.load %arg4[%c2_124, %c3_125, %c0_126, %c0_127] : memref<6x4x8x32xf32, #tpu.memory_space<vmem>>, vector<1x1x8x32xf32>
    %158 = vector.shape_cast %157 : vector<1x1x8x32xf32> to vector<8x32xf32>
    %cst_128 = arith.constant dense<0.000000e+00> : vector<16x8xf32>
    %159 = tpu.matmul %23, %158, %cst_128 {dimension_numbers = #tpu.dot_dimension_numbers<[1], [1], [0], [0], [0, 0, 1, 0], [], []>} : vector<16x32xf32>, vector<8x32xf32>, vector<16x8xf32> -> vector<16x8xf32>
    %c2_129 = arith.constant 2 : index
    %c3_130 = arith.constant 3 : index
    %c0_131 = arith.constant 0 : index
    %160 = vector.load %arg5[%c2_129, %c3_130, %c0_131] : memref<6x4x8xf32, #tpu.memory_space<vmem>>, vector<1x1x8xf32>
    %161 = vector.shape_cast %160 : vector<1x1x8xf32> to vector<1x8xf32>
    %162 = vector.broadcast %161 : vector<1x8xf32> to vector<16x8xf32>
    %163 = arith.addf %159, %162 : vector<16x8xf32>
    %cst_132 = arith.constant dense<0.000000e+00> : vector<16x16xf32>
    %164 = tpu.matmul %149, %156, %cst_132 {dimension_numbers = #tpu.dot_dimension_numbers<[1], [1], [0], [0], [0, 0, 1, 0], [], []>} : vector<16x8xf32>, vector<16x8xf32>, vector<16x16xf32> -> vector<16x16xf32>
    %cst_133 = arith.constant 0.353553385 : f32
    %165 = vector.broadcast %cst_133 : f32 to vector<16x16xf32>
    %166 = arith.mulf %164, %165 : vector<16x16xf32>
    %167 = arith.addf %166, %0 : vector<16x16xf32>
    %cst_134 = arith.constant dense<0xFF800000> : vector<16xf32>
    %168 = vector.multi_reduction <maximumf>, %167, %cst_134 [1] : vector<16x16xf32> to vector<16xf32>
    %169 = vector.shape_cast %168 : vector<16xf32> to vector<16x1xf32>
    %170 = vector.broadcast %169 : vector<16x1xf32> to vector<16x16xf32>
    %171 = arith.subf %167, %170 : vector<16x16xf32>
    %172 = math.exp %171 : vector<16x16xf32>
    %cst_135 = arith.constant dense<0.000000e+00> : vector<16xf32>
    %173 = vector.multi_reduction <add>, %172, %cst_135 [1] : vector<16x16xf32> to vector<16xf32>
    %174 = vector.shape_cast %173 : vector<16xf32> to vector<16x1xf32>
    %175 = tpu.reciprocal %174 {approx = true} : vector<16x1xf32> -> vector<16x1xf32>
    %176 = vector.broadcast %175 : vector<16x1xf32> to vector<16x16xf32>
    %177 = arith.mulf %172, %176 : vector<16x16xf32>
    %cst_136 = arith.constant dense<0.000000e+00> : vector<16x8xf32>
    %178 = tpu.matmul %177, %163, %cst_136 {dimension_numbers = #tpu.dot_dimension_numbers<[1], [0], [0], [1], [0, 0, 1, 1], [], []>} : vector<16x16xf32>, vector<16x8xf32>, vector<16x8xf32> -> vector<16x8xf32>
    %c0_137 = arith.constant 0 : index
    %c3_138 = arith.constant 3 : index
    %c0_139 = arith.constant 0 : index
    %c0_140 = arith.constant 0 : index
    %179 = vector.load %arg6[%c0_137, %c3_138, %c0_139, %c0_140] : memref<2x4x8x32xf32, #tpu.memory_space<vmem>>, vector<1x1x8x32xf32>
    %180 = vector.shape_cast %179 : vector<1x1x8x32xf32> to vector<8x32xf32>
    %cst_141 = arith.constant dense<0.000000e+00> : vector<16x32xf32>
    %181 = tpu.matmul %178, %180, %cst_141 {dimension_numbers = #tpu.dot_dimension_numbers<[1], [0], [0], [1], [0, 0, 1, 1], [], []>} : vector<16x8xf32>, vector<8x32xf32>, vector<16x32xf32> -> vector<16x32xf32>
    %182 = arith.addf %142, %181 : vector<16x32xf32>
    %c4 = arith.constant 4 : index
    %c0_142 = arith.constant 0 : index
    %183 = vector.load %arg8[%c4, %c0_142] : memref<17x64xf32, #tpu.memory_space<vmem>>, vector<1x32xf32>
    %184 = vector.broadcast %183 : vector<1x32xf32> to vector<16x32xf32>
    %185 = arith.addf %182, %184 : vector<16x32xf32>
    %186 = arith.addf %23, %185 : vector<16x32xf32>
    %c0_143 = arith.constant 0 : index
    %c0_144 = arith.constant 0 : index
    %187 = vector.load %arg8[%c0_143, %c0_144] : memref<17x64xf32, #tpu.memory_space<vmem>>, vector<1x32xf32>
    %c1_145 = arith.constant 1 : index
    %c0_146 = arith.constant 0 : index
    %188 = vector.load %arg8[%c1_145, %c0_146] : memref<17x64xf32, #tpu.memory_space<vmem>>, vector<1x32xf32>
    %cst_147 = arith.constant dense<0.000000e+00> : vector<16xf32>
    %189 = vector.multi_reduction <add>, %186, %cst_147 [1] : vector<16x32xf32> to vector<16xf32>
    %190 = vector.shape_cast %189 : vector<16xf32> to vector<16x1xf32>
    %cst_148 = arith.constant 3.200000e+01 : f32
    %191 = vector.broadcast %cst_148 : f32 to vector<16x1xf32>
    %192 = arith.divf %190, %191 : vector<16x1xf32>
    %193 = vector.broadcast %192 : vector<16x1xf32> to vector<16x32xf32>
    %194 = arith.subf %186, %193 : vector<16x32xf32>
    %195 = arith.mulf %194, %194 : vector<16x32xf32>
    %cst_149 = arith.constant dense<0.000000e+00> : vector<16xf32>
    %196 = vector.multi_reduction <add>, %195, %cst_149 [1] : vector<16x32xf32> to vector<16xf32>
    %197 = vector.shape_cast %196 : vector<16xf32> to vector<16x1xf32>
    %cst_150 = arith.constant 3.200000e+01 : f32
    %198 = vector.broadcast %cst_150 : f32 to vector<16x1xf32>
    %199 = arith.divf %197, %198 : vector<16x1xf32>
    %cst_151 = arith.constant 9.99999996E-13 : f32
    %200 = vector.broadcast %cst_151 : f32 to vector<16x1xf32>
    %201 = arith.addf %199, %200 : vector<16x1xf32>
    %202 = math.rsqrt %201 : vector<16x1xf32>
    %203 = vector.broadcast %202 : vector<16x1xf32> to vector<16x32xf32>
    %204 = arith.mulf %194, %203 : vector<16x32xf32>
    %205 = vector.broadcast %187 : vector<1x32xf32> to vector<16x32xf32>
    %206 = arith.mulf %204, %205 : vector<16x32xf32>
    %207 = vector.broadcast %188 : vector<1x32xf32> to vector<16x32xf32>
    %208 = arith.addf %206, %207 : vector<16x32xf32>
    %c0_152 = arith.constant 0 : index
    %c0_153 = arith.constant 0 : index
    %c0_154 = arith.constant 0 : index
    %209 = vector.load %arg7[%c0_152, %c0_153, %c0_154] : memref<2x96x64xf32, #tpu.memory_space<vmem>>, vector<1x32x64xf32>
    %210 = vector.shape_cast %209 : vector<1x32x64xf32> to vector<32x64xf32>
    %cst_155 = arith.constant dense<0.000000e+00> : vector<16x64xf32>
    %211 = tpu.matmul %208, %210, %cst_155 {dimension_numbers = #tpu.dot_dimension_numbers<[1], [0], [0], [1], [0, 0, 1, 1], [], []>} : vector<16x32xf32>, vector<32x64xf32>, vector<16x64xf32> -> vector<16x64xf32>
    %c5 = arith.constant 5 : index
    %c0_156 = arith.constant 0 : index
    %212 = vector.load %arg8[%c5, %c0_156] : memref<17x64xf32, #tpu.memory_space<vmem>>, vector<1x64xf32>
    %213 = vector.broadcast %212 : vector<1x64xf32> to vector<16x64xf32>
    %214 = arith.addf %211, %213 : vector<16x64xf32>
    %cst_157 = arith.constant 5.000000e-01 : f32
    %215 = vector.broadcast %cst_157 : f32 to vector<16x64xf32>
    %216 = arith.mulf %215, %214 : vector<16x64xf32>
    %cst_158 = arith.constant 0.707106769 : f32
    %217 = vector.broadcast %cst_158 : f32 to vector<16x64xf32>
    %218 = arith.mulf %214, %217 : vector<16x64xf32>
    %219 = math.erf %218 : vector<16x64xf32>
    %cst_159 = arith.constant 1.000000e+00 : f32
    %220 = vector.broadcast %cst_159 : f32 to vector<16x64xf32>
    %221 = arith.addf %220, %219 : vector<16x64xf32>
    %222 = arith.mulf %216, %221 : vector<16x64xf32>
    %c0_160 = arith.constant 0 : index
    %c32 = arith.constant 32 : index
    %c0_161 = arith.constant 0 : index
    %223 = vector.load %arg7[%c0_160, %c32, %c0_161] : memref<2x96x64xf32, #tpu.memory_space<vmem>>, vector<1x64x32xf32>
    %224 = vector.shape_cast %223 : vector<1x64x32xf32> to vector<64x32xf32>
    %cst_162 = arith.constant dense<0.000000e+00> : vector<16x32xf32>
    %225 = tpu.matmul %222, %224, %cst_162 {dimension_numbers = #tpu.dot_dimension_numbers<[1], [0], [0], [1], [0, 0, 1, 1], [], []>} : vector<16x64xf32>, vector<64x32xf32>, vector<16x32xf32> -> vector<16x32xf32>
    %c6 = arith.constant 6 : index
    %c0_163 = arith.constant 0 : index
    %226 = vector.load %arg8[%c6, %c0_163] : memref<17x64xf32, #tpu.memory_space<vmem>>, vector<1x32xf32>
    %227 = vector.broadcast %226 : vector<1x32xf32> to vector<16x32xf32>
    %228 = arith.addf %225, %227 : vector<16x32xf32>
    %229 = arith.addf %208, %228 : vector<16x32xf32>
    %c2_164 = arith.constant 2 : index
    %c0_165 = arith.constant 0 : index
    %230 = vector.load %arg8[%c2_164, %c0_165] : memref<17x64xf32, #tpu.memory_space<vmem>>, vector<1x32xf32>
    %c3_166 = arith.constant 3 : index
    %c0_167 = arith.constant 0 : index
    %231 = vector.load %arg8[%c3_166, %c0_167] : memref<17x64xf32, #tpu.memory_space<vmem>>, vector<1x32xf32>
    %cst_168 = arith.constant dense<0.000000e+00> : vector<16xf32>
    %232 = vector.multi_reduction <add>, %229, %cst_168 [1] : vector<16x32xf32> to vector<16xf32>
    %233 = vector.shape_cast %232 : vector<16xf32> to vector<16x1xf32>
    %cst_169 = arith.constant 3.200000e+01 : f32
    %234 = vector.broadcast %cst_169 : f32 to vector<16x1xf32>
    %235 = arith.divf %233, %234 : vector<16x1xf32>
    %236 = vector.broadcast %235 : vector<16x1xf32> to vector<16x32xf32>
    %237 = arith.subf %229, %236 : vector<16x32xf32>
    %238 = arith.mulf %237, %237 : vector<16x32xf32>
    %cst_170 = arith.constant dense<0.000000e+00> : vector<16xf32>
    %239 = vector.multi_reduction <add>, %238, %cst_170 [1] : vector<16x32xf32> to vector<16xf32>
    %240 = vector.shape_cast %239 : vector<16xf32> to vector<16x1xf32>
    %cst_171 = arith.constant 3.200000e+01 : f32
    %241 = vector.broadcast %cst_171 : f32 to vector<16x1xf32>
    %242 = arith.divf %240, %241 : vector<16x1xf32>
    %cst_172 = arith.constant 9.99999996E-13 : f32
    %243 = vector.broadcast %cst_172 : f32 to vector<16x1xf32>
    %244 = arith.addf %242, %243 : vector<16x1xf32>
    %245 = math.rsqrt %244 : vector<16x1xf32>
    %246 = vector.broadcast %245 : vector<16x1xf32> to vector<16x32xf32>
    %247 = arith.mulf %237, %246 : vector<16x32xf32>
    %248 = vector.broadcast %230 : vector<1x32xf32> to vector<16x32xf32>
    %249 = arith.mulf %247, %248 : vector<16x32xf32>
    %250 = vector.broadcast %231 : vector<1x32xf32> to vector<16x32xf32>
    %251 = arith.addf %249, %250 : vector<16x32xf32>
    %c3_173 = arith.constant 3 : index
    %c0_174 = arith.constant 0 : index
    %c0_175 = arith.constant 0 : index
    %c0_176 = arith.constant 0 : index
    %252 = vector.load %arg4[%c3_173, %c0_174, %c0_175, %c0_176] : memref<6x4x8x32xf32, #tpu.memory_space<vmem>>, vector<1x1x8x32xf32>
    %253 = vector.shape_cast %252 : vector<1x1x8x32xf32> to vector<8x32xf32>
    %cst_177 = arith.constant dense<0.000000e+00> : vector<16x8xf32>
    %254 = tpu.matmul %251, %253, %cst_177 {dimension_numbers = #tpu.dot_dimension_numbers<[1], [1], [0], [0], [0, 0, 1, 0], [], []>} : vector<16x32xf32>, vector<8x32xf32>, vector<16x8xf32> -> vector<16x8xf32>
    %c3_178 = arith.constant 3 : index
    %c0_179 = arith.constant 0 : index
    %c0_180 = arith.constant 0 : index
    %255 = vector.load %arg5[%c3_178, %c0_179, %c0_180] : memref<6x4x8xf32, #tpu.memory_space<vmem>>, vector<1x1x8xf32>
    %256 = vector.shape_cast %255 : vector<1x1x8xf32> to vector<1x8xf32>
    %257 = vector.broadcast %256 : vector<1x8xf32> to vector<16x8xf32>
    %258 = arith.addf %254, %257 : vector<16x8xf32>
    %c4_181 = arith.constant 4 : index
    %c0_182 = arith.constant 0 : index
    %c0_183 = arith.constant 0 : index
    %c0_184 = arith.constant 0 : index
    %259 = vector.load %arg4[%c4_181, %c0_182, %c0_183, %c0_184] : memref<6x4x8x32xf32, #tpu.memory_space<vmem>>, vector<1x1x8x32xf32>
    %260 = vector.shape_cast %259 : vector<1x1x8x32xf32> to vector<8x32xf32>
    %cst_185 = arith.constant dense<0.000000e+00> : vector<16x8xf32>
    %261 = tpu.matmul %251, %260, %cst_185 {dimension_numbers = #tpu.dot_dimension_numbers<[1], [1], [0], [0], [0, 0, 1, 0], [], []>} : vector<16x32xf32>, vector<8x32xf32>, vector<16x8xf32> -> vector<16x8xf32>
    %c4_186 = arith.constant 4 : index
    %c0_187 = arith.constant 0 : index
    %c0_188 = arith.constant 0 : index
    %262 = vector.load %arg5[%c4_186, %c0_187, %c0_188] : memref<6x4x8xf32, #tpu.memory_space<vmem>>, vector<1x1x8xf32>
    %263 = vector.shape_cast %262 : vector<1x1x8xf32> to vector<1x8xf32>
    %264 = vector.broadcast %263 : vector<1x8xf32> to vector<16x8xf32>
    %265 = arith.addf %261, %264 : vector<16x8xf32>
    %c5_189 = arith.constant 5 : index
    %c0_190 = arith.constant 0 : index
    %c0_191 = arith.constant 0 : index
    %c0_192 = arith.constant 0 : index
    %266 = vector.load %arg4[%c5_189, %c0_190, %c0_191, %c0_192] : memref<6x4x8x32xf32, #tpu.memory_space<vmem>>, vector<1x1x8x32xf32>
    %267 = vector.shape_cast %266 : vector<1x1x8x32xf32> to vector<8x32xf32>
    %cst_193 = arith.constant dense<0.000000e+00> : vector<16x8xf32>
    %268 = tpu.matmul %251, %267, %cst_193 {dimension_numbers = #tpu.dot_dimension_numbers<[1], [1], [0], [0], [0, 0, 1, 0], [], []>} : vector<16x32xf32>, vector<8x32xf32>, vector<16x8xf32> -> vector<16x8xf32>
    %c5_194 = arith.constant 5 : index
    %c0_195 = arith.constant 0 : index
    %c0_196 = arith.constant 0 : index
    %269 = vector.load %arg5[%c5_194, %c0_195, %c0_196] : memref<6x4x8xf32, #tpu.memory_space<vmem>>, vector<1x1x8xf32>
    %270 = vector.shape_cast %269 : vector<1x1x8xf32> to vector<1x8xf32>
    %271 = vector.broadcast %270 : vector<1x8xf32> to vector<16x8xf32>
    %272 = arith.addf %268, %271 : vector<16x8xf32>
    %cst_197 = arith.constant dense<0.000000e+00> : vector<16x16xf32>
    %273 = tpu.matmul %258, %265, %cst_197 {dimension_numbers = #tpu.dot_dimension_numbers<[1], [1], [0], [0], [0, 0, 1, 0], [], []>} : vector<16x8xf32>, vector<16x8xf32>, vector<16x16xf32> -> vector<16x16xf32>
    %cst_198 = arith.constant 0.353553385 : f32
    %274 = vector.broadcast %cst_198 : f32 to vector<16x16xf32>
    %275 = arith.mulf %273, %274 : vector<16x16xf32>
    %276 = arith.addf %275, %0 : vector<16x16xf32>
    %cst_199 = arith.constant dense<0xFF800000> : vector<16xf32>
    %277 = vector.multi_reduction <maximumf>, %276, %cst_199 [1] : vector<16x16xf32> to vector<16xf32>
    %278 = vector.shape_cast %277 : vector<16xf32> to vector<16x1xf32>
    %279 = vector.broadcast %278 : vector<16x1xf32> to vector<16x16xf32>
    %280 = arith.subf %276, %279 : vector<16x16xf32>
    %281 = math.exp %280 : vector<16x16xf32>
    %cst_200 = arith.constant dense<0.000000e+00> : vector<16xf32>
    %282 = vector.multi_reduction <add>, %281, %cst_200 [1] : vector<16x16xf32> to vector<16xf32>
    %283 = vector.shape_cast %282 : vector<16xf32> to vector<16x1xf32>
    %284 = tpu.reciprocal %283 {approx = true} : vector<16x1xf32> -> vector<16x1xf32>
    %285 = vector.broadcast %284 : vector<16x1xf32> to vector<16x16xf32>
    %286 = arith.mulf %281, %285 : vector<16x16xf32>
    %cst_201 = arith.constant dense<0.000000e+00> : vector<16x8xf32>
    %287 = tpu.matmul %286, %272, %cst_201 {dimension_numbers = #tpu.dot_dimension_numbers<[1], [0], [0], [1], [0, 0, 1, 1], [], []>} : vector<16x16xf32>, vector<16x8xf32>, vector<16x8xf32> -> vector<16x8xf32>
    %c1_202 = arith.constant 1 : index
    %c0_203 = arith.constant 0 : index
    %c0_204 = arith.constant 0 : index
    %c0_205 = arith.constant 0 : index
    %288 = vector.load %arg6[%c1_202, %c0_203, %c0_204, %c0_205] : memref<2x4x8x32xf32, #tpu.memory_space<vmem>>, vector<1x1x8x32xf32>
    %289 = vector.shape_cast %288 : vector<1x1x8x32xf32> to vector<8x32xf32>
    %cst_206 = arith.constant dense<0.000000e+00> : vector<16x32xf32>
    %290 = tpu.matmul %287, %289, %cst_206 {dimension_numbers = #tpu.dot_dimension_numbers<[1], [0], [0], [1], [0, 0, 1, 1], [], []>} : vector<16x8xf32>, vector<8x32xf32>, vector<16x32xf32> -> vector<16x32xf32>
    %c3_207 = arith.constant 3 : index
    %c1_208 = arith.constant 1 : index
    %c0_209 = arith.constant 0 : index
    %c0_210 = arith.constant 0 : index
    %291 = vector.load %arg4[%c3_207, %c1_208, %c0_209, %c0_210] : memref<6x4x8x32xf32, #tpu.memory_space<vmem>>, vector<1x1x8x32xf32>
    %292 = vector.shape_cast %291 : vector<1x1x8x32xf32> to vector<8x32xf32>
    %cst_211 = arith.constant dense<0.000000e+00> : vector<16x8xf32>
    %293 = tpu.matmul %251, %292, %cst_211 {dimension_numbers = #tpu.dot_dimension_numbers<[1], [1], [0], [0], [0, 0, 1, 0], [], []>} : vector<16x32xf32>, vector<8x32xf32>, vector<16x8xf32> -> vector<16x8xf32>
    %c3_212 = arith.constant 3 : index
    %c1_213 = arith.constant 1 : index
    %c0_214 = arith.constant 0 : index
    %294 = vector.load %arg5[%c3_212, %c1_213, %c0_214] : memref<6x4x8xf32, #tpu.memory_space<vmem>>, vector<1x1x8xf32>
    %295 = vector.shape_cast %294 : vector<1x1x8xf32> to vector<1x8xf32>
    %296 = vector.broadcast %295 : vector<1x8xf32> to vector<16x8xf32>
    %297 = arith.addf %293, %296 : vector<16x8xf32>
    %c4_215 = arith.constant 4 : index
    %c1_216 = arith.constant 1 : index
    %c0_217 = arith.constant 0 : index
    %c0_218 = arith.constant 0 : index
    %298 = vector.load %arg4[%c4_215, %c1_216, %c0_217, %c0_218] : memref<6x4x8x32xf32, #tpu.memory_space<vmem>>, vector<1x1x8x32xf32>
    %299 = vector.shape_cast %298 : vector<1x1x8x32xf32> to vector<8x32xf32>
    %cst_219 = arith.constant dense<0.000000e+00> : vector<16x8xf32>
    %300 = tpu.matmul %251, %299, %cst_219 {dimension_numbers = #tpu.dot_dimension_numbers<[1], [1], [0], [0], [0, 0, 1, 0], [], []>} : vector<16x32xf32>, vector<8x32xf32>, vector<16x8xf32> -> vector<16x8xf32>
    %c4_220 = arith.constant 4 : index
    %c1_221 = arith.constant 1 : index
    %c0_222 = arith.constant 0 : index
    %301 = vector.load %arg5[%c4_220, %c1_221, %c0_222] : memref<6x4x8xf32, #tpu.memory_space<vmem>>, vector<1x1x8xf32>
    %302 = vector.shape_cast %301 : vector<1x1x8xf32> to vector<1x8xf32>
    %303 = vector.broadcast %302 : vector<1x8xf32> to vector<16x8xf32>
    %304 = arith.addf %300, %303 : vector<16x8xf32>
    %c5_223 = arith.constant 5 : index
    %c1_224 = arith.constant 1 : index
    %c0_225 = arith.constant 0 : index
    %c0_226 = arith.constant 0 : index
    %305 = vector.load %arg4[%c5_223, %c1_224, %c0_225, %c0_226] : memref<6x4x8x32xf32, #tpu.memory_space<vmem>>, vector<1x1x8x32xf32>
    %306 = vector.shape_cast %305 : vector<1x1x8x32xf32> to vector<8x32xf32>
    %cst_227 = arith.constant dense<0.000000e+00> : vector<16x8xf32>
    %307 = tpu.matmul %251, %306, %cst_227 {dimension_numbers = #tpu.dot_dimension_numbers<[1], [1], [0], [0], [0, 0, 1, 0], [], []>} : vector<16x32xf32>, vector<8x32xf32>, vector<16x8xf32> -> vector<16x8xf32>
    %c5_228 = arith.constant 5 : index
    %c1_229 = arith.constant 1 : index
    %c0_230 = arith.constant 0 : index
    %308 = vector.load %arg5[%c5_228, %c1_229, %c0_230] : memref<6x4x8xf32, #tpu.memory_space<vmem>>, vector<1x1x8xf32>
    %309 = vector.shape_cast %308 : vector<1x1x8xf32> to vector<1x8xf32>
    %310 = vector.broadcast %309 : vector<1x8xf32> to vector<16x8xf32>
    %311 = arith.addf %307, %310 : vector<16x8xf32>
    %cst_231 = arith.constant dense<0.000000e+00> : vector<16x16xf32>
    %312 = tpu.matmul %297, %304, %cst_231 {dimension_numbers = #tpu.dot_dimension_numbers<[1], [1], [0], [0], [0, 0, 1, 0], [], []>} : vector<16x8xf32>, vector<16x8xf32>, vector<16x16xf32> -> vector<16x16xf32>
    %cst_232 = arith.constant 0.353553385 : f32
    %313 = vector.broadcast %cst_232 : f32 to vector<16x16xf32>
    %314 = arith.mulf %312, %313 : vector<16x16xf32>
    %315 = arith.addf %314, %0 : vector<16x16xf32>
    %cst_233 = arith.constant dense<0xFF800000> : vector<16xf32>
    %316 = vector.multi_reduction <maximumf>, %315, %cst_233 [1] : vector<16x16xf32> to vector<16xf32>
    %317 = vector.shape_cast %316 : vector<16xf32> to vector<16x1xf32>
    %318 = vector.broadcast %317 : vector<16x1xf32> to vector<16x16xf32>
    %319 = arith.subf %315, %318 : vector<16x16xf32>
    %320 = math.exp %319 : vector<16x16xf32>
    %cst_234 = arith.constant dense<0.000000e+00> : vector<16xf32>
    %321 = vector.multi_reduction <add>, %320, %cst_234 [1] : vector<16x16xf32> to vector<16xf32>
    %322 = vector.shape_cast %321 : vector<16xf32> to vector<16x1xf32>
    %323 = tpu.reciprocal %322 {approx = true} : vector<16x1xf32> -> vector<16x1xf32>
    %324 = vector.broadcast %323 : vector<16x1xf32> to vector<16x16xf32>
    %325 = arith.mulf %320, %324 : vector<16x16xf32>
    %cst_235 = arith.constant dense<0.000000e+00> : vector<16x8xf32>
    %326 = tpu.matmul %325, %311, %cst_235 {dimension_numbers = #tpu.dot_dimension_numbers<[1], [0], [0], [1], [0, 0, 1, 1], [], []>} : vector<16x16xf32>, vector<16x8xf32>, vector<16x8xf32> -> vector<16x8xf32>
    %c1_236 = arith.constant 1 : index
    %c1_237 = arith.constant 1 : index
    %c0_238 = arith.constant 0 : index
    %c0_239 = arith.constant 0 : index
    %327 = vector.load %arg6[%c1_236, %c1_237, %c0_238, %c0_239] : memref<2x4x8x32xf32, #tpu.memory_space<vmem>>, vector<1x1x8x32xf32>
    %328 = vector.shape_cast %327 : vector<1x1x8x32xf32> to vector<8x32xf32>
    %cst_240 = arith.constant dense<0.000000e+00> : vector<16x32xf32>
    %329 = tpu.matmul %326, %328, %cst_240 {dimension_numbers = #tpu.dot_dimension_numbers<[1], [0], [0], [1], [0, 0, 1, 1], [], []>} : vector<16x8xf32>, vector<8x32xf32>, vector<16x32xf32> -> vector<16x32xf32>
    %330 = arith.addf %290, %329 : vector<16x32xf32>
    %c3_241 = arith.constant 3 : index
    %c2_242 = arith.constant 2 : index
    %c0_243 = arith.constant 0 : index
    %c0_244 = arith.constant 0 : index
    %331 = vector.load %arg4[%c3_241, %c2_242, %c0_243, %c0_244] : memref<6x4x8x32xf32, #tpu.memory_space<vmem>>, vector<1x1x8x32xf32>
    %332 = vector.shape_cast %331 : vector<1x1x8x32xf32> to vector<8x32xf32>
    %cst_245 = arith.constant dense<0.000000e+00> : vector<16x8xf32>
    %333 = tpu.matmul %251, %332, %cst_245 {dimension_numbers = #tpu.dot_dimension_numbers<[1], [1], [0], [0], [0, 0, 1, 0], [], []>} : vector<16x32xf32>, vector<8x32xf32>, vector<16x8xf32> -> vector<16x8xf32>
    %c3_246 = arith.constant 3 : index
    %c2_247 = arith.constant 2 : index
    %c0_248 = arith.constant 0 : index
    %334 = vector.load %arg5[%c3_246, %c2_247, %c0_248] : memref<6x4x8xf32, #tpu.memory_space<vmem>>, vector<1x1x8xf32>
    %335 = vector.shape_cast %334 : vector<1x1x8xf32> to vector<1x8xf32>
    %336 = vector.broadcast %335 : vector<1x8xf32> to vector<16x8xf32>
    %337 = arith.addf %333, %336 : vector<16x8xf32>
    %c4_249 = arith.constant 4 : index
    %c2_250 = arith.constant 2 : index
    %c0_251 = arith.constant 0 : index
    %c0_252 = arith.constant 0 : index
    %338 = vector.load %arg4[%c4_249, %c2_250, %c0_251, %c0_252] : memref<6x4x8x32xf32, #tpu.memory_space<vmem>>, vector<1x1x8x32xf32>
    %339 = vector.shape_cast %338 : vector<1x1x8x32xf32> to vector<8x32xf32>
    %cst_253 = arith.constant dense<0.000000e+00> : vector<16x8xf32>
    %340 = tpu.matmul %251, %339, %cst_253 {dimension_numbers = #tpu.dot_dimension_numbers<[1], [1], [0], [0], [0, 0, 1, 0], [], []>} : vector<16x32xf32>, vector<8x32xf32>, vector<16x8xf32> -> vector<16x8xf32>
    %c4_254 = arith.constant 4 : index
    %c2_255 = arith.constant 2 : index
    %c0_256 = arith.constant 0 : index
    %341 = vector.load %arg5[%c4_254, %c2_255, %c0_256] : memref<6x4x8xf32, #tpu.memory_space<vmem>>, vector<1x1x8xf32>
    %342 = vector.shape_cast %341 : vector<1x1x8xf32> to vector<1x8xf32>
    %343 = vector.broadcast %342 : vector<1x8xf32> to vector<16x8xf32>
    %344 = arith.addf %340, %343 : vector<16x8xf32>
    %c5_257 = arith.constant 5 : index
    %c2_258 = arith.constant 2 : index
    %c0_259 = arith.constant 0 : index
    %c0_260 = arith.constant 0 : index
    %345 = vector.load %arg4[%c5_257, %c2_258, %c0_259, %c0_260] : memref<6x4x8x32xf32, #tpu.memory_space<vmem>>, vector<1x1x8x32xf32>
    %346 = vector.shape_cast %345 : vector<1x1x8x32xf32> to vector<8x32xf32>
    %cst_261 = arith.constant dense<0.000000e+00> : vector<16x8xf32>
    %347 = tpu.matmul %251, %346, %cst_261 {dimension_numbers = #tpu.dot_dimension_numbers<[1], [1], [0], [0], [0, 0, 1, 0], [], []>} : vector<16x32xf32>, vector<8x32xf32>, vector<16x8xf32> -> vector<16x8xf32>
    %c5_262 = arith.constant 5 : index
    %c2_263 = arith.constant 2 : index
    %c0_264 = arith.constant 0 : index
    %348 = vector.load %arg5[%c5_262, %c2_263, %c0_264] : memref<6x4x8xf32, #tpu.memory_space<vmem>>, vector<1x1x8xf32>
    %349 = vector.shape_cast %348 : vector<1x1x8xf32> to vector<1x8xf32>
    %350 = vector.broadcast %349 : vector<1x8xf32> to vector<16x8xf32>
    %351 = arith.addf %347, %350 : vector<16x8xf32>
    %cst_265 = arith.constant dense<0.000000e+00> : vector<16x16xf32>
    %352 = tpu.matmul %337, %344, %cst_265 {dimension_numbers = #tpu.dot_dimension_numbers<[1], [1], [0], [0], [0, 0, 1, 0], [], []>} : vector<16x8xf32>, vector<16x8xf32>, vector<16x16xf32> -> vector<16x16xf32>
    %cst_266 = arith.constant 0.353553385 : f32
    %353 = vector.broadcast %cst_266 : f32 to vector<16x16xf32>
    %354 = arith.mulf %352, %353 : vector<16x16xf32>
    %355 = arith.addf %354, %0 : vector<16x16xf32>
    %cst_267 = arith.constant dense<0xFF800000> : vector<16xf32>
    %356 = vector.multi_reduction <maximumf>, %355, %cst_267 [1] : vector<16x16xf32> to vector<16xf32>
    %357 = vector.shape_cast %356 : vector<16xf32> to vector<16x1xf32>
    %358 = vector.broadcast %357 : vector<16x1xf32> to vector<16x16xf32>
    %359 = arith.subf %355, %358 : vector<16x16xf32>
    %360 = math.exp %359 : vector<16x16xf32>
    %cst_268 = arith.constant dense<0.000000e+00> : vector<16xf32>
    %361 = vector.multi_reduction <add>, %360, %cst_268 [1] : vector<16x16xf32> to vector<16xf32>
    %362 = vector.shape_cast %361 : vector<16xf32> to vector<16x1xf32>
    %363 = tpu.reciprocal %362 {approx = true} : vector<16x1xf32> -> vector<16x1xf32>
    %364 = vector.broadcast %363 : vector<16x1xf32> to vector<16x16xf32>
    %365 = arith.mulf %360, %364 : vector<16x16xf32>
    %cst_269 = arith.constant dense<0.000000e+00> : vector<16x8xf32>
    %366 = tpu.matmul %365, %351, %cst_269 {dimension_numbers = #tpu.dot_dimension_numbers<[1], [0], [0], [1], [0, 0, 1, 1], [], []>} : vector<16x16xf32>, vector<16x8xf32>, vector<16x8xf32> -> vector<16x8xf32>
    %c1_270 = arith.constant 1 : index
    %c2_271 = arith.constant 2 : index
    %c0_272 = arith.constant 0 : index
    %c0_273 = arith.constant 0 : index
    %367 = vector.load %arg6[%c1_270, %c2_271, %c0_272, %c0_273] : memref<2x4x8x32xf32, #tpu.memory_space<vmem>>, vector<1x1x8x32xf32>
    %368 = vector.shape_cast %367 : vector<1x1x8x32xf32> to vector<8x32xf32>
    %cst_274 = arith.constant dense<0.000000e+00> : vector<16x32xf32>
    %369 = tpu.matmul %366, %368, %cst_274 {dimension_numbers = #tpu.dot_dimension_numbers<[1], [0], [0], [1], [0, 0, 1, 1], [], []>} : vector<16x8xf32>, vector<8x32xf32>, vector<16x32xf32> -> vector<16x32xf32>
    %370 = arith.addf %330, %369 : vector<16x32xf32>
    %c3_275 = arith.constant 3 : index
    %c3_276 = arith.constant 3 : index
    %c0_277 = arith.constant 0 : index
    %c0_278 = arith.constant 0 : index
    %371 = vector.load %arg4[%c3_275, %c3_276, %c0_277, %c0_278] : memref<6x4x8x32xf32, #tpu.memory_space<vmem>>, vector<1x1x8x32xf32>
    %372 = vector.shape_cast %371 : vector<1x1x8x32xf32> to vector<8x32xf32>
    %cst_279 = arith.constant dense<0.000000e+00> : vector<16x8xf32>
    %373 = tpu.matmul %251, %372, %cst_279 {dimension_numbers = #tpu.dot_dimension_numbers<[1], [1], [0], [0], [0, 0, 1, 0], [], []>} : vector<16x32xf32>, vector<8x32xf32>, vector<16x8xf32> -> vector<16x8xf32>
    %c3_280 = arith.constant 3 : index
    %c3_281 = arith.constant 3 : index
    %c0_282 = arith.constant 0 : index
    %374 = vector.load %arg5[%c3_280, %c3_281, %c0_282] : memref<6x4x8xf32, #tpu.memory_space<vmem>>, vector<1x1x8xf32>
    %375 = vector.shape_cast %374 : vector<1x1x8xf32> to vector<1x8xf32>
    %376 = vector.broadcast %375 : vector<1x8xf32> to vector<16x8xf32>
    %377 = arith.addf %373, %376 : vector<16x8xf32>
    %c4_283 = arith.constant 4 : index
    %c3_284 = arith.constant 3 : index
    %c0_285 = arith.constant 0 : index
    %c0_286 = arith.constant 0 : index
    %378 = vector.load %arg4[%c4_283, %c3_284, %c0_285, %c0_286] : memref<6x4x8x32xf32, #tpu.memory_space<vmem>>, vector<1x1x8x32xf32>
    %379 = vector.shape_cast %378 : vector<1x1x8x32xf32> to vector<8x32xf32>
    %cst_287 = arith.constant dense<0.000000e+00> : vector<16x8xf32>
    %380 = tpu.matmul %251, %379, %cst_287 {dimension_numbers = #tpu.dot_dimension_numbers<[1], [1], [0], [0], [0, 0, 1, 0], [], []>} : vector<16x32xf32>, vector<8x32xf32>, vector<16x8xf32> -> vector<16x8xf32>
    %c4_288 = arith.constant 4 : index
    %c3_289 = arith.constant 3 : index
    %c0_290 = arith.constant 0 : index
    %381 = vector.load %arg5[%c4_288, %c3_289, %c0_290] : memref<6x4x8xf32, #tpu.memory_space<vmem>>, vector<1x1x8xf32>
    %382 = vector.shape_cast %381 : vector<1x1x8xf32> to vector<1x8xf32>
    %383 = vector.broadcast %382 : vector<1x8xf32> to vector<16x8xf32>
    %384 = arith.addf %380, %383 : vector<16x8xf32>
    %c5_291 = arith.constant 5 : index
    %c3_292 = arith.constant 3 : index
    %c0_293 = arith.constant 0 : index
    %c0_294 = arith.constant 0 : index
    %385 = vector.load %arg4[%c5_291, %c3_292, %c0_293, %c0_294] : memref<6x4x8x32xf32, #tpu.memory_space<vmem>>, vector<1x1x8x32xf32>
    %386 = vector.shape_cast %385 : vector<1x1x8x32xf32> to vector<8x32xf32>
    %cst_295 = arith.constant dense<0.000000e+00> : vector<16x8xf32>
    %387 = tpu.matmul %251, %386, %cst_295 {dimension_numbers = #tpu.dot_dimension_numbers<[1], [1], [0], [0], [0, 0, 1, 0], [], []>} : vector<16x32xf32>, vector<8x32xf32>, vector<16x8xf32> -> vector<16x8xf32>
    %c5_296 = arith.constant 5 : index
    %c3_297 = arith.constant 3 : index
    %c0_298 = arith.constant 0 : index
    %388 = vector.load %arg5[%c5_296, %c3_297, %c0_298] : memref<6x4x8xf32, #tpu.memory_space<vmem>>, vector<1x1x8xf32>
    %389 = vector.shape_cast %388 : vector<1x1x8xf32> to vector<1x8xf32>
    %390 = vector.broadcast %389 : vector<1x8xf32> to vector<16x8xf32>
    %391 = arith.addf %387, %390 : vector<16x8xf32>
    %cst_299 = arith.constant dense<0.000000e+00> : vector<16x16xf32>
    %392 = tpu.matmul %377, %384, %cst_299 {dimension_numbers = #tpu.dot_dimension_numbers<[1], [1], [0], [0], [0, 0, 1, 0], [], []>} : vector<16x8xf32>, vector<16x8xf32>, vector<16x16xf32> -> vector<16x16xf32>
    %cst_300 = arith.constant 0.353553385 : f32
    %393 = vector.broadcast %cst_300 : f32 to vector<16x16xf32>
    %394 = arith.mulf %392, %393 : vector<16x16xf32>
    %395 = arith.addf %394, %0 : vector<16x16xf32>
    %cst_301 = arith.constant dense<0xFF800000> : vector<16xf32>
    %396 = vector.multi_reduction <maximumf>, %395, %cst_301 [1] : vector<16x16xf32> to vector<16xf32>
    %397 = vector.shape_cast %396 : vector<16xf32> to vector<16x1xf32>
    %398 = vector.broadcast %397 : vector<16x1xf32> to vector<16x16xf32>
    %399 = arith.subf %395, %398 : vector<16x16xf32>
    %400 = math.exp %399 : vector<16x16xf32>
    %cst_302 = arith.constant dense<0.000000e+00> : vector<16xf32>
    %401 = vector.multi_reduction <add>, %400, %cst_302 [1] : vector<16x16xf32> to vector<16xf32>
    %402 = vector.shape_cast %401 : vector<16xf32> to vector<16x1xf32>
    %403 = tpu.reciprocal %402 {approx = true} : vector<16x1xf32> -> vector<16x1xf32>
    %404 = vector.broadcast %403 : vector<16x1xf32> to vector<16x16xf32>
    %405 = arith.mulf %400, %404 : vector<16x16xf32>
    %cst_303 = arith.constant dense<0.000000e+00> : vector<16x8xf32>
    %406 = tpu.matmul %405, %391, %cst_303 {dimension_numbers = #tpu.dot_dimension_numbers<[1], [0], [0], [1], [0, 0, 1, 1], [], []>} : vector<16x16xf32>, vector<16x8xf32>, vector<16x8xf32> -> vector<16x8xf32>
    %c1_304 = arith.constant 1 : index
    %c3_305 = arith.constant 3 : index
    %c0_306 = arith.constant 0 : index
    %c0_307 = arith.constant 0 : index
    %407 = vector.load %arg6[%c1_304, %c3_305, %c0_306, %c0_307] : memref<2x4x8x32xf32, #tpu.memory_space<vmem>>, vector<1x1x8x32xf32>
    %408 = vector.shape_cast %407 : vector<1x1x8x32xf32> to vector<8x32xf32>
    %cst_308 = arith.constant dense<0.000000e+00> : vector<16x32xf32>
    %409 = tpu.matmul %406, %408, %cst_308 {dimension_numbers = #tpu.dot_dimension_numbers<[1], [0], [0], [1], [0, 0, 1, 1], [], []>} : vector<16x8xf32>, vector<8x32xf32>, vector<16x32xf32> -> vector<16x32xf32>
    %410 = arith.addf %370, %409 : vector<16x32xf32>
    %c11 = arith.constant 11 : index
    %c0_309 = arith.constant 0 : index
    %411 = vector.load %arg8[%c11, %c0_309] : memref<17x64xf32, #tpu.memory_space<vmem>>, vector<1x32xf32>
    %412 = vector.broadcast %411 : vector<1x32xf32> to vector<16x32xf32>
    %413 = arith.addf %410, %412 : vector<16x32xf32>
    %414 = arith.addf %251, %413 : vector<16x32xf32>
    %c7 = arith.constant 7 : index
    %c0_310 = arith.constant 0 : index
    %415 = vector.load %arg8[%c7, %c0_310] : memref<17x64xf32, #tpu.memory_space<vmem>>, vector<1x32xf32>
    %c8 = arith.constant 8 : index
    %c0_311 = arith.constant 0 : index
    %416 = vector.load %arg8[%c8, %c0_311] : memref<17x64xf32, #tpu.memory_space<vmem>>, vector<1x32xf32>
    %cst_312 = arith.constant dense<0.000000e+00> : vector<16xf32>
    %417 = vector.multi_reduction <add>, %414, %cst_312 [1] : vector<16x32xf32> to vector<16xf32>
    %418 = vector.shape_cast %417 : vector<16xf32> to vector<16x1xf32>
    %cst_313 = arith.constant 3.200000e+01 : f32
    %419 = vector.broadcast %cst_313 : f32 to vector<16x1xf32>
    %420 = arith.divf %418, %419 : vector<16x1xf32>
    %421 = vector.broadcast %420 : vector<16x1xf32> to vector<16x32xf32>
    %422 = arith.subf %414, %421 : vector<16x32xf32>
    %423 = arith.mulf %422, %422 : vector<16x32xf32>
    %cst_314 = arith.constant dense<0.000000e+00> : vector<16xf32>
    %424 = vector.multi_reduction <add>, %423, %cst_314 [1] : vector<16x32xf32> to vector<16xf32>
    %425 = vector.shape_cast %424 : vector<16xf32> to vector<16x1xf32>
    %cst_315 = arith.constant 3.200000e+01 : f32
    %426 = vector.broadcast %cst_315 : f32 to vector<16x1xf32>
    %427 = arith.divf %425, %426 : vector<16x1xf32>
    %cst_316 = arith.constant 9.99999996E-13 : f32
    %428 = vector.broadcast %cst_316 : f32 to vector<16x1xf32>
    %429 = arith.addf %427, %428 : vector<16x1xf32>
    %430 = math.rsqrt %429 : vector<16x1xf32>
    %431 = vector.broadcast %430 : vector<16x1xf32> to vector<16x32xf32>
    %432 = arith.mulf %422, %431 : vector<16x32xf32>
    %433 = vector.broadcast %415 : vector<1x32xf32> to vector<16x32xf32>
    %434 = arith.mulf %432, %433 : vector<16x32xf32>
    %435 = vector.broadcast %416 : vector<1x32xf32> to vector<16x32xf32>
    %436 = arith.addf %434, %435 : vector<16x32xf32>
    %c1_317 = arith.constant 1 : index
    %c0_318 = arith.constant 0 : index
    %c0_319 = arith.constant 0 : index
    %437 = vector.load %arg7[%c1_317, %c0_318, %c0_319] : memref<2x96x64xf32, #tpu.memory_space<vmem>>, vector<1x32x64xf32>
    %438 = vector.shape_cast %437 : vector<1x32x64xf32> to vector<32x64xf32>
    %cst_320 = arith.constant dense<0.000000e+00> : vector<16x64xf32>
    %439 = tpu.matmul %436, %438, %cst_320 {dimension_numbers = #tpu.dot_dimension_numbers<[1], [0], [0], [1], [0, 0, 1, 1], [], []>} : vector<16x32xf32>, vector<32x64xf32>, vector<16x64xf32> -> vector<16x64xf32>
    %c12 = arith.constant 12 : index
    %c0_321 = arith.constant 0 : index
    %440 = vector.load %arg8[%c12, %c0_321] : memref<17x64xf32, #tpu.memory_space<vmem>>, vector<1x64xf32>
    %441 = vector.broadcast %440 : vector<1x64xf32> to vector<16x64xf32>
    %442 = arith.addf %439, %441 : vector<16x64xf32>
    %cst_322 = arith.constant 5.000000e-01 : f32
    %443 = vector.broadcast %cst_322 : f32 to vector<16x64xf32>
    %444 = arith.mulf %443, %442 : vector<16x64xf32>
    %cst_323 = arith.constant 0.707106769 : f32
    %445 = vector.broadcast %cst_323 : f32 to vector<16x64xf32>
    %446 = arith.mulf %442, %445 : vector<16x64xf32>
    %447 = math.erf %446 : vector<16x64xf32>
    %cst_324 = arith.constant 1.000000e+00 : f32
    %448 = vector.broadcast %cst_324 : f32 to vector<16x64xf32>
    %449 = arith.addf %448, %447 : vector<16x64xf32>
    %450 = arith.mulf %444, %449 : vector<16x64xf32>
    %c1_325 = arith.constant 1 : index
    %c32_326 = arith.constant 32 : index
    %c0_327 = arith.constant 0 : index
    %451 = vector.load %arg7[%c1_325, %c32_326, %c0_327] : memref<2x96x64xf32, #tpu.memory_space<vmem>>, vector<1x64x32xf32>
    %452 = vector.shape_cast %451 : vector<1x64x32xf32> to vector<64x32xf32>
    %cst_328 = arith.constant dense<0.000000e+00> : vector<16x32xf32>
    %453 = tpu.matmul %450, %452, %cst_328 {dimension_numbers = #tpu.dot_dimension_numbers<[1], [0], [0], [1], [0, 0, 1, 1], [], []>} : vector<16x64xf32>, vector<64x32xf32>, vector<16x32xf32> -> vector<16x32xf32>
    %c13 = arith.constant 13 : index
    %c0_329 = arith.constant 0 : index
    %454 = vector.load %arg8[%c13, %c0_329] : memref<17x64xf32, #tpu.memory_space<vmem>>, vector<1x32xf32>
    %455 = vector.broadcast %454 : vector<1x32xf32> to vector<16x32xf32>
    %456 = arith.addf %453, %455 : vector<16x32xf32>
    %457 = arith.addf %436, %456 : vector<16x32xf32>
    %c9 = arith.constant 9 : index
    %c0_330 = arith.constant 0 : index
    %458 = vector.load %arg8[%c9, %c0_330] : memref<17x64xf32, #tpu.memory_space<vmem>>, vector<1x32xf32>
    %c10 = arith.constant 10 : index
    %c0_331 = arith.constant 0 : index
    %459 = vector.load %arg8[%c10, %c0_331] : memref<17x64xf32, #tpu.memory_space<vmem>>, vector<1x32xf32>
    %cst_332 = arith.constant dense<0.000000e+00> : vector<16xf32>
    %460 = vector.multi_reduction <add>, %457, %cst_332 [1] : vector<16x32xf32> to vector<16xf32>
    %461 = vector.shape_cast %460 : vector<16xf32> to vector<16x1xf32>
    %cst_333 = arith.constant 3.200000e+01 : f32
    %462 = vector.broadcast %cst_333 : f32 to vector<16x1xf32>
    %463 = arith.divf %461, %462 : vector<16x1xf32>
    %464 = vector.broadcast %463 : vector<16x1xf32> to vector<16x32xf32>
    %465 = arith.subf %457, %464 : vector<16x32xf32>
    %466 = arith.mulf %465, %465 : vector<16x32xf32>
    %cst_334 = arith.constant dense<0.000000e+00> : vector<16xf32>
    %467 = vector.multi_reduction <add>, %466, %cst_334 [1] : vector<16x32xf32> to vector<16xf32>
    %468 = vector.shape_cast %467 : vector<16xf32> to vector<16x1xf32>
    %cst_335 = arith.constant 3.200000e+01 : f32
    %469 = vector.broadcast %cst_335 : f32 to vector<16x1xf32>
    %470 = arith.divf %468, %469 : vector<16x1xf32>
    %cst_336 = arith.constant 9.99999996E-13 : f32
    %471 = vector.broadcast %cst_336 : f32 to vector<16x1xf32>
    %472 = arith.addf %470, %471 : vector<16x1xf32>
    %473 = math.rsqrt %472 : vector<16x1xf32>
    %474 = vector.broadcast %473 : vector<16x1xf32> to vector<16x32xf32>
    %475 = arith.mulf %465, %474 : vector<16x32xf32>
    %476 = vector.broadcast %458 : vector<1x32xf32> to vector<16x32xf32>
    %477 = arith.mulf %475, %476 : vector<16x32xf32>
    %478 = vector.broadcast %459 : vector<1x32xf32> to vector<16x32xf32>
    %479 = arith.addf %477, %478 : vector<16x32xf32>
    %c0_337 = arith.constant 0 : index
    %c0_338 = arith.constant 0 : index
    %480 = vector.load %arg3[%c0_337, %c0_338] : memref<2x16xf32, #tpu.memory_space<vmem>>, vector<2x16xf32>
    %cst_339 = arith.constant dense<0.000000e+00> : vector<2x32xf32>
    %481 = tpu.matmul %480, %23, %cst_339 {dimension_numbers = #tpu.dot_dimension_numbers<[1], [0], [0], [1], [0, 0, 1, 1], [], []>} : vector<2x16xf32>, vector<16x32xf32>, vector<2x32xf32> -> vector<2x32xf32>
    %cst_340 = arith.constant dense<0.000000e+00> : vector<2x32xf32>
    %482 = tpu.matmul %480, %479, %cst_340 {dimension_numbers = #tpu.dot_dimension_numbers<[1], [0], [0], [1], [0, 0, 1, 1], [], []>} : vector<2x16xf32>, vector<16x32xf32>, vector<2x32xf32> -> vector<2x32xf32>
    %c0_341 = arith.constant 0 : index
    %c0_342 = arith.constant 0 : index
    %483 = vector.load %arg9[%c0_341, %c0_342] : memref<64x16xf32, #tpu.memory_space<vmem>>, vector<32x16xf32>
    %cst_343 = arith.constant dense<0.000000e+00> : vector<2x16xf32>
    %484 = tpu.matmul %481, %483, %cst_343 {dimension_numbers = #tpu.dot_dimension_numbers<[1], [0], [0], [1], [0, 0, 1, 1], [], []>} : vector<2x32xf32>, vector<32x16xf32>, vector<2x16xf32> -> vector<2x16xf32>
    %c32_344 = arith.constant 32 : index
    %c0_345 = arith.constant 0 : index
    %485 = vector.load %arg9[%c32_344, %c0_345] : memref<64x16xf32, #tpu.memory_space<vmem>>, vector<32x16xf32>
    %cst_346 = arith.constant dense<0.000000e+00> : vector<2x16xf32>
    %486 = tpu.matmul %482, %485, %cst_346 {dimension_numbers = #tpu.dot_dimension_numbers<[1], [0], [0], [1], [0, 0, 1, 1], [], []>} : vector<2x32xf32>, vector<32x16xf32>, vector<2x16xf32> -> vector<2x16xf32>
    %487 = arith.addf %484, %486 : vector<2x16xf32>
    %c16 = arith.constant 16 : index
    %c0_347 = arith.constant 0 : index
    %488 = vector.load %arg8[%c16, %c0_347] : memref<17x64xf32, #tpu.memory_space<vmem>>, vector<1x16xf32>
    %489 = vector.broadcast %488 : vector<1x16xf32> to vector<2x16xf32>
    %490 = arith.addf %487, %489 : vector<2x16xf32>
    %491 = arith.mulf %490, %490 : vector<2x16xf32>
    %cst_348 = arith.constant dense<0.000000e+00> : vector<2xf32>
    %492 = vector.multi_reduction <add>, %491, %cst_348 [1] : vector<2x16xf32> to vector<2xf32>
    %493 = vector.shape_cast %492 : vector<2xf32> to vector<2x1xf32>
    %cst_349 = arith.constant 1.000000e-24 : f32
    %494 = vector.broadcast %cst_349 : f32 to vector<2x1xf32>
    %495 = arith.maximumf %493, %494 : vector<2x1xf32>
    %496 = math.rsqrt %495 : vector<2x1xf32>
    %497 = vector.broadcast %496 : vector<2x1xf32> to vector<2x16xf32>
    %498 = arith.mulf %490, %497 : vector<2x16xf32>
    %c0_350 = arith.constant 0 : index
    %c0_351 = arith.constant 0 : index
    %c0_352 = arith.constant 0 : index
    %499 = vector.load %arg10[%c0_350, %c0_351, %c0_352] : memref<1x2x16xf32, #tpu.memory_space<vmem>>, vector<1x2x16xf32>
    %500 = vector.shape_cast %499 : vector<1x2x16xf32> to vector<2x16xf32>
    %501 = vector.shape_cast %498 : vector<2x16xf32> to vector<1x2x16xf32>
    tpu.vector_store %arg10[%c0_350, %c0_351, %c0_352], %501 {strides = array<i32>} : memref<1x2x16xf32, #tpu.memory_space<vmem>>, vector<1x2x16xf32>,
    return
  }
  func.func @transform_0(%arg0: i32) -> (i32, i32) {
    %c0_i32 = arith.constant 0 : i32
    %c0_i32_0 = arith.constant 0 : i32
    return %arg0, %c0_i32 : i32, i32
  }
  func.func @transform_1(%arg0: i32) -> (i32, i32) {
    %c0_i32 = arith.constant 0 : i32
    %c0_i32_0 = arith.constant 0 : i32
    return %arg0, %c0_i32 : i32, i32
  }
  func.func @transform_2(%arg0: i32) -> (i32, i32) {
    %c0_i32 = arith.constant 0 : i32
    %c0_i32_0 = arith.constant 0 : i32
    %c0_i32_1 = arith.constant 0 : i32
    return %c0_i32, %c0_i32_0 : i32, i32
  }
  func.func @transform_3(%arg0: i32) -> (i32, i32, i32, i32) {
    %c0_i32 = arith.constant 0 : i32
    %c0_i32_0 = arith.constant 0 : i32
    %c0_i32_1 = arith.constant 0 : i32
    %c0_i32_2 = arith.constant 0 : i32
    %c0_i32_3 = arith.constant 0 : i32
    return %c0_i32, %c0_i32_0, %c0_i32_1, %c0_i32_2 : i32, i32, i32, i32
  }
  func.func @transform_4(%arg0: i32) -> (i32, i32, i32) {
    %c0_i32 = arith.constant 0 : i32
    %c0_i32_0 = arith.constant 0 : i32
    %c0_i32_1 = arith.constant 0 : i32
    %c0_i32_2 = arith.constant 0 : i32
    return %c0_i32, %c0_i32_0, %c0_i32_1 : i32, i32, i32
  }
  func.func @transform_5(%arg0: i32) -> (i32, i32, i32, i32) {
    %c0_i32 = arith.constant 0 : i32
    %c0_i32_0 = arith.constant 0 : i32
    %c0_i32_1 = arith.constant 0 : i32
    %c0_i32_2 = arith.constant 0 : i32
    %c0_i32_3 = arith.constant 0 : i32
    return %c0_i32, %c0_i32_0, %c0_i32_1, %c0_i32_2 : i32, i32, i32, i32
  }
  func.func @transform_6(%arg0: i32) -> (i32, i32, i32) {
    %c0_i32 = arith.constant 0 : i32
    %c0_i32_0 = arith.constant 0 : i32
    %c0_i32_1 = arith.constant 0 : i32
    %c0_i32_2 = arith.constant 0 : i32
    return %c0_i32, %c0_i32_0, %c0_i32_1 : i32, i32, i32
  }
  func.func @transform_7(%arg0: i32) -> (i32, i32) {
    %c0_i32 = arith.constant 0 : i32
    %c0_i32_0 = arith.constant 0 : i32
    %c0_i32_1 = arith.constant 0 : i32
    return %c0_i32, %c0_i32_0 : i32, i32
  }
  func.func @transform_8(%arg0: i32) -> (i32, i32) {
    %c0_i32 = arith.constant 0 : i32
    %c0_i32_0 = arith.constant 0 : i32
    %c0_i32_1 = arith.constant 0 : i32
    return %c0_i32, %c0_i32_0 : i32, i32
  }
  func.func @transform_9(%arg0: i32) -> (i32, i32, i32) {
    %c0_i32 = arith.constant 0 : i32
    %c0_i32_0 = arith.constant 0 : i32
    %c0_i32_1 = arith.constant 0 : i32
    return %arg0, %c0_i32, %c0_i32_0 : i32, i32, i32
  }
}

</mosaic_0001>

<bundles_post_ra>
// kernel: model_forward.2
= control target key start
LH: loop header
LB: loop body
LE: loop exit
PB: predicated region body
PF: predicated region fallthrough
CT: control target
= control target key end

     0   :  { %s6637_s30 = smov 0   ;;  %s7369_s0 = inlined_call_operand.vmem [shape: f32[32,32], index: 0, kind: input, shape index: {}]   ;;  %s7370_s1 = inlined_call_operand.vmem [shape: f32[32,16], index: 1, kind: input, shape index: {}]   ;;  %s7371_s2 = inlined_call_operand.vmem [shape: f32[2,16], index: 2, kind: input, shape index: {}]   ;;  %s7372_s3 = inlined_call_operand.vmem [shape: f32[6,4,8,32], index: 3, kind: input, shape index: {}]   ;;  %s7373_s4 = inlined_call_operand.vmem [shape: f32[6,4,8], index: 4, kind: input, shape index: {}]   ;;  %s7374_s5 = inlined_call_operand.vmem [shape: f32[2,4,8,32], index: 5, kind: input, shape index: {}]   ;;  %s7375_s6 = inlined_call_operand.vmem [shape: f32[2,96,64], index: 6, kind: input, shape index: {}]   ;;  %s7376_s7 = inlined_call_operand.vmem [shape: f32[17,64], index: 7, kind: input, shape index: {}]   ;;  %s7377_s8 = inlined_call_operand.vmem [shape: f32[64,16], index: 8, kind: input, shape index: {}]   ;;  %s7378_s9 = inlined_call_operand.vmem [shape: f32[2,2,16], index: 9, kind: output, shape index: {}]  }
   0x1 LB: > { %s6643_s10 = sadd.s32 4294967295, %s6583_s30   ;;  %p5636_p0 = scmp.ge.s32.totalorder %s6583_s30, 1  ;;  %s6583_s30 = sphi %s6637_s30, %s19_s30  }
   0x2   : > { %p299_p1 = scmp.lt.s32.totalorder %s6583_s30, 3 }
   0x4   : > { %p300_p2 = pnand %p5636_p0, %p299_p1 }
   0x5   : > { %s5637_s11 = sshll.u32 (!%p300_p2), %s6643_s10, 1  ;;  %p351_p4 = scmp.lt.s32.totalorder (!%p300_p2), %s6643_s10, 1 }
   0x6   : > { %303 = sbr.rel (%p300_p2) target bundleno = 10253 (0x280d), region = 56  ;;  %p340_p3 = scmp.lt.s32.totalorder (!%p300_p2), %s5637_s11, 3 }
   0xb   : > { %s7380_s11 = smov (!%p340_p3, %s5637_s11), 3  ;;  %vm361_vm0 = vcmask 261120   ;;  %v401_v14 = vld [vmem:[%s7372_s3] sm:$0xff]  ;;  %v5642_v24 = vld [vmem:[%s7376_s7 + $0xe] ss:$0 sm:$0xff]  ;;  %vm663_vm1 = vcmask 64512  }
   0xc   : > { %s5638_s12 = sshll.u32 %s7380_s11, 3  ;;  %v5648_v15 = vld [vmem:[%s7372_s3 + $0x20] sm:$0xff]  ;;  %6103 = vmatprep.subr.msk.mxu0 %vm361_vm0, %v401_v14  ;;  %v5643_v26 = vld [vmem:[%s7376_s7 + $0xf] ss:$0 sm:$0xff]  ;;  %v5656_v40 = vld [vmem:[%s7373_s4 + $0x8] ss:$0 sm:$0xff] }
   0xd   : > { %s343_s15 = scalar_lea.vmem %s7369_s0, %s5638_s12  ;;  %6108 = vmatprep.subr.msk.mxu1 %vm361_vm0, %v5648_v15  ;;  %6104 = vmatpush3.xpose.msk.msra.mxu0 %vm361_vm0, %v401_v14  ;;  %v5654_v16 = vld [vmem:[%s7372_s3 + $0x40] sm:$0xff]  ;;  %v5671_v46 = vld [vmem:[%s7372_s3 + $0x28] sm:$0xff]  ;;  %s6726_s19 = scalar_lea.vmem %s7370_s1, %s5638_s12  ;;  %vm755_vm2 = vcmask 130048   ;;  %vm2703_vm3 = vcmask 523264   ;;  %vm6586_vm4 = vmmov 0   ;;  %vm5559_vm5 = vcmask 123904  }
   0xe   : > { %v357_v0 = vld [vmem:[%s343_s15] sm:$0xff]  ;;  %v358_v2 = vld [vmem:[%s343_s15 + $0x8] sm:$0xff]  ;;  %6109 = vmatpush3.xpose.msk.msra.mxu1 %vm361_vm0, %v5648_v15  ;;  %6113 = vmatprep.subr.msk.mxu0 %vm361_vm0, %v5654_v16  ;;  %s7382_s10 = smov (!%p351_p4, %s6643_s10), 1 }
   0xf   : > { %v362_v1 = vsel %vm361_vm0, %v357_v0, 0.0  ;;  %v365_v3 = vsel %vm361_vm0, %v358_v2, 0.0  ;;  %v5650_v33 = vld [vmem:[%s7373_s4 + $0x4] ss:$0 sm:$0xff]  ;;  %v5644_v37 = vld [vmem:[%s7373_s4] ss:$0 sm:$0xff] }
  0x10   : > { %363 = vadd.xlane.f32.xlu0 %v362_v1  ;;  %v6729_v49 = vld [vmem:[%s6726_s19 + $0x8] sm:$0xff]  ;;  %v6732_v52 = vld [vmem:[%s6726_s19] sm:$0xff]  ;;  %s5641_s27 = sshll.u32 %s7382_s10, 1 }
  0x11   : > { %v5673_v54 = vld [vmem:[%s7373_s4 + $0x5] ss:$0 sm:$0xff]  ;;  %s354_s13 = scalar_lea.vmem %s7378_s9, %s5641_s27 }
  0x14   : > { %366 = vadd.xlane.f32.xlu0 %v365_v3 }
  0x99   : > { %v364_v4 = vpop.xlane.xlu0 %363 }
  0x9a   : > { %v369_v5 = vmul.f32 0.03125, %v364_v4 }
  0x9c   : > { %v371_v6 = vsub.f32 %v357_v0, %v369_v5 }
  0x9d   : > { %v367_v7 = vpop.xlane.xlu0 %366 }
  0x9e   : > { %v370_v8 = vmul.f32 0.03125, %v367_v7  ;;  %v373_v9 = vmul.f32 %v371_v6, %v371_v6 }
  0xa0   : > { %v372_v10 = vsub.f32 %v358_v2, %v370_v8  ;;  %v375_v11 = vsel %vm361_vm0, %v373_v9, 0.0 }
  0xa1   : > { %376 = vadd.xlane.f32.xlu1 %v375_v11 }
  0xa2   : > { %v374_v12 = vmul.f32 %v372_v10, %v372_v10 }
  0xa4   : > { %v378_v13 = vsel %vm361_vm0, %v374_v12, 0.0 }
  0xa5   : > { %379 = vadd.xlane.f32.xlu1 %v378_v13 }
 0x12a   : > { %v377_v17 = vpop.xlane.xlu1 %376 }
 0x12b   : > { %v381_v18 = vmul.f32 0.03125, %v377_v17  ;;  %v5677_v17 = vld [vmem:[%s7372_s3 + $0x48] sm:$0xff] }
 0x12d   : > { %v383_v19 = vadd.f32 1e-12, %v381_v18  ;;  %v859_v18 = vld [vmem:[%s7374_s5] sm:$0xff] }
 0x12e   : > { %v380_v20 = vpop.xlane.xlu1 %379 }
 0x12f   : > { %6481 = vrsqrt.f32 %v383_v19  ;;  %v382_v21 = vmul.f32 0.03125, %v380_v20 }
 0x131   : > { %v384_v22 = vadd.f32 1e-12, %v382_v21 }
 0x133   : > { %6483 = vrsqrt.f32 %v384_v22  ;;  %v5667_v22 = vld [vmem:[%s7373_s4 + $0x1] ss:$0 sm:$0xff] }
 0x13c   : > { %v6482_v23 = vpop.eup %6481 }
 0x13d   : > { %v387_v25 = vmul.f32 %v6482_v23, %v371_v6 }
 0x13f   : > { %v393_v27 = vmul.f32 %v5642_v24, %v387_v25 }
 0x140   : > { %v6484_v28 = vpop.eup %6483 }
 0x141   : > { %v6680_v29 = vadd.f32 %v5643_v26, %v393_v27  ;;  %v388_v30 = vmul.f32 %v6484_v28, %v372_v10  ;;  %v5666_v10 = vld [vmem:[%s7372_s3 + $0x8] sm:$0xff] }
 0x143   : > { %v394_v31 = vmul.f32 %v5642_v24, %v388_v30  ;;  %6105 = vmatprep.mubr.msk.f32.mxu0 %vm361_vm0, %v6680_v29  ;;  %6110 = vmatprep.mubr.msk.f32.mxu1 %vm361_vm0, %v6680_v29  ;;  %v5679_v24 = vld [vmem:[%s7373_s4 + $0x9] ss:$0 sm:$0xff] }
 0x145   : > { %v6686_v32 = vadd.f32 %v5643_v26, %v394_v31  ;;  %v5699_v31 = vld [vmem:[%s7372_s3 + $0x30] sm:$0xff] }
 0x147   : > { %6106 = vmatmul.mubr.msk.f32.vlgmr.msra.gmra.mxu0 %vm361_vm0, %v6686_v32  ;;  %6111 = vmatmul.mubr.msk.f32.vlgmr.msra.gmra.mxu1 %vm361_vm0, %v6686_v32 }
 0x148   : > { %6114 = vmatpush3.xpose.msk.msra.mxu0 %vm361_vm0, %v5654_v16  ;;  %6115 = vmatprep.mubr.msk.f32.mxu0 %vm361_vm0, %v6680_v29 }
 0x14b   : > { %6116 = vmatmul.mubr.msk.f32.vlgmr.msra.gmra.mxu0 %vm361_vm0, %v6686_v32 }
 0x207   : > { %v6107_v34 = vpop.f32.mrf.mxu0  ;;  %v6112_v35 = vpop.f32.mrf.mxu1 }
 0x208   : > { %v574_v36 = vadd.f32 %v6112_v35, %v5650_v33  ;;  %v488_v48 = vadd.f32 %v6107_v34, %v5644_v37 }
 0x209   : > { %v482_v38 = vpop.f32.mrf.mxu0  ;;  %v568_v39 = vpop.f32.mrf.mxu1 }
 0x20a   : > { %v483_v41 = vadd.f32 %v5644_v37, %v482_v38  ;;  %v569_v42 = vadd.f32 %v5650_v33, %v568_v39  ;;  %6118 = vmatprep.subr.msk.mxu1 %vm663_vm1, %v574_v36 }
 0x20b   : > { %v6117_v43 = vpop.f32.mrf.mxu0  ;;  %6119 = vmatpush3.xpose.msk.msra.mxu1 %vm663_vm1, %v574_v36 }
 0x20c   : > { %v660_v44 = vadd.f32 %v6117_v43, %v5656_v40  ;;  %6120 = vmatprep.subr.msk.mxu1 %vm663_vm1, %v569_v42  ;;  %6122 = vmatprep.mubr.msk.f32.mxu1 %vm663_vm1, %v483_v41  ;;  %v5701_v43 = vld [vmem:[%s7373_s4 + $0x6] ss:$0 sm:$0xff] }
 0x20d   : > { %v654_v45 = vpop.f32.mrf.mxu0 }
 0x20e   : > { %v655_v47 = vadd.f32 %v5656_v40, %v654_v45  ;;  %6125 = vmatprep.subr.mxu0 %v660_v44 }
 0x20f   : > { %6121 = vmatpush3.xpose.msk.msra.mxu1 %vm663_vm1, %v569_v42  ;;  %6126 = vmatpush3.msra.mxu0 %v660_v44 }
 0x210   : > { %6127 = vmatprep.subr.mxu0 %v655_v47  ;;  %6137 = vmatprep.subr.msk.mxu1 %vm361_vm0, %v5671_v46 }
 0x211   : > { %6128 = vmatpush3.msra.mxu0 %v655_v47 }
 0x212   : > { %6123 = vmatmul.mubr.msk.f32.vlgmr.msra.gmra.mxu1 %vm663_vm1, %v488_v48  ;;  %6132 = vmatprep.subr.msk.mxu0 %vm361_vm0, %v5666_v10 }
 0x213   : > { %6138 = vmatpush3.xpose.msk.msra.mxu1 %vm361_vm0, %v5671_v46  ;;  %6139 = vmatprep.mubr.msk.f32.mxu1 %vm361_vm0, %v6680_v29 }
 0x216   : > { %6140 = vmatmul.mubr.msk.f32.vlgmr.msra.gmra.mxu1 %vm361_vm0, %v6686_v32 }
 0x2d2   : > { %v6124_v50 = vpop.f32.mrf.mxu1 }
 0x2d3   : > { %v752_v51 = vmul.f32 0.35355338, %v6124_v50 }
 0x2d4   : > { %v742_v53 = vpop.f32.mrf.mxu1 }
 0x2d5   : > { %v751_v55 = vmul.f32 0.35355338, %v742_v53  ;;  %v754_v56 = vadd.f32 %v752_v51, %v6729_v49 }
 0x2d6   : > { %v6141_v57 = vpop.f32.mrf.mxu1 }
 0x2d7   : > { %v1027_v58 = vadd.f32 %v6141_v57, %v5673_v54  ;;  %v759_v59 = vsel %vm755_vm2, %v754_v56, -inf  ;;  %v753_v60 = vadd.f32 %v751_v55, %v6732_v52 }
 0x2d8   : > { %760 = vmax.xlane.f32.xlu1 %v759_v59  ;;  %v1021_v61 = vpop.f32.mrf.mxu1 }
 0x2d9   : > { %v1022_v62 = vadd.f32 %v5673_v54, %v1021_v61  ;;  %6147 = vmatprep.subr.msk.mxu1 %vm663_vm1, %v1027_v58  ;;  %v756_v63 = vsel %vm755_vm2, %v753_v60, -inf }
 0x2da   : > { %6148 = vmatpush3.xpose.msk.msra.mxu1 %vm663_vm1, %v1027_v58  ;;  %757 = vmax.xlane.f32.xlu0 %v756_v63 }
 0x2db   : > { %6149 = vmatprep.subr.msk.mxu1 %vm663_vm1, %v1022_v62 }
 0x2de   : > { %6150 = vmatpush3.xpose.msk.msra.mxu1 %vm663_vm1, %v1022_v62 }
 0x2df   : > { %6166 = vmatprep.subr.mxu1 %v859_v18 }
 0x361   : > { %v761_v0 = vpop.xlane.xlu1 %760 }
 0x362   : > { %v763_v1 = vsub.f32 %v754_v56, %v761_v0 }
 0x363   : > { %v758_v2 = vpop.xlane.xlu0 %757 }
 0x364   : > { %v766_v3 = vmul.f32 1.442695, %v763_v1  ;;  %v762_v4 = vsub.f32 %v753_v60, %v758_v2 }
 0x366   : > { %6485 = vpow2.f32 %v766_v3  ;;  %v764_v5 = vmul.f32 1.442695, %v762_v4  ;;  %v5689_v3 = vld [vmem:[%s7374_s5 + $0x8] sm:$0xff]  ;;  %v5694_v4 = vld [vmem:[%s7372_s3 + $0x10] sm:$0xff] }
 0x368   : > { %6487 = vpow2.f32 %v764_v5 }
 0x373   : > { %v6486_v6 = vpop.eup %6485 }
 0x374   : > { %v771_v7 = vsel %vm755_vm2, %v6486_v6, 0.0 }
 0x375   : > { %v6488_v8 = vpop.eup %6487  ;;  %772 = vadd.xlane.f32.xlu1 %v771_v7  ;;  %v5705_v7 = vld [vmem:[%s7372_s3 + $0x50] sm:$0xff] }
 0x376   : > { %v768_v9 = vsel %vm755_vm2, %v6488_v8, 0.0 }
 0x377   : > { %769 = vadd.xlane.f32.xlu0 %v768_v9 }
 0x3fe   : > { %v773_v11 = vpop.xlane.xlu1 %772 }
 0x3ff   : > { %6489 = vrcp.f32 %v773_v11 }
 0x400   : > { %v770_v12 = vpop.xlane.xlu0 %769 }
 0x401   : > { %6491 = vrcp.f32 %v770_v12  ;;  %v5695_v12 = vld [vmem:[%s7373_s4 + $0x2] ss:$0 sm:$0xff] }
 0x40c   : > { %v6490_v13 = vpop.eup %6489 }
 0x40d   : > { %v777_v16 = vmul.f32 %v6490_v13, %v6486_v6 }
 0x40e   : > { %v6492_v14 = vpop.eup %6491 }
 0x40f   : > { %v776_v15 = vmul.f32 %v6492_v14, %v6488_v8  ;;  %v5720_v8 = vld [vmem:[%s7372_s3 + $0x18] sm:$0xff]  ;;  %v5707_v14 = vld [vmem:[%s7373_s4 + $0xa] ss:$0 sm:$0xff] }
 0x411   : > { %6129 = vmatprep.mubr.msk.f32.mxu0 %vm755_vm2, %v776_v15 }
 0x412   : > { %6130 = vmatmul.mubr.msk.f32.vlgmr.msra.gmra.mxu0 %vm755_vm2, %v777_v16 }
 0x413   : > { %6133 = vmatpush3.xpose.msk.msra.mxu0 %vm361_vm0, %v5666_v10  ;;  %6134 = vmatprep.mubr.msk.f32.mxu0 %vm361_vm0, %v6680_v29 }
 0x414   : > { %6142 = vmatprep.subr.msk.mxu0 %vm361_vm0, %v5677_v17 }
 0x416   : > { %6135 = vmatmul.mubr.msk.f32.vlgmr.msra.gmra.mxu0 %vm361_vm0, %v6686_v32 }
 0x417   : > { %6143 = vmatpush3.xpose.msk.msra.mxu0 %vm361_vm0, %v5677_v17  ;;  %6144 = vmatprep.mubr.msk.f32.mxu0 %vm361_vm0, %v6680_v29 }
 0x41a   : > { %6145 = vmatmul.mubr.msk.f32.vlgmr.msra.gmra.mxu0 %vm361_vm0, %v6686_v32 }
 0x4d2   : > { %v6131_v19 = vpop.f32.mrf.mxu0 }
 0x4d4   : > { %v850_v20 = vpop.f32.mrf.mxu0 }
 0x4d6   : > { %v6136_v21 = vpop.f32.mrf.mxu0 }
 0x4d7   : > { %v942_v26 = vadd.f32 %v6136_v21, %v5667_v22 }
 0x4d8   : > { %v936_v23 = vpop.f32.mrf.mxu0 }
 0x4d9   : > { %v937_v25 = vadd.f32 %v5667_v22, %v936_v23 }
 0x4da   : > { %v6146_v27 = vpop.f32.mrf.mxu0 }
 0x4db   : > { %v1112_v28 = vadd.f32 %v6146_v27, %v5679_v24  ;;  %6151 = vmatprep.mubr.msk.f32.mxu1 %vm663_vm1, %v937_v25  ;;  %v5721_v25 = vld [vmem:[%s7373_s4 + $0x3] ss:$0 sm:$0xff] }
 0x4dc   : > { %v1106_v30 = vpop.f32.mrf.mxu0  ;;  %6152 = vmatmul.mubr.msk.f32.vlgmr.msra.gmra.mxu1 %vm663_vm1, %v942_v26 }
 0x4dd   : > { %v1107_v33 = vadd.f32 %v5679_v24, %v1106_v30  ;;  %6154 = vmatprep.subr.mxu0 %v1112_v28  ;;  %6168 = vmatprep.mubr.msk.f32.mxu1 %vm663_vm1, %v850_v20  ;;  %v5731_v20 = vld [vmem:[%s7372_s3 + $0x58] sm:$0xff] }
 0x4de   : > { %6155 = vmatpush3.msra.mxu0 %v1112_v28  ;;  %6167 = vmatpush3.msra.mxu1 %v859_v18 }
 0x4df   : > { %6156 = vmatprep.subr.mxu0 %v1107_v33  ;;  %6176 = vmatprep.subr.msk.mxu1 %vm361_vm0, %v5699_v31 }
 0x4e0   : > { %6157 = vmatpush3.msra.mxu0 %v1107_v33  ;;  %6169 = vmatmul.mubr.msk.f32.vlgmr.msra.gmra.mxu1 %vm663_vm1, %v6131_v19 }
 0x4e1   : > { %6177 = vmatpush3.xpose.msk.msra.mxu1 %vm361_vm0, %v5699_v31  ;;  %6178 = vmatprep.mubr.msk.f32.mxu1 %vm361_vm0, %v6680_v29 }
 0x4e2   : > { %6161 = vmatprep.subr.mxu0 %v5689_v3 }
 0x4e4   : > { %6179 = vmatmul.mubr.msk.f32.vlgmr.msra.gmra.mxu1 %vm361_vm0, %v6686_v32 }
 0x59c   : > { %v6153_v34 = vpop.f32.mrf.mxu1 }
 0x59d   : > { %v1203_v35 = vmul.f32 0.35355338, %v6153_v34 }
 0x59e   : > { %v1193_v36 = vpop.f32.mrf.mxu1 }
 0x59f   : > { %v1202_v37 = vmul.f32 0.35355338, %v1193_v36  ;;  %v1205_v38 = vadd.f32 %v1203_v35, %v6729_v49  ;;  %v5733_v35 = vld [vmem:[%s7373_s4 + $0xb] ss:$0 sm:$0xff] }
 0x5a0   : > { %v6790_v39 = vpop.f32.mrf.mxu1 }
 0x5a1   : > { %v1209_v40 = vsel %vm755_vm2, %v1205_v38, -inf  ;;  %v1204_v41 = vadd.f32 %v1202_v37, %v6732_v52 }
 0x5a2   : > { %1210 = vmax.xlane.f32.xlu1 %v1209_v40  ;;  %v6794_v42 = vpop.f32.mrf.mxu1 }
 0x5a3   : > { %v1206_v44 = vsel %vm755_vm2, %v1204_v41, -inf }
 0x5a4   : > { %v6180_v45 = vpop.f32.mrf.mxu1  ;;  %1207 = vmax.xlane.f32.xlu0 %v1206_v44 }
 0x5a5   : > { %v1640_v46 = vadd.f32 %v6180_v45, %v5701_v43 }
 0x5a6   : > { %v1634_v47 = vpop.f32.mrf.mxu1 }
 0x5a7   : > { %v1635_v48 = vadd.f32 %v5701_v43, %v1634_v47  ;;  %6186 = vmatprep.subr.msk.mxu1 %vm663_vm1, %v1640_v46 }
 0x5a8   : > { %6187 = vmatpush3.xpose.msk.msra.mxu1 %vm663_vm1, %v1640_v46 }
 0x5a9   : > { %6188 = vmatprep.subr.msk.mxu1 %vm663_vm1, %v1635_v48 }
 0x5ac   : > { %6189 = vmatpush3.xpose.msk.msra.mxu1 %vm663_vm1, %v1635_v48 }
 0x5ad   : > { %6205 = vmatprep.subr.msk.mxu1 %vm361_vm0, %v5720_v8 }
 0x62b   : > { %v1211_v50 = vpop.xlane.xlu1 %1210 }
 0x62c   : > { %v1213_v51 = vsub.f32 %v1205_v38, %v1211_v50 }
 0x62d   : > { %v1208_v53 = vpop.xlane.xlu0 %1207 }
 0x62e   : > { %v1216_v54 = vmul.f32 1.442695, %v1213_v51  ;;  %v1212_v55 = vsub.f32 %v1204_v41, %v1208_v53 }
 0x630   : > { %6493 = vpow2.f32 %v1216_v54  ;;  %v1214_v56 = vmul.f32 1.442695, %v1212_v55 }
 0x632   : > { %6495 = vpow2.f32 %v1214_v56 }
 0x63d   : > { %v6494_v57 = vpop.eup %6493 }
 0x63e   : > { %v1221_v58 = vsel %vm755_vm2, %v6494_v57, 0.0 }
 0x63f   : > { %v6496_v59 = vpop.eup %6495  ;;  %1222 = vadd.xlane.f32.xlu1 %v1221_v58 }
 0x640   : > { %v1218_v60 = vsel %vm755_vm2, %v6496_v59, 0.0 }
 0x641   : > { %1219 = vadd.xlane.f32.xlu0 %v1218_v60 }
 0x6c8   : > { %v1223_v61 = vpop.xlane.xlu1 %1222 }
 0x6c9   : > { %6497 = vrcp.f32 %v1223_v61  ;;  %v5717_v61 = vld [vmem:[%s7374_s5 + $0x10] sm:$0xff] }
 0x6ca   : > { %v1220_v62 = vpop.xlane.xlu0 %1219 }
 0x6cb   : > { %6499 = vrcp.f32 %v1220_v62  ;;  %v5725_v62 = vld [vmem:[%s7372_s3 + $0x38] sm:$0xff] }
 0x6d6   : > { %v6498_v63 = vpop.eup %6497 }
 0x6d7   : > { %v1227_v2 = vmul.f32 %v6498_v63, %v6494_v57 }
 0x6d8   : > { %v6500_v0 = vpop.eup %6499 }
 0x6d9   : > { %v1226_v1 = vmul.f32 %v6500_v0, %v6496_v59 }
 0x6db   : > { %6158 = vmatprep.mubr.msk.f32.mxu0 %vm755_vm2, %v1226_v1 }
 0x6dc   : > { %6159 = vmatmul.mubr.msk.f32.vlgmr.msra.gmra.mxu0 %vm755_vm2, %v1227_v2 }
 0x6dd   : > { %6162 = vmatpush3.msra.mxu0 %v5689_v3 }
 0x6de   : > { %6171 = vmatprep.subr.msk.mxu0 %vm361_vm0, %v5694_v4 }
 0x79c   : > { %v6160_v5 = vpop.f32.mrf.mxu0 }
 0x79e   : > { %v1300_v6 = vpop.f32.mrf.mxu0 }
 0x79f   : > { %6163 = vmatprep.mubr.msk.f32.mxu0 %vm663_vm1, %v1300_v6 }
 0x7a0   : > { %6164 = vmatmul.mubr.msk.f32.vlgmr.msra.gmra.mxu0 %vm663_vm1, %v6160_v5 }
 0x7a1   : > { %6172 = vmatpush3.xpose.msk.msra.mxu0 %vm361_vm0, %v5694_v4  ;;  %6173 = vmatprep.mubr.msk.f32.mxu0 %vm361_vm0, %v6680_v29 }
 0x7a2   : > { %6181 = vmatprep.subr.msk.mxu0 %vm361_vm0, %v5705_v7 }
 0x7a4   : > { %6174 = vmatmul.mubr.msk.f32.vlgmr.msra.gmra.mxu0 %vm361_vm0, %v6686_v32 }
 0x7a5   : > { %6182 = vmatpush3.xpose.msk.msra.mxu0 %vm361_vm0, %v5705_v7  ;;  %6183 = vmatprep.mubr.msk.f32.mxu0 %vm361_vm0, %v6680_v29  ;;  %v5727_v7 = vld [vmem:[%s7373_s4 + $0x7] ss:$0 sm:$0xff] }
 0x7a8   : > { %6184 = vmatmul.mubr.msk.f32.vlgmr.msra.gmra.mxu0 %vm361_vm0, %v6686_v32 }
 0x860   : > { %v6835_v9 = vpop.f32.mrf.mxu0 }
 0x861   : > { %v1470_v2 = vadd.f32 %v6790_v39, %v6835_v9 }
 0x862   : > { %v6837_v10 = vpop.f32.mrf.mxu0 }
 0x863   : > { %v1465_v4 = vadd.f32 %v6794_v42, %v6837_v10 }
 0x864   : > { %v6175_v11 = vpop.f32.mrf.mxu0 }
 0x865   : > { %v1555_v16 = vadd.f32 %v6175_v11, %v5695_v12 }
 0x866   : > { %v1549_v13 = vpop.f32.mrf.mxu0 }
 0x867   : > { %v1550_v15 = vadd.f32 %v5695_v12, %v1549_v13 }
 0x868   : > { %v6185_v17 = vpop.f32.mrf.mxu0 }
 0x869   : > { %v1725_v18 = vadd.f32 %v6185_v17, %v5707_v14  ;;  %6190 = vmatprep.mubr.msk.f32.mxu1 %vm663_vm1, %v1550_v15 }
 0x86a   : > { %v1719_v19 = vpop.f32.mrf.mxu0  ;;  %6191 = vmatmul.mubr.msk.f32.vlgmr.msra.gmra.mxu1 %vm663_vm1, %v1555_v16 }
 0x86b   : > { %v1720_v21 = vadd.f32 %v5707_v14, %v1719_v19  ;;  %6193 = vmatprep.subr.mxu0 %v1725_v18  ;;  %6206 = vmatpush3.xpose.msk.msra.mxu1 %vm361_vm0, %v5720_v8 }
 0x86c   : > { %6207 = vmatprep.mubr.msk.f32.mxu1 %vm361_vm0, %v6680_v29  ;;  %6194 = vmatpush3.msra.mxu0 %v1725_v18 }
 0x86d   : > { %6195 = vmatprep.subr.mxu0 %v1720_v21  ;;  %6215 = vmatprep.subr.msk.mxu1 %vm361_vm0, %v5731_v20 }
 0x86e   : > { %6196 = vmatpush3.msra.mxu0 %v1720_v21  ;;  %6208 = vmatmul.mubr.msk.f32.vlgmr.msra.gmra.mxu1 %vm361_vm0, %v6686_v32 }
 0x86f   : > { %6216 = vmatpush3.xpose.msk.msra.mxu1 %vm361_vm0, %v5731_v20  ;;  %6217 = vmatprep.mubr.msk.f32.mxu1 %vm361_vm0, %v6680_v29 }
 0x870   : > { %6200 = vmatprep.subr.mxu0 %v5717_v61 }
 0x872   : > { %6218 = vmatmul.mubr.msk.f32.vlgmr.msra.gmra.mxu1 %vm361_vm0, %v6686_v32 }
 0x92a   : > { %v6192_v22 = vpop.f32.mrf.mxu1 }
 0x92b   : > { %v1816_v23 = vmul.f32 0.35355338, %v6192_v22 }
 0x92c   : > { %v1806_v24 = vpop.f32.mrf.mxu1 }
 0x92d   : > { %v1815_v26 = vmul.f32 0.35355338, %v1806_v24  ;;  %v1818_v27 = vadd.f32 %v1816_v23, %v6729_v49 }
 0x92e   : > { %v6209_v28 = vpop.f32.mrf.mxu1 }
 0x92f   : > { %v6865_v30 = vadd.f32 %v6209_v28, %v5721_v25  ;;  %v1822_v31 = vsel %vm755_vm2, %v1818_v27, -inf  ;;  %v1817_v33 = vadd.f32 %v1815_v26, %v6732_v52 }
 0x930   : > { %1823 = vmax.xlane.f32.xlu1 %v1822_v31  ;;  %v2083_v34 = vpop.f32.mrf.mxu1 }
 0x931   : > { %v1819_v36 = vsel %vm755_vm2, %v1817_v33, -inf  ;;  %v2084_v1 = vadd.f32 %v5721_v25, %v2083_v34 }
 0x932   : > { %v6219_v37 = vpop.f32.mrf.mxu1  ;;  %1820 = vmax.xlane.f32.xlu0 %v1819_v36 }
 0x933   : > { %v2259_v38 = vadd.f32 %v6219_v37, %v5733_v35  ;;  %v5743_v37 = vld [vmem:[%s7374_s5 + $0x18] sm:$0xff] }
 0x934   : > { %v2253_v40 = vpop.f32.mrf.mxu1 }
 0x935   : > { %v2254_v41 = vadd.f32 %v5733_v35, %v2253_v40  ;;  %6227 = vmatprep.subr.mxu1 %v2259_v38 }
 0x936   : > { %6228 = vmatpush3.msra.mxu1 %v2259_v38 }
 0x937   : > { %6229 = vmatprep.subr.mxu1 %v2254_v41 }
 0x938   : > { %6230 = vmatpush3.msra.mxu1 %v2254_v41 }
 0x939   : > { %6234 = vmatprep.subr.mxu1 %v5743_v37 }
 0x9b9   : > { %v1824_v43 = vpop.xlane.xlu1 %1823 }
 0x9ba   : > { %v1826_v44 = vsub.f32 %v1818_v27, %v1824_v43  ;;  %v5746_v43 = vld [vmem:[%s7376_s7 + $0x4] ss:$0 sm:$0xff] }
 0x9bb   : > { %v1821_v45 = vpop.xlane.xlu0 %1820 }
 0x9bc   : > { %v1829_v46 = vmul.f32 1.442695, %v1826_v44  ;;  %v1825_v47 = vsub.f32 %v1817_v33, %v1821_v45 }
 0x9be   : > { %6501 = vpow2.f32 %v1829_v46  ;;  %v1827_v48 = vmul.f32 1.442695, %v1825_v47 }
 0x9c0   : > { %6503 = vpow2.f32 %v1827_v48 }
 0x9cb   : > { %v6502_v50 = vpop.eup %6501 }
 0x9cc   : > { %v1834_v51 = vsel %vm755_vm2, %v6502_v50, 0.0 }
 0x9cd   : > { %v6504_v53 = vpop.eup %6503  ;;  %1835 = vadd.xlane.f32.xlu1 %v1834_v51 }
 0x9ce   : > { %v1831_v54 = vsel %vm755_vm2, %v6504_v53, 0.0 }
 0x9cf   : > { %1832 = vadd.xlane.f32.xlu0 %v1831_v54 }
 0xa56   : > { %v1836_v55 = vpop.xlane.xlu1 %1835 }
 0xa57   : > { %6505 = vrcp.f32 %v1836_v55 }
 0xa58   : > { %v1833_v56 = vpop.xlane.xlu0 %1832 }
 0xa59   : > { %6507 = vrcp.f32 %v1833_v56 }
 0xa64   : > { %v6506_v57 = vpop.eup %6505 }
 0xa65   : > { %v1840_v60 = vmul.f32 %v6506_v57, %v6502_v50 }
 0xa66   : > { %v6508_v58 = vpop.eup %6507 }
 0xa67   : > { %v1839_v59 = vmul.f32 %v6508_v58, %v6504_v53 }
 0xa69   : > { %6197 = vmatprep.mubr.msk.f32.mxu0 %vm755_vm2, %v1839_v59 }
 0xa6a   : > { %6198 = vmatmul.mubr.msk.f32.vlgmr.msra.gmra.mxu0 %vm755_vm2, %v1840_v60 }
 0xa6b   : > { %6201 = vmatpush3.msra.mxu0 %v5717_v61 }
 0xa6c   : > { %6210 = vmatprep.subr.msk.mxu0 %vm361_vm0, %v5725_v62 }
 0xb2a   : > { %v6199_v63 = vpop.f32.mrf.mxu0 }
 0xb2c   : > { %v1913_v0 = vpop.f32.mrf.mxu0 }
 0xb2d   : > { %6202 = vmatprep.mubr.msk.f32.mxu0 %vm663_vm1, %v1913_v0 }
 0xb2e   : > { %6203 = vmatmul.mubr.msk.f32.vlgmr.msra.gmra.mxu0 %vm663_vm1, %v6199_v63 }
 0xb2f   : > { %6211 = vmatpush3.xpose.msk.msra.mxu0 %vm361_vm0, %v5725_v62  ;;  %6212 = vmatprep.mubr.msk.f32.mxu0 %vm361_vm0, %v6680_v29 }
 0xb32   : > { %6213 = vmatmul.mubr.msk.f32.vlgmr.msra.gmra.mxu0 %vm361_vm0, %v6686_v32 }
 0xb33   : > { %6224 = vmatprep.mubr.msk.f32.mxu0 %vm663_vm1, %v2084_v1  ;;  %v2593_v1 = vld [vmem:[%s7375_s6 + $0x18] sm:$0xff] }
 0xbee   : > { %v6204_v3 = vpop.f32.mrf.mxu0 }
 0xbef   : > { %v2006_v5 = vadd.f32 %v6204_v3, %v1470_v2  ;;  %v2592_v2 = vld [vmem:[%s7375_s6 + $0x10] sm:$0xff]  ;;  %v2591_v3 = vld [vmem:[%s7375_s6 + $0x8] sm:$0xff] }
 0xbf0   : > { %v1996_v6 = vpop.f32.mrf.mxu0 }
 0xbf1   : > { %v2005_v8 = vadd.f32 %v1996_v6, %v1465_v4  ;;  %v2590_v4 = vld [vmem:[%s7375_s6] sm:$0xff] }
 0xbf2   : > { %v6214_v11 = vpop.f32.mrf.mxu0 }
 0xbf3   : > { %v2174_v12 = vadd.f32 %v6214_v11, %v5727_v7 }
 0xbf4   : > { %v2168_v13 = vpop.f32.mrf.mxu0 }
 0xbf5   : > { %v2169_v14 = vadd.f32 %v5727_v7, %v2168_v13  ;;  %6220 = vmatprep.subr.msk.mxu0 %vm663_vm1, %v2174_v12 }
 0xbf6   : > { %6221 = vmatpush3.xpose.msk.msra.mxu0 %vm663_vm1, %v2174_v12 }
 0xbf7   : > { %6222 = vmatprep.subr.msk.mxu0 %vm663_vm1, %v2169_v14 }
 0xbfa   : > { %6223 = vmatpush3.xpose.msk.msra.mxu0 %vm663_vm1, %v2169_v14  ;;  %v5747_v14 = vld [vmem:[%s7376_s7] ss:$0 sm:$0xff] }
 0xbfb   : > { %6239 = vmatprep.subr.mxu0 %v2593_v1 }
 0xbfd   : > { %6225 = vmatmul.mubr.msk.f32.vlgmr.msra.gmra.mxu0 %vm663_vm1, %v6865_v30 }
 0xbfe   : > { %6240 = vmatpush3.msra.mxu0 %v2593_v1 }
 0xbff   : > { %6241 = vmatprep.subr.mxu0 %v2592_v2 }
 0xc00   : > { %6242 = vmatpush3.msra.mxu0 %v2592_v2 }
 0xc01   : > { %6243 = vmatprep.subr.mxu0 %v2591_v3 }
 0xc02   : > { %6244 = vmatpush3.msra.mxu0 %v2591_v3  ;;  %v5757_v3 = vld [vmem:[%s7372_s3 + $0x60] sm:$0xff] }
 0xc03   : > { %6245 = vmatprep.subr.mxu0 %v2590_v4 }
 0xc04   : > { %6246 = vmatpush3.msra.mxu0 %v2590_v4  ;;  %v5763_v4 = vld [vmem:[%s7372_s3 + $0x80] sm:$0xff] }
 0xc05   : > { %6269 = vmatprep.subr.msk.mxu0 %vm361_vm0, %v5757_v3 }
 0xcbd   : > { %v6226_v39 = vpop.f32.mrf.mxu0 }
 0xcbe   : > { %v2350_v42 = vmul.f32 0.35355338, %v6226_v39 }
 0xcbf   : > { %v2340_v9 = vpop.f32.mrf.mxu0 }
 0xcc0   : > { %v2349_v10 = vmul.f32 0.35355338, %v2340_v9  ;;  %v2352_v15 = vadd.f32 %v2350_v42, %v6729_v49 }
 0xcc2   : > { %v2356_v16 = vsel %vm755_vm2, %v2352_v15, -inf  ;;  %v2351_v17 = vadd.f32 %v2349_v10, %v6732_v52 }
 0xcc3   : > { %2357 = vmax.xlane.f32.xlu1 %v2356_v16 }
 0xcc4   : > { %v2353_v18 = vsel %vm755_vm2, %v2351_v17, -inf }
 0xcc5   : > { %2354 = vmax.xlane.f32.xlu0 %v2353_v18 }
 0xd4c   : > { %v2358_v19 = vpop.xlane.xlu1 %2357 }
 0xd4d   : > { %v2360_v20 = vsub.f32 %v2352_v15, %v2358_v19  ;;  %v5748_v15 = vld [vmem:[%s7376_s7 + $0x1] ss:$0 sm:$0xff]  ;;  %v2697_v19 = vld [vmem:[%s7375_s6 + $0x58] sm:$0xff] }
 0xd4e   : > { %v2355_v21 = vpop.xlane.xlu0 %2354 }
 0xd4f   : > { %v2363_v22 = vmul.f32 1.442695, %v2360_v20  ;;  %v2359_v23 = vsub.f32 %v2351_v17, %v2355_v21  ;;  %v2696_v20 = vld [vmem:[%s7375_s6 + $0x50] sm:$0xff]  ;;  %v2695_v21 = vld [vmem:[%s7375_s6 + $0x48] sm:$0xff] }
 0xd51   : > { %6509 = vpow2.f32 %v2363_v22  ;;  %v2361_v24 = vmul.f32 1.442695, %v2359_v23  ;;  %v2694_v22 = vld [vmem:[%s7375_s6 + $0x40] sm:$0xff]  ;;  %v2693_v23 = vld [vmem:[%s7375_s6 + $0x38] sm:$0xff] }
 0xd53   : > { %6511 = vpow2.f32 %v2361_v24  ;;  %v2692_v24 = vld [vmem:[%s7375_s6 + $0x30] sm:$0xff] }
 0xd5e   : > { %v6510_v25 = vpop.eup %6509 }
 0xd5f   : > { %v2368_v26 = vsel %vm755_vm2, %v6510_v25, 0.0 }
 0xd60   : > { %v6512_v27 = vpop.eup %6511  ;;  %2369 = vadd.xlane.f32.xlu1 %v2368_v26  ;;  %v2690_v26 = vld [vmem:[%s7375_s6 + $0x20] sm:$0xff] }
 0xd61   : > { %v2365_v28 = vsel %vm755_vm2, %v6512_v27, 0.0 }
 0xd62   : > { %2366 = vadd.xlane.f32.xlu0 %v2365_v28 }
 0xde9   : > { %v2370_v30 = vpop.xlane.xlu1 %2369 }
 0xdea   : > { %6513 = vrcp.f32 %v2370_v30 }
 0xdeb   : > { %v2367_v31 = vpop.xlane.xlu0 %2366 }
 0xdec   : > { %6515 = vrcp.f32 %v2367_v31 }
 0xdf7   : > { %v6514_v33 = vpop.eup %6513 }
 0xdf8   : > { %v2374_v36 = vmul.f32 %v6514_v33, %v6510_v25  ;;  %v2691_v25 = vld [vmem:[%s7375_s6 + $0x28] sm:$0xff] }
 0xdf9   : > { %v6516_v34 = vpop.eup %6515 }
 0xdfa   : > { %v2373_v35 = vmul.f32 %v6516_v34, %v6512_v27  ;;  %v5749_v27 = vld [vmem:[%s7376_s7 + $0x5] ss:$0 sm:$0xff] }
 0xdfc   : > { %6231 = vmatprep.mubr.msk.f32.mxu1 %vm755_vm2, %v2373_v35 }
 0xdfd   : > { %6232 = vmatmul.mubr.msk.f32.vlgmr.msra.gmra.mxu1 %vm755_vm2, %v2374_v36 }
 0xdfe   : > { %6235 = vmatpush3.msra.mxu1 %v5743_v37 }
 0xdff   : > { %6250 = vmatprep.subr.mxu1 %v2697_v19 }
 0xebd   : > { %v6233_v38 = vpop.f32.mrf.mxu1 }
 0xebf   : > { %v2447_v40 = vpop.f32.mrf.mxu1 }
 0xec0   : > { %6236 = vmatprep.mubr.msk.f32.mxu1 %vm663_vm1, %v2447_v40 }
 0xec1   : > { %6237 = vmatmul.mubr.msk.f32.vlgmr.msra.gmra.mxu1 %vm663_vm1, %v6233_v38 }
 0xec2   : > { %6251 = vmatpush3.msra.mxu1 %v2697_v19  ;;  %v5769_v19 = vld [vmem:[%s7372_s3 + $0xa0] sm:$0xff] }
 0xec3   : > { %6252 = vmatprep.subr.mxu1 %v2696_v20 }
 0xec4   : > { %6253 = vmatpush3.msra.mxu1 %v2696_v20 }
 0xec5   : > { %6254 = vmatprep.subr.mxu1 %v2695_v21 }
 0xec6   : > { %6255 = vmatpush3.msra.mxu1 %v2695_v21  ;;  %v5759_v21 = vld [vmem:[%s7373_s4 + $0xc] ss:$0 sm:$0xff] }
 0xec7   : > { %6256 = vmatprep.subr.mxu1 %v2694_v22 }
 0xec8   : > { %6257 = vmatpush3.msra.mxu1 %v2694_v22 }
 0xec9   : > { %6258 = vmatprep.subr.mxu1 %v2693_v23 }
 0xeca   : > { %6259 = vmatpush3.msra.mxu1 %v2693_v23  ;;  %v5765_v23 = vld [vmem:[%s7373_s4 + $0x10] ss:$0 sm:$0xff] }
 0xecb   : > { %6260 = vmatprep.subr.mxu1 %v2692_v24 }
 0xecc   : > { %6261 = vmatpush3.msra.mxu1 %v2692_v24 }
 0xecd   : > { %6262 = vmatprep.subr.mxu1 %v2691_v25 }
 0xece   : > { %6263 = vmatpush3.msra.mxu1 %v2691_v25 }
 0xecf   : > { %6264 = vmatprep.subr.mxu1 %v2690_v26 }
 0xed0   : > { %6265 = vmatpush3.msra.mxu1 %v2690_v26 }
 0xf81   : > { %v6238_v41 = vpop.f32.mrf.mxu1 }
 0xf82   : > { %v2540_v44 = vadd.f32 %v6238_v41, %v2006_v5 }
 0xf83   : > { %v2530_v45 = vpop.f32.mrf.mxu1 }
 0xf84   : > { %v2547_v46 = vadd.f32 %v5746_v43, %v2540_v44  ;;  %v2539_v47 = vadd.f32 %v2530_v45, %v2005_v8 }
 0xf86   : > { %v2546_v48 = vadd.f32 %v5746_v43, %v2539_v47  ;;  %v2549_v50 = vadd.f32 %v2547_v46, %v6686_v32  ;;  %v5752_v46 = vld [vmem:[%s7376_s7 + $0x6] ss:$0 sm:$0xff] }
 0xf88   : > { %v2555_v51 = vsel %vm361_vm0, %v2549_v50, 0.0  ;;  %v2548_v53 = vadd.f32 %v2546_v48, %v6680_v29 }
 0xf89   : > { %2556 = vadd.xlane.f32.xlu1 %v2555_v51 }
 0xf8a   : > { %v2552_v54 = vsel %vm361_vm0, %v2548_v53, 0.0 }
 0xf8b   : > { %2553 = vadd.xlane.f32.xlu0 %v2552_v54 }
0x1012   : > { %v2557_v55 = vpop.xlane.xlu1 %2556 }
0x1013   : > { %v2559_v56 = vmul.f32 0.03125, %v2557_v55 }
0x1014   : > { %v2554_v57 = vpop.xlane.xlu0 %2553 }
0x1015   : > { %v2561_v58 = vsub.f32 %v2549_v50, %v2559_v56  ;;  %v2558_v59 = vmul.f32 0.03125, %v2554_v57 }
0x1017   : > { %v2560_v60 = vsub.f32 %v2548_v53, %v2558_v59  ;;  %v2563_v61 = vmul.f32 %v2561_v58, %v2561_v58 }
0x1019   : > { %v2567_v62 = vsel %vm361_vm0, %v2563_v61, 0.0  ;;  %v2562_v63 = vmul.f32 %v2560_v60, %v2560_v60 }
0x101a   : > { %2568 = vadd.xlane.f32.xlu1 %v2567_v62 }
0x101b   : > { %v2564_v0 = vsel %vm361_vm0, %v2562_v63, 0.0 }
0x101c   : > { %2565 = vadd.xlane.f32.xlu0 %v2564_v0 }
0x10a3   : > { %v2569_v5 = vpop.xlane.xlu1 %2568 }
0x10a4   : > { %v2571_v6 = vmul.f32 0.03125, %v2569_v5 }
0x10a5   : > { %v2566_v7 = vpop.xlane.xlu0 %2565 }
0x10a6   : > { %v2573_v8 = vadd.f32 1e-12, %v2571_v6  ;;  %v2570_v11 = vmul.f32 0.03125, %v2566_v7 }
0x10a8   : > { %6517 = vrsqrt.f32 %v2573_v8  ;;  %v2572_v12 = vadd.f32 1e-12, %v2570_v11 }
0x10aa   : > { %6519 = vrsqrt.f32 %v2572_v12 }
0x10b5   : > { %v6518_v13 = vpop.eup %6517 }
0x10b6   : > { %v2577_v39 = vmul.f32 %v6518_v13, %v2561_v58 }
0x10b7   : > { %v6520_v42 = vpop.eup %6519 }
0x10b8   : > { %v2576_v9 = vmul.f32 %v6520_v42, %v2560_v60  ;;  %v2583_v10 = vmul.f32 %v5747_v14, %v2577_v39 }
0x10ba   : > { %v2582_v16 = vmul.f32 %v5747_v14, %v2576_v9  ;;  %v2589_v18 = vadd.f32 %v5748_v15, %v2583_v10  ;;  %v5755_v14 = vld [vmem:[%s7376_s7 + $0x2] ss:$0 sm:$0xff] }
0x10bc   : > { %v2588_v17 = vadd.f32 %v5748_v15, %v2582_v16  ;;  %v5756_v15 = vld [vmem:[%s7376_s7 + $0x3] ss:$0 sm:$0xff] }
0x10be   : > { %6247 = vmatprep.mubr.msk.f32.mxu0 %vm361_vm0, %v2588_v17 }
0x10bf   : > { %6248 = vmatmul.mubr.msk.f32.vlgmr.msra.gmra.mxu0 %vm361_vm0, %v2589_v18 }
0x10c0   : > { %6270 = vmatpush3.xpose.msk.msra.mxu0 %vm361_vm0, %v5757_v3 }
0x10c1   : > { %6274 = vmatprep.subr.msk.mxu0 %vm361_vm0, %v5763_v4 }
0x117f   : > { %v6249_v28 = vpop.f32.mrf.mxu0 }
0x1180   : > { %v2677_v30 = vadd.f32 %v6249_v28, %v5749_v27  ;;  %v5771_v28 = vld [vmem:[%s7373_s4 + $0x14] ss:$0 sm:$0xff] }
0x1181   : > { %v2671_v31 = vpop.f32.mrf.mxu0 }
0x1182   : > { %v2683_v33 = vmul.f32 0.70710677, %v2677_v30  ;;  %v2672_v34 = vadd.f32 %v5749_v27, %v2671_v31  ;;  %v2681_v43 = vmul.f32 0.5, %v2677_v30 }
0x1184   : > { %6521 = verf.f32 %v2683_v33  ;;  %v2682_v35 = vmul.f32 0.70710677, %v2672_v34  ;;  %v2680_v40 = vmul.f32 0.5, %v2672_v34 }
0x1186   : > { %6523 = verf.f32 %v2682_v35  ;;  %v5788_v35 = vld [vmem:[%s7372_s3 + $0x88] sm:$0xff] }
0x1191   : > { %v6522_v36 = vpop.eup %6521 }
0x1192   : > { %v2687_v38 = vadd.f32 1.0, %v6522_v36 }
0x1193   : > { %v6524_v37 = vpop.eup %6523 }
0x1194   : > { %v2686_v41 = vadd.f32 1.0, %v6524_v37  ;;  %v2689_v45 = vmul.f32 %v2687_v38, %v2681_v43  ;;  %v5790_v43 = vld [vmem:[%s7373_s4 + $0x11] ss:$0 sm:$0xff] }
0x1196   : > { %v2688_v44 = vmul.f32 %v2686_v41, %v2680_v40 }
0x1198   : > { %6266 = vmatprep.mubr.msk.f32.mxu1 %vm2703_vm3, %v2688_v44 }
0x1199   : > { %6267 = vmatmul.mubr.msk.f32.vlgmr.msra.gmra.mxu1 %vm2703_vm3, %v2689_v45 }
0x1259   : > { %v6268_v47 = vpop.f32.mrf.mxu1 }
0x125a   : > { %v2782_v48 = vadd.f32 %v6268_v47, %v5752_v46 }
0x125b   : > { %v2776_v50 = vpop.f32.mrf.mxu1 }
0x125c   : > { %v2777_v51 = vadd.f32 %v5752_v46, %v2776_v50  ;;  %v2786_v53 = vadd.f32 %v2782_v48, %v2589_v18 }
0x125e   : > { %v2792_v54 = vsel %vm361_vm0, %v2786_v53, 0.0  ;;  %v2785_v55 = vadd.f32 %v2777_v51, %v2588_v17 }
0x125f   : > { %2793 = vadd.xlane.f32.xlu1 %v2792_v54 }
0x1260   : > { %v2789_v56 = vsel %vm361_vm0, %v2785_v55, 0.0 }
0x1261   : > { %2790 = vadd.xlane.f32.xlu0 %v2789_v56 }
0x12e8   : > { %v2794_v57 = vpop.xlane.xlu1 %2793 }
0x12e9   : > { %v2796_v58 = vmul.f32 0.03125, %v2794_v57 }
0x12ea   : > { %v2791_v59 = vpop.xlane.xlu0 %2790 }
0x12eb   : > { %v2798_v60 = vsub.f32 %v2786_v53, %v2796_v58  ;;  %v2795_v61 = vmul.f32 0.03125, %v2791_v59 }
0x12ed   : > { %v2797_v62 = vsub.f32 %v2785_v55, %v2795_v61  ;;  %v2800_v63 = vmul.f32 %v2798_v60, %v2798_v60 }
0x12ef   : > { %v2804_v0 = vsel %vm361_vm0, %v2800_v63, 0.0  ;;  %v2799_v1 = vmul.f32 %v2797_v62, %v2797_v62  ;;  %v5782_v63 = vld [vmem:[%s7372_s3 + $0x68] sm:$0xff] }
0x12f0   : > { %2805 = vadd.xlane.f32.xlu1 %v2804_v0 }
0x12f1   : > { %v2801_v2 = vsel %vm361_vm0, %v2799_v1, 0.0 }
0x12f2   : > { %2802 = vadd.xlane.f32.xlu0 %v2801_v2 }
0x1379   : > { %v2806_v5 = vpop.xlane.xlu1 %2805 }
0x137a   : > { %v2808_v6 = vmul.f32 0.03125, %v2806_v5 }
0x137b   : > { %v2803_v7 = vpop.xlane.xlu0 %2802 }
0x137c   : > { %v2810_v8 = vadd.f32 1e-12, %v2808_v6  ;;  %v2807_v11 = vmul.f32 0.03125, %v2803_v7  ;;  %v5794_v6 = vld [vmem:[%s7372_s3 + $0xa8] sm:$0xff]  ;;  %v5781_v7 = vld [vmem:[%s7374_s5 + $0x20] sm:$0xff] }
0x137e   : > { %6525 = vrsqrt.f32 %v2810_v8  ;;  %v2809_v12 = vadd.f32 1e-12, %v2807_v11 }
0x1380   : > { %6527 = vrsqrt.f32 %v2809_v12 }
0x138b   : > { %v6526_v13 = vpop.eup %6525 }
0x138c   : > { %v2814_v39 = vmul.f32 %v6526_v13, %v2798_v60  ;;  %v5784_v13 = vld [vmem:[%s7373_s4 + $0xd] ss:$0 sm:$0xff] }
0x138d   : > { %v6528_v42 = vpop.eup %6527 }
0x138e   : > { %v2813_v9 = vmul.f32 %v6528_v42, %v2797_v62  ;;  %v2820_v10 = vmul.f32 %v5755_v14, %v2814_v39  ;;  %v5796_v39 = vld [vmem:[%s7373_s4 + $0x15] ss:$0 sm:$0xff] }
0x1390   : > { %v2819_v16 = vmul.f32 %v5755_v14, %v2813_v9  ;;  %v7000_v18 = vadd.f32 %v5756_v15, %v2820_v10 }
0x1392   : > { %v6998_v17 = vadd.f32 %v5756_v15, %v2819_v16 }
0x1394   : > { %6271 = vmatprep.mubr.msk.f32.mxu0 %vm361_vm0, %v6998_v17 }
0x1395   : > { %6272 = vmatmul.mubr.msk.f32.vlgmr.msra.gmra.mxu0 %vm361_vm0, %v7000_v18 }
0x1396   : > { %6275 = vmatpush3.xpose.msk.msra.mxu0 %vm361_vm0, %v5763_v4  ;;  %6276 = vmatprep.mubr.msk.f32.mxu0 %vm361_vm0, %v6998_v17 }
0x1397   : > { %6279 = vmatprep.subr.msk.mxu0 %vm361_vm0, %v5769_v19 }
0x1399   : > { %6277 = vmatmul.mubr.msk.f32.vlgmr.msra.gmra.mxu0 %vm361_vm0, %v7000_v18 }
0x139a   : > { %6280 = vmatpush3.xpose.msk.msra.mxu0 %vm361_vm0, %v5769_v19  ;;  %6281 = vmatprep.mubr.msk.f32.mxu0 %vm361_vm0, %v6998_v17  ;;  %v5817_v19 = vld [vmem:[%s7372_s3 + $0x90] sm:$0xff] }
0x139d   : > { %6282 = vmatmul.mubr.msk.f32.vlgmr.msra.gmra.mxu0 %vm361_vm0, %v7000_v18 }
0x1455   : > { %v6273_v20 = vpop.f32.mrf.mxu0 }
0x1456   : > { %v2916_v37 = vadd.f32 %v6273_v20, %v5759_v21 }
0x1457   : > { %v2910_v22 = vpop.f32.mrf.mxu0 }
0x1458   : > { %v2911_v24 = vadd.f32 %v5759_v21, %v2910_v22 }
0x1459   : > { %v6278_v25 = vpop.f32.mrf.mxu0 }
0x145a   : > { %v3002_v26 = vadd.f32 %v6278_v25, %v5765_v23  ;;  %6288 = vmatprep.mubr.msk.f32.mxu1 %vm663_vm1, %v2911_v24  ;;  %v7100_v25 = vld [vmem:[%s6726_s19 + $0x8] sm:$0xff] }
0x145b   : > { %v2996_v27 = vpop.f32.mrf.mxu0 }
0x145c   : > { %v2997_v30 = vadd.f32 %v5765_v23, %v2996_v27  ;;  %6284 = vmatprep.subr.msk.mxu1 %vm663_vm1, %v3002_v26 }
0x145d   : > { %v6283_v31 = vpop.f32.mrf.mxu0  ;;  %6285 = vmatpush3.xpose.msk.msra.mxu1 %vm663_vm1, %v3002_v26 }
0x145e   : > { %v3088_v33 = vadd.f32 %v6283_v31, %v5771_v28  ;;  %6286 = vmatprep.subr.msk.mxu1 %vm663_vm1, %v2997_v30 }
0x145f   : > { %v3082_v34 = vpop.f32.mrf.mxu0 }
0x1460   : > { %v3083_v36 = vadd.f32 %v5771_v28, %v3082_v34  ;;  %6291 = vmatprep.subr.mxu0 %v3088_v33  ;;  %v5819_v34 = vld [vmem:[%s7373_s4 + $0x12] ss:$0 sm:$0xff] }
0x1461   : > { %6287 = vmatpush3.xpose.msk.msra.mxu1 %vm663_vm1, %v2997_v30  ;;  %6292 = vmatpush3.msra.mxu0 %v3088_v33  ;;  %v7107_v30 = vld [vmem:[%s6726_s19] sm:$0xff] }
0x1462   : > { %6293 = vmatprep.subr.mxu0 %v3083_v36  ;;  %6303 = vmatprep.subr.msk.mxu1 %vm361_vm0, %v5788_v35 }
0x1463   : > { %6294 = vmatpush3.msra.mxu0 %v3083_v36 }
0x1464   : > { %6289 = vmatmul.mubr.msk.f32.vlgmr.msra.gmra.mxu1 %vm663_vm1, %v2916_v37  ;;  %6298 = vmatprep.subr.msk.mxu0 %vm361_vm0, %v5782_v63 }
0x1465   : > { %6304 = vmatpush3.xpose.msk.msra.mxu1 %vm361_vm0, %v5788_v35  ;;  %6305 = vmatprep.mubr.msk.f32.mxu1 %vm361_vm0, %v6998_v17 }
0x1468   : > { %6306 = vmatmul.mubr.msk.f32.vlgmr.msra.gmra.mxu1 %vm361_vm0, %v7000_v18 }
0x1524   : > { %v6290_v38 = vpop.f32.mrf.mxu1 }
0x1525   : > { %v3179_v40 = vmul.f32 0.35355338, %v6290_v38 }
0x1526   : > { %v3169_v41 = vpop.f32.mrf.mxu1 }
0x1527   : > { %v3178_v44 = vmul.f32 0.35355338, %v3169_v41  ;;  %v3181_v45 = vadd.f32 %v3179_v40, %v6729_v49 }
0x1528   : > { %v6307_v46 = vpop.f32.mrf.mxu1 }
0x1529   : > { %v3454_v47 = vadd.f32 %v6307_v46, %v5790_v43  ;;  %v3185_v48 = vsel %vm755_vm2, %v3181_v45, -inf  ;;  %v3180_v50 = vadd.f32 %v3178_v44, %v6732_v52 }
0x152a   : > { %3186 = vmax.xlane.f32.xlu1 %v3185_v48  ;;  %v3448_v51 = vpop.f32.mrf.mxu1 }
0x152b   : > { %v3449_v53 = vadd.f32 %v5790_v43, %v3448_v51  ;;  %6313 = vmatprep.subr.msk.mxu1 %vm663_vm1, %v3454_v47  ;;  %v3182_v54 = vsel %vm755_vm2, %v3180_v50, -inf }
0x152c   : > { %6314 = vmatpush3.xpose.msk.msra.mxu1 %vm663_vm1, %v3454_v47  ;;  %3183 = vmax.xlane.f32.xlu0 %v3182_v54 }
0x152d   : > { %6315 = vmatprep.subr.msk.mxu1 %vm663_vm1, %v3449_v53 }
0x1530   : > { %6316 = vmatpush3.xpose.msk.msra.mxu1 %vm663_vm1, %v3449_v53 }
0x1531   : > { %6332 = vmatprep.subr.mxu1 %v5781_v7 }
0x15b3   : > { %v3187_v49 = vpop.xlane.xlu1 %3186 }
0x15b4   : > { %v3189_v55 = vsub.f32 %v3181_v45, %v3187_v49 }
0x15b5   : > { %v3184_v56 = vpop.xlane.xlu0 %3183 }
0x15b6   : > { %v3192_v57 = vmul.f32 1.442695, %v3189_v55  ;;  %v3188_v58 = vsub.f32 %v3180_v50, %v3184_v56 }
0x15b8   : > { %6529 = vpow2.f32 %v3192_v57  ;;  %v3190_v52 = vmul.f32 1.442695, %v3188_v58 }
0x15ba   : > { %6531 = vpow2.f32 %v3190_v52  ;;  %v5806_v52 = vld [vmem:[%s7374_s5 + $0x28] sm:$0xff] }
0x15c5   : > { %v6530_v59 = vpop.eup %6529 }
0x15c6   : > { %v3197_v60 = vsel %vm755_vm2, %v6530_v59, 0.0 }
0x15c7   : > { %v6532_v61 = vpop.eup %6531  ;;  %3198 = vadd.xlane.f32.xlu1 %v3197_v60 }
0x15c8   : > { %v3194_v62 = vsel %vm755_vm2, %v6532_v61, 0.0 }
0x15c9   : > { %3195 = vadd.xlane.f32.xlu0 %v3194_v62  ;;  %v5823_v62 = vld [vmem:[%s7372_s3 + $0xb0] sm:$0xff] }
0x1650   : > { %v3199_v0 = vpop.xlane.xlu1 %3198 }
0x1651   : > { %6533 = vrcp.f32 %v3199_v0 }
0x1652   : > { %v3196_v1 = vpop.xlane.xlu0 %3195 }
0x1653   : > { %6535 = vrcp.f32 %v3196_v1 }
0x165e   : > { %v6534_v2 = vpop.eup %6533 }
0x165f   : > { %v3203_v5 = vmul.f32 %v6534_v2, %v6530_v59  ;;  %v5811_v59 = vld [vmem:[%s7372_s3 + $0x70] sm:$0xff] }
0x1660   : > { %v6536_v3 = vpop.eup %6535 }
0x1661   : > { %v3202_v4 = vmul.f32 %v6536_v3, %v6532_v61  ;;  %v5813_v3 = vld [vmem:[%s7373_s4 + $0xe] ss:$0 sm:$0xff] }
0x1663   : > { %6295 = vmatprep.mubr.msk.f32.mxu0 %vm755_vm2, %v3202_v4 }
0x1664   : > { %6296 = vmatmul.mubr.msk.f32.vlgmr.msra.gmra.mxu0 %vm755_vm2, %v3203_v5  ;;  %v5825_v5 = vld [vmem:[%s7373_s4 + $0x16] ss:$0 sm:$0xff] }
0x1665   : > { %6299 = vmatpush3.xpose.msk.msra.mxu0 %vm361_vm0, %v5782_v63  ;;  %6300 = vmatprep.mubr.msk.f32.mxu0 %vm361_vm0, %v6998_v17  ;;  %v5838_v63 = vld [vmem:[%s7372_s3 + $0x78] sm:$0xff] }
0x1666   : > { %6308 = vmatprep.subr.msk.mxu0 %vm361_vm0, %v5794_v6 }
0x1668   : > { %6301 = vmatmul.mubr.msk.f32.vlgmr.msra.gmra.mxu0 %vm361_vm0, %v7000_v18 }
0x1669   : > { %6309 = vmatpush3.xpose.msk.msra.mxu0 %vm361_vm0, %v5794_v6  ;;  %6310 = vmatprep.mubr.msk.f32.mxu0 %vm361_vm0, %v6998_v17 }
0x166c   : > { %6311 = vmatmul.mubr.msk.f32.vlgmr.msra.gmra.mxu0 %vm361_vm0, %v7000_v18 }
0x1724   : > { %v6297_v8 = vpop.f32.mrf.mxu0 }
0x1726   : > { %v3276_v11 = vpop.f32.mrf.mxu0 }
0x1728   : > { %v6302_v12 = vpop.f32.mrf.mxu0 }
0x1729   : > { %v3369_v9 = vadd.f32 %v6302_v12, %v5784_v13 }
0x172a   : > { %v3363_v14 = vpop.f32.mrf.mxu0 }
0x172b   : > { %v3364_v42 = vadd.f32 %v5784_v13, %v3363_v14  ;;  %v5850_v13 = vld [vmem:[%s7372_s3 + $0xb8] sm:$0xff] }
0x172c   : > { %v6312_v10 = vpop.f32.mrf.mxu0 }
0x172d   : > { %v3539_v15 = vadd.f32 %v6312_v10, %v5796_v39  ;;  %6317 = vmatprep.mubr.msk.f32.mxu1 %vm663_vm1, %v3364_v42  ;;  %v5840_v10 = vld [vmem:[%s7373_s4 + $0xf] ss:$0 sm:$0xff] }
0x172e   : > { %v3533_v16 = vpop.f32.mrf.mxu0  ;;  %6318 = vmatmul.mubr.msk.f32.vlgmr.msra.gmra.mxu1 %vm663_vm1, %v3369_v9 }
0x172f   : > { %v3534_v20 = vadd.f32 %v5796_v39, %v3533_v16  ;;  %6320 = vmatprep.subr.mxu0 %v3539_v15  ;;  %6334 = vmatprep.mubr.msk.f32.mxu1 %vm663_vm1, %v3276_v11 }
0x1730   : > { %6321 = vmatpush3.msra.mxu0 %v3539_v15  ;;  %6333 = vmatpush3.msra.mxu1 %v5781_v7 }
0x1731   : > { %6322 = vmatprep.subr.mxu0 %v3534_v20  ;;  %6342 = vmatprep.subr.msk.mxu1 %vm361_vm0, %v5817_v19 }
0x1732   : > { %6323 = vmatpush3.msra.mxu0 %v3534_v20  ;;  %6335 = vmatmul.mubr.msk.f32.vlgmr.msra.gmra.mxu1 %vm663_vm1, %v6297_v8 }
0x1733   : > { %6343 = vmatpush3.xpose.msk.msra.mxu1 %vm361_vm0, %v5817_v19  ;;  %6344 = vmatprep.mubr.msk.f32.mxu1 %vm361_vm0, %v6998_v17 }
0x1734   : > { %6327 = vmatprep.subr.mxu0 %v5806_v52 }
0x1736   : > { %6345 = vmatmul.mubr.msk.f32.vlgmr.msra.gmra.mxu1 %vm361_vm0, %v7000_v18 }
0x17ee   : > { %v6319_v21 = vpop.f32.mrf.mxu1 }
0x17ef   : > { %v3630_v22 = vmul.f32 0.35355338, %v6319_v21 }
0x17f0   : > { %v3620_v23 = vpop.f32.mrf.mxu1 }
0x17f1   : > { %v3629_v24 = vmul.f32 0.35355338, %v3620_v23  ;;  %v3632_v26 = vadd.f32 %v7100_v25, %v3630_v22 }
0x17f2   : > { %v7103_v27 = vpop.f32.mrf.mxu1 }
0x17f3   : > { %v3636_v28 = vsel %vm755_vm2, %v3632_v26, -inf  ;;  %v3631_v31 = vadd.f32 %v7107_v30, %v3629_v24  ;;  %v5852_v24 = vld [vmem:[%s7373_s4 + $0x17] ss:$0 sm:$0xff] }
0x17f4   : > { %3637 = vmax.xlane.f32.xlu1 %v3636_v28  ;;  %v7110_v33 = vpop.f32.mrf.mxu1 }
0x17f5   : > { %v3633_v35 = vsel %vm755_vm2, %v3631_v31, -inf }
0x17f6   : > { %v6346_v36 = vpop.f32.mrf.mxu1  ;;  %3634 = vmax.xlane.f32.xlu0 %v3633_v35 }
0x17f7   : > { %v4067_v37 = vadd.f32 %v6346_v36, %v5819_v34 }
0x17f8   : > { %v4061_v38 = vpop.f32.mrf.mxu1 }
0x17f9   : > { %v4062_v40 = vadd.f32 %v5819_v34, %v4061_v38  ;;  %6352 = vmatprep.subr.msk.mxu1 %vm663_vm1, %v4067_v37 }
0x17fa   : > { %6353 = vmatpush3.xpose.msk.msra.mxu1 %vm663_vm1, %v4067_v37 }
0x17fb   : > { %6354 = vmatprep.subr.msk.mxu1 %vm663_vm1, %v4062_v40 }
0x17fe   : > { %6355 = vmatpush3.xpose.msk.msra.mxu1 %vm663_vm1, %v4062_v40 }
0x17ff   : > { %6371 = vmatprep.subr.msk.mxu1 %vm361_vm0, %v5838_v63 }
0x187d   : > { %v3638_v41 = vpop.xlane.xlu1 %3637 }
0x187e   : > { %v3640_v43 = vsub.f32 %v3632_v26, %v3638_v41 }
0x187f   : > { %v3635_v44 = vpop.xlane.xlu0 %3634 }
0x1880   : > { %v3643_v45 = vmul.f32 1.442695, %v3640_v43  ;;  %v3639_v46 = vsub.f32 %v3631_v31, %v3635_v44 }
0x1882   : > { %6537 = vpow2.f32 %v3643_v45  ;;  %v3641_v47 = vmul.f32 1.442695, %v3639_v46 }
0x1884   : > { %6539 = vpow2.f32 %v3641_v47 }
0x188f   : > { %v6538_v48 = vpop.eup %6537 }
0x1890   : > { %v3648_v50 = vsel %vm755_vm2, %v6538_v48, 0.0 }
0x1891   : > { %v6540_v51 = vpop.eup %6539  ;;  %3649 = vadd.xlane.f32.xlu1 %v3648_v50 }
0x1892   : > { %v3645_v53 = vsel %vm755_vm2, %v6540_v51, 0.0 }
0x1893   : > { %3646 = vadd.xlane.f32.xlu0 %v3645_v53 }
0x191a   : > { %v3650_v54 = vpop.xlane.xlu1 %3649 }
0x191b   : > { %6541 = vrcp.f32 %v3650_v54 }
0x191c   : > { %v3647_v49 = vpop.xlane.xlu0 %3646 }
0x191d   : > { %6543 = vrcp.f32 %v3647_v49 }
0x1928   : > { %v6542_v55 = vpop.eup %6541 }
0x1929   : > { %v3654_v58 = vmul.f32 %v6542_v55, %v6538_v48  ;;  %v5835_v55 = vld [vmem:[%s7374_s5 + $0x30] sm:$0xff] }
0x192a   : > { %v6544_v56 = vpop.eup %6543 }
0x192b   : > { %v3653_v57 = vmul.f32 %v6544_v56, %v6540_v51  ;;  %v5844_v56 = vld [vmem:[%s7372_s3 + $0x98] sm:$0xff] }
0x192d   : > { %6324 = vmatprep.mubr.msk.f32.mxu0 %vm755_vm2, %v3653_v57 }
0x192e   : > { %6325 = vmatmul.mubr.msk.f32.vlgmr.msra.gmra.mxu0 %vm755_vm2, %v3654_v58 }
0x192f   : > { %6328 = vmatpush3.msra.mxu0 %v5806_v52 }
0x1930   : > { %6337 = vmatprep.subr.msk.mxu0 %vm361_vm0, %v5811_v59 }
0x19ee   : > { %v6326_v60 = vpop.f32.mrf.mxu0 }
0x19f0   : > { %v3727_v61 = vpop.f32.mrf.mxu0 }
0x19f1   : > { %6329 = vmatprep.mubr.msk.f32.mxu0 %vm663_vm1, %v3727_v61 }
0x19f2   : > { %6330 = vmatmul.mubr.msk.f32.vlgmr.msra.gmra.mxu0 %vm663_vm1, %v6326_v60 }
0x19f3   : > { %6338 = vmatpush3.xpose.msk.msra.mxu0 %vm361_vm0, %v5811_v59  ;;  %6339 = vmatprep.mubr.msk.f32.mxu0 %vm361_vm0, %v6998_v17 }
0x19f4   : > { %6347 = vmatprep.subr.msk.mxu0 %vm361_vm0, %v5823_v62 }
0x19f6   : > { %6340 = vmatmul.mubr.msk.f32.vlgmr.msra.gmra.mxu0 %vm361_vm0, %v7000_v18 }
0x19f7   : > { %6348 = vmatpush3.xpose.msk.msra.mxu0 %vm361_vm0, %v5823_v62  ;;  %6349 = vmatprep.mubr.msk.f32.mxu0 %vm361_vm0, %v6998_v17 }
0x19fa   : > { %6350 = vmatmul.mubr.msk.f32.vlgmr.msra.gmra.mxu0 %vm361_vm0, %v7000_v18 }
0x1ab2   : > { %v7151_v0 = vpop.f32.mrf.mxu0 }
0x1ab3   : > { %v3897_v59 = vadd.f32 %v7103_v27, %v7151_v0 }
0x1ab4   : > { %v7153_v1 = vpop.f32.mrf.mxu0 }
0x1ab5   : > { %v3892_v61 = vadd.f32 %v7110_v33, %v7153_v1 }
0x1ab6   : > { %v6341_v2 = vpop.f32.mrf.mxu0 }
0x1ab7   : > { %v3982_v7 = vadd.f32 %v6341_v2, %v5813_v3  ;;  %v5846_v2 = vld [vmem:[%s7373_s4 + $0x13] ss:$0 sm:$0xff] }
0x1ab8   : > { %v3976_v4 = vpop.f32.mrf.mxu0 }
0x1ab9   : > { %v3977_v6 = vadd.f32 %v5813_v3, %v3976_v4 }
0x1aba   : > { %v6351_v8 = vpop.f32.mrf.mxu0 }
0x1abb   : > { %v4152_v11 = vadd.f32 %v6351_v8, %v5825_v5  ;;  %6356 = vmatprep.mubr.msk.f32.mxu1 %vm663_vm1, %v3977_v6 }
0x1abc   : > { %v4146_v12 = vpop.f32.mrf.mxu0  ;;  %6357 = vmatmul.mubr.msk.f32.vlgmr.msra.gmra.mxu1 %vm663_vm1, %v3982_v7 }
0x1abd   : > { %v4147_v14 = vadd.f32 %v5825_v5, %v4146_v12  ;;  %6359 = vmatprep.subr.mxu0 %v4152_v11  ;;  %6372 = vmatpush3.xpose.msk.msra.mxu1 %vm361_vm0, %v5838_v63 }
0x1abe   : > { %6373 = vmatprep.mubr.msk.f32.mxu1 %vm361_vm0, %v6998_v17  ;;  %6360 = vmatpush3.msra.mxu0 %v4152_v11 }
0x1abf   : > { %6361 = vmatprep.subr.mxu0 %v4147_v14  ;;  %6381 = vmatprep.subr.msk.mxu1 %vm361_vm0, %v5850_v13 }
0x1ac0   : > { %6362 = vmatpush3.msra.mxu0 %v4147_v14  ;;  %6374 = vmatmul.mubr.msk.f32.vlgmr.msra.gmra.mxu1 %vm361_vm0, %v7000_v18 }
0x1ac1   : > { %6382 = vmatpush3.xpose.msk.msra.mxu1 %vm361_vm0, %v5850_v13  ;;  %6383 = vmatprep.mubr.msk.f32.mxu1 %vm361_vm0, %v6998_v17 }
0x1ac2   : > { %6366 = vmatprep.subr.mxu0 %v5835_v55 }
0x1ac4   : > { %6384 = vmatmul.mubr.msk.f32.vlgmr.msra.gmra.mxu1 %vm361_vm0, %v7000_v18 }
0x1b7c   : > { %v6358_v39 = vpop.f32.mrf.mxu1 }
0x1b7d   : > { %v4243_v42 = vmul.f32 0.35355338, %v6358_v39 }
0x1b7e   : > { %v4233_v9 = vpop.f32.mrf.mxu1 }
0x1b7f   : > { %v4242_v15 = vmul.f32 0.35355338, %v4233_v9  ;;  %v4245_v16 = vadd.f32 %v7100_v25, %v4243_v42 }
0x1b80   : > { %v6375_v19 = vpop.f32.mrf.mxu1 }
0x1b81   : > { %v7181_v20 = vadd.f32 %v6375_v19, %v5840_v10  ;;  %v4249_v21 = vsel %vm755_vm2, %v4245_v16, -inf  ;;  %v4244_v22 = vadd.f32 %v7107_v30, %v4242_v15 }
0x1b82   : > { %4250 = vmax.xlane.f32.xlu1 %v4249_v21  ;;  %v4510_v23 = vpop.f32.mrf.mxu1 }
0x1b83   : > { %v4246_v26 = vsel %vm755_vm2, %v4244_v22, -inf  ;;  %v4511_v52 = vadd.f32 %v5840_v10, %v4510_v23 }
0x1b84   : > { %v6385_v28 = vpop.f32.mrf.mxu1  ;;  %4247 = vmax.xlane.f32.xlu0 %v4246_v26 }
0x1b85   : > { %v4686_v31 = vadd.f32 %v6385_v28, %v5852_v24  ;;  %v5862_v28 = vld [vmem:[%s7374_s5 + $0x38] sm:$0xff] }
0x1b86   : > { %v4680_v34 = vpop.f32.mrf.mxu1 }
0x1b87   : > { %v4681_v35 = vadd.f32 %v5852_v24, %v4680_v34  ;;  %6393 = vmatprep.subr.mxu1 %v4686_v31 }
0x1b88   : > { %6394 = vmatpush3.msra.mxu1 %v4686_v31 }
0x1b89   : > { %6395 = vmatprep.subr.mxu1 %v4681_v35 }
0x1b8a   : > { %6396 = vmatpush3.msra.mxu1 %v4681_v35 }
0x1b8b   : > { %6400 = vmatprep.subr.mxu1 %v5862_v28 }
0x1c0b   : > { %v4251_v36 = vpop.xlane.xlu1 %4250 }
0x1c0c   : > { %v4253_v37 = vsub.f32 %v4245_v16, %v4251_v36  ;;  %v5865_v36 = vld [vmem:[%s7376_s7 + $0xb] ss:$0 sm:$0xff] }
0x1c0d   : > { %v4248_v38 = vpop.xlane.xlu0 %4247 }
0x1c0e   : > { %v4256_v40 = vmul.f32 1.442695, %v4253_v37  ;;  %v4252_v41 = vsub.f32 %v4244_v22, %v4248_v38 }
0x1c10   : > { %6545 = vpow2.f32 %v4256_v40  ;;  %v4254_v43 = vmul.f32 1.442695, %v4252_v41 }
0x1c12   : > { %6547 = vpow2.f32 %v4254_v43 }
0x1c1d   : > { %v6546_v44 = vpop.eup %6545 }
0x1c1e   : > { %v4261_v45 = vsel %vm755_vm2, %v6546_v44, 0.0 }
0x1c1f   : > { %v6548_v46 = vpop.eup %6547  ;;  %4262 = vadd.xlane.f32.xlu1 %v4261_v45 }
0x1c20   : > { %v4258_v47 = vsel %vm755_vm2, %v6548_v46, 0.0 }
0x1c21   : > { %4259 = vadd.xlane.f32.xlu0 %v4258_v47 }
0x1ca8   : > { %v4263_v48 = vpop.xlane.xlu1 %4262 }
0x1ca9   : > { %6549 = vrcp.f32 %v4263_v48 }
0x1caa   : > { %v4260_v50 = vpop.xlane.xlu0 %4259 }
0x1cab   : > { %6551 = vrcp.f32 %v4260_v50 }
0x1cb6   : > { %v6550_v51 = vpop.eup %6549 }
0x1cb7   : > { %v4267_v49 = vmul.f32 %v6550_v51, %v6546_v44 }
0x1cb8   : > { %v6552_v53 = vpop.eup %6551 }
0x1cb9   : > { %v4266_v54 = vmul.f32 %v6552_v53, %v6548_v46 }
0x1cbb   : > { %6363 = vmatprep.mubr.msk.f32.mxu0 %vm755_vm2, %v4266_v54 }
0x1cbc   : > { %6364 = vmatmul.mubr.msk.f32.vlgmr.msra.gmra.mxu0 %vm755_vm2, %v4267_v49 }
0x1cbd   : > { %6367 = vmatpush3.msra.mxu0 %v5835_v55 }
0x1cbe   : > { %6376 = vmatprep.subr.msk.mxu0 %vm361_vm0, %v5844_v56 }
0x1d7c   : > { %v6365_v57 = vpop.f32.mrf.mxu0 }
0x1d7e   : > { %v4340_v58 = vpop.f32.mrf.mxu0 }
0x1d7f   : > { %6368 = vmatprep.mubr.msk.f32.mxu0 %vm663_vm1, %v4340_v58  ;;  %v5870_v58 = vld [vmem:[%s7375_s6 + $0x70] sm:$0xff] }
0x1d80   : > { %6369 = vmatmul.mubr.msk.f32.vlgmr.msra.gmra.mxu0 %vm663_vm1, %v6365_v57 }
0x1d81   : > { %6377 = vmatpush3.xpose.msk.msra.mxu0 %vm361_vm0, %v5844_v56  ;;  %6378 = vmatprep.mubr.msk.f32.mxu0 %vm361_vm0, %v6998_v17 }
0x1d84   : > { %6379 = vmatmul.mubr.msk.f32.vlgmr.msra.gmra.mxu0 %vm361_vm0, %v7000_v18 }
0x1d85   : > { %6390 = vmatprep.mubr.msk.f32.mxu0 %vm663_vm1, %v4511_v52  ;;  %v5869_v52 = vld [vmem:[%s7375_s6 + $0x68] sm:$0xff] }
0x1e40   : > { %v6370_v60 = vpop.f32.mrf.mxu0 }
0x1e41   : > { %v4433_v62 = vadd.f32 %v6370_v60, %v3897_v59  ;;  %v5868_v59 = vld [vmem:[%s7375_s6 + $0x60] sm:$0xff]  ;;  %v6585_v60 = vmov 0.0  }
0x1e42   : > { %v4423_v63 = vpop.f32.mrf.mxu0 }
0x1e43   : > { %v4432_v3 = vadd.f32 %v4423_v63, %v3892_v61 }
0x1e44   : > { %v6380_v4 = vpop.f32.mrf.mxu0 }
0x1e45   : > { %v4601_v5 = vadd.f32 %v6380_v4, %v5846_v2 }
0x1e46   : > { %v4595_v6 = vpop.f32.mrf.mxu0 }
0x1e47   : > { %v4596_v7 = vadd.f32 %v5846_v2, %v4595_v6  ;;  %6386 = vmatprep.subr.msk.mxu0 %vm663_vm1, %v4601_v5  ;;  %v5866_v6 = vld [vmem:[%s7376_s7 + $0x7] ss:$0 sm:$0xff] }
0x1e48   : > { %6387 = vmatpush3.xpose.msk.msra.mxu0 %vm663_vm1, %v4601_v5 }
0x1e49   : > { %6388 = vmatprep.subr.msk.mxu0 %vm663_vm1, %v4596_v7 }
0x1e4c   : > { %6389 = vmatpush3.xpose.msk.msra.mxu0 %vm663_vm1, %v4596_v7 }
0x1e4f   : > { %6391 = vmatmul.mubr.msk.f32.vlgmr.msra.gmra.mxu0 %vm663_vm1, %v7181_v20 }
0x1f0f   : > { %v6392_v27 = vpop.f32.mrf.mxu0 }
0x1f10   : > { %v4777_v33 = vmul.f32 0.35355338, %v6392_v27 }
0x1f11   : > { %v4767_v0 = vpop.f32.mrf.mxu0 }
0x1f12   : > { %v4776_v1 = vmul.f32 0.35355338, %v4767_v0  ;;  %v4779_v8 = vadd.f32 %v7100_v25, %v4777_v33 }
0x1f14   : > { %v4783_v11 = vsel %vm755_vm2, %v4779_v8, -inf  ;;  %v4778_v12 = vadd.f32 %v7107_v30, %v4776_v1  ;;  %v5867_v1 = vld [vmem:[%s7376_s7 + $0x8] ss:$0 sm:$0xff] }
0x1f15   : > { %4784 = vmax.xlane.f32.xlu1 %v4783_v11 }
0x1f16   : > { %v4780_v13 = vsel %vm755_vm2, %v4778_v12, -inf }
0x1f17   : > { %4781 = vmax.xlane.f32.xlu0 %v4780_v13  ;;  %v5882_v13 = vld [vmem:[%s7375_s6 + $0xb8] sm:$0xff] }
0x1f9e   : > { %v4785_v14 = vpop.xlane.xlu1 %4784 }
0x1f9f   : > { %v4787_v39 = vsub.f32 %v4779_v8, %v4785_v14  ;;  %v5881_v14 = vld [vmem:[%s7375_s6 + $0xb0] sm:$0xff] }
0x1fa0   : > { %v4782_v42 = vpop.xlane.xlu0 %4781 }
0x1fa1   : > { %v4790_v9 = vmul.f32 1.442695, %v4787_v39  ;;  %v4786_v10 = vsub.f32 %v4778_v12, %v4782_v42  ;;  %v5878_v39 = vld [vmem:[%s7375_s6 + $0x98] sm:$0xff]  ;;  %v5877_v42 = vld [vmem:[%s7375_s6 + $0x90] sm:$0xff] }
0x1fa3   : > { %6553 = vpow2.f32 %v4790_v9  ;;  %v4788_v15 = vmul.f32 1.442695, %v4786_v10  ;;  %v5876_v9 = vld [vmem:[%s7375_s6 + $0x88] sm:$0xff]  ;;  %v5875_v10 = vld [vmem:[%s7375_s6 + $0x80] sm:$0xff] }
0x1fa5   : > { %6555 = vpow2.f32 %v4788_v15  ;;  %v5872_v15 = vld [vmem:[%s7376_s7 + $0xc] ss:$0 sm:$0xff] }
0x1fb0   : > { %v6554_v16 = vpop.eup %6553 }
0x1fb1   : > { %v4795_v19 = vsel %vm755_vm2, %v6554_v16, 0.0 }
0x1fb2   : > { %v6556_v25 = vpop.eup %6555  ;;  %4796 = vadd.xlane.f32.xlu1 %v4795_v19 }
0x1fb3   : > { %v4792_v20 = vsel %vm755_vm2, %v6556_v25, 0.0 }
0x1fb4   : > { %4793 = vadd.xlane.f32.xlu0 %v4792_v20 }
0x203b   : > { %v4797_v30 = vpop.xlane.xlu1 %4796 }
0x203c   : > { %6557 = vrcp.f32 %v4797_v30 }
0x203d   : > { %v4794_v21 = vpop.xlane.xlu0 %4793 }
0x203e   : > { %6559 = vrcp.f32 %v4794_v21 }
0x2049   : > { %v6558_v22 = vpop.eup %6557 }
0x204a   : > { %v4801_v26 = vmul.f32 %v6558_v22, %v6554_v16 }
0x204b   : > { %v6560_v23 = vpop.eup %6559 }
0x204c   : > { %v4800_v24 = vmul.f32 %v6560_v23, %v6556_v25 }
0x204e   : > { %6397 = vmatprep.mubr.msk.f32.mxu1 %vm755_vm2, %v4800_v24 }
0x204f   : > { %6398 = vmatmul.mubr.msk.f32.vlgmr.msra.gmra.mxu1 %vm755_vm2, %v4801_v26 }
0x2050   : > { %6401 = vmatpush3.msra.mxu1 %v5862_v28 }
0x2051   : > { %6416 = vmatprep.subr.mxu1 %v5882_v13 }
0x210f   : > { %v6399_v31 = vpop.f32.mrf.mxu1 }
0x2111   : > { %v4874_v34 = vpop.f32.mrf.mxu1 }
0x2112   : > { %6402 = vmatprep.mubr.msk.f32.mxu1 %vm663_vm1, %v4874_v34 }
0x2113   : > { %6403 = vmatmul.mubr.msk.f32.vlgmr.msra.gmra.mxu1 %vm663_vm1, %v6399_v31 }
0x2114   : > { %6417 = vmatpush3.msra.mxu1 %v5882_v13  ;;  %v5405_v13 = vld [vmem:[%s7377_s8 + $0x38] sm:$0xff] }
0x2115   : > { %6418 = vmatprep.subr.mxu1 %v5881_v14 }
0x2116   : > { %6419 = vmatpush3.msra.mxu1 %v5881_v14  ;;  %v5404_v14 = vld [vmem:[%s7377_s8 + $0x30] sm:$0xff] }
0x21d3   : > { %v6404_v35 = vpop.f32.mrf.mxu1 }
0x21d4   : > { %v4967_v37 = vadd.f32 %v6404_v35, %v4433_v62 }
0x21d5   : > { %v4957_v38 = vpop.f32.mrf.mxu1 }
0x21d6   : > { %v4974_v40 = vadd.f32 %v5865_v36, %v4967_v37  ;;  %v4966_v41 = vadd.f32 %v4957_v38, %v4432_v3 }
0x21d8   : > { %v4973_v43 = vadd.f32 %v5865_v36, %v4966_v41  ;;  %v4976_v44 = vadd.f32 %v4974_v40, %v7000_v18  ;;  %v5883_v36 = vld [vmem:[%s7376_s7 + $0xd] ss:$0 sm:$0xff] }
0x21da   : > { %v4982_v45 = vsel %vm361_vm0, %v4976_v44, 0.0  ;;  %v4975_v46 = vadd.f32 %v4973_v43, %v6998_v17  ;;  %v5871_v17 = vld [vmem:[%s7375_s6 + $0x78] sm:$0xff] }
0x21db   : > { %4983 = vadd.xlane.f32.xlu1 %v4982_v45  ;;  %6405 = vmatprep.subr.mxu0 %v5871_v17 }
0x21dc   : > { %v4979_v47 = vsel %vm361_vm0, %v4975_v46, 0.0  ;;  %6406 = vmatpush3.msra.mxu0 %v5871_v17  ;;  %v5401_v17 = vld [vmem:[%s7377_s8 + $0x18] sm:$0xff] }
0x21dd   : > { %4980 = vadd.xlane.f32.xlu0 %v4979_v47  ;;  %6407 = vmatprep.subr.mxu0 %v5870_v58 }
0x21de   : > { %6408 = vmatpush3.msra.mxu0 %v5870_v58  ;;  %v5400_v58 = vld [vmem:[%s7377_s8 + $0x10] sm:$0xff] }
0x21df   : > { %6409 = vmatprep.subr.mxu0 %v5869_v52 }
0x21e0   : > { %6410 = vmatpush3.msra.mxu0 %v5869_v52  ;;  %v5399_v52 = vld [vmem:[%s7377_s8 + $0x8] sm:$0xff] }
0x21e1   : > { %6411 = vmatprep.subr.mxu0 %v5868_v59 }
0x21e2   : > { %6412 = vmatpush3.msra.mxu0 %v5868_v59  ;;  %v5398_v59 = vld [vmem:[%s7377_s8] sm:$0xff] }
0x21e3   : > { %6435 = vmatprep.subr.mxu0 %v6585_v60 }
0x2264   : > { %v4984_v48 = vpop.xlane.xlu1 %4983 }
0x2265   : > { %v4986_v50 = vmul.f32 0.03125, %v4984_v48 }
0x2266   : > { %v4981_v51 = vpop.xlane.xlu0 %4980 }
0x2267   : > { %v4988_v53 = vsub.f32 %v4976_v44, %v4986_v50  ;;  %v4985_v54 = vmul.f32 0.03125, %v4981_v51 }
0x2269   : > { %v4987_v49 = vsub.f32 %v4975_v46, %v4985_v54  ;;  %v4990_v55 = vmul.f32 %v4988_v53, %v4988_v53 }
0x226b   : > { %v4994_v56 = vsel %vm361_vm0, %v4990_v55, 0.0  ;;  %v4989_v57 = vmul.f32 %v4987_v49, %v4987_v49 }
0x226c   : > { %4995 = vadd.xlane.f32.xlu1 %v4994_v56 }
0x226d   : > { %v4991_v18 = vsel %vm361_vm0, %v4989_v57, 0.0 }
0x226e   : > { %4992 = vadd.xlane.f32.xlu0 %v4991_v18  ;;  %v5254_v18 = vld [vmem:[%s7371_s2] sm:$0x3] }
0x22f5   : > { %v4996_v61 = vpop.xlane.xlu1 %4995 }
0x22f6   : > { %v4998_v62 = vmul.f32 0.03125, %v4996_v61 }
0x22f7   : > { %v4993_v63 = vpop.xlane.xlu0 %4992 }
0x22f8   : > { %v5000_v2 = vadd.f32 1e-12, %v4998_v62  ;;  %v4997_v3 = vmul.f32 0.03125, %v4993_v63 }
0x22fa   : > { %6561 = vrsqrt.f32 %v5000_v2  ;;  %v4999_v4 = vadd.f32 1e-12, %v4997_v3 }
0x22fc   : > { %6563 = vrsqrt.f32 %v4999_v4 }
0x2307   : > { %v6562_v5 = vpop.eup %6561 }
0x2308   : > { %v5004_v7 = vmul.f32 %v6562_v5, %v4988_v53 }
0x2309   : > { %v6564_v27 = vpop.eup %6563 }
0x230a   : > { %v5003_v33 = vmul.f32 %v6564_v27, %v4987_v49  ;;  %v5010_v0 = vmul.f32 %v5866_v6, %v5004_v7 }
0x230c   : > { %v5009_v8 = vmul.f32 %v5866_v6, %v5003_v33  ;;  %v5016_v12 = vadd.f32 %v5867_v1, %v5010_v0  ;;  %v5886_v6 = vld [vmem:[%s7376_s7 + $0x9] ss:$0 sm:$0xff]  ;;  %v5887_v33 = vld [vmem:[%s7376_s7 + $0xa] ss:$0 sm:$0xff] }
0x230e   : > { %v5015_v11 = vadd.f32 %v5867_v1, %v5009_v8 }
0x2310   : > { %6413 = vmatprep.mubr.msk.f32.mxu0 %vm361_vm0, %v5015_v11 }
0x2311   : > { %6414 = vmatmul.mubr.msk.f32.vlgmr.msra.gmra.mxu0 %vm361_vm0, %v5016_v12 }
0x2312   : > { %6436 = vmatpush3.msra.mxu0 %v6686_v32  ;;  %v5880_v32 = vld [vmem:[%s7375_s6 + $0xa8] sm:$0xff]  ;;  %6439 = vmatprep.mubr.msk.f32.mxu0 %vm6586_vm4, %v6585_v60 }
0x2313   : > { %6437 = vmatprep.subr.mxu0 %v6585_v60  ;;  %6420 = vmatprep.subr.mxu1 %v5880_v32 }
0x2314   : > { %6438 = vmatpush3.msra.mxu0 %v6680_v29  ;;  %6421 = vmatpush3.msra.mxu1 %v5880_v32  ;;  %v5879_v29 = vld [vmem:[%s7375_s6 + $0xa0] sm:$0xff]  ;;  %v5403_v32 = vld [vmem:[%s7377_s8 + $0x28] sm:$0xff] }
0x2315   : > { %6442 = vmatprep.subr.mxu0 %v6585_v60  ;;  %6422 = vmatprep.subr.mxu1 %v5879_v29 }
0x2316   : > { %6423 = vmatpush3.msra.mxu1 %v5879_v29  ;;  %6440 = vmatmul.mubr.msk.f32.vlgmr.msra.gmra.mxu0 %vm755_vm2, %v5254_v18 }
0x2317   : > { %6424 = vmatprep.subr.mxu1 %v5878_v39  ;;  %6446 = vmatprep.mubr.msk.f32.mxu0 %vm6586_vm4, %v6585_v60 }
0x2318   : > { %6425 = vmatpush3.msra.mxu1 %v5878_v39 }
0x2319   : > { %6426 = vmatprep.subr.mxu1 %v5877_v42 }
0x231a   : > { %6427 = vmatpush3.msra.mxu1 %v5877_v42  ;;  %v5402_v42 = vld [vmem:[%s7377_s8 + $0x20] sm:$0xff] }
0x231b   : > { %6428 = vmatprep.subr.mxu1 %v5876_v9 }
0x231c   : > { %6429 = vmatpush3.msra.mxu1 %v5876_v9 }
0x231d   : > { %6430 = vmatprep.subr.mxu1 %v5875_v10 }
0x231e   : > { %6431 = vmatpush3.msra.mxu1 %v5875_v10 }
0x231f   : > { %6460 = vmatprep.subr.mxu1 %v6585_v60 }
0x23d1   : > { %v6415_v16 = vpop.f32.mrf.mxu0 }
0x23d2   : > { %v5105_v19 = vadd.f32 %v6415_v16, %v5872_v15 }
0x23d3   : > { %v5099_v25 = vpop.f32.mrf.mxu0 }
0x23d4   : > { %v5111_v20 = vmul.f32 0.70710677, %v5105_v19  ;;  %v5100_v30 = vadd.f32 %v5872_v15, %v5099_v25  ;;  %v5109_v31 = vmul.f32 0.5, %v5105_v19 }
0x23d6   : > { %6565 = verf.f32 %v5111_v20  ;;  %v5110_v21 = vmul.f32 0.70710677, %v5100_v30  ;;  %v5108_v26 = vmul.f32 0.5, %v5100_v30  ;;  %v5324_v29 = vpop.f32.mrf.mxu0 }
0x23d8   : > { %6567 = verf.f32 %v5110_v21  ;;  %v6441_v39 = vpop.f32.mrf.mxu0 }
0x23e3   : > { %v6566_v22 = vpop.eup %6565 }
0x23e4   : > { %v5115_v24 = vadd.f32 1.0, %v6566_v22 }
0x23e5   : > { %v6568_v23 = vpop.eup %6567 }
0x23e6   : > { %v5114_v28 = vadd.f32 1.0, %v6568_v23  ;;  %v5117_v35 = vmul.f32 %v5115_v24, %v5109_v31 }
0x23e8   : > { %v5116_v34 = vmul.f32 %v5114_v28, %v5108_v26 }
0x23ea   : > { %6432 = vmatprep.mubr.msk.f32.mxu1 %vm2703_vm3, %v5116_v34 }
0x23eb   : > { %6433 = vmatmul.mubr.msk.f32.vlgmr.msra.gmra.mxu1 %vm2703_vm3, %v5117_v35 }
0x23ec   : > { %6468 = vmatprep.mubr.msk.f32.mxu1 %vm6586_vm4, %v6585_v60  ;;  %6461 = vmatpush3.msra.mxu1 %v5401_v17 }
0x23ed   : > { %6462 = vmatprep.subr.mxu1 %v6585_v60 }
0x23ee   : > { %6463 = vmatpush3.msra.mxu1 %v5400_v58 }
0x23ef   : > { %6464 = vmatprep.subr.mxu1 %v6585_v60 }
0x23f0   : > { %6465 = vmatpush3.msra.mxu1 %v5399_v52 }
0x23f1   : > { %6466 = vmatprep.subr.mxu1 %v6585_v60 }
0x23f2   : > { %6467 = vmatpush3.msra.mxu1 %v5398_v59 }
0x23f3   : > { %6469 = vmatmul.mubr.msk.f32.vlgmr.msra.gmra.mxu1 %vm361_vm0, %v5324_v29 }
0x24ab   : > { %v6434_v37 = vpop.f32.mrf.mxu1 }
0x24ac   : > { %v5209_v38 = vadd.f32 %v6434_v37, %v5883_v36 }
0x24ad   : > { %v5203_v40 = vpop.f32.mrf.mxu1 }
0x24ae   : > { %v5204_v41 = vadd.f32 %v5883_v36, %v5203_v40  ;;  %v5213_v43 = vadd.f32 %v5209_v38, %v5016_v12 }
0x24b0   : > { %v5219_v44 = vsel %vm361_vm0, %v5213_v43, 0.0  ;;  %v5212_v45 = vadd.f32 %v5204_v41, %v5015_v11 }
0x24b1   : > { %5220 = vadd.xlane.f32.xlu0 %v5219_v44 }
0x24b2   : > { %v5216_v46 = vsel %vm361_vm0, %v5212_v45, 0.0 }
0x24b3   : > { %5217 = vadd.xlane.f32.xlu1 %v5216_v46  ;;  %v5548_v15 = vpop.f32.mrf.mxu1 }
0x24b5   : > { %v6470_v16 = vpop.f32.mrf.mxu1 }
0x253a   : > { %v5221_v47 = vpop.xlane.xlu0 %5220 }
0x253b   : > { %v5223_v48 = vmul.f32 0.03125, %v5221_v47 }
0x253c   : > { %v5218_v50 = vpop.xlane.xlu1 %5217 }
0x253d   : > { %v5225_v51 = vsub.f32 %v5213_v43, %v5223_v48  ;;  %v5222_v53 = vmul.f32 0.03125, %v5218_v50 }
0x253f   : > { %v5224_v54 = vsub.f32 %v5212_v45, %v5222_v53  ;;  %v5227_v49 = vmul.f32 %v5225_v51, %v5225_v51 }
0x2541   : > { %v5231_v55 = vsel %vm361_vm0, %v5227_v49, 0.0  ;;  %v5226_v56 = vmul.f32 %v5224_v54, %v5224_v54 }
0x2542   : > { %5232 = vadd.xlane.f32.xlu0 %v5231_v55 }
0x2543   : > { %v5228_v57 = vsel %vm361_vm0, %v5226_v56, 0.0 }
0x2544   : > { %5229 = vadd.xlane.f32.xlu1 %v5228_v57 }
0x25cb   : > { %v5233_v61 = vpop.xlane.xlu0 %5232 }
0x25cc   : > { %v5235_v62 = vmul.f32 0.03125, %v5233_v61 }
0x25cd   : > { %v5230_v63 = vpop.xlane.xlu1 %5229 }
0x25ce   : > { %v5237_v2 = vadd.f32 1e-12, %v5235_v62  ;;  %v5234_v3 = vmul.f32 0.03125, %v5230_v63 }
0x25d0   : > { %6569 = vrsqrt.f32 %v5237_v2  ;;  %v5236_v4 = vadd.f32 1e-12, %v5234_v3 }
0x25d2   : > { %6571 = vrsqrt.f32 %v5236_v4 }
0x25dd   : > { %v6570_v5 = vpop.eup %6569 }
0x25de   : > { %v5241_v7 = vmul.f32 %v6570_v5, %v5225_v51 }
0x25df   : > { %v6572_v27 = vpop.eup %6571 }
0x25e0   : > { %v5247_v0 = vmul.f32 %v5886_v6, %v5241_v7  ;;  %v5240_v1 = vmul.f32 %v6572_v27, %v5224_v54 }
0x25e2   : > { %v5253_v8 = vadd.f32 %v5887_v33, %v5247_v0  ;;  %v5246_v11 = vmul.f32 %v5886_v6, %v5240_v1 }
0x25e4   : > { %6443 = vmatpush3.msra.mxu0 %v5253_v8  ;;  %v5252_v12 = vadd.f32 %v5887_v33, %v5246_v11 }
0x25e5   : > { %6444 = vmatprep.subr.mxu0 %v6585_v60 }
0x25e6   : > { %6445 = vmatpush3.msra.mxu0 %v5252_v12 }
0x25e7   : > { %6447 = vmatmul.mubr.msk.f32.vlgmr.msra.gmra.mxu0 %vm755_vm2, %v5254_v18  ;;  %6449 = vmatprep.subr.mxu0 %v6585_v60 }
0x25e8   : > { %6450 = vmatpush3.msra.mxu0 %v5405_v13  ;;  %6457 = vmatprep.mubr.msk.f32.mxu0 %vm6586_vm4, %v6585_v60 }
0x25e9   : > { %6451 = vmatprep.subr.mxu0 %v6585_v60 }
0x25ea   : > { %6452 = vmatpush3.msra.mxu0 %v5404_v14 }
0x25eb   : > { %6453 = vmatprep.subr.mxu0 %v6585_v60 }
0x25ec   : > { %6454 = vmatpush3.msra.mxu0 %v5403_v32 }
0x25ed   : > { %6455 = vmatprep.subr.mxu0 %v6585_v60  ;;  %v5892_v60 = vld [vmem:[%s7376_s7 + $0x10] ss:$0 sm:$0xff] }
0x25ee   : > { %6456 = vmatpush3.msra.mxu0 %v5402_v42 }
0x26a7   : > { %v5394_v9 = vpop.f32.mrf.mxu0 }
0x26a8   : > { %6458 = vmatmul.mubr.msk.f32.vlgmr.msra.gmra.mxu0 %vm361_vm0, %v5394_v9 }
0x26a9   : > { %v6448_v10 = vpop.f32.mrf.mxu0 }
0x2768   : > { %v5475_v19 = vpop.f32.mrf.mxu0 }
0x2769   : > { %v5549_v25 = vadd.f32 %v5548_v15, %v5475_v19 }
0x276a   : > { %v6459_v20 = vpop.f32.mrf.mxu0 }
0x276b   : > { %v5557_v30 = vadd.f32 %v5892_v60, %v5549_v25 }
0x276d   : > { %v5558_v21 = vmul.f32 %v5557_v30, %v5557_v30 }
0x276f   : > { %v5560_v22 = vsel %vm5559_vm5, %v5558_v21, 0.0 }
0x2770   : > { %5561 = vadd.xlane.f32.xlu0 %v5560_v22 }
0x27f9   : > { %v5562_v23 = vpop.xlane.xlu0 %5561 }
0x27fa   : > { %v5563_v24 = vmax.f32 %v5562_v23, 1e-24 }
0x27fc   : > { %6573 = vrsqrt.f32 %v5563_v24 }
0x2809   : > { %v6574_v26 = vpop.eup %6573 }
0x280a   : > { %v5565_v28 = vmul.f32 %v6574_v26, %v5557_v30 }
0x280c   : > { %5566 = vst.msk [vmem:[%s354_s13] sm:$0x3] %vm5559_vm5, %v5565_v28 }
0x280d PF: > { %s19_s30 = sadd.s32 1, %s6583_s30  }
0x280e   : > { %p16_p5 = scmp.ge.s32.totalorder %s19_s30, 4  }
0x2810   :  { %18 = sbr.rel (!%p16_p5) target bundleno = 1 (0x1), region = 125 }

// kernel: model_forward.3
= control target key start
LH: loop header
LB: loop body
LE: loop exit
PB: predicated region body
PF: predicated region fallthrough
CT: control target
= control target key end

     0   :  { %s9558_s30 = smov 0   ;;  %s11442_s0 = inlined_call_operand.vmem [shape: f32[40,40], index: 0, kind: input, shape index: {}]   ;;  %s11443_s1 = inlined_call_operand.vmem [shape: f32[80,48], index: 1, kind: input, shape index: {}]   ;;  %s11444_s2 = inlined_call_operand.vmem [shape: f32[96,32], index: 2, kind: input, shape index: {}]   ;;  %s11445_s3 = inlined_call_operand.vmem [shape: f32[80,32], index: 3, kind: input, shape index: {}]   ;;  %s11446_s4 = inlined_call_operand.vmem [shape: f32[12,4,8,32], index: 4, kind: input, shape index: {}]   ;;  %s11447_s5 = inlined_call_operand.vmem [shape: f32[12,4,8], index: 5, kind: input, shape index: {}]   ;;  %s11448_s6 = inlined_call_operand.vmem [shape: f32[4,4,8,32], index: 6, kind: input, shape index: {}]   ;;  %s11449_s7 = inlined_call_operand.vmem [shape: f32[4,96,64], index: 7, kind: input, shape index: {}]   ;;  %s11450_s8 = inlined_call_operand.vmem [shape: f32[32,64], index: 8, kind: input, shape index: {}]   ;;  %s11451_s9 = inlined_call_operand.vmem [shape: f32[2,2,32], index: 9, kind: output, shape index: {}]  }
   0x1 LB: > { %s9564_s10 = sadd.s32 4294967295, %s9504_s30   ;;  %p7312_p0 = scmp.ge.s32.totalorder %s9504_s30, 1  ;;  %s9504_s30 = sphi %s9558_s30, %s19_s30  }
   0x2   : > { %p368_p1 = scmp.lt.s32.totalorder %s9504_s30, 3 }
   0x4   : > { %p369_p2 = pnand %p7312_p0, %p368_p1 }
   0x5   : > { %s447_s11 = smul.u32 (!%p369_p2), 6, %s9564_s10  ;;  %s7319_s28 = sshll.u32 (!%p369_p2), %s9564_s10, 1 }
   0x6   : > { %372 = sbr.rel (%p369_p2) target bundleno = 10140 (0x279c), region = 56  ;;  %p473_p5 = scmp.lt.s32.totalorder (!%p369_p2), %s7319_s28, 3 }
   0x7   : > { %s441_s12 = smul.u32 (!%p369_p2), 5, %s9564_s10  ;;  %p448_p3 = scmp.lt.s32.totalorder (!%p369_p2), %s447_s11, 11 }
   0x8   : > { %p492_p6 = scmp.lt.s32.totalorder (!%p369_p2), %s9564_s10, 1 }
   0x9   : > { %p442_p4 = scmp.lt.s32.totalorder (!%p369_p2), %s441_s12, 9 }
   0xb   : > { %v9506_v0 = vmov 0.0   ;;  %vm9507_vm0 = vmmov 0   ;;  %s11453_s11 = smov (!%p448_p3, %s447_s11), 11  ;;  %s11455_s12 = smov (!%p442_p4, %s441_s12), 9  ;;  %vm517_vm1 = vcmask 392192   ;;  %vm625_vm2 = vcmask 261120  }
   0xc   : > { %8169 = vmatprep.subr.mxu0 %v9506_v0  ;;  %8181 = vmatprep.mubr.msk.f32.mxu0 %vm9507_vm0, %v9506_v0  ;;  %s7314_s13 = sshll.u32 %s11453_s11, 3  ;;  %s7313_s17 = sshll.u32 %s11455_s12, 3  ;;  %vm1026_vm3 = vcmask 64512   ;;  %vm1157_vm4 = vcmask 326656   ;;  %vm3777_vm5 = vcmask 523264   ;;  %vm7169_vm6 = vcmask 254976  }
   0xd   : > { %9248 = vmatprep.subr.mxu1 %v9506_v0  ;;  %8201 = vmatprep.mubr.msk.f32.mxu1 %vm9507_vm0, %v9506_v0  ;;  %s451_s16 = scalar_lea.vmem %s11444_s2, %s7314_s13  ;;  %s445_s20 = scalar_lea.vmem %s11443_s1, %s7313_s17 }
   0xe   : > { %v511_v1 = vld [vmem:[%s451_s16 + $0x28] sm:$0xff]  ;;  %v510_v2 = vld [vmem:[%s451_s16 + $0x20] sm:$0xff]  ;;  %v509_v3 = vld [vmem:[%s451_s16 + $0x18] sm:$0xff]  ;;  %s457_s23 = scalar_lea.vmem %s11445_s3, %s7313_s17  ;;  %s7760_s24 = sshll.u32 %s11453_s11, 5 }
   0xf   : > { %8170 = vmatpush3.msra.mxu0 %v511_v1  ;;  %v508_v4 = vld [vmem:[%s451_s16 + $0x10] sm:$0xff]  ;;  %v507_v5 = vld [vmem:[%s451_s16 + $0x8] sm:$0xff]  ;;  %v506_v6 = vld [vmem:[%s451_s16] sm:$0xff]  ;;  %s9662_s27 = scalar_lea.vmem %s11446_s4, %s7760_s24  ;;  %s11457_s28 = smov (!%p473_p5, %s7319_s28), 3 }
  0x10   : > { %8171 = vmatprep.subr.mxu0 %v9506_v0  ;;  %v501_v7 = vld [vmem:[%s445_s20] sm:$0xff]  ;;  %v502_v8 = vld [vmem:[%s445_s20 + $0x8] sm:$0xff]  ;;  %v503_v9 = vld [vmem:[%s445_s20 + $0x10] sm:$0xff]  ;;  %s7325_s29 = sshll.u32 %s11457_s28, 3  ;;  %s7318_s15 = sshll.u32 %s11453_s11, 2 }
  0x11   : > { %8172 = vmatpush3.msra.mxu0 %v510_v2  ;;  %v504_v10 = vld [vmem:[%s445_s20 + $0x18] sm:$0xff]  ;;  %v505_v11 = vld [vmem:[%s445_s20 + $0x20] sm:$0xff]  ;;  %v513_v14 = vld [vmem:[%s457_s23 + $0x8] sm:$0xff]  ;;  %s9676_s14 = scalar_lea.vmem %s11450_s8, %s7325_s29  ;;  %s9771_s18 = scalar_lea.vmem %s11447_s5, %s7318_s15 }
  0x12   : > { %8173 = vmatprep.subr.mxu0 %v9506_v0  ;;  %v514_v18 = vld [vmem:[%s457_s23 + $0x10] sm:$0xff]  ;;  %v512_v20 = vld [vmem:[%s457_s23] sm:$0xff]  ;;  %v515_v24 = vld [vmem:[%s457_s23 + $0x18] sm:$0xff]  ;;  %s7761_s12 = sshll.u32 %s11457_s28, 5  ;;  %s9250_s29 = smul.u32 96, %s11457_s28 }
  0x13   : > { %8174 = vmatpush3.msra.mxu0 %v509_v3  ;;  %v516_v30 = vld [vmem:[%s457_s23 + $0x20] sm:$0xff]  ;;  %s10023_s16 = scalar_lea.vmem %s11448_s6, %s7761_s12  ;;  %s11459_s10 = smov (!%p492_p6, %s9564_s10), 1 }
  0x14   : > { %8175 = vmatprep.subr.mxu0 %v9506_v0  ;;  %v710_v62 = vld [vmem:[%s9662_s27] sm:$0xff]  ;;  %s10503_s15 = scalar_lea.vmem %s11449_s7, %s9250_s29 }
  0x15   : > { %8176 = vmatpush3.msra.mxu0 %v508_v4  ;;  %9249 = vmatpush3.xpose.msk.msra.mxu1 %vm625_vm2, %v710_v62 }
  0x16   : > { %8177 = vmatprep.subr.mxu0 %v9506_v0  ;;  %8213 = vmatprep.subr.mxu1 %v9506_v0 }
  0x17   : > { %8178 = vmatpush3.msra.mxu0 %v507_v5 }
  0x18   : > { %8179 = vmatprep.subr.mxu0 %v9506_v0 }
  0x19   : > { %8180 = vmatpush3.msra.mxu0 %v506_v6 }
  0x1a   : > { %8182 = vmatmul.mubr.msk.f32.vlgmr.msra.gmra.mxu0 %vm517_vm1, %v501_v7  ;;  %8196 = vmatprep.subr.mxu0 %v9506_v0 }
  0x1b   : > { %8184 = vmatprep.mubr.msk.f32.mxu0 %vm9507_vm0, %v9506_v0  ;;  %8197 = vmatpush3.xpose.msk.msra.mxu0 %vm625_vm2, %v710_v62 }
  0x1c   : > { %8230 = vmatprep.subr.mxu0 %v9506_v0 }
  0x1e   : > { %8185 = vmatmul.mubr.msk.f32.gmra.mxu0 %vm517_vm1, %v502_v8 }
  0x1f   : > { %8187 = vmatprep.mubr.msk.f32.mxu0 %vm9507_vm0, %v9506_v0 }
  0x22   : > { %8188 = vmatmul.mubr.msk.f32.gmra.mxu0 %vm517_vm1, %v503_v9 }
  0x23   : > { %8190 = vmatprep.mubr.msk.f32.mxu0 %vm9507_vm0, %v9506_v0 }
  0x26   : > { %8191 = vmatmul.mubr.msk.f32.gmra.mxu0 %vm517_vm1, %v504_v10 }
  0x27   : > { %8193 = vmatprep.mubr.msk.f32.mxu0 %vm9507_vm0, %v9506_v0 }
  0x2a   : > { %8194 = vmatmul.mubr.msk.f32.gmra.mxu0 %vm517_vm1, %v505_v11 }
  0x2b   : > { %8198 = vmatprep.mubr.msk.f32.mxu0 %vm9507_vm0, %v9506_v0 }
  0xda   : > { %v599_v12 = vpop.f32.mrf.mxu0 }
  0xdb   : > { %v9622_v25 = vadd.f32 %v599_v12, %v512_v20 }
  0xdc   : > { %v8183_v13 = vpop.f32.mrf.mxu0 }
  0xdd   : > { %v626_v31 = vsel %vm625_vm2, %v9622_v25, 0.0 }
  0xde   : > { %v604_v15 = vpop.f32.mrf.mxu0 }
  0xdf   : > { %v9616_v16 = vadd.f32 %v604_v15, %v513_v14 }
  0xe0   : > { %v8186_v17 = vpop.f32.mrf.mxu0 }
  0xe1   : > { %v629_v19 = vsel %vm625_vm2, %v9616_v16, 0.0  ;;  %v7332_v17 = vld [vmem:[%s9676_s14] ss:$0 sm:$0xff] }
  0xe2   : > { %630 = vadd.xlane.f32.xlu0 %v629_v19  ;;  %v609_v21 = vpop.f32.mrf.mxu0  ;;  %v7333_v19 = vld [vmem:[%s9676_s14 + $0x1] ss:$0 sm:$0xff] }
  0xe3   : > { %v9620_v22 = vadd.f32 %v609_v21, %v514_v18 }
  0xe4   : > { %v8189_v23 = vpop.f32.mrf.mxu0 }
  0xe5   : > { %v632_v26 = vsel %vm625_vm2, %v9620_v22, 0.0 }
  0xe6   : > { %633 = vadd.xlane.f32.xlu0 %v632_v26  ;;  %v614_v27 = vpop.f32.mrf.mxu0  ;;  %v7341_v26 = vld [vmem:[%s9662_s27 + $0x20] sm:$0xff] }
  0xe7   : > { %v9626_v28 = vadd.f32 %v614_v27, %v515_v24 }
  0xe8   : > { %v8192_v29 = vpop.f32.mrf.mxu0 }
  0xe9   : > { %v635_v32 = vsel %vm625_vm2, %v9626_v28, 0.0 }
  0xea   : > { %627 = vadd.xlane.f32.xlu0 %v626_v31  ;;  %636 = vadd.xlane.f32.xlu1 %v635_v32  ;;  %v619_v33 = vpop.f32.mrf.mxu0 }
  0xeb   : > { %v9632_v34 = vadd.f32 %v619_v33, %v516_v30 }
  0xec   : > { %v8195_v35 = vpop.f32.mrf.mxu0 }
  0xed   : > { %v638_v36 = vsel %vm625_vm2, %v9632_v34, 0.0 }
  0xee   : > { %639 = vadd.xlane.f32.xlu1 %v638_v36 }
 0x16b   : > { %v631_v37 = vpop.xlane.xlu0 %630 }
 0x16c   : > { %v643_v38 = vmul.f32 0.03125, %v631_v37 }
 0x16e   : > { %v648_v39 = vsub.f32 %v9616_v16, %v643_v38 }
 0x16f   : > { %v634_v40 = vpop.xlane.xlu0 %633 }
 0x170   : > { %v644_v41 = vmul.f32 0.03125, %v634_v40  ;;  %v653_v42 = vmul.f32 %v648_v39, %v648_v39 }
 0x172   : > { %v9638_v43 = vsub.f32 %v9620_v22, %v644_v41  ;;  %v660_v44 = vsel %vm625_vm2, %v653_v42, 0.0 }
 0x173   : > { %v628_v45 = vpop.xlane.xlu0 %627  ;;  %v637_v46 = vpop.xlane.xlu1 %636  ;;  %661 = vadd.xlane.f32.xlu1 %v660_v44 }
 0x174   : > { %v642_v47 = vmul.f32 0.03125, %v628_v45  ;;  %v645_v48 = vmul.f32 0.03125, %v637_v46  ;;  %v654_v49 = vmul.f32 %v9638_v43, %v9638_v43 }
 0x176   : > { %v9644_v50 = vsub.f32 %v9622_v25, %v642_v47  ;;  %v650_v51 = vsub.f32 %v9626_v28, %v645_v48  ;;  %v663_v52 = vsel %vm625_vm2, %v654_v49, 0.0 }
 0x177   : > { %664 = vadd.xlane.f32.xlu0 %v663_v52  ;;  %v640_v53 = vpop.xlane.xlu1 %639 }
 0x178   : > { %v646_v54 = vmul.f32 0.03125, %v640_v53  ;;  %v655_v55 = vmul.f32 %v650_v51, %v650_v51  ;;  %v652_v58 = vmul.f32 %v9644_v50, %v9644_v50 }
 0x17a   : > { %v9649_v56 = vsub.f32 %v9632_v34, %v646_v54  ;;  %v666_v57 = vsel %vm625_vm2, %v655_v55, 0.0  ;;  %v657_v60 = vsel %vm625_vm2, %v652_v58, 0.0 }
 0x17b   : > { %667 = vadd.xlane.f32.xlu1 %v666_v57 }
 0x17c   : > { %v656_v59 = vmul.f32 %v9649_v56, %v9649_v56 }
 0x17e   : > { %v669_v61 = vsel %vm625_vm2, %v656_v59, 0.0 }
 0x17f   : > { %658 = vadd.xlane.f32.xlu1 %v657_v60  ;;  %670 = vadd.xlane.f32.xlu0 %v669_v61 }
 0x1fc   : > { %v662_v63 = vpop.xlane.xlu1 %661 }
 0x1fd   : > { %v673_v1 = vmul.f32 0.03125, %v662_v63 }
 0x1ff   : > { %v678_v2 = vadd.f32 1e-06, %v673_v1 }
 0x200   : > { %v665_v3 = vpop.xlane.xlu0 %664 }
 0x201   : > { %9261 = vrsqrt.f32 %v678_v2  ;;  %v674_v4 = vmul.f32 0.03125, %v665_v3 }
 0x203   : > { %v679_v5 = vadd.f32 1e-06, %v674_v4 }
 0x204   : > { %v668_v6 = vpop.xlane.xlu1 %667 }
 0x205   : > { %9263 = vrsqrt.f32 %v679_v5  ;;  %v675_v7 = vmul.f32 0.03125, %v668_v6 }
 0x207   : > { %v680_v8 = vadd.f32 1e-06, %v675_v7  ;;  %v7343_v7 = vld [vmem:[%s9771_s18 + $0x4] ss:$0 sm:$0xff] }
 0x208   : > { %v671_v9 = vpop.xlane.xlu0 %670  ;;  %v659_v10 = vpop.xlane.xlu1 %658 }
 0x209   : > { %9265 = vrsqrt.f32 %v680_v8  ;;  %v676_v11 = vmul.f32 0.03125, %v671_v9  ;;  %v672_v12 = vmul.f32 0.03125, %v659_v10  ;;  %v7352_v9 = vld [vmem:[%s9771_s18 + $0x8] ss:$0 sm:$0xff] }
 0x20b   : > { %v681_v13 = vadd.f32 1e-06, %v676_v11  ;;  %v677_v14 = vadd.f32 1e-06, %v672_v12 }
 0x20d   : > { %9267 = vrsqrt.f32 %v681_v13 }
 0x20e   : > { %v9262_v15 = vpop.eup %9261  ;;  %9269 = vrsqrt.f32 %v677_v14 }
 0x20f   : > { %v688_v18 = vmul.f32 %v9262_v15, %v648_v39 }
 0x211   : > { %v697_v20 = vmul.f32 %v7332_v17, %v688_v18 }
 0x212   : > { %v9264_v21 = vpop.eup %9263 }
 0x213   : > { %v9680_v23 = vadd.f32 %v7333_v19, %v697_v20  ;;  %v689_v24 = vmul.f32 %v9264_v21, %v9638_v43  ;;  %v7350_v43 = vld [vmem:[%s9662_s27 + $0x40] sm:$0xff] }
 0x215   : > { %v698_v27 = vmul.f32 %v7332_v17, %v689_v24  ;;  %8202 = vmatmul.mubr.msk.f32.vlgmr.msra.gmra.mxu1 %vm625_vm2, %v9680_v23 }
 0x216   : > { %v9266_v29 = vpop.eup %9265  ;;  %8214 = vmatpush3.xpose.msk.msra.mxu1 %vm625_vm2, %v7341_v26  ;;  %8204 = vmatprep.mubr.msk.f32.mxu1 %vm9507_vm0, %v9506_v0 }
 0x217   : > { %v9689_v30 = vadd.f32 %v7333_v19, %v698_v27  ;;  %v690_v31 = vmul.f32 %v9266_v29, %v650_v51  ;;  %8247 = vmatprep.subr.mxu1 %v9506_v0  ;;  %v7334_v27 = vld [vmem:[%s9771_s18] ss:$0 sm:$0xff] }
 0x219   : > { %v699_v32 = vmul.f32 %v7332_v17, %v690_v31  ;;  %8205 = vmatmul.mubr.msk.f32.gmra.mxu1 %vm625_vm2, %v9689_v30  ;;  %v7374_v31 = vld [vmem:[%s9662_s27 + $0x8] sm:$0xff] }
 0x21a   : > { %v9268_v33 = vpop.eup %9267  ;;  %8207 = vmatprep.mubr.msk.f32.mxu1 %vm9507_vm0, %v9506_v0 }
 0x21b   : > { %v9270_v35 = vpop.eup %9269  ;;  %v9696_v36 = vadd.f32 %v7333_v19, %v699_v32  ;;  %v691_v37 = vmul.f32 %v9268_v33, %v9649_v56 }
 0x21c   : > { %v687_v38 = vmul.f32 %v9270_v35, %v9644_v50 }
 0x21d   : > { %v700_v39 = vmul.f32 %v7332_v17, %v691_v37  ;;  %8208 = vmatmul.mubr.msk.f32.gmra.mxu1 %vm625_vm2, %v9696_v36 }
 0x21e   : > { %v696_v40 = vmul.f32 %v7332_v17, %v687_v38  ;;  %8210 = vmatprep.mubr.msk.f32.mxu1 %vm9507_vm0, %v9506_v0  ;;  %v7391_v38 = vld [vmem:[%s9662_s27 + $0x48] sm:$0xff] }
 0x21f   : > { %v9704_v41 = vadd.f32 %v7333_v19, %v700_v39 }
 0x220   : > { %v9706_v42 = vadd.f32 %v7333_v19, %v696_v40  ;;  %v9859_v40 = vld [vmem:[%s11442_s0] sm:$0xff] }
 0x221   : > { %8211 = vmatmul.mubr.msk.f32.gmra.mxu1 %vm625_vm2, %v9704_v41 }
 0x222   : > { %8199 = vmatmul.mubr.msk.f32.vlgmr.msra.gmra.mxu0 %vm625_vm2, %v9706_v42  ;;  %8215 = vmatprep.mubr.msk.f32.mxu1 %vm9507_vm0, %v9506_v0 }
 0x223   : > { %8231 = vmatpush3.xpose.msk.msra.mxu0 %vm625_vm2, %v7350_v43  ;;  %8232 = vmatprep.mubr.msk.f32.mxu0 %vm9507_vm0, %v9506_v0 }
 0x224   : > { %8272 = vmatprep.subr.mxu0 %v9506_v0 }
 0x225   : > { %8216 = vmatmul.mubr.msk.f32.vlgmr.msra.gmra.mxu1 %vm625_vm2, %v9706_v42 }
 0x226   : > { %8233 = vmatmul.mubr.msk.f32.vlgmr.msra.gmra.mxu0 %vm625_vm2, %v9706_v42  ;;  %8218 = vmatprep.mubr.msk.f32.mxu1 %vm9507_vm0, %v9506_v0 }
 0x227   : > { %8235 = vmatprep.mubr.msk.f32.mxu0 %vm9507_vm0, %v9506_v0 }
 0x229   : > { %8219 = vmatmul.mubr.msk.f32.gmra.mxu1 %vm625_vm2, %v9680_v23 }
 0x22a   : > { %8236 = vmatmul.mubr.msk.f32.gmra.mxu0 %vm625_vm2, %v9680_v23  ;;  %8221 = vmatprep.mubr.msk.f32.mxu1 %vm9507_vm0, %v9506_v0 }
 0x22b   : > { %8238 = vmatprep.mubr.msk.f32.mxu0 %vm9507_vm0, %v9506_v0 }
 0x22d   : > { %8222 = vmatmul.mubr.msk.f32.gmra.mxu1 %vm625_vm2, %v9689_v30 }
 0x22e   : > { %8239 = vmatmul.mubr.msk.f32.gmra.mxu0 %vm625_vm2, %v9689_v30  ;;  %8224 = vmatprep.mubr.msk.f32.mxu1 %vm9507_vm0, %v9506_v0 }
 0x22f   : > { %8241 = vmatprep.mubr.msk.f32.mxu0 %vm9507_vm0, %v9506_v0 }
 0x231   : > { %8225 = vmatmul.mubr.msk.f32.gmra.mxu1 %vm625_vm2, %v9696_v36 }
 0x232   : > { %8242 = vmatmul.mubr.msk.f32.gmra.mxu0 %vm625_vm2, %v9696_v36  ;;  %8227 = vmatprep.mubr.msk.f32.mxu1 %vm9507_vm0, %v9506_v0 }
 0x233   : > { %8244 = vmatprep.mubr.msk.f32.mxu0 %vm9507_vm0, %v9506_v0 }
 0x235   : > { %8228 = vmatmul.mubr.msk.f32.gmra.mxu1 %vm625_vm2, %v9704_v41 }
 0x236   : > { %8245 = vmatmul.mubr.msk.f32.gmra.mxu0 %vm625_vm2, %v9704_v41  ;;  %8257 = vmatprep.mubr.msk.f32.mxu1 %vm9507_vm0, %v9506_v0 }
 0x237   : > { %8282 = vmatprep.mubr.msk.f32.mxu0 %vm9507_vm0, %v9506_v0 }
 0x2d5   : > { %v9759_v44 = vpop.f32.mrf.mxu1 }
 0x2d6   : > { %v806_v32 = vadd.f32 %v7334_v27, %v9759_v44 }
 0x2d7   : > { %v8203_v45 = vpop.f32.mrf.mxu1 }
 0x2d9   : > { %v9761_v46 = vpop.f32.mrf.mxu1 }
 0x2da   : > { %v811_v33 = vadd.f32 %v7334_v27, %v9761_v46 }
 0x2db   : > { %v8206_v47 = vpop.f32.mrf.mxu1 }
 0x2dc   : > { %v9867_v47 = vld [vmem:[%s11442_s0 + $0x8] sm:$0xff] }
 0x2dd   : > { %v9763_v48 = vpop.f32.mrf.mxu1 }
 0x2de   : > { %v816_v35 = vadd.f32 %v7334_v27, %v9763_v48 }
 0x2df   : > { %v8209_v49 = vpop.f32.mrf.mxu1 }
 0x2e1   : > { %v9765_v50 = vpop.f32.mrf.mxu1 }
 0x2e2   : > { %v800_v51 = vpop.f32.mrf.mxu0  ;;  %v821_v37 = vadd.f32 %v7334_v27, %v9765_v50 }
 0x2e3   : > { %v8212_v52 = vpop.f32.mrf.mxu1  ;;  %v801_v29 = vadd.f32 %v7334_v27, %v800_v51 }
 0x2e4   : > { %v8200_v53 = vpop.f32.mrf.mxu0 }
 0x2e5   : > { %v901_v54 = vpop.f32.mrf.mxu1  ;;  %v9877_v53 = vld [vmem:[%s11442_s0 + $0x10] sm:$0xff] }
 0x2e6   : > { %v1002_v55 = vpop.f32.mrf.mxu0  ;;  %v902_v26 = vadd.f32 %v7343_v7, %v901_v54 }
 0x2e7   : > { %v8217_v56 = vpop.f32.mrf.mxu1  ;;  %v1003_v21 = vadd.f32 %v7352_v9, %v1002_v55 }
 0x2e8   : > { %v8234_v57 = vpop.f32.mrf.mxu0 }
 0x2e9   : > { %v906_v58 = vpop.f32.mrf.mxu1 }
 0x2ea   : > { %v1007_v59 = vpop.f32.mrf.mxu0  ;;  %v907_v24 = vadd.f32 %v7343_v7, %v906_v58 }
 0x2eb   : > { %v8220_v60 = vpop.f32.mrf.mxu1  ;;  %v1008_v19 = vadd.f32 %v7352_v9, %v1007_v59  ;;  %v9887_v59 = vld [vmem:[%s11442_s0 + $0x18] sm:$0xff] }
 0x2ec   : > { %v8237_v61 = vpop.f32.mrf.mxu0 }
 0x2ed   : > { %v911_v62 = vpop.f32.mrf.mxu1 }
 0x2ee   : > { %v1012_v63 = vpop.f32.mrf.mxu0  ;;  %v912_v20 = vadd.f32 %v7343_v7, %v911_v62 }
 0x2ef   : > { %v8223_v1 = vpop.f32.mrf.mxu1  ;;  %v1013_v18 = vadd.f32 %v7352_v9, %v1012_v63 }
 0x2f0   : > { %v8240_v2 = vpop.f32.mrf.mxu0 }
 0x2f1   : > { %v916_v3 = vpop.f32.mrf.mxu1  ;;  %v9895_v2 = vld [vmem:[%s11442_s0 + $0x20] sm:$0xff] }
 0x2f2   : > { %v1017_v4 = vpop.f32.mrf.mxu0  ;;  %v917_v17 = vadd.f32 %v7343_v7, %v916_v3 }
 0x2f3   : > { %v8226_v5 = vpop.f32.mrf.mxu1  ;;  %v1018_v15 = vadd.f32 %v7352_v9, %v1017_v4 }
 0x2f4   : > { %v8243_v6 = vpop.f32.mrf.mxu0 }
 0x2f5   : > { %v921_v8 = vpop.f32.mrf.mxu1 }
 0x2f6   : > { %v922_v10 = vadd.f32 %v7343_v7, %v921_v8  ;;  %v1022_v11 = vpop.f32.mrf.mxu0 }
 0x2f7   : > { %v1023_v12 = vadd.f32 %v7352_v9, %v1022_v11  ;;  %v8229_v13 = vpop.f32.mrf.mxu1 }
 0x2f8   : > { %v8246_v14 = vpop.f32.mrf.mxu0  ;;  %8248 = vmatpush3.xpose.msk.msra.mxu1 %vm1026_vm3, %v922_v10 }
 0x2f9   : > { %8273 = vmatpush3.msra.mxu0 %v1023_v12  ;;  %8249 = vmatprep.subr.mxu1 %v9506_v0 }
 0x2fa   : > { %8274 = vmatprep.subr.mxu0 %v9506_v0 }
 0x2fb   : > { %8275 = vmatpush3.msra.mxu0 %v1018_v15 }
 0x2fc   : > { %8276 = vmatprep.subr.mxu0 %v9506_v0  ;;  %8250 = vmatpush3.xpose.msk.msra.mxu1 %vm1026_vm3, %v917_v17 }
 0x2fd   : > { %8277 = vmatpush3.msra.mxu0 %v1013_v18  ;;  %8251 = vmatprep.subr.mxu1 %v9506_v0 }
 0x2fe   : > { %8278 = vmatprep.subr.mxu0 %v9506_v0 }
 0x2ff   : > { %8279 = vmatpush3.msra.mxu0 %v1008_v19 }
 0x300   : > { %8280 = vmatprep.subr.mxu0 %v9506_v0  ;;  %8252 = vmatpush3.xpose.msk.msra.mxu1 %vm1026_vm3, %v912_v20 }
 0x301   : > { %8281 = vmatpush3.msra.mxu0 %v1003_v21  ;;  %8253 = vmatprep.subr.mxu1 %v9506_v0 }
 0x302   : > { %8314 = vmatprep.subr.mxu0 %v9506_v0 }
 0x304   : > { %8254 = vmatpush3.xpose.msk.msra.mxu1 %vm1026_vm3, %v907_v24 }
 0x305   : > { %8255 = vmatprep.subr.mxu1 %v9506_v0 }
 0x308   : > { %8256 = vmatpush3.xpose.msk.msra.mxu1 %vm1026_vm3, %v902_v26 }
 0x309   : > { %8297 = vmatprep.subr.mxu1 %v9506_v0 }
 0x30b   : > { %8258 = vmatmul.mubr.msk.f32.vlgmr.msra.gmra.mxu1 %vm1026_vm3, %v801_v29 }
 0x30c   : > { %8260 = vmatprep.mubr.msk.f32.mxu1 %vm9507_vm0, %v9506_v0  ;;  %8298 = vmatpush3.xpose.msk.msra.mxu1 %vm625_vm2, %v7374_v31 }
 0x30d   : > { %8331 = vmatprep.subr.mxu1 %v9506_v0 }
 0x30f   : > { %8261 = vmatmul.mubr.msk.f32.gmra.mxu1 %vm1026_vm3, %v806_v32  ;;  %v7393_v32 = vld [vmem:[%s9771_s18 + $0x9] ss:$0 sm:$0xff] }
 0x310   : > { %8263 = vmatprep.mubr.msk.f32.mxu1 %vm9507_vm0, %v9506_v0 }
 0x313   : > { %8264 = vmatmul.mubr.msk.f32.gmra.mxu1 %vm1026_vm3, %v811_v33 }
 0x314   : > { %8266 = vmatprep.mubr.msk.f32.mxu1 %vm9507_vm0, %v9506_v0 }
 0x317   : > { %8267 = vmatmul.mubr.msk.f32.gmra.mxu1 %vm1026_vm3, %v816_v35 }
 0x318   : > { %8269 = vmatprep.mubr.msk.f32.mxu1 %vm9507_vm0, %v9506_v0 }
 0x31b   : > { %8270 = vmatmul.mubr.msk.f32.gmra.mxu1 %vm1026_vm3, %v821_v37 }
 0x31c   : > { %8299 = vmatprep.mubr.msk.f32.mxu1 %vm9507_vm0, %v9506_v0 }
 0x31f   : > { %8300 = vmatmul.mubr.msk.f32.vlgmr.msra.gmra.mxu1 %vm625_vm2, %v9706_v42 }
 0x320   : > { %8302 = vmatprep.mubr.msk.f32.mxu1 %vm9507_vm0, %v9506_v0  ;;  %8332 = vmatpush3.xpose.msk.msra.mxu1 %vm625_vm2, %v7391_v38 }
 0x321   : > { %8373 = vmatprep.subr.mxu1 %v9506_v0 }
 0x323   : > { %8303 = vmatmul.mubr.msk.f32.gmra.mxu1 %vm625_vm2, %v9680_v23 }
 0x324   : > { %8305 = vmatprep.mubr.msk.f32.mxu1 %vm9507_vm0, %v9506_v0 }
 0x327   : > { %8306 = vmatmul.mubr.msk.f32.gmra.mxu1 %vm625_vm2, %v9689_v30 }
 0x328   : > { %8308 = vmatprep.mubr.msk.f32.mxu1 %vm9507_vm0, %v9506_v0 }
 0x32b   : > { %8309 = vmatmul.mubr.msk.f32.gmra.mxu1 %vm625_vm2, %v9696_v36 }
 0x32c   : > { %8311 = vmatprep.mubr.msk.f32.mxu1 %vm9507_vm0, %v9506_v0 }
 0x32f   : > { %8312 = vmatmul.mubr.msk.f32.gmra.mxu1 %vm625_vm2, %v9704_v41 }
 0x330   : > { %8333 = vmatprep.mubr.msk.f32.mxu1 %vm9507_vm0, %v9506_v0 }
 0x333   : > { %8334 = vmatmul.mubr.msk.f32.vlgmr.msra.gmra.mxu1 %vm625_vm2, %v9706_v42 }
 0x334   : > { %8336 = vmatprep.mubr.msk.f32.mxu1 %vm9507_vm0, %v9506_v0 }
 0x337   : > { %8337 = vmatmul.mubr.msk.f32.gmra.mxu1 %vm625_vm2, %v9680_v23 }
 0x338   : > { %8339 = vmatprep.mubr.msk.f32.mxu1 %vm9507_vm0, %v9506_v0 }
 0x33b   : > { %8340 = vmatmul.mubr.msk.f32.gmra.mxu1 %vm625_vm2, %v9689_v30 }
 0x33c   : > { %8342 = vmatprep.mubr.msk.f32.mxu1 %vm9507_vm0, %v9506_v0 }
 0x33f   : > { %8343 = vmatmul.mubr.msk.f32.gmra.mxu1 %vm625_vm2, %v9696_v36 }
 0x340   : > { %8345 = vmatprep.mubr.msk.f32.mxu1 %vm9507_vm0, %v9506_v0 }
 0x343   : > { %8346 = vmatmul.mubr.msk.f32.gmra.mxu1 %vm625_vm2, %v9704_v41 }
 0x344   : > { %8383 = vmatprep.mubr.msk.f32.mxu1 %vm9507_vm0, %v9506_v0 }
 0x3cb   : > { %v1123_v39 = vpop.f32.mrf.mxu1 }
 0x3cc   : > { %v1147_v43 = vmul.f32 0.35355338, %v1123_v39 }
 0x3cd   : > { %v8259_v44 = vpop.f32.mrf.mxu1 }
 0x3ce   : > { %v9862_v45 = vadd.f32 %v1147_v43, %v9859_v40 }
 0x3cf   : > { %v1128_v46 = vpop.f32.mrf.mxu1 }
 0x3d0   : > { %v1148_v48 = vmul.f32 0.35355338, %v1128_v46  ;;  %v1158_v49 = vsel %vm1157_vm4, %v9862_v45, -inf }
 0x3d1   : > { %1159 = vmax.xlane.f32.xlu0 %v1158_v49  ;;  %v8262_v50 = vpop.f32.mrf.mxu1 }
 0x3d2   : > { %v9872_v51 = vadd.f32 %v1148_v48, %v9867_v47 }
 0x3d3   : > { %v1133_v52 = vpop.f32.mrf.mxu1 }
 0x3d4   : > { %v1149_v54 = vmul.f32 0.35355338, %v1133_v52  ;;  %v1161_v55 = vsel %vm1157_vm4, %v9872_v51, -inf }
 0x3d5   : > { %1162 = vmax.xlane.f32.xlu1 %v1161_v55  ;;  %v8265_v56 = vpop.f32.mrf.mxu1 }
 0x3d6   : > { %v9882_v57 = vadd.f32 %v1149_v54, %v9877_v53 }
 0x3d7   : > { %v1138_v58 = vpop.f32.mrf.mxu1 }
 0x3d8   : > { %v1150_v60 = vmul.f32 0.35355338, %v1138_v58  ;;  %v1164_v61 = vsel %vm1157_vm4, %v9882_v57, -inf }
 0x3d9   : > { %1165 = vmax.xlane.f32.xlu0 %v1164_v61  ;;  %v8268_v62 = vpop.f32.mrf.mxu1 }
 0x3da   : > { %v1155_v63 = vadd.f32 %v1150_v60, %v9887_v59 }
 0x3db   : > { %v1143_v1 = vpop.f32.mrf.mxu1 }
 0x3dc   : > { %v1151_v3 = vmul.f32 0.35355338, %v1143_v1  ;;  %v1167_v4 = vsel %vm1157_vm4, %v1155_v63, -inf }
 0x3dd   : > { %1168 = vmax.xlane.f32.xlu1 %v1167_v4  ;;  %v8271_v5 = vpop.f32.mrf.mxu1 }
 0x3de   : > { %v1156_v6 = vadd.f32 %v1151_v3, %v9895_v2 }
 0x3df   : > { %v9899_v7 = vpop.f32.mrf.mxu1 }
 0x3e0   : > { %v1170_v8 = vsel %vm1157_vm4, %v1156_v6, -inf }
 0x3e1   : > { %1171 = vmax.xlane.f32.xlu0 %v1170_v8  ;;  %v8301_v9 = vpop.f32.mrf.mxu1 }
 0x3e3   : > { %v9902_v10 = vpop.f32.mrf.mxu1 }
 0x3e5   : > { %v8304_v11 = vpop.f32.mrf.mxu1 }
 0x3e7   : > { %v9904_v12 = vpop.f32.mrf.mxu1 }
 0x3e9   : > { %v8307_v13 = vpop.f32.mrf.mxu1 }
 0x3eb   : > { %v9906_v14 = vpop.f32.mrf.mxu1 }
 0x3ed   : > { %v8310_v15 = vpop.f32.mrf.mxu1 }
 0x3ef   : > { %v9908_v17 = vpop.f32.mrf.mxu1 }
 0x3f1   : > { %v8313_v18 = vpop.f32.mrf.mxu1 }
 0x3f3   : > { %v1595_v19 = vpop.f32.mrf.mxu1 }
 0x3f4   : > { %v1596_v44 = vadd.f32 %v7393_v32, %v1595_v19 }
 0x3f5   : > { %v8335_v20 = vpop.f32.mrf.mxu1 }
 0x3f7   : > { %v1600_v21 = vpop.f32.mrf.mxu1 }
 0x3f8   : > { %v1601_v43 = vadd.f32 %v7393_v32, %v1600_v21 }
 0x3f9   : > { %v8338_v24 = vpop.f32.mrf.mxu1 }
 0x3fb   : > { %v1605_v26 = vpop.f32.mrf.mxu1 }
 0x3fc   : > { %v1606_v39 = vadd.f32 %v7393_v32, %v1605_v26  ;;  %v7382_v26 = vld [vmem:[%s9662_s27 + $0x28] sm:$0xff] }
 0x3fd   : > { %v8341_v27 = vpop.f32.mrf.mxu1 }
 0x3ff   : > { %v1610_v29 = vpop.f32.mrf.mxu1 }
 0x400   : > { %v1611_v38 = vadd.f32 %v7393_v32, %v1610_v29 }
 0x401   : > { %v8344_v31 = vpop.f32.mrf.mxu1 }
 0x403   : > { %v1615_v33 = vpop.f32.mrf.mxu1 }
 0x404   : > { %v1616_v35 = vadd.f32 %v7393_v32, %v1615_v33 }
 0x405   : > { %v8347_v37 = vpop.f32.mrf.mxu1 }
 0x406   : > { %8374 = vmatpush3.msra.mxu1 %v1616_v35 }
 0x407   : > { %8375 = vmatprep.subr.mxu1 %v9506_v0 }
 0x408   : > { %8376 = vmatpush3.msra.mxu1 %v1611_v38 }
 0x409   : > { %8377 = vmatprep.subr.mxu1 %v9506_v0 }
 0x40a   : > { %8378 = vmatpush3.msra.mxu1 %v1606_v39 }
 0x40b   : > { %8379 = vmatprep.subr.mxu1 %v9506_v0 }
 0x40c   : > { %8380 = vmatpush3.msra.mxu1 %v1601_v43 }
 0x40d   : > { %8381 = vmatprep.subr.mxu1 %v9506_v0 }
 0x40e   : > { %8382 = vmatpush3.msra.mxu1 %v1596_v44 }
 0x40f   : > { %8415 = vmatprep.subr.mxu1 %v9506_v0 }
 0x45a   : > { %v1160_v46 = vpop.xlane.xlu0 %1159 }
 0x45b   : > { %v1173_v48 = vsub.f32 %v9862_v45, %v1160_v46 }
 0x45d   : > { %v1178_v49 = vmul.f32 1.442695, %v1173_v48 }
 0x45e   : > { %v1163_v50 = vpop.xlane.xlu1 %1162 }
 0x45f   : > { %9271 = vpow2.f32 %v1178_v49  ;;  %v1174_v52 = vsub.f32 %v9872_v51, %v1163_v50 }
 0x461   : > { %v1180_v54 = vmul.f32 1.442695, %v1174_v52 }
 0x462   : > { %v1166_v55 = vpop.xlane.xlu0 %1165 }
 0x463   : > { %9273 = vpow2.f32 %v1180_v54  ;;  %v1175_v56 = vsub.f32 %v9882_v57, %v1166_v55 }
 0x465   : > { %v1182_v58 = vmul.f32 1.442695, %v1175_v56 }
 0x466   : > { %v1169_v60 = vpop.xlane.xlu1 %1168 }
 0x467   : > { %9275 = vpow2.f32 %v1182_v58  ;;  %v1176_v61 = vsub.f32 %v1155_v63, %v1169_v60 }
 0x469   : > { %v1184_v62 = vmul.f32 1.442695, %v1176_v61 }
 0x46a   : > { %v1172_v1 = vpop.xlane.xlu0 %1171 }
 0x46b   : > { %9277 = vpow2.f32 %v1184_v62  ;;  %v1177_v3 = vsub.f32 %v1156_v6, %v1172_v1 }
 0x46c   : > { %v9272_v4 = vpop.eup %9271 }
 0x46d   : > { %v1186_v45 = vmul.f32 1.442695, %v1177_v3  ;;  %v1188_v5 = vsel %vm1157_vm4, %v9272_v4, 0.0 }
 0x46e   : > { %1189 = vadd.xlane.f32.xlu1 %v1188_v5  ;;  %v7384_v5 = vld [vmem:[%s9771_s18 + $0x5] ss:$0 sm:$0xff] }
 0x46f   : > { %9279 = vpow2.f32 %v1186_v45 }
 0x470   : > { %v9274_v51 = vpop.eup %9273 }
 0x471   : > { %v1191_v8 = vsel %vm1157_vm4, %v9274_v51, 0.0 }
 0x472   : > { %1192 = vadd.xlane.f32.xlu0 %v1191_v8 }
 0x474   : > { %v9276_v9 = vpop.eup %9275 }
 0x475   : > { %v1194_v57 = vsel %vm1157_vm4, %v9276_v9, 0.0 }
 0x476   : > { %1195 = vadd.xlane.f32.xlu1 %v1194_v57 }
 0x478   : > { %v9278_v11 = vpop.eup %9277 }
 0x479   : > { %v1197_v63 = vsel %vm1157_vm4, %v9278_v11, 0.0 }
 0x47a   : > { %1198 = vadd.xlane.f32.xlu0 %v1197_v63 }
 0x47c   : > { %v9280_v6 = vpop.eup %9279 }
 0x47d   : > { %v1200_v13 = vsel %vm1157_vm4, %v9280_v6, 0.0 }
 0x47e   : > { %1201 = vadd.xlane.f32.xlu1 %v1200_v13 }
 0x4f7   : > { %v1190_v15 = vpop.xlane.xlu1 %1189 }
 0x4f8   : > { %9281 = vrcp.f32 %v1190_v15 }
 0x4fb   : > { %v1193_v18 = vpop.xlane.xlu0 %1192 }
 0x4fc   : > { %9283 = vrcp.f32 %v1193_v18 }
 0x4ff   : > { %v1196_v19 = vpop.xlane.xlu1 %1195 }
 0x500   : > { %9285 = vrcp.f32 %v1196_v19 }
 0x503   : > { %v1199_v20 = vpop.xlane.xlu0 %1198 }
 0x504   : > { %9287 = vrcp.f32 %v1199_v20 }
 0x505   : > { %v9282_v21 = vpop.eup %9281 }
 0x506   : > { %v1208_v24 = vmul.f32 %v9282_v21, %v9272_v4 }
 0x507   : > { %v1202_v27 = vpop.xlane.xlu1 %1201 }
 0x508   : > { %9289 = vrcp.f32 %v1202_v27  ;;  %8283 = vmatmul.mubr.msk.f32.vlgmr.msra.gmra.mxu0 %vm1157_vm4, %v1208_v24 }
 0x509   : > { %v9284_v29 = vpop.eup %9283  ;;  %8315 = vmatpush3.xpose.msk.msra.mxu0 %vm625_vm2, %v7382_v26  ;;  %8285 = vmatprep.mubr.msk.f32.mxu0 %vm9507_vm0, %v9506_v0 }
 0x50a   : > { %v1209_v31 = vmul.f32 %v9284_v29, %v9274_v51  ;;  %8348 = vmatprep.subr.mxu0 %v9506_v0 }
 0x50c   : > { %8286 = vmatmul.mubr.msk.f32.gmra.mxu0 %vm1157_vm4, %v1209_v31 }
 0x50d   : > { %v9286_v32 = vpop.eup %9285  ;;  %8288 = vmatprep.mubr.msk.f32.mxu0 %vm9507_vm0, %v9506_v0 }
 0x50e   : > { %v1210_v33 = vmul.f32 %v9286_v32, %v9276_v9 }
 0x510   : > { %8289 = vmatmul.mubr.msk.f32.gmra.mxu0 %vm1157_vm4, %v1210_v33 }
 0x511   : > { %v9288_v35 = vpop.eup %9287  ;;  %8291 = vmatprep.mubr.msk.f32.mxu0 %vm9507_vm0, %v9506_v0 }
 0x512   : > { %v1211_v37 = vmul.f32 %v9288_v35, %v9278_v11 }
 0x514   : > { %8292 = vmatmul.mubr.msk.f32.gmra.mxu0 %vm1157_vm4, %v1211_v37 }
 0x515   : > { %v9290_v38 = vpop.eup %9289  ;;  %8294 = vmatprep.mubr.msk.f32.mxu0 %vm9507_vm0, %v9506_v0 }
 0x516   : > { %v1212_v39 = vmul.f32 %v9290_v38, %v9280_v6  ;;  %v7375_v6 = vld [vmem:[%s9771_s18 + $0x1] ss:$0 sm:$0xff] }
 0x517   : > { %v1396_v15 = vadd.f32 %v7375_v6, %v9899_v7  ;;  %v1401_v18 = vadd.f32 %v7375_v6, %v9902_v10  ;;  %v1406_v19 = vadd.f32 %v7375_v6, %v9904_v12  ;;  %v1411_v7 = vadd.f32 %v7375_v6, %v9906_v14 }
 0x518   : > { %8295 = vmatmul.mubr.msk.f32.gmra.mxu0 %vm1157_vm4, %v1212_v39  ;;  %v1416_v10 = vadd.f32 %v7375_v6, %v9908_v17 }
 0x519   : > { %8316 = vmatprep.mubr.msk.f32.mxu0 %vm9507_vm0, %v9506_v0 }
 0x51c   : > { %8317 = vmatmul.mubr.msk.f32.vlgmr.msra.gmra.mxu0 %vm625_vm2, %v9706_v42 }
 0x51d   : > { %8319 = vmatprep.mubr.msk.f32.mxu0 %vm9507_vm0, %v9506_v0 }
 0x520   : > { %8320 = vmatmul.mubr.msk.f32.gmra.mxu0 %vm625_vm2, %v9680_v23 }
 0x521   : > { %8322 = vmatprep.mubr.msk.f32.mxu0 %vm9507_vm0, %v9506_v0 }
 0x524   : > { %8323 = vmatmul.mubr.msk.f32.gmra.mxu0 %vm625_vm2, %v9689_v30 }
 0x525   : > { %8325 = vmatprep.mubr.msk.f32.mxu0 %vm9507_vm0, %v9506_v0 }
 0x528   : > { %8326 = vmatmul.mubr.msk.f32.gmra.mxu0 %vm625_vm2, %v9696_v36 }
 0x529   : > { %8328 = vmatprep.mubr.msk.f32.mxu0 %vm9507_vm0, %v9506_v0 }
 0x52c   : > { %8329 = vmatmul.mubr.msk.f32.gmra.mxu0 %vm625_vm2, %v9704_v41 }
 0x52d   : > { %8358 = vmatprep.mubr.msk.f32.mxu0 %vm9507_vm0, %v9506_v0 }
 0x5c8   : > { %v9962_v43 = vpop.f32.mrf.mxu0 }
 0x5ca   : > { %v8284_v44 = vpop.f32.mrf.mxu0 }
 0x5cc   : > { %v9964_v46 = vpop.f32.mrf.mxu0 }
 0x5ce   : > { %v8287_v48 = vpop.f32.mrf.mxu0 }
 0x5d0   : > { %v9966_v49 = vpop.f32.mrf.mxu0 }
 0x5d2   : > { %v8290_v50 = vpop.f32.mrf.mxu0 }
 0x5d4   : > { %v9968_v52 = vpop.f32.mrf.mxu0 }
 0x5d6   : > { %v8293_v54 = vpop.f32.mrf.mxu0 }
 0x5d8   : > { %v9970_v55 = vpop.f32.mrf.mxu0 }
 0x5da   : > { %v8296_v56 = vpop.f32.mrf.mxu0 }
 0x5dc   : > { %v1495_v58 = vpop.f32.mrf.mxu0 }
 0x5dd   : > { %v1496_v13 = vadd.f32 %v7384_v5, %v1495_v58 }
 0x5de   : > { %v8318_v60 = vpop.f32.mrf.mxu0 }
 0x5e0   : > { %v1500_v61 = vpop.f32.mrf.mxu0 }
 0x5e1   : > { %v1501_v63 = vadd.f32 %v7384_v5, %v1500_v61 }
 0x5e2   : > { %v8321_v62 = vpop.f32.mrf.mxu0 }
 0x5e4   : > { %v1505_v1 = vpop.f32.mrf.mxu0 }
 0x5e5   : > { %v1506_v11 = vadd.f32 %v7384_v5, %v1505_v1 }
 0x5e6   : > { %v8324_v3 = vpop.f32.mrf.mxu0 }
 0x5e8   : > { %v1510_v4 = vpop.f32.mrf.mxu0 }
 0x5e9   : > { %v1511_v57 = vadd.f32 %v7384_v5, %v1510_v4 }
 0x5ea   : > { %v8327_v45 = vpop.f32.mrf.mxu0 }
 0x5ec   : > { %v1515_v51 = vpop.f32.mrf.mxu0 }
 0x5ed   : > { %v1516_v8 = vadd.f32 %v7384_v5, %v1515_v51 }
 0x5ee   : > { %v8330_v9 = vpop.f32.mrf.mxu0 }
 0x5ef   : > { %8349 = vmatpush3.xpose.msk.msra.mxu0 %vm1026_vm3, %v1516_v8 }
 0x5f0   : > { %8350 = vmatprep.subr.mxu0 %v9506_v0 }
 0x5f3   : > { %8351 = vmatpush3.xpose.msk.msra.mxu0 %vm1026_vm3, %v1511_v57 }
 0x5f4   : > { %8352 = vmatprep.subr.mxu0 %v9506_v0 }
 0x5f7   : > { %8353 = vmatpush3.xpose.msk.msra.mxu0 %vm1026_vm3, %v1506_v11 }
 0x5f8   : > { %8354 = vmatprep.subr.mxu0 %v9506_v0 }
 0x5fb   : > { %8355 = vmatpush3.xpose.msk.msra.mxu0 %vm1026_vm3, %v1501_v63 }
 0x5fc   : > { %8356 = vmatprep.subr.mxu0 %v9506_v0 }
 0x5ff   : > { %8357 = vmatpush3.xpose.msk.msra.mxu0 %vm1026_vm3, %v1496_v13 }
 0x600   : > { %8398 = vmatprep.subr.mxu0 %v9506_v0 }
 0x602   : > { %8359 = vmatmul.mubr.msk.f32.vlgmr.msra.gmra.mxu0 %vm1026_vm3, %v1396_v15 }
 0x603   : > { %8361 = vmatprep.mubr.msk.f32.mxu0 %vm9507_vm0, %v9506_v0 }
 0x606   : > { %8362 = vmatmul.mubr.msk.f32.gmra.mxu0 %vm1026_vm3, %v1401_v18 }
 0x607   : > { %8364 = vmatprep.mubr.msk.f32.mxu0 %vm9507_vm0, %v9506_v0 }
 0x60a   : > { %8365 = vmatmul.mubr.msk.f32.gmra.mxu0 %vm1026_vm3, %v1406_v19 }
 0x60b   : > { %8367 = vmatprep.mubr.msk.f32.mxu0 %vm9507_vm0, %v9506_v0 }
 0x60e   : > { %8368 = vmatmul.mubr.msk.f32.gmra.mxu0 %vm1026_vm3, %v1411_v7 }
 0x60f   : > { %8370 = vmatprep.mubr.msk.f32.mxu0 %vm9507_vm0, %v9506_v0 }
 0x612   : > { %8371 = vmatmul.mubr.msk.f32.gmra.mxu0 %vm1026_vm3, %v1416_v10 }
 0x613   : > { %8400 = vmatprep.mubr.msk.f32.mxu0 %vm9507_vm0, %v9506_v0 }
 0x6c2   : > { %v1715_v12 = vpop.f32.mrf.mxu0 }
 0x6c3   : > { %v1739_v20 = vmul.f32 0.35355338, %v1715_v12 }
 0x6c4   : > { %v8360_v21 = vpop.f32.mrf.mxu0 }
 0x6c5   : > { %v1744_v24 = vadd.f32 %v1739_v20, %v9859_v40 }
 0x6c6   : > { %v1720_v26 = vpop.f32.mrf.mxu0 }
 0x6c7   : > { %v1740_v27 = vmul.f32 0.35355338, %v1720_v26  ;;  %v1749_v14 = vsel %vm1157_vm4, %v1744_v24, -inf }
 0x6c8   : > { %1750 = vmax.xlane.f32.xlu0 %v1749_v14  ;;  %v8363_v29 = vpop.f32.mrf.mxu0 }
 0x6c9   : > { %v1745_v31 = vadd.f32 %v1740_v27, %v9867_v47  ;;  %v7415_v29 = vld [vmem:[%s10023_s16 + $0x8] sm:$0xff] }
 0x6ca   : > { %v1725_v32 = vpop.f32.mrf.mxu0  ;;  %8399 = vmatpush3.msra.mxu0 %v7415_v29  ;;  %v7436_v29 = vld [vmem:[%s9771_s18 + $0x6] ss:$0 sm:$0xff] }
 0x6cb   : > { %v1741_v17 = vmul.f32 0.35355338, %v1725_v32  ;;  %v1752_v33 = vsel %vm1157_vm4, %v1745_v31, -inf  ;;  %8432 = vmatprep.subr.mxu0 %v9506_v0 }
 0x6cc   : > { %1753 = vmax.xlane.f32.xlu1 %v1752_v33  ;;  %v8366_v35 = vpop.f32.mrf.mxu0 }
 0x6cd   : > { %v1746_v37 = vadd.f32 %v1741_v17, %v9877_v53 }
 0x6ce   : > { %v1730_v38 = vpop.f32.mrf.mxu0 }
 0x6cf   : > { %v1742_v39 = vmul.f32 0.35355338, %v1730_v38  ;;  %v1755_v44 = vsel %vm1157_vm4, %v1746_v37, -inf  ;;  %v1318_v38 = vld [vmem:[%s10023_s16] sm:$0xff] }
 0x6d0   : > { %1756 = vmax.xlane.f32.xlu0 %v1755_v44  ;;  %v8369_v48 = vpop.f32.mrf.mxu0 }
 0x6d1   : > { %v1747_v50 = vadd.f32 %v1742_v39, %v9887_v59 }
 0x6d2   : > { %v1735_v54 = vpop.f32.mrf.mxu0 }
 0x6d3   : > { %v1743_v56 = vmul.f32 0.35355338, %v1735_v54  ;;  %v1758_v58 = vsel %vm1157_vm4, %v1747_v50, -inf }
 0x6d4   : > { %1759 = vmax.xlane.f32.xlu1 %v1758_v58  ;;  %v8372_v60 = vpop.f32.mrf.mxu0 }
 0x6d5   : > { %v1748_v61 = vadd.f32 %v1743_v56, %v9895_v2 }
 0x6d7   : > { %v1761_v62 = vsel %vm1157_vm4, %v1748_v61, -inf }
 0x6d8   : > { %1762 = vmax.xlane.f32.xlu0 %v1761_v62  ;;  %v7434_v62 = vld [vmem:[%s9662_s27 + $0x30] sm:$0xff] }
 0x751   : > { %v1751_v1 = vpop.xlane.xlu0 %1750 }
 0x752   : > { %v1764_v3 = vsub.f32 %v1744_v24, %v1751_v1 }
 0x754   : > { %v1769_v4 = vmul.f32 1.442695, %v1764_v3 }
 0x755   : > { %v1754_v45 = vpop.xlane.xlu1 %1753 }
 0x756   : > { %9291 = vpow2.f32 %v1769_v4  ;;  %v1765_v5 = vsub.f32 %v1745_v31, %v1754_v45 }
 0x758   : > { %v1771_v51 = vmul.f32 1.442695, %v1765_v5 }
 0x759   : > { %v1757_v8 = vpop.xlane.xlu0 %1756 }
 0x75a   : > { %9293 = vpow2.f32 %v1771_v51  ;;  %v1766_v9 = vsub.f32 %v1746_v37, %v1757_v8  ;;  %v7443_v8 = vld [vmem:[%s9662_s27 + $0x50] sm:$0xff] }
 0x75c   : > { %v1773_v57 = vmul.f32 1.442695, %v1766_v9 }
 0x75d   : > { %v1760_v11 = vpop.xlane.xlu1 %1759 }
 0x75e   : > { %9295 = vpow2.f32 %v1773_v57  ;;  %v1767_v63 = vsub.f32 %v1747_v50, %v1760_v11 }
 0x760   : > { %v1775_v6 = vmul.f32 1.442695, %v1767_v63 }
 0x761   : > { %v1763_v13 = vpop.xlane.xlu0 %1762 }
 0x762   : > { %9297 = vpow2.f32 %v1775_v6  ;;  %v1768_v15 = vsub.f32 %v1748_v61, %v1763_v13 }
 0x763   : > { %v9292_v18 = vpop.eup %9291 }
 0x764   : > { %v1777_v19 = vmul.f32 1.442695, %v1768_v15  ;;  %v1779_v7 = vsel %vm1157_vm4, %v9292_v18, 0.0 }
 0x765   : > { %1780 = vadd.xlane.f32.xlu1 %v1779_v7 }
 0x766   : > { %9299 = vpow2.f32 %v1777_v19 }
 0x767   : > { %v9294_v10 = vpop.eup %9293 }
 0x768   : > { %v1782_v12 = vsel %vm1157_vm4, %v9294_v10, 0.0 }
 0x769   : > { %1783 = vadd.xlane.f32.xlu0 %v1782_v12 }
 0x76b   : > { %v9296_v20 = vpop.eup %9295 }
 0x76c   : > { %v1785_v21 = vsel %vm1157_vm4, %v9296_v20, 0.0 }
 0x76d   : > { %1786 = vadd.xlane.f32.xlu1 %v1785_v21 }
 0x76f   : > { %v9298_v24 = vpop.eup %9297 }
 0x770   : > { %v1788_v26 = vsel %vm1157_vm4, %v9298_v24, 0.0 }
 0x771   : > { %1789 = vadd.xlane.f32.xlu0 %v1788_v26 }
 0x773   : > { %v9300_v27 = vpop.eup %9299 }
 0x774   : > { %v1791_v14 = vsel %vm1157_vm4, %v9300_v27, 0.0 }
 0x775   : > { %1792 = vadd.xlane.f32.xlu1 %v1791_v14 }
 0x7ee   : > { %v1781_v31 = vpop.xlane.xlu1 %1780 }
 0x7ef   : > { %9301 = vrcp.f32 %v1781_v31 }
 0x7f2   : > { %v1784_v32 = vpop.xlane.xlu0 %1783 }
 0x7f3   : > { %9303 = vrcp.f32 %v1784_v32 }
 0x7f6   : > { %v1787_v17 = vpop.xlane.xlu1 %1786 }
 0x7f7   : > { %9305 = vrcp.f32 %v1787_v17 }
 0x7fa   : > { %v1790_v33 = vpop.xlane.xlu0 %1789 }
 0x7fb   : > { %9307 = vrcp.f32 %v1790_v33 }
 0x7fc   : > { %v9302_v35 = vpop.eup %9301 }
 0x7fd   : > { %v1799_v37 = vmul.f32 %v9302_v35, %v9292_v18 }
 0x7fe   : > { %v1793_v39 = vpop.xlane.xlu1 %1792 }
 0x7ff   : > { %9309 = vrcp.f32 %v1793_v39  ;;  %8384 = vmatmul.mubr.msk.f32.vlgmr.msra.gmra.mxu1 %vm1157_vm4, %v1799_v37 }
 0x800   : > { %v9304_v44 = vpop.eup %9303  ;;  %8386 = vmatprep.mubr.msk.f32.mxu1 %vm9507_vm0, %v9506_v0  ;;  %8416 = vmatpush3.msra.mxu1 %v1318_v38 }
 0x801   : > { %v1800_v48 = vmul.f32 %v9304_v44, %v9294_v10  ;;  %8449 = vmatprep.subr.mxu1 %v9506_v0 }
 0x803   : > { %8387 = vmatmul.mubr.msk.f32.gmra.mxu1 %vm1157_vm4, %v1800_v48 }
 0x804   : > { %v9306_v50 = vpop.eup %9305  ;;  %8389 = vmatprep.mubr.msk.f32.mxu1 %vm9507_vm0, %v9506_v0 }
 0x805   : > { %v1801_v54 = vmul.f32 %v9306_v50, %v9296_v20 }
 0x807   : > { %8390 = vmatmul.mubr.msk.f32.gmra.mxu1 %vm1157_vm4, %v1801_v54 }
 0x808   : > { %v9308_v56 = vpop.eup %9307  ;;  %8392 = vmatprep.mubr.msk.f32.mxu1 %vm9507_vm0, %v9506_v0 }
 0x809   : > { %v1802_v58 = vmul.f32 %v9308_v56, %v9298_v24 }
 0x80b   : > { %8393 = vmatmul.mubr.msk.f32.gmra.mxu1 %vm1157_vm4, %v1802_v58 }
 0x80c   : > { %v9310_v60 = vpop.eup %9309  ;;  %8395 = vmatprep.mubr.msk.f32.mxu1 %vm9507_vm0, %v9506_v0 }
 0x80d   : > { %v1803_v61 = vmul.f32 %v9310_v60, %v9300_v27 }
 0x80f   : > { %8396 = vmatmul.mubr.msk.f32.gmra.mxu1 %vm1157_vm4, %v1803_v61 }
 0x810   : > { %8417 = vmatprep.mubr.msk.f32.mxu1 %vm9507_vm0, %v9506_v0 }
 0x813   : > { %8418 = vmatmul.mubr.msk.f32.vlgmr.msra.gmra.mxu1 %vm1026_vm3, %v9962_v43  ;;  %v7426_v43 = vld [vmem:[%s9662_s27 + $0x10] sm:$0xff] }
 0x814   : > { %8420 = vmatprep.mubr.msk.f32.mxu1 %vm9507_vm0, %v9506_v0  ;;  %8450 = vmatpush3.xpose.msk.msra.mxu1 %vm625_vm2, %v7434_v62 }
 0x815   : > { %8483 = vmatprep.subr.mxu1 %v9506_v0 }
 0x817   : > { %8421 = vmatmul.mubr.msk.f32.gmra.mxu1 %vm1026_vm3, %v9964_v46 }
 0x818   : > { %8423 = vmatprep.mubr.msk.f32.mxu1 %vm9507_vm0, %v9506_v0 }
 0x81b   : > { %8424 = vmatmul.mubr.msk.f32.gmra.mxu1 %vm1026_vm3, %v9966_v49 }
 0x81c   : > { %8426 = vmatprep.mubr.msk.f32.mxu1 %vm9507_vm0, %v9506_v0 }
 0x81f   : > { %8427 = vmatmul.mubr.msk.f32.gmra.mxu1 %vm1026_vm3, %v9968_v52 }
 0x820   : > { %8429 = vmatprep.mubr.msk.f32.mxu1 %vm9507_vm0, %v9506_v0 }
 0x823   : > { %8430 = vmatmul.mubr.msk.f32.gmra.mxu1 %vm1026_vm3, %v9970_v55 }
 0x824   : > { %8451 = vmatprep.mubr.msk.f32.mxu1 %vm9507_vm0, %v9506_v0 }
 0x827   : > { %8452 = vmatmul.mubr.msk.f32.vlgmr.msra.gmra.mxu1 %vm625_vm2, %v9706_v42 }
 0x828   : > { %8454 = vmatprep.mubr.msk.f32.mxu1 %vm9507_vm0, %v9506_v0 }
 0x82b   : > { %8455 = vmatmul.mubr.msk.f32.gmra.mxu1 %vm625_vm2, %v9680_v23 }
 0x82c   : > { %8457 = vmatprep.mubr.msk.f32.mxu1 %vm9507_vm0, %v9506_v0 }
 0x82f   : > { %8458 = vmatmul.mubr.msk.f32.gmra.mxu1 %vm625_vm2, %v9689_v30 }
 0x830   : > { %8460 = vmatprep.mubr.msk.f32.mxu1 %vm9507_vm0, %v9506_v0 }
 0x833   : > { %8461 = vmatmul.mubr.msk.f32.gmra.mxu1 %vm625_vm2, %v9696_v36 }
 0x834   : > { %8463 = vmatprep.mubr.msk.f32.mxu1 %vm9507_vm0, %v9506_v0 }
 0x837   : > { %8464 = vmatmul.mubr.msk.f32.gmra.mxu1 %vm625_vm2, %v9704_v41 }
 0x838   : > { %8493 = vmatprep.mubr.msk.f32.mxu1 %vm9507_vm0, %v9506_v0 }
 0x8bf   : > { %v1885_v46 = vpop.f32.mrf.mxu1 }
 0x8c0   : > { %8401 = vmatmul.mubr.msk.f32.vlgmr.msra.gmra.mxu0 %vm1026_vm3, %v1885_v46 }
 0x8c1   : > { %v8385_v49 = vpop.f32.mrf.mxu1  ;;  %8433 = vmatpush3.xpose.msk.msra.mxu0 %vm625_vm2, %v7426_v43  ;;  %8403 = vmatprep.mubr.msk.f32.mxu0 %vm9507_vm0, %v9506_v0  ;;  %v7427_v43 = vld [vmem:[%s9771_s18 + $0x2] ss:$0 sm:$0xff] }
 0x8c2   : > { %8466 = vmatprep.subr.mxu0 %v9506_v0 }
 0x8c3   : > { %v1890_v52 = vpop.f32.mrf.mxu1 }
 0x8c4   : > { %8404 = vmatmul.mubr.msk.f32.gmra.mxu0 %vm1026_vm3, %v1890_v52 }
 0x8c5   : > { %v8388_v55 = vpop.f32.mrf.mxu1  ;;  %8406 = vmatprep.mubr.msk.f32.mxu0 %vm9507_vm0, %v9506_v0 }
 0x8c7   : > { %v1895_v1 = vpop.f32.mrf.mxu1 }
 0x8c8   : > { %8407 = vmatmul.mubr.msk.f32.gmra.mxu0 %vm1026_vm3, %v1895_v1 }
 0x8c9   : > { %v8391_v3 = vpop.f32.mrf.mxu1  ;;  %8409 = vmatprep.mubr.msk.f32.mxu0 %vm9507_vm0, %v9506_v0 }
 0x8cb   : > { %v1900_v4 = vpop.f32.mrf.mxu1 }
 0x8cc   : > { %8410 = vmatmul.mubr.msk.f32.gmra.mxu0 %vm1026_vm3, %v1900_v4 }
 0x8cd   : > { %v8394_v45 = vpop.f32.mrf.mxu1  ;;  %8412 = vmatprep.mubr.msk.f32.mxu0 %vm9507_vm0, %v9506_v0 }
 0x8cf   : > { %v1905_v5 = vpop.f32.mrf.mxu1 }
 0x8d0   : > { %8413 = vmatmul.mubr.msk.f32.gmra.mxu0 %vm1026_vm3, %v1905_v5 }
 0x8d1   : > { %v8397_v51 = vpop.f32.mrf.mxu1  ;;  %8434 = vmatprep.mubr.msk.f32.mxu0 %vm9507_vm0, %v9506_v0 }
 0x8d3   : > { %v10106_v9 = vpop.f32.mrf.mxu1 }
 0x8d4   : > { %8435 = vmatmul.mubr.msk.f32.vlgmr.msra.gmra.mxu0 %vm625_vm2, %v9706_v42 }
 0x8d5   : > { %v8419_v57 = vpop.f32.mrf.mxu1  ;;  %8437 = vmatprep.mubr.msk.f32.mxu0 %vm9507_vm0, %v9506_v0  ;;  %8467 = vmatpush3.xpose.msk.msra.mxu0 %vm625_vm2, %v7443_v8 }
 0x8d6   : > { %8508 = vmatprep.subr.mxu0 %v9506_v0 }
 0x8d7   : > { %v10114_v11 = vpop.f32.mrf.mxu1 }
 0x8d8   : > { %8438 = vmatmul.mubr.msk.f32.gmra.mxu0 %vm625_vm2, %v9680_v23 }
 0x8d9   : > { %v8422_v63 = vpop.f32.mrf.mxu1  ;;  %8440 = vmatprep.mubr.msk.f32.mxu0 %vm9507_vm0, %v9506_v0 }
 0x8db   : > { %v10120_v6 = vpop.f32.mrf.mxu1 }
 0x8dc   : > { %8441 = vmatmul.mubr.msk.f32.gmra.mxu0 %vm625_vm2, %v9689_v30 }
 0x8dd   : > { %v8425_v13 = vpop.f32.mrf.mxu1  ;;  %8443 = vmatprep.mubr.msk.f32.mxu0 %vm9507_vm0, %v9506_v0 }
 0x8df   : > { %v10126_v15 = vpop.f32.mrf.mxu1 }
 0x8e0   : > { %8444 = vmatmul.mubr.msk.f32.gmra.mxu0 %vm625_vm2, %v9696_v36 }
 0x8e1   : > { %v8428_v18 = vpop.f32.mrf.mxu1  ;;  %8446 = vmatprep.mubr.msk.f32.mxu0 %vm9507_vm0, %v9506_v0 }
 0x8e3   : > { %v10132_v19 = vpop.f32.mrf.mxu1 }
 0x8e4   : > { %8447 = vmatmul.mubr.msk.f32.gmra.mxu0 %vm625_vm2, %v9704_v41 }
 0x8e5   : > { %v8431_v7 = vpop.f32.mrf.mxu1  ;;  %8468 = vmatprep.mubr.msk.f32.mxu0 %vm9507_vm0, %v9506_v0 }
 0x8e7   : > { %v2297_v10 = vpop.f32.mrf.mxu1 }
 0x8e8   : > { %8469 = vmatmul.mubr.msk.f32.vlgmr.msra.gmra.mxu0 %vm625_vm2, %v9706_v42  ;;  %v2298_v38 = vadd.f32 %v7436_v29, %v2297_v10 }
 0x8e9   : > { %v8453_v12 = vpop.f32.mrf.mxu1  ;;  %8471 = vmatprep.mubr.msk.f32.mxu0 %vm9507_vm0, %v9506_v0 }
 0x8eb   : > { %v2302_v20 = vpop.f32.mrf.mxu1 }
 0x8ec   : > { %8472 = vmatmul.mubr.msk.f32.gmra.mxu0 %vm625_vm2, %v9680_v23  ;;  %v2303_v37 = vadd.f32 %v7436_v29, %v2302_v20 }
 0x8ed   : > { %v8456_v21 = vpop.f32.mrf.mxu1  ;;  %8474 = vmatprep.mubr.msk.f32.mxu0 %vm9507_vm0, %v9506_v0 }
 0x8ef   : > { %v2307_v24 = vpop.f32.mrf.mxu1 }
 0x8f0   : > { %8475 = vmatmul.mubr.msk.f32.gmra.mxu0 %vm625_vm2, %v9689_v30  ;;  %v2308_v35 = vadd.f32 %v7436_v29, %v2307_v24 }
 0x8f1   : > { %v8459_v26 = vpop.f32.mrf.mxu1  ;;  %8477 = vmatprep.mubr.msk.f32.mxu0 %vm9507_vm0, %v9506_v0 }
 0x8f3   : > { %v2312_v27 = vpop.f32.mrf.mxu1 }
 0x8f4   : > { %8478 = vmatmul.mubr.msk.f32.gmra.mxu0 %vm625_vm2, %v9696_v36  ;;  %v2313_v33 = vadd.f32 %v7436_v29, %v2312_v27 }
 0x8f5   : > { %v8462_v14 = vpop.f32.mrf.mxu1  ;;  %8480 = vmatprep.mubr.msk.f32.mxu0 %vm9507_vm0, %v9506_v0 }
 0x8f6   : > { %v7445_v14 = vld [vmem:[%s9771_s18 + $0xa] ss:$0 sm:$0xff] }
 0x8f7   : > { %v2317_v31 = vpop.f32.mrf.mxu1 }
 0x8f8   : > { %v2318_v32 = vadd.f32 %v7436_v29, %v2317_v31  ;;  %8481 = vmatmul.mubr.msk.f32.gmra.mxu0 %vm625_vm2, %v9704_v41 }
 0x8f9   : > { %v8465_v17 = vpop.f32.mrf.mxu1  ;;  %8518 = vmatprep.mubr.msk.f32.mxu0 %vm9507_vm0, %v9506_v0 }
 0x8fa   : > { %8484 = vmatpush3.xpose.msk.msra.mxu1 %vm1026_vm3, %v2318_v32 }
 0x8fb   : > { %8485 = vmatprep.subr.mxu1 %v9506_v0 }
 0x8fe   : > { %8486 = vmatpush3.xpose.msk.msra.mxu1 %vm1026_vm3, %v2313_v33 }
 0x8ff   : > { %8487 = vmatprep.subr.mxu1 %v9506_v0 }
 0x902   : > { %8488 = vmatpush3.xpose.msk.msra.mxu1 %vm1026_vm3, %v2308_v35 }
 0x903   : > { %8489 = vmatprep.subr.mxu1 %v9506_v0 }
 0x906   : > { %8490 = vmatpush3.xpose.msk.msra.mxu1 %vm1026_vm3, %v2303_v37 }
 0x907   : > { %8491 = vmatprep.subr.mxu1 %v9506_v0 }
 0x90a   : > { %8492 = vmatpush3.xpose.msk.msra.mxu1 %vm1026_vm3, %v2298_v38 }
 0x90b   : > { %8533 = vmatprep.subr.mxu1 %v9506_v0 }
 0x980   : > { %v10169_v39 = vpop.f32.mrf.mxu0 }
 0x982   : > { %v8402_v44 = vpop.f32.mrf.mxu0 }
 0x984   : > { %v10171_v48 = vpop.f32.mrf.mxu0 }
 0x986   : > { %v8405_v50 = vpop.f32.mrf.mxu0 }
 0x988   : > { %v10173_v54 = vpop.f32.mrf.mxu0 }
 0x98a   : > { %v8408_v56 = vpop.f32.mrf.mxu0 }
 0x98c   : > { %v10175_v58 = vpop.f32.mrf.mxu0 }
 0x98e   : > { %v8411_v60 = vpop.f32.mrf.mxu0 }
 0x990   : > { %v10177_v61 = vpop.f32.mrf.mxu0 }
 0x992   : > { %v8414_v62 = vpop.f32.mrf.mxu0 }
 0x994   : > { %v2197_v46 = vpop.f32.mrf.mxu0 }
 0x995   : > { %v2198_v49 = vadd.f32 %v7427_v43, %v2197_v46 }
 0x996   : > { %v8436_v52 = vpop.f32.mrf.mxu0 }
 0x997   : > { %8494 = vmatmul.mubr.msk.f32.vlgmr.msra.gmra.mxu1 %vm1026_vm3, %v2198_v49 }
 0x998   : > { %v2202_v55 = vpop.f32.mrf.mxu0  ;;  %8496 = vmatprep.mubr.msk.f32.mxu1 %vm9507_vm0, %v9506_v0 }
 0x999   : > { %v2203_v1 = vadd.f32 %v7427_v43, %v2202_v55 }
 0x99a   : > { %v8439_v3 = vpop.f32.mrf.mxu0 }
 0x99b   : > { %8497 = vmatmul.mubr.msk.f32.gmra.mxu1 %vm1026_vm3, %v2203_v1 }
 0x99c   : > { %v2207_v4 = vpop.f32.mrf.mxu0  ;;  %8499 = vmatprep.mubr.msk.f32.mxu1 %vm9507_vm0, %v9506_v0 }
 0x99d   : > { %v2208_v45 = vadd.f32 %v7427_v43, %v2207_v4 }
 0x99e   : > { %v8442_v5 = vpop.f32.mrf.mxu0 }
 0x99f   : > { %8500 = vmatmul.mubr.msk.f32.gmra.mxu1 %vm1026_vm3, %v2208_v45 }
 0x9a0   : > { %v2212_v51 = vpop.f32.mrf.mxu0  ;;  %8502 = vmatprep.mubr.msk.f32.mxu1 %vm9507_vm0, %v9506_v0 }
 0x9a1   : > { %v2213_v8 = vadd.f32 %v7427_v43, %v2212_v51 }
 0x9a2   : > { %v8445_v57 = vpop.f32.mrf.mxu0 }
 0x9a3   : > { %8503 = vmatmul.mubr.msk.f32.gmra.mxu1 %vm1026_vm3, %v2213_v8 }
 0x9a4   : > { %v2217_v63 = vpop.f32.mrf.mxu0  ;;  %8505 = vmatprep.mubr.msk.f32.mxu1 %vm9507_vm0, %v9506_v0 }
 0x9a5   : > { %v2218_v13 = vadd.f32 %v7427_v43, %v2217_v63 }
 0x9a6   : > { %v8448_v18 = vpop.f32.mrf.mxu0 }
 0x9a7   : > { %8506 = vmatmul.mubr.msk.f32.gmra.mxu1 %vm1026_vm3, %v2218_v13 }
 0x9a8   : > { %v2397_v7 = vpop.f32.mrf.mxu0  ;;  %8535 = vmatprep.mubr.msk.f32.mxu1 %vm9507_vm0, %v9506_v0 }
 0x9a9   : > { %v2398_v37 = vadd.f32 %v7445_v14, %v2397_v7 }
 0x9aa   : > { %v8470_v10 = vpop.f32.mrf.mxu0 }
 0x9ac   : > { %v2402_v12 = vpop.f32.mrf.mxu0 }
 0x9ad   : > { %v2403_v35 = vadd.f32 %v7445_v14, %v2402_v12 }
 0x9ae   : > { %v8473_v20 = vpop.f32.mrf.mxu0 }
 0x9b0   : > { %v2407_v21 = vpop.f32.mrf.mxu0 }
 0x9b1   : > { %v2408_v33 = vadd.f32 %v7445_v14, %v2407_v21 }
 0x9b2   : > { %v8476_v24 = vpop.f32.mrf.mxu0 }
 0x9b4   : > { %v2412_v26 = vpop.f32.mrf.mxu0 }
 0x9b5   : > { %v2413_v17 = vadd.f32 %v7445_v14, %v2412_v26 }
 0x9b6   : > { %v8479_v27 = vpop.f32.mrf.mxu0 }
 0x9b8   : > { %v2417_v29 = vpop.f32.mrf.mxu0 }
 0x9b9   : > { %v2418_v31 = vadd.f32 %v7445_v14, %v2417_v29 }
 0x9ba   : > { %v8482_v32 = vpop.f32.mrf.mxu0 }
 0x9bb   : > { %8509 = vmatpush3.msra.mxu0 %v2418_v31 }
 0x9bc   : > { %8510 = vmatprep.subr.mxu0 %v9506_v0 }
 0x9bd   : > { %8511 = vmatpush3.msra.mxu0 %v2413_v17 }
 0x9be   : > { %8512 = vmatprep.subr.mxu0 %v9506_v0 }
 0x9bf   : > { %8513 = vmatpush3.msra.mxu0 %v2408_v33 }
 0x9c0   : > { %8514 = vmatprep.subr.mxu0 %v9506_v0 }
 0x9c1   : > { %8515 = vmatpush3.msra.mxu0 %v2403_v35 }
 0x9c2   : > { %8516 = vmatprep.subr.mxu0 %v9506_v0 }
 0x9c3   : > { %8517 = vmatpush3.msra.mxu0 %v2398_v37 }
 0x9c4   : > { %8550 = vmatprep.subr.mxu0 %v9506_v0 }
 0xa57   : > { %v2517_v38 = vpop.f32.mrf.mxu1 }
 0xa58   : > { %v2541_v44 = vmul.f32 0.35355338, %v2517_v38 }
 0xa59   : > { %v8495_v50 = vpop.f32.mrf.mxu1 }
 0xa5a   : > { %v2546_v56 = vadd.f32 %v2541_v44, %v9859_v40 }
 0xa5b   : > { %v2522_v60 = vpop.f32.mrf.mxu1 }
 0xa5c   : > { %v2542_v62 = vmul.f32 0.35355338, %v2522_v60  ;;  %v2551_v43 = vsel %vm1157_vm4, %v2546_v56, -inf }
 0xa5d   : > { %2552 = vmax.xlane.f32.xlu0 %v2551_v43  ;;  %v8498_v46 = vpop.f32.mrf.mxu1 }
 0xa5e   : > { %v2547_v49 = vadd.f32 %v2542_v62, %v9867_v47  ;;  %v7467_v46 = vld [vmem:[%s10023_s16 + $0x10] sm:$0xff] }
 0xa5f   : > { %v2527_v52 = vpop.f32.mrf.mxu1  ;;  %8534 = vmatpush3.msra.mxu1 %v7467_v46  ;;  %v7492_v46 = vld [vmem:[%s9771_s18 + $0xb] ss:$0 sm:$0xff] }
 0xa60   : > { %v2543_v55 = vmul.f32 0.35355338, %v2527_v52  ;;  %v2554_v1 = vsel %vm1157_vm4, %v2547_v49, -inf  ;;  %8567 = vmatprep.subr.mxu1 %v9506_v0 }
 0xa61   : > { %2555 = vmax.xlane.f32.xlu1 %v2554_v1  ;;  %v8501_v3 = vpop.f32.mrf.mxu1 }
 0xa62   : > { %v2548_v4 = vadd.f32 %v2543_v55, %v9877_v53 }
 0xa63   : > { %v2532_v45 = vpop.f32.mrf.mxu1 }
 0xa64   : > { %v2544_v5 = vmul.f32 0.35355338, %v2532_v45  ;;  %v2557_v40 = vsel %vm1157_vm4, %v2548_v4, -inf  ;;  %v7473_v45 = vld [vmem:[%s9662_s27 + $0x18] sm:$0xff] }
 0xa65   : > { %2558 = vmax.xlane.f32.xlu0 %v2557_v40  ;;  %v8504_v51 = vpop.f32.mrf.mxu1 }
 0xa66   : > { %v2549_v8 = vadd.f32 %v2544_v5, %v9887_v59 }
 0xa67   : > { %v2537_v57 = vpop.f32.mrf.mxu1 }
 0xa68   : > { %v2545_v63 = vmul.f32 0.35355338, %v2537_v57  ;;  %v2560_v47 = vsel %vm1157_vm4, %v2549_v8, -inf }
 0xa69   : > { %2561 = vmax.xlane.f32.xlu1 %v2560_v47  ;;  %v8507_v13 = vpop.f32.mrf.mxu1 }
 0xa6a   : > { %v2550_v18 = vadd.f32 %v2545_v63, %v9895_v2 }
 0xa6c   : > { %v2563_v7 = vsel %vm1157_vm4, %v2550_v18, -inf }
 0xa6d   : > { %2564 = vmax.xlane.f32.xlu0 %v2563_v7  ;;  %v7490_v7 = vld [vmem:[%s9662_s27 + $0x58] sm:$0xff] }
 0xae6   : > { %v2553_v53 = vpop.xlane.xlu0 %2552 }
 0xae7   : > { %v2566_v10 = vsub.f32 %v2546_v56, %v2553_v53  ;;  %v7481_v53 = vld [vmem:[%s9662_s27 + $0x38] sm:$0xff] }
 0xae9   : > { %v2571_v12 = vmul.f32 1.442695, %v2566_v10 }
 0xaea   : > { %v2556_v20 = vpop.xlane.xlu1 %2555 }
 0xaeb   : > { %9311 = vpow2.f32 %v2571_v12  ;;  %v2567_v21 = vsub.f32 %v2547_v49, %v2556_v20 }
 0xaed   : > { %v2573_v24 = vmul.f32 1.442695, %v2567_v21 }
 0xaee   : > { %v2559_v26 = vpop.xlane.xlu0 %2558 }
 0xaef   : > { %9313 = vpow2.f32 %v2573_v24  ;;  %v2568_v59 = vsub.f32 %v2548_v4, %v2559_v26 }
 0xaf1   : > { %v2575_v27 = vmul.f32 1.442695, %v2568_v59 }
 0xaf2   : > { %v2562_v14 = vpop.xlane.xlu1 %2561 }
 0xaf3   : > { %9315 = vpow2.f32 %v2575_v27  ;;  %v2569_v29 = vsub.f32 %v2549_v8, %v2562_v14 }
 0xaf5   : > { %v2577_v31 = vmul.f32 1.442695, %v2569_v29 }
 0xaf6   : > { %v2565_v32 = vpop.xlane.xlu0 %2564 }
 0xaf7   : > { %9317 = vpow2.f32 %v2577_v31  ;;  %v2570_v2 = vsub.f32 %v2550_v18, %v2565_v32 }
 0xaf8   : > { %v9312_v17 = vpop.eup %9311 }
 0xaf9   : > { %v2579_v33 = vmul.f32 1.442695, %v2570_v2  ;;  %v2581_v35 = vsel %vm1157_vm4, %v9312_v17, 0.0 }
 0xafa   : > { %2582 = vadd.xlane.f32.xlu1 %v2581_v35 }
 0xafb   : > { %9319 = vpow2.f32 %v2579_v33 }
 0xafc   : > { %v9314_v37 = vpop.eup %9313 }
 0xafd   : > { %v2584_v38 = vsel %vm1157_vm4, %v9314_v37, 0.0 }
 0xafe   : > { %2585 = vadd.xlane.f32.xlu0 %v2584_v38 }
 0xb00   : > { %v9316_v44 = vpop.eup %9315 }
 0xb01   : > { %v2587_v50 = vsel %vm1157_vm4, %v9316_v44, 0.0 }
 0xb02   : > { %2588 = vadd.xlane.f32.xlu1 %v2587_v50 }
 0xb04   : > { %v9318_v56 = vpop.eup %9317 }
 0xb05   : > { %v2590_v60 = vsel %vm1157_vm4, %v9318_v56, 0.0 }
 0xb06   : > { %2591 = vadd.xlane.f32.xlu0 %v2590_v60 }
 0xb08   : > { %v9320_v62 = vpop.eup %9319 }
 0xb09   : > { %v2593_v43 = vsel %vm1157_vm4, %v9320_v62, 0.0 }
 0xb0a   : > { %2594 = vadd.xlane.f32.xlu1 %v2593_v43 }
 0xb83   : > { %v2583_v49 = vpop.xlane.xlu1 %2582 }
 0xb84   : > { %9321 = vrcp.f32 %v2583_v49 }
 0xb87   : > { %v2586_v52 = vpop.xlane.xlu0 %2585 }
 0xb88   : > { %9323 = vrcp.f32 %v2586_v52 }
 0xb8b   : > { %v2589_v55 = vpop.xlane.xlu1 %2588 }
 0xb8c   : > { %9325 = vrcp.f32 %v2589_v55 }
 0xb8f   : > { %v2592_v1 = vpop.xlane.xlu0 %2591 }
 0xb90   : > { %9327 = vrcp.f32 %v2592_v1 }
 0xb91   : > { %v9322_v3 = vpop.eup %9321 }
 0xb92   : > { %v2601_v4 = vmul.f32 %v9322_v3, %v9312_v17 }
 0xb93   : > { %v2595_v5 = vpop.xlane.xlu1 %2594 }
 0xb94   : > { %9329 = vrcp.f32 %v2595_v5  ;;  %8519 = vmatmul.mubr.msk.f32.vlgmr.msra.gmra.mxu0 %vm1157_vm4, %v2601_v4 }
 0xb95   : > { %v9324_v40 = vpop.eup %9323  ;;  %8521 = vmatprep.mubr.msk.f32.mxu0 %vm9507_vm0, %v9506_v0  ;;  %8551 = vmatpush3.xpose.msk.msra.mxu0 %vm625_vm2, %v7473_v45  ;;  %v2098_v45 = vadd.f32 %v10106_v9, %v10169_v39  ;;  %v2113_v9 = vadd.f32 %v10126_v15, %v10175_v58  ;;  %v7483_v58 = vld [vmem:[%s9771_s18 + $0x7] ss:$0 sm:$0xff] }
 0xb96   : > { %v2602_v51 = vmul.f32 %v9324_v40, %v9314_v37  ;;  %8584 = vmatprep.subr.mxu0 %v9506_v0 }
 0xb98   : > { %8522 = vmatmul.mubr.msk.f32.gmra.mxu0 %vm1157_vm4, %v2602_v51 }
 0xb99   : > { %v9326_v8 = vpop.eup %9325  ;;  %8524 = vmatprep.mubr.msk.f32.mxu0 %vm9507_vm0, %v9506_v0 }
 0xb9a   : > { %v2603_v57 = vmul.f32 %v9326_v8, %v9316_v44  ;;  %v2103_v8 = vadd.f32 %v10114_v11, %v10171_v48  ;;  %v2118_v11 = vadd.f32 %v10132_v19, %v10177_v61 }
 0xb9c   : > { %8525 = vmatmul.mubr.msk.f32.gmra.mxu0 %vm1157_vm4, %v2603_v57 }
 0xb9d   : > { %v9328_v63 = vpop.eup %9327  ;;  %8527 = vmatprep.mubr.msk.f32.mxu0 %vm9507_vm0, %v9506_v0 }
 0xb9e   : > { %v2604_v47 = vmul.f32 %v9328_v63, %v9318_v56 }
 0xba0   : > { %8528 = vmatmul.mubr.msk.f32.gmra.mxu0 %vm1157_vm4, %v2604_v47 }
 0xba1   : > { %v9330_v13 = vpop.eup %9329  ;;  %8530 = vmatprep.mubr.msk.f32.mxu0 %vm9507_vm0, %v9506_v0 }
 0xba2   : > { %v2605_v18 = vmul.f32 %v9330_v13, %v9320_v62  ;;  %v2108_v13 = vadd.f32 %v10120_v6, %v10173_v54 }
 0xba4   : > { %8531 = vmatmul.mubr.msk.f32.gmra.mxu0 %vm1157_vm4, %v2605_v18 }
 0xba5   : > { %8552 = vmatprep.mubr.msk.f32.mxu0 %vm9507_vm0, %v9506_v0 }
 0xba8   : > { %8553 = vmatmul.mubr.msk.f32.vlgmr.msra.gmra.mxu0 %vm625_vm2, %v9706_v42 }
 0xba9   : > { %8555 = vmatprep.mubr.msk.f32.mxu0 %vm9507_vm0, %v9506_v0  ;;  %8585 = vmatpush3.xpose.msk.msra.mxu0 %vm625_vm2, %v7490_v7 }
 0xbaa   : > { %8626 = vmatprep.subr.mxu0 %v9506_v0 }
 0xbac   : > { %8556 = vmatmul.mubr.msk.f32.gmra.mxu0 %vm625_vm2, %v9680_v23 }
 0xbad   : > { %8558 = vmatprep.mubr.msk.f32.mxu0 %vm9507_vm0, %v9506_v0 }
 0xbb0   : > { %8559 = vmatmul.mubr.msk.f32.gmra.mxu0 %vm625_vm2, %v9689_v30 }
 0xbb1   : > { %8561 = vmatprep.mubr.msk.f32.mxu0 %vm9507_vm0, %v9506_v0 }
 0xbb4   : > { %8562 = vmatmul.mubr.msk.f32.gmra.mxu0 %vm625_vm2, %v9696_v36 }
 0xbb5   : > { %8564 = vmatprep.mubr.msk.f32.mxu0 %vm9507_vm0, %v9506_v0 }
 0xbb8   : > { %8565 = vmatmul.mubr.msk.f32.gmra.mxu0 %vm625_vm2, %v9704_v41 }
 0xbb9   : > { %8586 = vmatprep.mubr.msk.f32.mxu0 %vm9507_vm0, %v9506_v0 }
 0xbbc   : > { %8587 = vmatmul.mubr.msk.f32.vlgmr.msra.gmra.mxu0 %vm625_vm2, %v9706_v42 }
 0xbbd   : > { %8589 = vmatprep.mubr.msk.f32.mxu0 %vm9507_vm0, %v9506_v0 }
 0xbc0   : > { %8590 = vmatmul.mubr.msk.f32.gmra.mxu0 %vm625_vm2, %v9680_v23 }
 0xbc1   : > { %8592 = vmatprep.mubr.msk.f32.mxu0 %vm9507_vm0, %v9506_v0 }
 0xbc4   : > { %8593 = vmatmul.mubr.msk.f32.gmra.mxu0 %vm625_vm2, %v9689_v30 }
 0xbc5   : > { %8595 = vmatprep.mubr.msk.f32.mxu0 %vm9507_vm0, %v9506_v0 }
 0xbc8   : > { %8596 = vmatmul.mubr.msk.f32.gmra.mxu0 %vm625_vm2, %v9696_v36 }
 0xbc9   : > { %8598 = vmatprep.mubr.msk.f32.mxu0 %vm9507_vm0, %v9506_v0 }
 0xbcc   : > { %8599 = vmatmul.mubr.msk.f32.gmra.mxu0 %vm625_vm2, %v9704_v41 }
 0xbcd   : > { %8636 = vmatprep.mubr.msk.f32.mxu0 %vm9507_vm0, %v9506_v0 }
 0xc54   : > { %v2687_v10 = vpop.f32.mrf.mxu0 }
 0xc55   : > { %8536 = vmatmul.mubr.msk.f32.vlgmr.msra.gmra.mxu1 %vm1026_vm3, %v2687_v10 }
 0xc56   : > { %v8520_v12 = vpop.f32.mrf.mxu0  ;;  %8568 = vmatpush3.xpose.msk.msra.mxu1 %vm625_vm2, %v7481_v53  ;;  %8538 = vmatprep.mubr.msk.f32.mxu1 %vm9507_vm0, %v9506_v0 }
 0xc57   : > { %8601 = vmatprep.subr.mxu1 %v9506_v0 }
 0xc58   : > { %v2692_v20 = vpop.f32.mrf.mxu0 }
 0xc59   : > { %8539 = vmatmul.mubr.msk.f32.gmra.mxu1 %vm1026_vm3, %v2692_v20 }
 0xc5a   : > { %v8523_v21 = vpop.f32.mrf.mxu0  ;;  %8541 = vmatprep.mubr.msk.f32.mxu1 %vm9507_vm0, %v9506_v0 }
 0xc5c   : > { %v2697_v24 = vpop.f32.mrf.mxu0 }
 0xc5d   : > { %8542 = vmatmul.mubr.msk.f32.gmra.mxu1 %vm1026_vm3, %v2697_v24 }
 0xc5e   : > { %v8526_v26 = vpop.f32.mrf.mxu0  ;;  %8544 = vmatprep.mubr.msk.f32.mxu1 %vm9507_vm0, %v9506_v0 }
 0xc60   : > { %v2702_v59 = vpop.f32.mrf.mxu0 }
 0xc61   : > { %8545 = vmatmul.mubr.msk.f32.gmra.mxu1 %vm1026_vm3, %v2702_v59 }
 0xc62   : > { %v8529_v27 = vpop.f32.mrf.mxu0  ;;  %8547 = vmatprep.mubr.msk.f32.mxu1 %vm9507_vm0, %v9506_v0 }
 0xc64   : > { %v2707_v14 = vpop.f32.mrf.mxu0 }
 0xc65   : > { %8548 = vmatmul.mubr.msk.f32.gmra.mxu1 %vm1026_vm3, %v2707_v14 }
 0xc66   : > { %v8532_v29 = vpop.f32.mrf.mxu0  ;;  %8569 = vmatprep.mubr.msk.f32.mxu1 %vm9507_vm0, %v9506_v0 }
 0xc68   : > { %v10297_v31 = vpop.f32.mrf.mxu0 }
 0xc69   : > { %8570 = vmatmul.mubr.msk.f32.vlgmr.msra.gmra.mxu1 %vm625_vm2, %v9706_v42 }
 0xc6a   : > { %v8554_v32 = vpop.f32.mrf.mxu0  ;;  %8572 = vmatprep.mubr.msk.f32.mxu1 %vm9507_vm0, %v9506_v0 }
 0xc6c   : > { %v10303_v2 = vpop.f32.mrf.mxu0 }
 0xc6d   : > { %8573 = vmatmul.mubr.msk.f32.gmra.mxu1 %vm625_vm2, %v9680_v23 }
 0xc6e   : > { %v8557_v17 = vpop.f32.mrf.mxu0  ;;  %8575 = vmatprep.mubr.msk.f32.mxu1 %vm9507_vm0, %v9506_v0 }
 0xc70   : > { %v10309_v33 = vpop.f32.mrf.mxu0 }
 0xc71   : > { %8576 = vmatmul.mubr.msk.f32.gmra.mxu1 %vm625_vm2, %v9689_v30 }
 0xc72   : > { %v8560_v35 = vpop.f32.mrf.mxu0  ;;  %8578 = vmatprep.mubr.msk.f32.mxu1 %vm9507_vm0, %v9506_v0 }
 0xc74   : > { %v10315_v42 = vpop.f32.mrf.mxu0 }
 0xc75   : > { %8579 = vmatmul.mubr.msk.f32.gmra.mxu1 %vm625_vm2, %v9696_v36 }
 0xc76   : > { %v8563_v23 = vpop.f32.mrf.mxu0  ;;  %8581 = vmatprep.mubr.msk.f32.mxu1 %vm9507_vm0, %v9506_v0 }
 0xc77   : > { %v7474_v23 = vld [vmem:[%s9771_s18 + $0x3] ss:$0 sm:$0xff] }
 0xc78   : > { %v10321_v37 = vpop.f32.mrf.mxu0 }
 0xc79   : > { %8582 = vmatmul.mubr.msk.f32.gmra.mxu1 %vm625_vm2, %v9704_v41 }
 0xc7a   : > { %v8566_v30 = vpop.f32.mrf.mxu0  ;;  %8611 = vmatprep.mubr.msk.f32.mxu1 %vm9507_vm0, %v9506_v0 }
 0xc7c   : > { %v3099_v38 = vpop.f32.mrf.mxu0 }
 0xc7d   : > { %v3100_v4 = vadd.f32 %v7492_v46, %v3099_v38  ;;  %v2900_v38 = vadd.f32 %v7474_v23, %v10297_v31  ;;  %v2915_v31 = vadd.f32 %v7474_v23, %v10315_v42 }
 0xc7e   : > { %v8588_v44 = vpop.f32.mrf.mxu0 }
 0xc7f   : > { %v2905_v44 = vadd.f32 %v7474_v23, %v10303_v2  ;;  %v2920_v2 = vadd.f32 %v7474_v23, %v10321_v37  ;;  %v9484_v37 = vld [vmem:[%s11442_s0 + $0x8] sm:$0xff] }
 0xc80   : > { %v3104_v50 = vpop.f32.mrf.mxu0 }
 0xc81   : > { %v3105_v3 = vadd.f32 %v7492_v46, %v3104_v50  ;;  %v2910_v50 = vadd.f32 %v7474_v23, %v10309_v33 }
 0xc82   : > { %v8591_v56 = vpop.f32.mrf.mxu0 }
 0xc84   : > { %v3109_v60 = vpop.f32.mrf.mxu0 }
 0xc85   : > { %v3110_v41 = vadd.f32 %v7492_v46, %v3109_v60 }
 0xc86   : > { %v8594_v62 = vpop.f32.mrf.mxu0 }
 0xc87   : > { %v9483_v62 = vld [vmem:[%s11442_s0] sm:$0xff] }
 0xc88   : > { %v3114_v36 = vpop.f32.mrf.mxu0 }
 0xc89   : > { %v3115_v1 = vadd.f32 %v7492_v46, %v3114_v36 }
 0xc8a   : > { %v8597_v43 = vpop.f32.mrf.mxu0 }
 0xc8c   : > { %v3119_v49 = vpop.f32.mrf.mxu0 }
 0xc8d   : > { %v3120_v52 = vadd.f32 %v7492_v46, %v3119_v49 }
 0xc8e   : > { %v8600_v55 = vpop.f32.mrf.mxu0 }
 0xc8f   : > { %8627 = vmatpush3.msra.mxu0 %v3120_v52 }
 0xc90   : > { %8628 = vmatprep.subr.mxu0 %v9506_v0 }
 0xc91   : > { %8629 = vmatpush3.msra.mxu0 %v3115_v1 }
 0xc92   : > { %8630 = vmatprep.subr.mxu0 %v9506_v0 }
 0xc93   : > { %8631 = vmatpush3.msra.mxu0 %v3110_v41 }
 0xc94   : > { %8632 = vmatprep.subr.mxu0 %v9506_v0 }
 0xc95   : > { %8633 = vmatpush3.msra.mxu0 %v3105_v3 }
 0xc96   : > { %8634 = vmatprep.subr.mxu0 %v9506_v0 }
 0xc97   : > { %8635 = vmatpush3.msra.mxu0 %v3100_v4  ;;  %v9485_v4 = vld [vmem:[%s11442_s0 + $0x10] sm:$0xff] }
 0xc98   : > { %8668 = vmatprep.subr.mxu0 %v9506_v0 }
 0xd15   : > { %v2794_v5 = vpop.f32.mrf.mxu1 }
 0xd16   : > { %v10335_v40 = vadd.f32 %v2794_v5, %v2098_v45 }
 0xd17   : > { %v8537_v51 = vpop.f32.mrf.mxu1 }
 0xd19   : > { %v2799_v57 = vpop.f32.mrf.mxu1 }
 0xd1a   : > { %v10339_v63 = vadd.f32 %v2799_v57, %v2103_v8 }
 0xd1b   : > { %v8540_v47 = vpop.f32.mrf.mxu1 }
 0xd1c   : > { %v9486_v47 = vld [vmem:[%s11442_s0 + $0x18] sm:$0xff] }
 0xd1d   : > { %v2804_v18 = vpop.f32.mrf.mxu1 }
 0xd1e   : > { %v10343_v7 = vadd.f32 %v2804_v18, %v2108_v13 }
 0xd1f   : > { %v8543_v53 = vpop.f32.mrf.mxu1 }
 0xd21   : > { %v2809_v39 = vpop.f32.mrf.mxu1 }
 0xd22   : > { %v10347_v10 = vadd.f32 %v2809_v39, %v2113_v9 }
 0xd23   : > { %v8546_v12 = vpop.f32.mrf.mxu1 }
 0xd24   : > { %v9487_v12 = vld [vmem:[%s11442_s0 + $0x20] sm:$0xff] }
 0xd25   : > { %v2814_v48 = vpop.f32.mrf.mxu1 }
 0xd26   : > { %v10351_v20 = vadd.f32 %v2814_v48, %v2118_v11 }
 0xd27   : > { %v8549_v21 = vpop.f32.mrf.mxu1 }
 0xd29   : > { %v2999_v6 = vpop.f32.mrf.mxu1 }
 0xd2a   : > { %v3000_v30 = vadd.f32 %v7483_v58, %v2999_v6 }
 0xd2b   : > { %v8571_v54 = vpop.f32.mrf.mxu1 }
 0xd2d   : > { %v3004_v24 = vpop.f32.mrf.mxu1 }
 0xd2e   : > { %v3005_v35 = vadd.f32 %v7483_v58, %v3004_v24 }
 0xd2f   : > { %v8574_v26 = vpop.f32.mrf.mxu1 }
 0xd31   : > { %v3009_v59 = vpop.f32.mrf.mxu1 }
 0xd32   : > { %v3010_v61 = vadd.f32 %v7483_v58, %v3009_v59 }
 0xd33   : > { %v8577_v27 = vpop.f32.mrf.mxu1 }
 0xd35   : > { %v3014_v14 = vpop.f32.mrf.mxu1 }
 0xd36   : > { %v3015_v19 = vadd.f32 %v7483_v58, %v3014_v14 }
 0xd37   : > { %v8580_v15 = vpop.f32.mrf.mxu1 }
 0xd39   : > { %v3019_v29 = vpop.f32.mrf.mxu1 }
 0xd3a   : > { %v3020_v32 = vadd.f32 %v7483_v58, %v3019_v29 }
 0xd3b   : > { %v8583_v17 = vpop.f32.mrf.mxu1 }
 0xd3c   : > { %8602 = vmatpush3.xpose.msk.msra.mxu1 %vm1026_vm3, %v3020_v32 }
 0xd3d   : > { %8603 = vmatprep.subr.mxu1 %v9506_v0 }
 0xd40   : > { %8604 = vmatpush3.xpose.msk.msra.mxu1 %vm1026_vm3, %v3015_v19 }
 0xd41   : > { %8605 = vmatprep.subr.mxu1 %v9506_v0 }
 0xd44   : > { %8606 = vmatpush3.xpose.msk.msra.mxu1 %vm1026_vm3, %v3010_v61 }
 0xd45   : > { %8607 = vmatprep.subr.mxu1 %v9506_v0 }
 0xd48   : > { %8608 = vmatpush3.xpose.msk.msra.mxu1 %vm1026_vm3, %v3005_v35 }
 0xd49   : > { %8609 = vmatprep.subr.mxu1 %v9506_v0 }
 0xd4c   : > { %8610 = vmatpush3.xpose.msk.msra.mxu1 %vm1026_vm3, %v3000_v30 }
 0xd4d   : > { %8651 = vmatprep.subr.mxu1 %v9506_v0 }
 0xd4f   : > { %8612 = vmatmul.mubr.msk.f32.vlgmr.msra.gmra.mxu1 %vm1026_vm3, %v2900_v38 }
 0xd50   : > { %8614 = vmatprep.mubr.msk.f32.mxu1 %vm9507_vm0, %v9506_v0 }
 0xd53   : > { %8615 = vmatmul.mubr.msk.f32.gmra.mxu1 %vm1026_vm3, %v2905_v44 }
 0xd54   : > { %8617 = vmatprep.mubr.msk.f32.mxu1 %vm9507_vm0, %v9506_v0 }
 0xd57   : > { %8618 = vmatmul.mubr.msk.f32.gmra.mxu1 %vm1026_vm3, %v2910_v50 }
 0xd58   : > { %8620 = vmatprep.mubr.msk.f32.mxu1 %vm9507_vm0, %v9506_v0 }
 0xd5b   : > { %8621 = vmatmul.mubr.msk.f32.gmra.mxu1 %vm1026_vm3, %v2915_v31 }
 0xd5c   : > { %8623 = vmatprep.mubr.msk.f32.mxu1 %vm9507_vm0, %v9506_v0 }
 0xd5f   : > { %8624 = vmatmul.mubr.msk.f32.gmra.mxu1 %vm1026_vm3, %v2920_v2 }
 0xd60   : > { %8653 = vmatprep.mubr.msk.f32.mxu1 %vm9507_vm0, %v9506_v0 }
 0xe0f   : > { %v3219_v33 = vpop.f32.mrf.mxu1 }
 0xe10   : > { %v3243_v56 = vmul.f32 0.35355338, %v3219_v33 }
 0xe11   : > { %v8613_v60 = vpop.f32.mrf.mxu1 }
 0xe12   : > { %v3248_v42 = vadd.f32 %v9483_v62, %v3243_v56  ;;  %v7514_v60 = vld [vmem:[%s10023_s16 + $0x18] sm:$0xff] }
 0xe13   : > { %v3224_v36 = vpop.f32.mrf.mxu1  ;;  %8652 = vmatpush3.msra.mxu1 %v7514_v60 }
 0xe14   : > { %v3244_v43 = vmul.f32 0.35355338, %v3224_v36  ;;  %v3253_v46 = vsel %vm1157_vm4, %v3248_v42, -inf  ;;  %8691 = vmatprep.subr.mxu1 %v9506_v0 }
 0xe15   : > { %3254 = vmax.xlane.f32.xlu0 %v3253_v46  ;;  %v8616_v49 = vpop.f32.mrf.mxu1 }
 0xe16   : > { %v3249_v52 = vadd.f32 %v9484_v37, %v3244_v43 }
 0xe17   : > { %v3229_v55 = vpop.f32.mrf.mxu1 }
 0xe18   : > { %v3245_v1 = vmul.f32 0.35355338, %v3229_v55  ;;  %v3256_v41 = vsel %vm1157_vm4, %v3249_v52, -inf }
 0xe19   : > { %3257 = vmax.xlane.f32.xlu1 %v3256_v41  ;;  %v8619_v3 = vpop.f32.mrf.mxu1 }
 0xe1a   : > { %v3250_v45 = vadd.f32 %v9485_v4, %v3245_v1 }
 0xe1b   : > { %v3234_v5 = vpop.f32.mrf.mxu1 }
 0xe1c   : > { %v3246_v51 = vmul.f32 0.35355338, %v3234_v5  ;;  %v3259_v8 = vsel %vm1157_vm4, %v3250_v45, -inf }
 0xe1d   : > { %3260 = vmax.xlane.f32.xlu0 %v3259_v8  ;;  %v8622_v57 = vpop.f32.mrf.mxu1 }
 0xe1e   : > { %v3251_v13 = vadd.f32 %v9486_v47, %v3246_v51 }
 0xe1f   : > { %v3239_v18 = vpop.f32.mrf.mxu1 }
 0xe20   : > { %v3247_v53 = vmul.f32 0.35355338, %v3239_v18  ;;  %v3262_v9 = vsel %vm1157_vm4, %v3251_v13, -inf }
 0xe21   : > { %3263 = vmax.xlane.f32.xlu1 %v3262_v9  ;;  %v8625_v39 = vpop.f32.mrf.mxu1 }
 0xe22   : > { %v3252_v11 = vadd.f32 %v9487_v12, %v3247_v53 }
 0xe24   : > { %v3265_v48 = vsel %vm1157_vm4, %v3252_v11, -inf }
 0xe25   : > { %3266 = vmax.xlane.f32.xlu0 %v3265_v48 }
 0xe9e   : > { %v3255_v21 = vpop.xlane.xlu0 %3254 }
 0xe9f   : > { %v3268_v6 = vsub.f32 %v3248_v42, %v3255_v21  ;;  %v7520_v21 = vld [vmem:[%s9676_s14 + $0x4] ss:$0 sm:$0xff] }
 0xea1   : > { %v3273_v54 = vmul.f32 1.442695, %v3268_v6 }
 0xea2   : > { %v3258_v24 = vpop.xlane.xlu1 %3257 }
 0xea3   : > { %9331 = vpow2.f32 %v3273_v54  ;;  %v3269_v26 = vsub.f32 %v3249_v52, %v3258_v24 }
 0xea5   : > { %v3275_v59 = vmul.f32 1.442695, %v3269_v26 }
 0xea6   : > { %v3261_v27 = vpop.xlane.xlu0 %3260 }
 0xea7   : > { %9333 = vpow2.f32 %v3275_v59  ;;  %v3270_v14 = vsub.f32 %v3250_v45, %v3261_v27 }
 0xea9   : > { %v3277_v15 = vmul.f32 1.442695, %v3270_v14 }
 0xeaa   : > { %v3264_v58 = vpop.xlane.xlu1 %3263 }
 0xeab   : > { %9335 = vpow2.f32 %v3277_v15  ;;  %v3271_v29 = vsub.f32 %v3251_v13, %v3264_v58 }
 0xead   : > { %v3279_v32 = vmul.f32 1.442695, %v3271_v29 }
 0xeae   : > { %v3267_v17 = vpop.xlane.xlu0 %3266 }
 0xeaf   : > { %9337 = vpow2.f32 %v3279_v32  ;;  %v3272_v19 = vsub.f32 %v3252_v11, %v3267_v17 }
 0xeb0   : > { %v9332_v61 = vpop.eup %9331 }
 0xeb1   : > { %v3281_v35 = vmul.f32 1.442695, %v3272_v19  ;;  %v3283_v23 = vsel %vm1157_vm4, %v9332_v61, 0.0 }
 0xeb2   : > { %3284 = vadd.xlane.f32.xlu1 %v3283_v23 }
 0xeb3   : > { %9339 = vpow2.f32 %v3281_v35 }
 0xeb4   : > { %v9334_v30 = vpop.eup %9333 }
 0xeb5   : > { %v3286_v38 = vsel %vm1157_vm4, %v9334_v30, 0.0 }
 0xeb6   : > { %3287 = vadd.xlane.f32.xlu0 %v3286_v38 }
 0xeb8   : > { %v9336_v44 = vpop.eup %9335 }
 0xeb9   : > { %v3289_v50 = vsel %vm1157_vm4, %v9336_v44, 0.0 }
 0xeba   : > { %3290 = vadd.xlane.f32.xlu1 %v3289_v50 }
 0xebc   : > { %v9338_v31 = vpop.eup %9337 }
 0xebd   : > { %v3292_v2 = vsel %vm1157_vm4, %v9338_v31, 0.0 }
 0xebe   : > { %3293 = vadd.xlane.f32.xlu0 %v3292_v2 }
 0xec0   : > { %v9340_v33 = vpop.eup %9339 }
 0xec1   : > { %v3295_v56 = vsel %vm1157_vm4, %v9340_v33, 0.0 }
 0xec2   : > { %3296 = vadd.xlane.f32.xlu1 %v3295_v56 }
 0xf3b   : > { %v3285_v62 = vpop.xlane.xlu1 %3284 }
 0xf3c   : > { %9341 = vrcp.f32 %v3285_v62 }
 0xf3f   : > { %v3288_v42 = vpop.xlane.xlu0 %3287 }
 0xf40   : > { %9343 = vrcp.f32 %v3288_v42 }
 0xf43   : > { %v3291_v36 = vpop.xlane.xlu1 %3290 }
 0xf44   : > { %9345 = vrcp.f32 %v3291_v36 }
 0xf47   : > { %v3294_v43 = vpop.xlane.xlu0 %3293 }
 0xf48   : > { %9347 = vrcp.f32 %v3294_v43 }
 0xf49   : > { %v9342_v46 = vpop.eup %9341 }
 0xf4a   : > { %v3303_v49 = vmul.f32 %v9342_v46, %v9332_v61 }
 0xf4b   : > { %v3297_v37 = vpop.xlane.xlu1 %3296 }
 0xf4c   : > { %9349 = vrcp.f32 %v3297_v37  ;;  %8637 = vmatmul.mubr.msk.f32.vlgmr.msra.gmra.mxu0 %vm1157_vm4, %v3303_v49 }
 0xf4d   : > { %v9344_v52 = vpop.eup %9343  ;;  %8639 = vmatprep.mubr.msk.f32.mxu0 %vm9507_vm0, %v9506_v0 }
 0xf4e   : > { %v3304_v55 = vmul.f32 %v9344_v52, %v9334_v30 }
 0xf50   : > { %8640 = vmatmul.mubr.msk.f32.gmra.mxu0 %vm1157_vm4, %v3304_v55 }
 0xf51   : > { %v9346_v1 = vpop.eup %9345  ;;  %8642 = vmatprep.mubr.msk.f32.mxu0 %vm9507_vm0, %v9506_v0 }
 0xf52   : > { %v3305_v41 = vmul.f32 %v9346_v1, %v9336_v44 }
 0xf54   : > { %8643 = vmatmul.mubr.msk.f32.gmra.mxu0 %vm1157_vm4, %v3305_v41 }
 0xf55   : > { %v9348_v3 = vpop.eup %9347  ;;  %8645 = vmatprep.mubr.msk.f32.mxu0 %vm9507_vm0, %v9506_v0 }
 0xf56   : > { %v3306_v4 = vmul.f32 %v9348_v3, %v9338_v31 }
 0xf58   : > { %8646 = vmatmul.mubr.msk.f32.gmra.mxu0 %vm1157_vm4, %v3306_v4 }
 0xf59   : > { %v9350_v45 = vpop.eup %9349  ;;  %8648 = vmatprep.mubr.msk.f32.mxu0 %vm9507_vm0, %v9506_v0 }
 0xf5a   : > { %v3307_v5 = vmul.f32 %v9350_v45, %v9340_v33 }
 0xf5c   : > { %8649 = vmatmul.mubr.msk.f32.gmra.mxu0 %vm1157_vm4, %v3307_v5 }
 0xf5d   : > { %8676 = vmatprep.mubr.msk.f32.mxu0 %vm9507_vm0, %v9506_v0 }
0x100c   : > { %v3389_v51 = vpop.f32.mrf.mxu0 }
0x100d   : > { %8654 = vmatmul.mubr.msk.f32.vlgmr.msra.gmra.mxu1 %vm1026_vm3, %v3389_v51 }
0x100e   : > { %v8638_v8 = vpop.f32.mrf.mxu0  ;;  %8656 = vmatprep.mubr.msk.f32.mxu1 %vm9507_vm0, %v9506_v0 }
0x1010   : > { %v3394_v57 = vpop.f32.mrf.mxu0 }
0x1011   : > { %8657 = vmatmul.mubr.msk.f32.gmra.mxu1 %vm1026_vm3, %v3394_v57 }
0x1012   : > { %v8641_v47 = vpop.f32.mrf.mxu0  ;;  %8659 = vmatprep.mubr.msk.f32.mxu1 %vm9507_vm0, %v9506_v0 }
0x1013   : > { %v3628_v47 = vld [vmem:[%s10503_s15 + $0x18] sm:$0xff] }
0x1014   : > { %v3399_v13 = vpop.f32.mrf.mxu0  ;;  %8669 = vmatpush3.msra.mxu0 %v3628_v47 }
0x1015   : > { %8660 = vmatmul.mubr.msk.f32.gmra.mxu1 %vm1026_vm3, %v3399_v13  ;;  %8670 = vmatprep.subr.mxu0 %v9506_v0  ;;  %v3627_v13 = vld [vmem:[%s10503_s15 + $0x10] sm:$0xff] }
0x1016   : > { %v8644_v18 = vpop.f32.mrf.mxu0  ;;  %8662 = vmatprep.mubr.msk.f32.mxu1 %vm9507_vm0, %v9506_v0  ;;  %8671 = vmatpush3.msra.mxu0 %v3627_v13 }
0x1017   : > { %8672 = vmatprep.subr.mxu0 %v9506_v0  ;;  %v3626_v18 = vld [vmem:[%s10503_s15 + $0x8] sm:$0xff] }
0x1018   : > { %v3404_v53 = vpop.f32.mrf.mxu0  ;;  %8673 = vmatpush3.msra.mxu0 %v3626_v18 }
0x1019   : > { %8663 = vmatmul.mubr.msk.f32.gmra.mxu1 %vm1026_vm3, %v3404_v53  ;;  %8674 = vmatprep.subr.mxu0 %v9506_v0  ;;  %v3625_v53 = vld [vmem:[%s10503_s15] sm:$0xff] }
0x101a   : > { %v8647_v9 = vpop.f32.mrf.mxu0  ;;  %8665 = vmatprep.mubr.msk.f32.mxu1 %vm9507_vm0, %v9506_v0  ;;  %8675 = vmatpush3.msra.mxu0 %v3625_v53 }
0x101b   : > { %8722 = vmatprep.subr.mxu0 %v9506_v0 }
0x101c   : > { %v3409_v39 = vpop.f32.mrf.mxu0 }
0x101d   : > { %8666 = vmatmul.mubr.msk.f32.gmra.mxu1 %vm1026_vm3, %v3409_v39 }
0x101e   : > { %v8650_v12 = vpop.f32.mrf.mxu0  ;;  %8707 = vmatprep.mubr.msk.f32.mxu1 %vm9507_vm0, %v9506_v0 }
0x10cd   : > { %v3496_v11 = vpop.f32.mrf.mxu1 }
0x10ce   : > { %v3520_v48 = vadd.f32 %v3496_v11, %v10335_v40 }
0x10cf   : > { %v8655_v6 = vpop.f32.mrf.mxu1 }
0x10d0   : > { %v3525_v54 = vadd.f32 %v3520_v48, %v9622_v25 }
0x10d1   : > { %v3501_v24 = vpop.f32.mrf.mxu1 }
0x10d2   : > { %v10445_v26 = vadd.f32 %v7520_v21, %v3525_v54  ;;  %v3521_v59 = vadd.f32 %v3501_v24, %v10339_v63 }
0x10d3   : > { %v8658_v27 = vpop.f32.mrf.mxu1 }
0x10d4   : > { %v3526_v14 = vadd.f32 %v3521_v59, %v9616_v16  ;;  %v3542_v15 = vsel %vm625_vm2, %v10445_v26, 0.0 }
0x10d5   : > { %3543 = vadd.xlane.f32.xlu0 %v3542_v15  ;;  %v3506_v58 = vpop.f32.mrf.mxu1 }
0x10d6   : > { %v10451_v29 = vadd.f32 %v7520_v21, %v3526_v14  ;;  %v3522_v40 = vadd.f32 %v3506_v58, %v10343_v7 }
0x10d7   : > { %v8661_v32 = vpop.f32.mrf.mxu1 }
0x10d8   : > { %v3527_v25 = vadd.f32 %v3522_v40, %v9620_v22  ;;  %v3545_v17 = vsel %vm625_vm2, %v10451_v29, 0.0  ;;  %v7521_v32 = vld [vmem:[%s9676_s14 + $0x2] ss:$0 sm:$0xff] }
0x10d9   : > { %3546 = vadd.xlane.f32.xlu1 %v3545_v17  ;;  %v3511_v63 = vpop.f32.mrf.mxu1 }
0x10da   : > { %v10457_v19 = vadd.f32 %v7520_v21, %v3527_v25  ;;  %v3523_v16 = vadd.f32 %v3511_v63, %v10347_v10  ;;  %v7522_v63 = vld [vmem:[%s9676_s14 + $0x3] ss:$0 sm:$0xff] }
0x10db   : > { %v8664_v61 = vpop.f32.mrf.mxu1 }
0x10dc   : > { %v3528_v35 = vadd.f32 %v3523_v16, %v9626_v28  ;;  %v3548_v23 = vsel %vm625_vm2, %v10457_v19, 0.0 }
0x10dd   : > { %3549 = vadd.xlane.f32.xlu0 %v3548_v23  ;;  %v3516_v7 = vpop.f32.mrf.mxu1 }
0x10de   : > { %v10463_v30 = vadd.f32 %v7520_v21, %v3528_v35  ;;  %v3524_v22 = vadd.f32 %v3516_v7, %v10351_v20 }
0x10df   : > { %v8667_v38 = vpop.f32.mrf.mxu1 }
0x10e0   : > { %v3529_v44 = vadd.f32 %v3524_v22, %v9632_v34  ;;  %v3551_v50 = vsel %vm625_vm2, %v10463_v30, 0.0 }
0x10e1   : > { %3552 = vadd.xlane.f32.xlu1 %v3551_v50 }
0x10e2   : > { %v10469_v10 = vadd.f32 %v7520_v21, %v3529_v44 }
0x10e4   : > { %v3554_v28 = vsel %vm625_vm2, %v10469_v10, 0.0 }
0x10e5   : > { %3555 = vadd.xlane.f32.xlu0 %v3554_v28 }
0x115e   : > { %v3544_v31 = vpop.xlane.xlu0 %3543 }
0x115f   : > { %v3557_v2 = vmul.f32 0.03125, %v3544_v31 }
0x1161   : > { %v3562_v33 = vsub.f32 %v10445_v26, %v3557_v2 }
0x1162   : > { %v3547_v56 = vpop.xlane.xlu1 %3546 }
0x1163   : > { %v3558_v60 = vmul.f32 0.03125, %v3547_v56  ;;  %v3567_v20 = vmul.f32 %v3562_v33, %v3562_v33 }
0x1165   : > { %v10475_v62 = vsub.f32 %v10451_v29, %v3558_v60  ;;  %v3572_v34 = vsel %vm625_vm2, %v3567_v20, 0.0 }
0x1166   : > { %v3550_v42 = vpop.xlane.xlu0 %3549  ;;  %3573 = vadd.xlane.f32.xlu1 %v3572_v34 }
0x1167   : > { %v3559_v36 = vmul.f32 0.03125, %v3550_v42  ;;  %v3568_v43 = vmul.f32 %v10475_v62, %v10475_v62  ;;  %v3771_v42 = vld [vmem:[%s10503_s15 + $0x58] sm:$0xff] }
0x1168   : > { %8692 = vmatpush3.msra.mxu1 %v3771_v42 }
0x1169   : > { %v10481_v46 = vsub.f32 %v10457_v19, %v3559_v36  ;;  %v3575_v49 = vsel %vm625_vm2, %v3568_v43, 0.0  ;;  %8693 = vmatprep.subr.mxu1 %v9506_v0  ;;  %v3770_v36 = vld [vmem:[%s10503_s15 + $0x50] sm:$0xff]  ;;  %v3769_v43 = vld [vmem:[%s10503_s15 + $0x48] sm:$0xff] }
0x116a   : > { %v3553_v37 = vpop.xlane.xlu1 %3552  ;;  %3576 = vadd.xlane.f32.xlu0 %v3575_v49  ;;  %8694 = vmatpush3.msra.mxu1 %v3770_v36  ;;  %v3767_v49 = vld [vmem:[%s10503_s15 + $0x38] sm:$0xff] }
0x116b   : > { %v3560_v52 = vmul.f32 0.03125, %v3553_v37  ;;  %v3569_v55 = vmul.f32 %v10481_v46, %v10481_v46  ;;  %8695 = vmatprep.subr.mxu1 %v9506_v0  ;;  %v3766_v37 = vld [vmem:[%s10503_s15 + $0x30] sm:$0xff] }
0x116c   : > { %8696 = vmatpush3.msra.mxu1 %v3769_v43 }
0x116d   : > { %v10487_v1 = vsub.f32 %v10463_v30, %v3560_v52  ;;  %v3578_v41 = vsel %vm625_vm2, %v3569_v55, 0.0  ;;  %8697 = vmatprep.subr.mxu1 %v9506_v0  ;;  %v3765_v52 = vld [vmem:[%s10503_s15 + $0x28] sm:$0xff]  ;;  %v3764_v55 = vld [vmem:[%s10503_s15 + $0x20] sm:$0xff] }
0x116e   : > { %3579 = vadd.xlane.f32.xlu1 %v3578_v41  ;;  %v3556_v3 = vpop.xlane.xlu0 %3555 }
0x116f   : > { %v3561_v4 = vmul.f32 0.03125, %v3556_v3  ;;  %v3570_v45 = vmul.f32 %v10487_v1, %v10487_v1 }
0x1171   : > { %v10493_v5 = vsub.f32 %v10469_v10, %v3561_v4  ;;  %v3581_v51 = vsel %vm625_vm2, %v3570_v45, 0.0 }
0x1172   : > { %3582 = vadd.xlane.f32.xlu0 %v3581_v51 }
0x1173   : > { %v3571_v8 = vmul.f32 %v10493_v5, %v10493_v5 }
0x1175   : > { %v3584_v57 = vsel %vm625_vm2, %v3571_v8, 0.0 }
0x1176   : > { %3585 = vadd.xlane.f32.xlu1 %v3584_v57 }
0x11ef   : > { %v3574_v9 = vpop.xlane.xlu1 %3573 }
0x11f0   : > { %v3587_v39 = vmul.f32 0.03125, %v3574_v9 }
0x11f2   : > { %v3592_v12 = vadd.f32 1e-06, %v3587_v39 }
0x11f3   : > { %v3577_v11 = vpop.xlane.xlu0 %3576 }
0x11f4   : > { %9351 = vrsqrt.f32 %v3592_v12  ;;  %v3588_v48 = vmul.f32 0.03125, %v3577_v11 }
0x11f6   : > { %v3593_v21 = vadd.f32 1e-06, %v3588_v48 }
0x11f7   : > { %v3580_v6 = vpop.xlane.xlu1 %3579 }
0x11f8   : > { %9353 = vrsqrt.f32 %v3593_v21  ;;  %v3589_v54 = vmul.f32 0.03125, %v3580_v6 }
0x11fa   : > { %v3594_v24 = vadd.f32 1e-06, %v3589_v54 }
0x11fb   : > { %v3583_v59 = vpop.xlane.xlu0 %3582 }
0x11fc   : > { %9355 = vrsqrt.f32 %v3594_v24  ;;  %v3590_v27 = vmul.f32 0.03125, %v3583_v59 }
0x11fe   : > { %v3595_v14 = vadd.f32 1e-06, %v3590_v27 }
0x11ff   : > { %v3586_v15 = vpop.xlane.xlu1 %3585 }
0x1200   : > { %9357 = vrsqrt.f32 %v3595_v14  ;;  %v3591_v58 = vmul.f32 0.03125, %v3586_v15 }
0x1201   : > { %v9352_v40 = vpop.eup %9351 }
0x1202   : > { %v3602_v25 = vmul.f32 %v9352_v40, %v3562_v33  ;;  %v3596_v17 = vadd.f32 1e-06, %v3591_v58 }
0x1204   : > { %v3611_v16 = vmul.f32 %v7521_v32, %v3602_v25  ;;  %9359 = vrsqrt.f32 %v3596_v17 }
0x1205   : > { %v9354_v61 = vpop.eup %9353 }
0x1206   : > { %v3620_v35 = vadd.f32 %v7522_v63, %v3611_v16  ;;  %v3603_v23 = vmul.f32 %v9354_v61, %v10475_v62 }
0x1208   : > { %8677 = vmatmul.mubr.msk.f32.vlgmr.msra.gmra.mxu0 %vm625_vm2, %v3620_v35  ;;  %v3612_v7 = vmul.f32 %v7521_v32, %v3603_v23 }
0x1209   : > { %v9356_v22 = vpop.eup %9355  ;;  %8679 = vmatprep.mubr.msk.f32.mxu0 %vm9507_vm0, %v9506_v0 }
0x120a   : > { %v3604_v38 = vmul.f32 %v9356_v22, %v10481_v46  ;;  %v3621_v44 = vadd.f32 %v7522_v63, %v3612_v7  ;;  %v3768_v46 = vld [vmem:[%s10503_s15 + $0x40] sm:$0xff] }
0x120b   : > { %8698 = vmatpush3.msra.mxu1 %v3768_v46 }
0x120c   : > { %8680 = vmatmul.mubr.msk.f32.gmra.mxu0 %vm625_vm2, %v3621_v44  ;;  %v3613_v50 = vmul.f32 %v7521_v32, %v3604_v38  ;;  %8699 = vmatprep.subr.mxu1 %v9506_v0 }
0x120d   : > { %v9358_v28 = vpop.eup %9357  ;;  %8682 = vmatprep.mubr.msk.f32.mxu0 %vm9507_vm0, %v9506_v0  ;;  %8700 = vmatpush3.msra.mxu1 %v3767_v49 }
0x120e   : > { %v3605_v31 = vmul.f32 %v9358_v28, %v10487_v1  ;;  %v3622_v2 = vadd.f32 %v7522_v63, %v3613_v50  ;;  %8701 = vmatprep.subr.mxu1 %v9506_v0  ;;  %v7523_v1 = vld [vmem:[%s9676_s14 + $0x5] ss:$0 sm:$0xff]  ;;  %v7529_v28 = vld [vmem:[%s9676_s14 + $0x6] ss:$0 sm:$0xff] }
0x120f   : > { %8702 = vmatpush3.msra.mxu1 %v3766_v37 }
0x1210   : > { %8683 = vmatmul.mubr.msk.f32.gmra.mxu0 %vm625_vm2, %v3622_v2  ;;  %v3614_v33 = vmul.f32 %v7521_v32, %v3605_v31  ;;  %8703 = vmatprep.subr.mxu1 %v9506_v0 }
0x1211   : > { %v9360_v56 = vpop.eup %9359  ;;  %8685 = vmatprep.mubr.msk.f32.mxu0 %vm9507_vm0, %v9506_v0  ;;  %8704 = vmatpush3.msra.mxu1 %v3765_v52 }
0x1212   : > { %v3606_v60 = vmul.f32 %v9360_v56, %v10493_v5  ;;  %v3623_v20 = vadd.f32 %v7522_v63, %v3614_v33  ;;  %8705 = vmatprep.subr.mxu1 %v9506_v0 }
0x1213   : > { %8706 = vmatpush3.msra.mxu1 %v3764_v55 }
0x1214   : > { %8686 = vmatmul.mubr.msk.f32.gmra.mxu0 %vm625_vm2, %v3623_v20  ;;  %v3615_v62 = vmul.f32 %v7521_v32, %v3606_v60  ;;  %8739 = vmatprep.subr.mxu1 %v9506_v0 }
0x1215   : > { %8688 = vmatprep.mubr.msk.f32.mxu0 %vm9507_vm0, %v9506_v0 }
0x1216   : > { %v3624_v34 = vadd.f32 %v7522_v63, %v3615_v62 }
0x1218   : > { %8689 = vmatmul.mubr.msk.f32.gmra.mxu0 %vm625_vm2, %v3624_v34 }
0x1219   : > { %8724 = vmatprep.mubr.msk.f32.mxu0 %vm9507_vm0, %v9506_v0 }
0x12c8   : > { %v3715_v41 = vpop.f32.mrf.mxu0 }
0x12c9   : > { %v3716_v3 = vadd.f32 %v7523_v1, %v3715_v41 }
0x12ca   : > { %v8678_v4 = vpop.f32.mrf.mxu0 }
0x12cb   : > { %v3744_v45 = vmul.f32 0.70710677, %v3716_v3  ;;  %v3739_v24 = vmul.f32 0.5, %v3716_v3 }
0x12cc   : > { %v3720_v5 = vpop.f32.mrf.mxu0 }
0x12cd   : > { %9361 = verf.f32 %v3744_v45  ;;  %v3721_v51 = vadd.f32 %v7523_v1, %v3720_v5 }
0x12ce   : > { %v8681_v8 = vpop.f32.mrf.mxu0 }
0x12cf   : > { %v3745_v57 = vmul.f32 0.70710677, %v3721_v51  ;;  %v3740_v58 = vmul.f32 0.5, %v3721_v51 }
0x12d0   : > { %v3725_v47 = vpop.f32.mrf.mxu0 }
0x12d1   : > { %9363 = verf.f32 %v3745_v57  ;;  %v3726_v13 = vadd.f32 %v7523_v1, %v3725_v47 }
0x12d2   : > { %v8684_v18 = vpop.f32.mrf.mxu0 }
0x12d3   : > { %v3746_v53 = vmul.f32 0.70710677, %v3726_v13  ;;  %v3741_v17 = vmul.f32 0.5, %v3726_v13 }
0x12d4   : > { %v3730_v9 = vpop.f32.mrf.mxu0 }
0x12d5   : > { %9365 = verf.f32 %v3746_v53  ;;  %v3731_v39 = vadd.f32 %v7523_v1, %v3730_v9 }
0x12d6   : > { %v8687_v12 = vpop.f32.mrf.mxu0 }
0x12d7   : > { %v3747_v11 = vmul.f32 0.70710677, %v3731_v39  ;;  %v3742_v35 = vmul.f32 0.5, %v3731_v39 }
0x12d8   : > { %v3735_v48 = vpop.f32.mrf.mxu0 }
0x12d9   : > { %9367 = verf.f32 %v3747_v11  ;;  %v3736_v21 = vadd.f32 %v7523_v1, %v3735_v48 }
0x12da   : > { %v9362_v6 = vpop.eup %9361  ;;  %v8690_v54 = vpop.f32.mrf.mxu0 }
0x12db   : > { %v3754_v59 = vadd.f32 1.0, %v9362_v6  ;;  %v3748_v27 = vmul.f32 0.70710677, %v3736_v21  ;;  %v3743_v38 = vmul.f32 0.5, %v3736_v21 }
0x12dd   : > { %v3759_v14 = vmul.f32 %v3754_v59, %v3739_v24  ;;  %9369 = verf.f32 %v3748_v27 }
0x12de   : > { %v9364_v15 = vpop.eup %9363 }
0x12df   : > { %v3755_v40 = vadd.f32 1.0, %v9364_v15  ;;  %8708 = vmatmul.mubr.msk.f32.vlgmr.msra.gmra.mxu1 %vm3777_vm5, %v3759_v14 }
0x12e0   : > { %8710 = vmatprep.mubr.msk.f32.mxu1 %vm9507_vm0, %v9506_v0 }
0x12e1   : > { %v3760_v32 = vmul.f32 %v3755_v40, %v3740_v58 }
0x12e2   : > { %v9366_v25 = vpop.eup %9365 }
0x12e3   : > { %v3756_v63 = vadd.f32 1.0, %v9366_v25  ;;  %8711 = vmatmul.mubr.msk.f32.gmra.mxu1 %vm3777_vm5, %v3760_v32  ;;  %v7546_v25 = vld [vmem:[%s9662_s27 + $0x80] sm:$0xff] }
0x12e4   : > { %8713 = vmatprep.mubr.msk.f32.mxu1 %vm9507_vm0, %v9506_v0  ;;  %8740 = vmatpush3.xpose.msk.msra.mxu1 %vm625_vm2, %v7546_v25 }
0x12e5   : > { %v3761_v16 = vmul.f32 %v3756_v63, %v3741_v17  ;;  %v7537_v17 = vld [vmem:[%s9662_s27 + $0x60] sm:$0xff]  ;;  %8773 = vmatprep.subr.mxu1 %v9506_v0 }
0x12e6   : > { %v9368_v61 = vpop.eup %9367  ;;  %8723 = vmatpush3.xpose.msk.msra.mxu0 %vm625_vm2, %v7537_v17 }
0x12e7   : > { %v3757_v23 = vadd.f32 1.0, %v9368_v61  ;;  %8714 = vmatmul.mubr.msk.f32.gmra.mxu1 %vm3777_vm5, %v3761_v16  ;;  %8756 = vmatprep.subr.mxu0 %v9506_v0 }
0x12e8   : > { %8716 = vmatprep.mubr.msk.f32.mxu1 %vm9507_vm0, %v9506_v0 }
0x12e9   : > { %v3762_v7 = vmul.f32 %v3757_v23, %v3742_v35 }
0x12ea   : > { %v9370_v22 = vpop.eup %9369 }
0x12eb   : > { %v3758_v44 = vadd.f32 1.0, %v9370_v22  ;;  %8717 = vmatmul.mubr.msk.f32.gmra.mxu1 %vm3777_vm5, %v3762_v7 }
0x12ec   : > { %8719 = vmatprep.mubr.msk.f32.mxu1 %vm9507_vm0, %v9506_v0 }
0x12ed   : > { %v3763_v50 = vmul.f32 %v3758_v44, %v3743_v38 }
0x12ef   : > { %8720 = vmatmul.mubr.msk.f32.gmra.mxu1 %vm3777_vm5, %v3763_v50 }
0x12f0   : > { %8741 = vmatprep.mubr.msk.f32.mxu1 %vm9507_vm0, %v9506_v0 }
0x139f   : > { %v3859_v31 = vpop.f32.mrf.mxu1 }
0x13a0   : > { %v3860_v2 = vadd.f32 %v7529_v28, %v3859_v31 }
0x13a1   : > { %v8709_v33 = vpop.f32.mrf.mxu1 }
0x13a2   : > { %v10568_v56 = vadd.f32 %v3860_v2, %v10445_v26 }
0x13a3   : > { %v3864_v60 = vpop.f32.mrf.mxu1 }
0x13a4   : > { %v3865_v20 = vadd.f32 %v7529_v28, %v3864_v60  ;;  %v3890_v62 = vsel %vm625_vm2, %v10568_v56, 0.0 }
0x13a5   : > { %3891 = vadd.xlane.f32.xlu0 %v3890_v62  ;;  %v8712_v34 = vpop.f32.mrf.mxu1 }
0x13a6   : > { %v10573_v42 = vadd.f32 %v3865_v20, %v10451_v29  ;;  %v7535_v20 = vld [vmem:[%s9676_s14 + $0x7] ss:$0 sm:$0xff] }
0x13a7   : > { %v3869_v36 = vpop.f32.mrf.mxu1 }
0x13a8   : > { %v3870_v43 = vadd.f32 %v7529_v28, %v3869_v36  ;;  %v3893_v46 = vsel %vm625_vm2, %v10573_v42, 0.0  ;;  %v7536_v36 = vld [vmem:[%s9676_s14 + $0x8] ss:$0 sm:$0xff] }
0x13a9   : > { %3894 = vadd.xlane.f32.xlu1 %v3893_v46  ;;  %v8715_v49 = vpop.f32.mrf.mxu1 }
0x13aa   : > { %v10578_v26 = vadd.f32 %v3870_v43, %v10457_v19 }
0x13ab   : > { %v3874_v37 = vpop.f32.mrf.mxu1 }
0x13ac   : > { %v3875_v52 = vadd.f32 %v7529_v28, %v3874_v37  ;;  %v3896_v55 = vsel %vm625_vm2, %v10578_v26, 0.0 }
0x13ad   : > { %3897 = vadd.xlane.f32.xlu0 %v3896_v55  ;;  %v8718_v1 = vpop.f32.mrf.mxu1 }
0x13ae   : > { %v10583_v29 = vadd.f32 %v3875_v52, %v10463_v30  ;;  %v7555_v52 = vld [vmem:[%s9662_s27 + $0xa0] sm:$0xff] }
0x13af   : > { %v3879_v41 = vpop.f32.mrf.mxu1 }
0x13b0   : > { %v3880_v3 = vadd.f32 %v7529_v28, %v3879_v41  ;;  %v3899_v4 = vsel %vm625_vm2, %v10583_v29, 0.0 }
0x13b1   : > { %3900 = vadd.xlane.f32.xlu1 %v3899_v4  ;;  %v8721_v45 = vpop.f32.mrf.mxu1 }
0x13b2   : > { %v10588_v19 = vadd.f32 %v3880_v3, %v10469_v10 }
0x13b4   : > { %v3902_v5 = vsel %vm625_vm2, %v10588_v19, 0.0 }
0x13b5   : > { %3903 = vadd.xlane.f32.xlu0 %v3902_v5 }
0x142e   : > { %v3892_v51 = vpop.xlane.xlu0 %3891 }
0x142f   : > { %v3905_v8 = vmul.f32 0.03125, %v3892_v51 }
0x1431   : > { %v3910_v57 = vsub.f32 %v10568_v56, %v3905_v8 }
0x1432   : > { %v3895_v30 = vpop.xlane.xlu1 %3894 }
0x1433   : > { %v3906_v47 = vmul.f32 0.03125, %v3895_v30  ;;  %v3915_v13 = vmul.f32 %v3910_v57, %v3910_v57 }
0x1435   : > { %v3911_v18 = vsub.f32 %v10573_v42, %v3906_v47  ;;  %v3920_v53 = vsel %vm625_vm2, %v3915_v13, 0.0 }
0x1436   : > { %v3898_v9 = vpop.xlane.xlu0 %3897  ;;  %3921 = vadd.xlane.f32.xlu1 %v3920_v53 }
0x1437   : > { %v3907_v39 = vmul.f32 0.03125, %v3898_v9  ;;  %v3916_v10 = vmul.f32 %v3911_v18, %v3911_v18 }
0x1439   : > { %v3912_v12 = vsub.f32 %v10578_v26, %v3907_v39  ;;  %v3923_v11 = vsel %vm625_vm2, %v3916_v10, 0.0 }
0x143a   : > { %v3901_v48 = vpop.xlane.xlu1 %3900  ;;  %3924 = vadd.xlane.f32.xlu0 %v3923_v11 }
0x143b   : > { %v3908_v21 = vmul.f32 0.03125, %v3901_v48  ;;  %v3917_v6 = vmul.f32 %v3912_v12, %v3912_v12 }
0x143d   : > { %v10598_v54 = vsub.f32 %v10583_v29, %v3908_v21  ;;  %v3926_v24 = vsel %vm625_vm2, %v3917_v6, 0.0 }
0x143e   : > { %3927 = vadd.xlane.f32.xlu1 %v3926_v24  ;;  %v3904_v59 = vpop.xlane.xlu0 %3903 }
0x143f   : > { %v3909_v27 = vmul.f32 0.03125, %v3904_v59  ;;  %v3918_v14 = vmul.f32 %v10598_v54, %v10598_v54 }
0x1441   : > { %v10604_v15 = vsub.f32 %v10588_v19, %v3909_v27  ;;  %v3929_v58 = vsel %vm625_vm2, %v3918_v14, 0.0 }
0x1442   : > { %3930 = vadd.xlane.f32.xlu0 %v3929_v58 }
0x1443   : > { %v3919_v40 = vmul.f32 %v10604_v15, %v10604_v15 }
0x1445   : > { %v3932_v32 = vsel %vm625_vm2, %v3919_v40, 0.0  ;;  %v7548_v40 = vld [vmem:[%s9771_s18 + $0x10] ss:$0 sm:$0xff] }
0x1446   : > { %3933 = vadd.xlane.f32.xlu1 %v3932_v32 }
0x14bf   : > { %v3922_v63 = vpop.xlane.xlu1 %3921 }
0x14c0   : > { %v3935_v16 = vmul.f32 0.03125, %v3922_v63 }
0x14c2   : > { %v3940_v61 = vadd.f32 1e-06, %v3935_v16 }
0x14c3   : > { %v3925_v35 = vpop.xlane.xlu0 %3924 }
0x14c4   : > { %9371 = vrsqrt.f32 %v3940_v61  ;;  %v3936_v23 = vmul.f32 0.03125, %v3925_v35 }
0x14c6   : > { %v3941_v7 = vadd.f32 1e-06, %v3936_v23 }
0x14c7   : > { %v3928_v22 = vpop.xlane.xlu1 %3927 }
0x14c8   : > { %9373 = vrsqrt.f32 %v3941_v7  ;;  %v3937_v38 = vmul.f32 0.03125, %v3928_v22 }
0x14ca   : > { %v3942_v44 = vadd.f32 1e-06, %v3937_v38 }
0x14cb   : > { %v3931_v50 = vpop.xlane.xlu0 %3930 }
0x14cc   : > { %9375 = vrsqrt.f32 %v3942_v44  ;;  %v3938_v28 = vmul.f32 0.03125, %v3931_v50 }
0x14ce   : > { %v3943_v31 = vadd.f32 1e-06, %v3938_v28 }
0x14cf   : > { %v3934_v2 = vpop.xlane.xlu1 %3933 }
0x14d0   : > { %9377 = vrsqrt.f32 %v3943_v31  ;;  %v3939_v33 = vmul.f32 0.03125, %v3934_v2  ;;  %v7539_v2 = vld [vmem:[%s9771_s18 + $0xc] ss:$0 sm:$0xff] }
0x14d1   : > { %v9372_v60 = vpop.eup %9371 }
0x14d2   : > { %v3950_v62 = vmul.f32 %v9372_v60, %v3910_v57  ;;  %v3944_v34 = vadd.f32 1e-06, %v3939_v33 }
0x14d4   : > { %v3959_v43 = vmul.f32 %v7535_v20, %v3950_v62  ;;  %9379 = vrsqrt.f32 %v3944_v34  ;;  %v7557_v62 = vld [vmem:[%s9771_s18 + $0x14] ss:$0 sm:$0xff] }
0x14d5   : > { %v9374_v46 = vpop.eup %9373 }
0x14d6   : > { %v10618_v49 = vadd.f32 %v7536_v36, %v3959_v43  ;;  %v3951_v37 = vmul.f32 %v9374_v46, %v3911_v18  ;;  %v7580_v43 = vld [vmem:[%s9662_s27 + $0x68] sm:$0xff] }
0x14d8   : > { %v3960_v55 = vmul.f32 %v7535_v20, %v3951_v37  ;;  %8725 = vmatmul.mubr.msk.f32.vlgmr.msra.gmra.mxu0 %vm625_vm2, %v10618_v49  ;;  %8742 = vmatmul.mubr.msk.f32.vlgmr.msra.gmra.mxu1 %vm625_vm2, %v10618_v49 }
0x14d9   : > { %v9376_v1 = vpop.eup %9375  ;;  %8727 = vmatprep.mubr.msk.f32.mxu0 %vm9507_vm0, %v9506_v0  ;;  %8744 = vmatprep.mubr.msk.f32.mxu1 %vm9507_vm0, %v9506_v0 }
0x14da   : > { %v10629_v41 = vadd.f32 %v7536_v36, %v3960_v55  ;;  %v3952_v3 = vmul.f32 %v9376_v1, %v3912_v12  ;;  %8757 = vmatpush3.xpose.msk.msra.mxu0 %vm625_vm2, %v7555_v52 }
0x14db   : > { %8798 = vmatprep.subr.mxu0 %v9506_v0 }
0x14dc   : > { %v3961_v4 = vmul.f32 %v7535_v20, %v3952_v3  ;;  %8728 = vmatmul.mubr.msk.f32.gmra.mxu0 %vm625_vm2, %v10629_v41  ;;  %8745 = vmatmul.mubr.msk.f32.gmra.mxu1 %vm625_vm2, %v10629_v41 }
0x14dd   : > { %v9378_v45 = vpop.eup %9377  ;;  %8730 = vmatprep.mubr.msk.f32.mxu0 %vm9507_vm0, %v9506_v0  ;;  %8747 = vmatprep.mubr.msk.f32.mxu1 %vm9507_vm0, %v9506_v0 }
0x14de   : > { %v10641_v5 = vadd.f32 %v7536_v36, %v3961_v4  ;;  %v3953_v51 = vmul.f32 %v9378_v45, %v10598_v54 }
0x14e0   : > { %v3962_v8 = vmul.f32 %v7535_v20, %v3953_v51  ;;  %8731 = vmatmul.mubr.msk.f32.gmra.mxu0 %vm625_vm2, %v10641_v5  ;;  %8748 = vmatmul.mubr.msk.f32.gmra.mxu1 %vm625_vm2, %v10641_v5 }
0x14e1   : > { %v9380_v57 = vpop.eup %9379  ;;  %8733 = vmatprep.mubr.msk.f32.mxu0 %vm9507_vm0, %v9506_v0  ;;  %8750 = vmatprep.mubr.msk.f32.mxu1 %vm9507_vm0, %v9506_v0 }
0x14e2   : > { %v10652_v30 = vadd.f32 %v7536_v36, %v3962_v8  ;;  %v3954_v47 = vmul.f32 %v9380_v57, %v10604_v15  ;;  %v7598_v8 = vld [vmem:[%s9662_s27 + $0xa8] sm:$0xff] }
0x14e4   : > { %v3963_v13 = vmul.f32 %v7535_v20, %v3954_v47  ;;  %8734 = vmatmul.mubr.msk.f32.gmra.mxu0 %vm625_vm2, %v10652_v30  ;;  %8751 = vmatmul.mubr.msk.f32.gmra.mxu1 %vm625_vm2, %v10652_v30 }
0x14e5   : > { %8736 = vmatprep.mubr.msk.f32.mxu0 %vm9507_vm0, %v9506_v0  ;;  %8753 = vmatprep.mubr.msk.f32.mxu1 %vm9507_vm0, %v9506_v0 }
0x14e6   : > { %v10663_v18 = vadd.f32 %v7536_v36, %v3963_v13 }
0x14e8   : > { %8737 = vmatmul.mubr.msk.f32.gmra.mxu0 %vm625_vm2, %v10663_v18  ;;  %8754 = vmatmul.mubr.msk.f32.gmra.mxu1 %vm625_vm2, %v10663_v18 }
0x14e9   : > { %8758 = vmatprep.mubr.msk.f32.mxu0 %vm9507_vm0, %v9506_v0  ;;  %8783 = vmatprep.mubr.msk.f32.mxu1 %vm9507_vm0, %v9506_v0 }
0x14ec   : > { %8759 = vmatmul.mubr.msk.f32.vlgmr.msra.gmra.mxu0 %vm625_vm2, %v10618_v49 }
0x14ed   : > { %8761 = vmatprep.mubr.msk.f32.mxu0 %vm9507_vm0, %v9506_v0 }
0x14f0   : > { %8762 = vmatmul.mubr.msk.f32.gmra.mxu0 %vm625_vm2, %v10629_v41 }
0x14f1   : > { %8764 = vmatprep.mubr.msk.f32.mxu0 %vm9507_vm0, %v9506_v0 }
0x14f4   : > { %8765 = vmatmul.mubr.msk.f32.gmra.mxu0 %vm625_vm2, %v10641_v5 }
0x14f5   : > { %8767 = vmatprep.mubr.msk.f32.mxu0 %vm9507_vm0, %v9506_v0 }
0x14f8   : > { %8768 = vmatmul.mubr.msk.f32.gmra.mxu0 %vm625_vm2, %v10652_v30 }
0x14f9   : > { %8770 = vmatprep.mubr.msk.f32.mxu0 %vm9507_vm0, %v9506_v0 }
0x14fc   : > { %8771 = vmatmul.mubr.msk.f32.gmra.mxu0 %vm625_vm2, %v10663_v18 }
0x14fd   : > { %8808 = vmatprep.mubr.msk.f32.mxu0 %vm9507_vm0, %v9506_v0 }
0x1598   : > { %v4065_v53 = vpop.f32.mrf.mxu0  ;;  %v4166_v9 = vpop.f32.mrf.mxu1 }
0x1599   : > { %v4167_v33 = vadd.f32 %v7548_v40, %v4166_v9  ;;  %v4066_v20 = vadd.f32 %v7539_v2, %v4065_v53  ;;  %v10775_v53 = vld [vmem:[%s11442_s0] sm:$0xff] }
0x159a   : > { %v8726_v39 = vpop.f32.mrf.mxu0  ;;  %v8743_v10 = vpop.f32.mrf.mxu1 }
0x159c   : > { %v4070_v12 = vpop.f32.mrf.mxu0  ;;  %v4171_v11 = vpop.f32.mrf.mxu1 }
0x159d   : > { %v4172_v50 = vadd.f32 %v7548_v40, %v4171_v11  ;;  %v4071_v52 = vadd.f32 %v7539_v2, %v4070_v12 }
0x159e   : > { %v8729_v48 = vpop.f32.mrf.mxu0  ;;  %v8746_v21 = vpop.f32.mrf.mxu1 }
0x159f   : > { %v10785_v48 = vld [vmem:[%s11442_s0 + $0x8] sm:$0xff] }
0x15a0   : > { %v4075_v6 = vpop.f32.mrf.mxu0  ;;  %v4176_v54 = vpop.f32.mrf.mxu1 }
0x15a1   : > { %v4177_v22 = vadd.f32 %v7548_v40, %v4176_v54  ;;  %v4076_v3 = vadd.f32 %v7539_v2, %v4075_v6 }
0x15a2   : > { %v8732_v24 = vpop.f32.mrf.mxu0  ;;  %v8749_v59 = vpop.f32.mrf.mxu1 }
0x15a4   : > { %v4080_v27 = vpop.f32.mrf.mxu0  ;;  %v4181_v14 = vpop.f32.mrf.mxu1 }
0x15a5   : > { %v4182_v35 = vadd.f32 %v7548_v40, %v4181_v14  ;;  %v4081_v45 = vadd.f32 %v7539_v2, %v4080_v27  ;;  %v10795_v27 = vld [vmem:[%s11442_s0 + $0x10] sm:$0xff] }
0x15a6   : > { %v8735_v15 = vpop.f32.mrf.mxu0  ;;  %v8752_v58 = vpop.f32.mrf.mxu1 }
0x15a8   : > { %v4085_v32 = vpop.f32.mrf.mxu0  ;;  %v4186_v25 = vpop.f32.mrf.mxu1 }
0x15a9   : > { %v4187_v17 = vadd.f32 %v7548_v40, %v4186_v25  ;;  %v4086_v51 = vadd.f32 %v7539_v2, %v4085_v32  ;;  %v10805_v25 = vld [vmem:[%s11442_s0 + $0x18] sm:$0xff] }
0x15aa   : > { %v8738_v63 = vpop.f32.mrf.mxu0  ;;  %v8755_v16 = vpop.f32.mrf.mxu1 }
0x15ab   : > { %8774 = vmatpush3.xpose.msk.msra.mxu1 %vm1026_vm3, %v4187_v17 }
0x15ac   : > { %v4267_v61 = vpop.f32.mrf.mxu0  ;;  %8775 = vmatprep.subr.mxu1 %v9506_v0 }
0x15ad   : > { %v4268_v4 = vadd.f32 %v7557_v62, %v4267_v61 }
0x15ae   : > { %v8760_v23 = vpop.f32.mrf.mxu0 }
0x15af   : > { %8776 = vmatpush3.xpose.msk.msra.mxu1 %vm1026_vm3, %v4182_v35  ;;  %v10812_v23 = vld [vmem:[%s11442_s0 + $0x20] sm:$0xff] }
0x15b0   : > { %v4272_v7 = vpop.f32.mrf.mxu0  ;;  %8777 = vmatprep.subr.mxu1 %v9506_v0 }
0x15b1   : > { %v4273_v1 = vadd.f32 %v7557_v62, %v4272_v7 }
0x15b2   : > { %v8763_v38 = vpop.f32.mrf.mxu0 }
0x15b3   : > { %8778 = vmatpush3.xpose.msk.msra.mxu1 %vm1026_vm3, %v4177_v22 }
0x15b4   : > { %v4277_v44 = vpop.f32.mrf.mxu0  ;;  %8779 = vmatprep.subr.mxu1 %v9506_v0 }
0x15b5   : > { %v4278_v55 = vadd.f32 %v7557_v62, %v4277_v44 }
0x15b6   : > { %v8766_v28 = vpop.f32.mrf.mxu0 }
0x15b7   : > { %8780 = vmatpush3.xpose.msk.msra.mxu1 %vm1026_vm3, %v4172_v50 }
0x15b8   : > { %v4282_v31 = vpop.f32.mrf.mxu0  ;;  %8781 = vmatprep.subr.mxu1 %v9506_v0 }
0x15b9   : > { %v4283_v37 = vadd.f32 %v7557_v62, %v4282_v31 }
0x15ba   : > { %v8769_v60 = vpop.f32.mrf.mxu0 }
0x15bb   : > { %8782 = vmatpush3.xpose.msk.msra.mxu1 %vm1026_vm3, %v4167_v33 }
0x15bc   : > { %v4287_v34 = vpop.f32.mrf.mxu0  ;;  %8823 = vmatprep.subr.mxu1 %v9506_v0 }
0x15bd   : > { %v4288_v36 = vadd.f32 %v7557_v62, %v4287_v34 }
0x15be   : > { %v8772_v46 = vpop.f32.mrf.mxu0  ;;  %8784 = vmatmul.mubr.msk.f32.vlgmr.msra.gmra.mxu1 %vm1026_vm3, %v4066_v20 }
0x15bf   : > { %8799 = vmatpush3.msra.mxu0 %v4288_v36  ;;  %8786 = vmatprep.mubr.msk.f32.mxu1 %vm9507_vm0, %v9506_v0 }
0x15c0   : > { %8800 = vmatprep.subr.mxu0 %v9506_v0  ;;  %8824 = vmatpush3.xpose.msk.msra.mxu1 %vm625_vm2, %v7580_v43 }
0x15c1   : > { %8801 = vmatpush3.msra.mxu0 %v4283_v37  ;;  %8857 = vmatprep.subr.mxu1 %v9506_v0 }
0x15c2   : > { %8787 = vmatmul.mubr.msk.f32.gmra.mxu1 %vm1026_vm3, %v4071_v52  ;;  %8802 = vmatprep.subr.mxu0 %v9506_v0 }
0x15c3   : > { %8803 = vmatpush3.msra.mxu0 %v4278_v55  ;;  %8789 = vmatprep.mubr.msk.f32.mxu1 %vm9507_vm0, %v9506_v0 }
0x15c4   : > { %8804 = vmatprep.subr.mxu0 %v9506_v0 }
0x15c5   : > { %8805 = vmatpush3.msra.mxu0 %v4273_v1 }
0x15c6   : > { %8790 = vmatmul.mubr.msk.f32.gmra.mxu1 %vm1026_vm3, %v4076_v3  ;;  %8806 = vmatprep.subr.mxu0 %v9506_v0  ;;  %v7600_v3 = vld [vmem:[%s9771_s18 + $0x15] ss:$0 sm:$0xff] }
0x15c7   : > { %8807 = vmatpush3.msra.mxu0 %v4268_v4  ;;  %8792 = vmatprep.mubr.msk.f32.mxu1 %vm9507_vm0, %v9506_v0 }
0x15c8   : > { %8840 = vmatprep.subr.mxu0 %v9506_v0 }
0x15ca   : > { %8793 = vmatmul.mubr.msk.f32.gmra.mxu1 %vm1026_vm3, %v4081_v45 }
0x15cb   : > { %8795 = vmatprep.mubr.msk.f32.mxu1 %vm9507_vm0, %v9506_v0 }
0x15ce   : > { %8796 = vmatmul.mubr.msk.f32.gmra.mxu1 %vm1026_vm3, %v4086_v51 }
0x15cf   : > { %8825 = vmatprep.mubr.msk.f32.mxu1 %vm9507_vm0, %v9506_v0 }
0x15d2   : > { %8826 = vmatmul.mubr.msk.f32.vlgmr.msra.gmra.mxu1 %vm625_vm2, %v10618_v49 }
0x15d3   : > { %8828 = vmatprep.mubr.msk.f32.mxu1 %vm9507_vm0, %v9506_v0  ;;  %8858 = vmatpush3.xpose.msk.msra.mxu1 %vm625_vm2, %v7598_v8 }
0x15d4   : > { %8899 = vmatprep.subr.mxu1 %v9506_v0 }
0x15d6   : > { %8829 = vmatmul.mubr.msk.f32.gmra.mxu1 %vm625_vm2, %v10629_v41 }
0x15d7   : > { %8831 = vmatprep.mubr.msk.f32.mxu1 %vm9507_vm0, %v9506_v0 }
0x15da   : > { %8832 = vmatmul.mubr.msk.f32.gmra.mxu1 %vm625_vm2, %v10641_v5 }
0x15db   : > { %8834 = vmatprep.mubr.msk.f32.mxu1 %vm9507_vm0, %v9506_v0 }
0x15de   : > { %8835 = vmatmul.mubr.msk.f32.gmra.mxu1 %vm625_vm2, %v10652_v30 }
0x15df   : > { %8837 = vmatprep.mubr.msk.f32.mxu1 %vm9507_vm0, %v9506_v0 }
0x15e2   : > { %8838 = vmatmul.mubr.msk.f32.gmra.mxu1 %vm625_vm2, %v10663_v18 }
0x15e3   : > { %8859 = vmatprep.mubr.msk.f32.mxu1 %vm9507_vm0, %v9506_v0 }
0x15e6   : > { %8860 = vmatmul.mubr.msk.f32.vlgmr.msra.gmra.mxu1 %vm625_vm2, %v10618_v49 }
0x15e7   : > { %8862 = vmatprep.mubr.msk.f32.mxu1 %vm9507_vm0, %v9506_v0 }
0x15ea   : > { %8863 = vmatmul.mubr.msk.f32.gmra.mxu1 %vm625_vm2, %v10629_v41 }
0x15eb   : > { %8865 = vmatprep.mubr.msk.f32.mxu1 %vm9507_vm0, %v9506_v0 }
0x15ee   : > { %8866 = vmatmul.mubr.msk.f32.gmra.mxu1 %vm625_vm2, %v10641_v5 }
0x15ef   : > { %8868 = vmatprep.mubr.msk.f32.mxu1 %vm9507_vm0, %v9506_v0 }
0x15f2   : > { %8869 = vmatmul.mubr.msk.f32.gmra.mxu1 %vm625_vm2, %v10652_v30 }
0x15f3   : > { %8871 = vmatprep.mubr.msk.f32.mxu1 %vm9507_vm0, %v9506_v0 }
0x15f6   : > { %8872 = vmatmul.mubr.msk.f32.gmra.mxu1 %vm625_vm2, %v10663_v18 }
0x15f7   : > { %8909 = vmatprep.mubr.msk.f32.mxu1 %vm9507_vm0, %v9506_v0 }
0x167e   : > { %v4387_v57 = vpop.f32.mrf.mxu1 }
0x167f   : > { %v4411_v47 = vmul.f32 0.35355338, %v4387_v57 }
0x1680   : > { %v8785_v13 = vpop.f32.mrf.mxu1 }
0x1681   : > { %v10778_v9 = vadd.f32 %v10775_v53, %v4411_v47 }
0x1682   : > { %v4392_v39 = vpop.f32.mrf.mxu1 }
0x1683   : > { %v4412_v10 = vmul.f32 0.35355338, %v4392_v39  ;;  %v4421_v12 = vsel %vm1157_vm4, %v10778_v9, -inf }
0x1684   : > { %4422 = vmax.xlane.f32.xlu0 %v4421_v12  ;;  %v8788_v11 = vpop.f32.mrf.mxu1 }
0x1685   : > { %v10788_v21 = vadd.f32 %v10785_v48, %v4412_v10 }
0x1686   : > { %v4397_v6 = vpop.f32.mrf.mxu1 }
0x1687   : > { %v4413_v54 = vmul.f32 0.35355338, %v4397_v6  ;;  %v4424_v24 = vsel %vm1157_vm4, %v10788_v21, -inf }
0x1688   : > { %4425 = vmax.xlane.f32.xlu1 %v4424_v24  ;;  %v8791_v59 = vpop.f32.mrf.mxu1 }
0x1689   : > { %v10798_v14 = vadd.f32 %v10795_v27, %v4413_v54 }
0x168a   : > { %v4402_v15 = vpop.f32.mrf.mxu1 }
0x168b   : > { %v4414_v58 = vmul.f32 0.35355338, %v4402_v15  ;;  %v4427_v40 = vsel %vm1157_vm4, %v10798_v14, -inf }
0x168c   : > { %4428 = vmax.xlane.f32.xlu0 %v4427_v40  ;;  %v8794_v32 = vpop.f32.mrf.mxu1 }
0x168d   : > { %v4419_v17 = vadd.f32 %v10805_v25, %v4414_v58 }
0x168e   : > { %v4407_v63 = vpop.f32.mrf.mxu1 }
0x168f   : > { %v4415_v16 = vmul.f32 0.35355338, %v4407_v63  ;;  %v4430_v61 = vsel %vm1157_vm4, %v4419_v17, -inf }
0x1690   : > { %4431 = vmax.xlane.f32.xlu1 %v4430_v61  ;;  %v8797_v35 = vpop.f32.mrf.mxu1 }
0x1691   : > { %v4420_v7 = vadd.f32 %v10812_v23, %v4415_v16 }
0x1692   : > { %v10815_v22 = vpop.f32.mrf.mxu1 }
0x1693   : > { %v4433_v38 = vsel %vm1157_vm4, %v4420_v7, -inf }
0x1694   : > { %4434 = vmax.xlane.f32.xlu0 %v4433_v38  ;;  %v8827_v44 = vpop.f32.mrf.mxu1 }
0x1696   : > { %v10818_v50 = vpop.f32.mrf.mxu1 }
0x1698   : > { %v8830_v28 = vpop.f32.mrf.mxu1 }
0x169a   : > { %v10820_v31 = vpop.f32.mrf.mxu1 }
0x169c   : > { %v8833_v2 = vpop.f32.mrf.mxu1 }
0x169e   : > { %v10822_v33 = vpop.f32.mrf.mxu1 }
0x16a0   : > { %v8836_v60 = vpop.f32.mrf.mxu1 }
0x16a2   : > { %v10824_v20 = vpop.f32.mrf.mxu1 }
0x16a4   : > { %v8839_v62 = vpop.f32.mrf.mxu1 }
0x16a6   : > { %v4859_v34 = vpop.f32.mrf.mxu1 }
0x16a7   : > { %v4860_v13 = vadd.f32 %v7600_v3, %v4859_v34 }
0x16a8   : > { %v8861_v36 = vpop.f32.mrf.mxu1 }
0x16aa   : > { %v4864_v43 = vpop.f32.mrf.mxu1 }
0x16ab   : > { %v4865_v47 = vadd.f32 %v7600_v3, %v4864_v43 }
0x16ac   : > { %v8864_v46 = vpop.f32.mrf.mxu1 }
0x16ae   : > { %v4869_v37 = vpop.f32.mrf.mxu1 }
0x16af   : > { %v4870_v57 = vadd.f32 %v7600_v3, %v4869_v37  ;;  %v7589_v37 = vld [vmem:[%s9662_s27 + $0x88] sm:$0xff] }
0x16b0   : > { %v8867_v52 = vpop.f32.mrf.mxu1 }
0x16b2   : > { %v4874_v55 = vpop.f32.mrf.mxu1 }
0x16b3   : > { %v4875_v8 = vadd.f32 %v7600_v3, %v4874_v55 }
0x16b4   : > { %v8870_v1 = vpop.f32.mrf.mxu1 }
0x16b6   : > { %v4879_v4 = vpop.f32.mrf.mxu1 }
0x16b7   : > { %v4880_v45 = vadd.f32 %v7600_v3, %v4879_v4 }
0x16b8   : > { %v8873_v51 = vpop.f32.mrf.mxu1 }
0x16b9   : > { %8900 = vmatpush3.msra.mxu1 %v4880_v45 }
0x16ba   : > { %8901 = vmatprep.subr.mxu1 %v9506_v0 }
0x16bb   : > { %8902 = vmatpush3.msra.mxu1 %v4875_v8 }
0x16bc   : > { %8903 = vmatprep.subr.mxu1 %v9506_v0 }
0x16bd   : > { %8904 = vmatpush3.msra.mxu1 %v4870_v57 }
0x16be   : > { %8905 = vmatprep.subr.mxu1 %v9506_v0 }
0x16bf   : > { %8906 = vmatpush3.msra.mxu1 %v4865_v47 }
0x16c0   : > { %8907 = vmatprep.subr.mxu1 %v9506_v0 }
0x16c1   : > { %8908 = vmatpush3.msra.mxu1 %v4860_v13 }
0x16c2   : > { %8941 = vmatprep.subr.mxu1 %v9506_v0 }
0x170d   : > { %v4423_v39 = vpop.xlane.xlu0 %4422 }
0x170e   : > { %v4436_v10 = vsub.f32 %v10778_v9, %v4423_v39 }
0x1710   : > { %v4441_v12 = vmul.f32 1.442695, %v4436_v10 }
0x1711   : > { %v4426_v11 = vpop.xlane.xlu1 %4425 }
0x1712   : > { %9381 = vpow2.f32 %v4441_v12  ;;  %v4437_v6 = vsub.f32 %v10788_v21, %v4426_v11 }
0x1714   : > { %v4443_v54 = vmul.f32 1.442695, %v4437_v6 }
0x1715   : > { %v4429_v24 = vpop.xlane.xlu0 %4428 }
0x1716   : > { %9383 = vpow2.f32 %v4443_v54  ;;  %v4438_v59 = vsub.f32 %v10798_v14, %v4429_v24 }
0x1718   : > { %v4445_v15 = vmul.f32 1.442695, %v4438_v59 }
0x1719   : > { %v4432_v58 = vpop.xlane.xlu1 %4431 }
0x171a   : > { %9385 = vpow2.f32 %v4445_v15  ;;  %v4439_v40 = vsub.f32 %v4419_v17, %v4432_v58 }
0x171c   : > { %v4447_v32 = vmul.f32 1.442695, %v4439_v40 }
0x171d   : > { %v4435_v63 = vpop.xlane.xlu0 %4434 }
0x171e   : > { %9387 = vpow2.f32 %v4447_v32  ;;  %v4440_v16 = vsub.f32 %v4420_v7, %v4435_v63 }
0x171f   : > { %v9382_v61 = vpop.eup %9381 }
0x1720   : > { %v4449_v9 = vmul.f32 1.442695, %v4440_v16  ;;  %v4451_v35 = vsel %vm1157_vm4, %v9382_v61, 0.0 }
0x1721   : > { %4452 = vadd.xlane.f32.xlu1 %v4451_v35  ;;  %v7591_v35 = vld [vmem:[%s9771_s18 + $0x11] ss:$0 sm:$0xff] }
0x1722   : > { %9389 = vpow2.f32 %v4449_v9 }
0x1723   : > { %v9384_v21 = vpop.eup %9383 }
0x1724   : > { %v4454_v38 = vsel %vm1157_vm4, %v9384_v21, 0.0 }
0x1725   : > { %4455 = vadd.xlane.f32.xlu0 %v4454_v38 }
0x1727   : > { %v9386_v44 = vpop.eup %9385 }
0x1728   : > { %v4457_v14 = vsel %vm1157_vm4, %v9386_v44, 0.0 }
0x1729   : > { %4458 = vadd.xlane.f32.xlu1 %v4457_v14 }
0x172b   : > { %v9388_v28 = vpop.eup %9387 }
0x172c   : > { %v4460_v17 = vsel %vm1157_vm4, %v9388_v28, 0.0 }
0x172d   : > { %4461 = vadd.xlane.f32.xlu0 %v4460_v17 }
0x172f   : > { %v9390_v7 = vpop.eup %9389 }
0x1730   : > { %v4463_v2 = vsel %vm1157_vm4, %v9390_v7, 0.0 }
0x1731   : > { %4464 = vadd.xlane.f32.xlu1 %v4463_v2 }
0x17aa   : > { %v4453_v60 = vpop.xlane.xlu1 %4452 }
0x17ab   : > { %9391 = vrcp.f32 %v4453_v60 }
0x17ae   : > { %v4456_v62 = vpop.xlane.xlu0 %4455 }
0x17af   : > { %9393 = vrcp.f32 %v4456_v62 }
0x17b2   : > { %v4459_v34 = vpop.xlane.xlu1 %4458 }
0x17b3   : > { %9395 = vrcp.f32 %v4459_v34 }
0x17b6   : > { %v4462_v36 = vpop.xlane.xlu0 %4461 }
0x17b7   : > { %9397 = vrcp.f32 %v4462_v36 }
0x17b8   : > { %v9392_v43 = vpop.eup %9391 }
0x17b9   : > { %v4471_v46 = vmul.f32 %v9392_v43, %v9382_v61 }
0x17ba   : > { %v4465_v52 = vpop.xlane.xlu1 %4464 }
0x17bb   : > { %9399 = vrcp.f32 %v4465_v52  ;;  %8809 = vmatmul.mubr.msk.f32.vlgmr.msra.gmra.mxu0 %vm1157_vm4, %v4471_v46 }
0x17bc   : > { %v9394_v55 = vpop.eup %9393  ;;  %8841 = vmatpush3.xpose.msk.msra.mxu0 %vm625_vm2, %v7589_v37  ;;  %8811 = vmatprep.mubr.msk.f32.mxu0 %vm9507_vm0, %v9506_v0 }
0x17bd   : > { %v4472_v1 = vmul.f32 %v9394_v55, %v9384_v21  ;;  %8874 = vmatprep.subr.mxu0 %v9506_v0 }
0x17bf   : > { %8812 = vmatmul.mubr.msk.f32.gmra.mxu0 %vm1157_vm4, %v4472_v1 }
0x17c0   : > { %v9396_v3 = vpop.eup %9395  ;;  %8814 = vmatprep.mubr.msk.f32.mxu0 %vm9507_vm0, %v9506_v0 }
0x17c1   : > { %v4473_v4 = vmul.f32 %v9396_v3, %v9386_v44 }
0x17c3   : > { %8815 = vmatmul.mubr.msk.f32.gmra.mxu0 %vm1157_vm4, %v4473_v4 }
0x17c4   : > { %v9398_v45 = vpop.eup %9397  ;;  %8817 = vmatprep.mubr.msk.f32.mxu0 %vm9507_vm0, %v9506_v0 }
0x17c5   : > { %v4474_v51 = vmul.f32 %v9398_v45, %v9388_v28 }
0x17c7   : > { %8818 = vmatmul.mubr.msk.f32.gmra.mxu0 %vm1157_vm4, %v4474_v51 }
0x17c8   : > { %v9400_v8 = vpop.eup %9399  ;;  %8820 = vmatprep.mubr.msk.f32.mxu0 %vm9507_vm0, %v9506_v0 }
0x17c9   : > { %v4475_v57 = vmul.f32 %v9400_v8, %v9390_v7  ;;  %v7582_v7 = vld [vmem:[%s9771_s18 + $0xd] ss:$0 sm:$0xff] }
0x17ca   : > { %v4660_v60 = vadd.f32 %v7582_v7, %v10815_v22  ;;  %v4665_v62 = vadd.f32 %v7582_v7, %v10818_v50  ;;  %v4670_v34 = vadd.f32 %v7582_v7, %v10820_v31  ;;  %v4675_v22 = vadd.f32 %v7582_v7, %v10822_v33 }
0x17cb   : > { %8821 = vmatmul.mubr.msk.f32.gmra.mxu0 %vm1157_vm4, %v4475_v57  ;;  %v4680_v50 = vadd.f32 %v7582_v7, %v10824_v20 }
0x17cc   : > { %8842 = vmatprep.mubr.msk.f32.mxu0 %vm9507_vm0, %v9506_v0 }
0x17cf   : > { %8843 = vmatmul.mubr.msk.f32.vlgmr.msra.gmra.mxu0 %vm625_vm2, %v10618_v49 }
0x17d0   : > { %8845 = vmatprep.mubr.msk.f32.mxu0 %vm9507_vm0, %v9506_v0 }
0x17d3   : > { %8846 = vmatmul.mubr.msk.f32.gmra.mxu0 %vm625_vm2, %v10629_v41 }
0x17d4   : > { %8848 = vmatprep.mubr.msk.f32.mxu0 %vm9507_vm0, %v9506_v0 }
0x17d7   : > { %8849 = vmatmul.mubr.msk.f32.gmra.mxu0 %vm625_vm2, %v10641_v5 }
0x17d8   : > { %8851 = vmatprep.mubr.msk.f32.mxu0 %vm9507_vm0, %v9506_v0 }
0x17db   : > { %8852 = vmatmul.mubr.msk.f32.gmra.mxu0 %vm625_vm2, %v10652_v30 }
0x17dc   : > { %8854 = vmatprep.mubr.msk.f32.mxu0 %vm9507_vm0, %v9506_v0 }
0x17df   : > { %8855 = vmatmul.mubr.msk.f32.gmra.mxu0 %vm625_vm2, %v10663_v18 }
0x17e0   : > { %8884 = vmatprep.mubr.msk.f32.mxu0 %vm9507_vm0, %v9506_v0 }
0x187b   : > { %v10878_v47 = vpop.f32.mrf.mxu0 }
0x187d   : > { %v8810_v13 = vpop.f32.mrf.mxu0 }
0x187f   : > { %v10880_v39 = vpop.f32.mrf.mxu0 }
0x1881   : > { %v8813_v10 = vpop.f32.mrf.mxu0 }
0x1883   : > { %v10882_v12 = vpop.f32.mrf.mxu0 }
0x1885   : > { %v8816_v11 = vpop.f32.mrf.mxu0 }
0x1887   : > { %v10884_v6 = vpop.f32.mrf.mxu0 }
0x1889   : > { %v8819_v54 = vpop.f32.mrf.mxu0 }
0x188b   : > { %v10886_v24 = vpop.f32.mrf.mxu0 }
0x188d   : > { %v8822_v59 = vpop.f32.mrf.mxu0 }
0x188f   : > { %v4759_v15 = vpop.f32.mrf.mxu0 }
0x1890   : > { %v4760_v2 = vadd.f32 %v7591_v35, %v4759_v15 }
0x1891   : > { %v8844_v58 = vpop.f32.mrf.mxu0 }
0x1893   : > { %v4764_v40 = vpop.f32.mrf.mxu0 }
0x1894   : > { %v4765_v17 = vadd.f32 %v7591_v35, %v4764_v40 }
0x1895   : > { %v8847_v32 = vpop.f32.mrf.mxu0 }
0x1897   : > { %v4769_v63 = vpop.f32.mrf.mxu0 }
0x1898   : > { %v4770_v28 = vadd.f32 %v7591_v35, %v4769_v63 }
0x1899   : > { %v8850_v16 = vpop.f32.mrf.mxu0 }
0x189b   : > { %v4774_v61 = vpop.f32.mrf.mxu0 }
0x189c   : > { %v4775_v14 = vadd.f32 %v7591_v35, %v4774_v61 }
0x189d   : > { %v8853_v9 = vpop.f32.mrf.mxu0 }
0x189f   : > { %v4779_v21 = vpop.f32.mrf.mxu0 }
0x18a0   : > { %v4780_v38 = vadd.f32 %v7591_v35, %v4779_v21 }
0x18a1   : > { %v8856_v44 = vpop.f32.mrf.mxu0 }
0x18a2   : > { %8875 = vmatpush3.xpose.msk.msra.mxu0 %vm1026_vm3, %v4780_v38 }
0x18a3   : > { %8876 = vmatprep.subr.mxu0 %v9506_v0 }
0x18a6   : > { %8877 = vmatpush3.xpose.msk.msra.mxu0 %vm1026_vm3, %v4775_v14 }
0x18a7   : > { %8878 = vmatprep.subr.mxu0 %v9506_v0 }
0x18aa   : > { %8879 = vmatpush3.xpose.msk.msra.mxu0 %vm1026_vm3, %v4770_v28 }
0x18ab   : > { %8880 = vmatprep.subr.mxu0 %v9506_v0 }
0x18ae   : > { %8881 = vmatpush3.xpose.msk.msra.mxu0 %vm1026_vm3, %v4765_v17 }
0x18af   : > { %8882 = vmatprep.subr.mxu0 %v9506_v0 }
0x18b2   : > { %8883 = vmatpush3.xpose.msk.msra.mxu0 %vm1026_vm3, %v4760_v2 }
0x18b3   : > { %8924 = vmatprep.subr.mxu0 %v9506_v0 }
0x18b5   : > { %8885 = vmatmul.mubr.msk.f32.vlgmr.msra.gmra.mxu0 %vm1026_vm3, %v4660_v60 }
0x18b6   : > { %8887 = vmatprep.mubr.msk.f32.mxu0 %vm9507_vm0, %v9506_v0 }
0x18b9   : > { %8888 = vmatmul.mubr.msk.f32.gmra.mxu0 %vm1026_vm3, %v4665_v62 }
0x18ba   : > { %8890 = vmatprep.mubr.msk.f32.mxu0 %vm9507_vm0, %v9506_v0 }
0x18bd   : > { %8891 = vmatmul.mubr.msk.f32.gmra.mxu0 %vm1026_vm3, %v4670_v34 }
0x18be   : > { %8893 = vmatprep.mubr.msk.f32.mxu0 %vm9507_vm0, %v9506_v0 }
0x18c1   : > { %8894 = vmatmul.mubr.msk.f32.gmra.mxu0 %vm1026_vm3, %v4675_v22 }
0x18c2   : > { %8896 = vmatprep.mubr.msk.f32.mxu0 %vm9507_vm0, %v9506_v0 }
0x18c5   : > { %8897 = vmatmul.mubr.msk.f32.gmra.mxu0 %vm1026_vm3, %v4680_v50 }
0x18c6   : > { %8926 = vmatprep.mubr.msk.f32.mxu0 %vm9507_vm0, %v9506_v0 }
0x1975   : > { %v4979_v31 = vpop.f32.mrf.mxu0 }
0x1976   : > { %v5003_v36 = vmul.f32 0.35355338, %v4979_v31 }
0x1977   : > { %v8886_v43 = vpop.f32.mrf.mxu0 }
0x1978   : > { %v5008_v46 = vadd.f32 %v10775_v53, %v5003_v36 }
0x1979   : > { %v4984_v37 = vpop.f32.mrf.mxu0 }
0x197a   : > { %v5004_v52 = vmul.f32 0.35355338, %v4984_v37  ;;  %v5013_v33 = vsel %vm1157_vm4, %v5008_v46, -inf }
0x197b   : > { %5014 = vmax.xlane.f32.xlu0 %v5013_v33  ;;  %v8889_v55 = vpop.f32.mrf.mxu0 }
0x197c   : > { %v5009_v1 = vadd.f32 %v10785_v48, %v5004_v52  ;;  %v7622_v55 = vld [vmem:[%s10023_s16 + $0x28] sm:$0xff] }
0x197d   : > { %v4989_v3 = vpop.f32.mrf.mxu0  ;;  %8925 = vmatpush3.msra.mxu0 %v7622_v55  ;;  %v7644_v55 = vld [vmem:[%s9771_s18 + $0x12] ss:$0 sm:$0xff] }
0x197e   : > { %v5005_v20 = vmul.f32 0.35355338, %v4989_v3  ;;  %v5016_v4 = vsel %vm1157_vm4, %v5009_v1, -inf  ;;  %8958 = vmatprep.subr.mxu0 %v9506_v0 }
0x197f   : > { %5017 = vmax.xlane.f32.xlu1 %v5016_v4  ;;  %v8892_v45 = vpop.f32.mrf.mxu0 }
0x1980   : > { %v5010_v51 = vadd.f32 %v10795_v27, %v5005_v20 }
0x1981   : > { %v4994_v8 = vpop.f32.mrf.mxu0 }
0x1982   : > { %v5006_v57 = vmul.f32 0.35355338, %v4994_v8  ;;  %v5019_v13 = vsel %vm1157_vm4, %v5010_v51, -inf  ;;  %v7579_v8 = vld [vmem:[%s10023_s16 + $0x20] sm:$0xff] }
0x1983   : > { %5020 = vmax.xlane.f32.xlu0 %v5019_v13  ;;  %v8895_v10 = vpop.f32.mrf.mxu0 }
0x1984   : > { %v5011_v11 = vadd.f32 %v10805_v25, %v5006_v57 }
0x1985   : > { %v4999_v54 = vpop.f32.mrf.mxu0 }
0x1986   : > { %v5007_v59 = vmul.f32 0.35355338, %v4999_v54  ;;  %v5022_v15 = vsel %vm1157_vm4, %v5011_v11, -inf }
0x1987   : > { %5023 = vmax.xlane.f32.xlu1 %v5022_v15  ;;  %v8898_v58 = vpop.f32.mrf.mxu0 }
0x1988   : > { %v5012_v40 = vadd.f32 %v10812_v23, %v5007_v59 }
0x198a   : > { %v5025_v32 = vsel %vm1157_vm4, %v5012_v40, -inf }
0x198b   : > { %5026 = vmax.xlane.f32.xlu0 %v5025_v32  ;;  %v7642_v32 = vld [vmem:[%s9662_s27 + $0x90] sm:$0xff] }
0x1a04   : > { %v5015_v63 = vpop.xlane.xlu0 %5014 }
0x1a05   : > { %v5028_v16 = vsub.f32 %v5008_v46, %v5015_v63 }
0x1a07   : > { %v5033_v61 = vmul.f32 1.442695, %v5028_v16 }
0x1a08   : > { %v5018_v9 = vpop.xlane.xlu1 %5017 }
0x1a09   : > { %9401 = vpow2.f32 %v5033_v61  ;;  %v5029_v35 = vsub.f32 %v5009_v1, %v5018_v9 }
0x1a0b   : > { %v5035_v21 = vmul.f32 1.442695, %v5029_v35 }
0x1a0c   : > { %v5021_v38 = vpop.xlane.xlu0 %5020 }
0x1a0d   : > { %9403 = vpow2.f32 %v5035_v21  ;;  %v5030_v44 = vsub.f32 %v5010_v51, %v5021_v38  ;;  %v7651_v38 = vld [vmem:[%s9662_s27 + $0xb0] sm:$0xff] }
0x1a0f   : > { %v5037_v14 = vmul.f32 1.442695, %v5030_v44 }
0x1a10   : > { %v5024_v28 = vpop.xlane.xlu1 %5023 }
0x1a11   : > { %9405 = vpow2.f32 %v5037_v14  ;;  %v5031_v17 = vsub.f32 %v5011_v11, %v5024_v28 }
0x1a13   : > { %v5039_v7 = vmul.f32 1.442695, %v5031_v17 }
0x1a14   : > { %v5027_v2 = vpop.xlane.xlu0 %5026 }
0x1a15   : > { %9407 = vpow2.f32 %v5039_v7  ;;  %v5032_v60 = vsub.f32 %v5012_v40, %v5027_v2 }
0x1a16   : > { %v9402_v62 = vpop.eup %9401 }
0x1a17   : > { %v5041_v34 = vmul.f32 1.442695, %v5032_v60  ;;  %v5043_v22 = vsel %vm1157_vm4, %v9402_v62, 0.0 }
0x1a18   : > { %5044 = vadd.xlane.f32.xlu1 %v5043_v22 }
0x1a19   : > { %9409 = vpow2.f32 %v5041_v34 }
0x1a1a   : > { %v9404_v50 = vpop.eup %9403 }
0x1a1b   : > { %v5046_v31 = vsel %vm1157_vm4, %v9404_v50, 0.0 }
0x1a1c   : > { %5047 = vadd.xlane.f32.xlu0 %v5046_v31 }
0x1a1e   : > { %v9406_v36 = vpop.eup %9405 }
0x1a1f   : > { %v5049_v43 = vsel %vm1157_vm4, %v9406_v36, 0.0 }
0x1a20   : > { %5050 = vadd.xlane.f32.xlu1 %v5049_v43 }
0x1a22   : > { %v9408_v46 = vpop.eup %9407 }
0x1a23   : > { %v5052_v37 = vsel %vm1157_vm4, %v9408_v46, 0.0 }
0x1a24   : > { %5053 = vadd.xlane.f32.xlu0 %v5052_v37 }
0x1a26   : > { %v9410_v52 = vpop.eup %9409 }
0x1a27   : > { %v5055_v33 = vsel %vm1157_vm4, %v9410_v52, 0.0 }
0x1a28   : > { %5056 = vadd.xlane.f32.xlu1 %v5055_v33 }
0x1aa1   : > { %v5045_v1 = vpop.xlane.xlu1 %5044 }
0x1aa2   : > { %9411 = vrcp.f32 %v5045_v1 }
0x1aa5   : > { %v5048_v3 = vpop.xlane.xlu0 %5047 }
0x1aa6   : > { %9413 = vrcp.f32 %v5048_v3 }
0x1aa9   : > { %v5051_v20 = vpop.xlane.xlu1 %5050 }
0x1aaa   : > { %9415 = vrcp.f32 %v5051_v20 }
0x1aad   : > { %v5054_v4 = vpop.xlane.xlu0 %5053 }
0x1aae   : > { %9417 = vrcp.f32 %v5054_v4 }
0x1aaf   : > { %v9412_v45 = vpop.eup %9411 }
0x1ab0   : > { %v5063_v51 = vmul.f32 %v9412_v45, %v9402_v62 }
0x1ab1   : > { %v5057_v57 = vpop.xlane.xlu1 %5056 }
0x1ab2   : > { %9419 = vrcp.f32 %v5057_v57  ;;  %8910 = vmatmul.mubr.msk.f32.vlgmr.msra.gmra.mxu1 %vm1157_vm4, %v5063_v51 }
0x1ab3   : > { %v9414_v13 = vpop.eup %9413  ;;  %8912 = vmatprep.mubr.msk.f32.mxu1 %vm9507_vm0, %v9506_v0  ;;  %8942 = vmatpush3.msra.mxu1 %v7579_v8 }
0x1ab4   : > { %v5064_v10 = vmul.f32 %v9414_v13, %v9404_v50  ;;  %8975 = vmatprep.subr.mxu1 %v9506_v0 }
0x1ab6   : > { %8913 = vmatmul.mubr.msk.f32.gmra.mxu1 %vm1157_vm4, %v5064_v10 }
0x1ab7   : > { %v9416_v11 = vpop.eup %9415  ;;  %8915 = vmatprep.mubr.msk.f32.mxu1 %vm9507_vm0, %v9506_v0 }
0x1ab8   : > { %v5065_v54 = vmul.f32 %v9416_v11, %v9406_v36 }
0x1aba   : > { %8916 = vmatmul.mubr.msk.f32.gmra.mxu1 %vm1157_vm4, %v5065_v54 }
0x1abb   : > { %v9418_v59 = vpop.eup %9417  ;;  %8918 = vmatprep.mubr.msk.f32.mxu1 %vm9507_vm0, %v9506_v0 }
0x1abc   : > { %v5066_v15 = vmul.f32 %v9418_v59, %v9408_v46 }
0x1abe   : > { %8919 = vmatmul.mubr.msk.f32.gmra.mxu1 %vm1157_vm4, %v5066_v15 }
0x1abf   : > { %v9420_v58 = vpop.eup %9419  ;;  %8921 = vmatprep.mubr.msk.f32.mxu1 %vm9507_vm0, %v9506_v0 }
0x1ac0   : > { %v5067_v40 = vmul.f32 %v9420_v58, %v9410_v52 }
0x1ac2   : > { %8922 = vmatmul.mubr.msk.f32.gmra.mxu1 %vm1157_vm4, %v5067_v40 }
0x1ac3   : > { %8943 = vmatprep.mubr.msk.f32.mxu1 %vm9507_vm0, %v9506_v0 }
0x1ac6   : > { %8944 = vmatmul.mubr.msk.f32.vlgmr.msra.gmra.mxu1 %vm1026_vm3, %v10878_v47  ;;  %v7633_v47 = vld [vmem:[%s9662_s27 + $0x70] sm:$0xff] }
0x1ac7   : > { %8946 = vmatprep.mubr.msk.f32.mxu1 %vm9507_vm0, %v9506_v0  ;;  %8976 = vmatpush3.xpose.msk.msra.mxu1 %vm625_vm2, %v7642_v32 }
0x1ac8   : > { %9009 = vmatprep.subr.mxu1 %v9506_v0 }
0x1aca   : > { %8947 = vmatmul.mubr.msk.f32.gmra.mxu1 %vm1026_vm3, %v10880_v39 }
0x1acb   : > { %8949 = vmatprep.mubr.msk.f32.mxu1 %vm9507_vm0, %v9506_v0 }
0x1ace   : > { %8950 = vmatmul.mubr.msk.f32.gmra.mxu1 %vm1026_vm3, %v10882_v12 }
0x1acf   : > { %8952 = vmatprep.mubr.msk.f32.mxu1 %vm9507_vm0, %v9506_v0 }
0x1ad2   : > { %8953 = vmatmul.mubr.msk.f32.gmra.mxu1 %vm1026_vm3, %v10884_v6 }
0x1ad3   : > { %8955 = vmatprep.mubr.msk.f32.mxu1 %vm9507_vm0, %v9506_v0 }
0x1ad6   : > { %8956 = vmatmul.mubr.msk.f32.gmra.mxu1 %vm1026_vm3, %v10886_v24 }
0x1ad7   : > { %8977 = vmatprep.mubr.msk.f32.mxu1 %vm9507_vm0, %v9506_v0 }
0x1ada   : > { %8978 = vmatmul.mubr.msk.f32.vlgmr.msra.gmra.mxu1 %vm625_vm2, %v10618_v49 }
0x1adb   : > { %8980 = vmatprep.mubr.msk.f32.mxu1 %vm9507_vm0, %v9506_v0 }
0x1ade   : > { %8981 = vmatmul.mubr.msk.f32.gmra.mxu1 %vm625_vm2, %v10629_v41 }
0x1adf   : > { %8983 = vmatprep.mubr.msk.f32.mxu1 %vm9507_vm0, %v9506_v0 }
0x1ae2   : > { %8984 = vmatmul.mubr.msk.f32.gmra.mxu1 %vm625_vm2, %v10641_v5 }
0x1ae3   : > { %8986 = vmatprep.mubr.msk.f32.mxu1 %vm9507_vm0, %v9506_v0 }
0x1ae6   : > { %8987 = vmatmul.mubr.msk.f32.gmra.mxu1 %vm625_vm2, %v10652_v30 }
0x1ae7   : > { %8989 = vmatprep.mubr.msk.f32.mxu1 %vm9507_vm0, %v9506_v0 }
0x1aea   : > { %8990 = vmatmul.mubr.msk.f32.gmra.mxu1 %vm625_vm2, %v10663_v18 }
0x1aeb   : > { %9019 = vmatprep.mubr.msk.f32.mxu1 %vm9507_vm0, %v9506_v0 }
0x1b72   : > { %v5149_v39 = vpop.f32.mrf.mxu1 }
0x1b73   : > { %8927 = vmatmul.mubr.msk.f32.vlgmr.msra.gmra.mxu0 %vm1026_vm3, %v5149_v39 }
0x1b74   : > { %v8911_v12 = vpop.f32.mrf.mxu1  ;;  %8959 = vmatpush3.xpose.msk.msra.mxu0 %vm625_vm2, %v7633_v47  ;;  %8929 = vmatprep.mubr.msk.f32.mxu0 %vm9507_vm0, %v9506_v0  ;;  %v7635_v47 = vld [vmem:[%s9771_s18 + $0xe] ss:$0 sm:$0xff] }
0x1b75   : > { %8992 = vmatprep.subr.mxu0 %v9506_v0 }
0x1b76   : > { %v5154_v6 = vpop.f32.mrf.mxu1 }
0x1b77   : > { %8930 = vmatmul.mubr.msk.f32.gmra.mxu0 %vm1026_vm3, %v5154_v6 }
0x1b78   : > { %v8914_v24 = vpop.f32.mrf.mxu1  ;;  %8932 = vmatprep.mubr.msk.f32.mxu0 %vm9507_vm0, %v9506_v0 }
0x1b7a   : > { %v5159_v63 = vpop.f32.mrf.mxu1 }
0x1b7b   : > { %8933 = vmatmul.mubr.msk.f32.gmra.mxu0 %vm1026_vm3, %v5159_v63 }
0x1b7c   : > { %v8917_v16 = vpop.f32.mrf.mxu1  ;;  %8935 = vmatprep.mubr.msk.f32.mxu0 %vm9507_vm0, %v9506_v0 }
0x1b7e   : > { %v5164_v61 = vpop.f32.mrf.mxu1 }
0x1b7f   : > { %8936 = vmatmul.mubr.msk.f32.gmra.mxu0 %vm1026_vm3, %v5164_v61 }
0x1b80   : > { %v8920_v9 = vpop.f32.mrf.mxu1  ;;  %8938 = vmatprep.mubr.msk.f32.mxu0 %vm9507_vm0, %v9506_v0 }
0x1b82   : > { %v5169_v35 = vpop.f32.mrf.mxu1 }
0x1b83   : > { %8939 = vmatmul.mubr.msk.f32.gmra.mxu0 %vm1026_vm3, %v5169_v35 }
0x1b84   : > { %v8923_v21 = vpop.f32.mrf.mxu1  ;;  %8960 = vmatprep.mubr.msk.f32.mxu0 %vm9507_vm0, %v9506_v0 }
0x1b86   : > { %v11016_v44 = vpop.f32.mrf.mxu1 }
0x1b87   : > { %8961 = vmatmul.mubr.msk.f32.vlgmr.msra.gmra.mxu0 %vm625_vm2, %v10618_v49 }
0x1b88   : > { %v8945_v14 = vpop.f32.mrf.mxu1  ;;  %8963 = vmatprep.mubr.msk.f32.mxu0 %vm9507_vm0, %v9506_v0  ;;  %8993 = vmatpush3.xpose.msk.msra.mxu0 %vm625_vm2, %v7651_v38 }
0x1b89   : > { %9034 = vmatprep.subr.mxu0 %v9506_v0 }
0x1b8a   : > { %v11024_v28 = vpop.f32.mrf.mxu1 }
0x1b8b   : > { %8964 = vmatmul.mubr.msk.f32.gmra.mxu0 %vm625_vm2, %v10629_v41 }
0x1b8c   : > { %v8948_v17 = vpop.f32.mrf.mxu1  ;;  %8966 = vmatprep.mubr.msk.f32.mxu0 %vm9507_vm0, %v9506_v0 }
0x1b8e   : > { %v11030_v7 = vpop.f32.mrf.mxu1 }
0x1b8f   : > { %8967 = vmatmul.mubr.msk.f32.gmra.mxu0 %vm625_vm2, %v10641_v5 }
0x1b90   : > { %v8951_v2 = vpop.f32.mrf.mxu1  ;;  %8969 = vmatprep.mubr.msk.f32.mxu0 %vm9507_vm0, %v9506_v0 }
0x1b92   : > { %v11036_v60 = vpop.f32.mrf.mxu1 }
0x1b93   : > { %8970 = vmatmul.mubr.msk.f32.gmra.mxu0 %vm625_vm2, %v10652_v30 }
0x1b94   : > { %v8954_v62 = vpop.f32.mrf.mxu1  ;;  %8972 = vmatprep.mubr.msk.f32.mxu0 %vm9507_vm0, %v9506_v0 }
0x1b96   : > { %v11042_v34 = vpop.f32.mrf.mxu1 }
0x1b97   : > { %8973 = vmatmul.mubr.msk.f32.gmra.mxu0 %vm625_vm2, %v10663_v18 }
0x1b98   : > { %v8957_v22 = vpop.f32.mrf.mxu1  ;;  %8994 = vmatprep.mubr.msk.f32.mxu0 %vm9507_vm0, %v9506_v0 }
0x1b9a   : > { %v5561_v50 = vpop.f32.mrf.mxu1 }
0x1b9b   : > { %8995 = vmatmul.mubr.msk.f32.vlgmr.msra.gmra.mxu0 %vm625_vm2, %v10618_v49  ;;  %v5562_v8 = vadd.f32 %v7644_v55, %v5561_v50 }
0x1b9c   : > { %v8979_v31 = vpop.f32.mrf.mxu1  ;;  %8997 = vmatprep.mubr.msk.f32.mxu0 %vm9507_vm0, %v9506_v0 }
0x1b9e   : > { %v5566_v36 = vpop.f32.mrf.mxu1 }
0x1b9f   : > { %8998 = vmatmul.mubr.msk.f32.gmra.mxu0 %vm625_vm2, %v10629_v41  ;;  %v5567_v51 = vadd.f32 %v7644_v55, %v5566_v36 }
0x1ba0   : > { %v8982_v43 = vpop.f32.mrf.mxu1  ;;  %9000 = vmatprep.mubr.msk.f32.mxu0 %vm9507_vm0, %v9506_v0 }
0x1ba2   : > { %v5571_v46 = vpop.f32.mrf.mxu1 }
0x1ba3   : > { %9001 = vmatmul.mubr.msk.f32.gmra.mxu0 %vm625_vm2, %v10641_v5  ;;  %v5572_v45 = vadd.f32 %v7644_v55, %v5571_v46 }
0x1ba4   : > { %v8985_v37 = vpop.f32.mrf.mxu1  ;;  %9003 = vmatprep.mubr.msk.f32.mxu0 %vm9507_vm0, %v9506_v0 }
0x1ba6   : > { %v5576_v52 = vpop.f32.mrf.mxu1 }
0x1ba7   : > { %9004 = vmatmul.mubr.msk.f32.gmra.mxu0 %vm625_vm2, %v10652_v30  ;;  %v5577_v4 = vadd.f32 %v7644_v55, %v5576_v52 }
0x1ba8   : > { %v8988_v33 = vpop.f32.mrf.mxu1  ;;  %9006 = vmatprep.mubr.msk.f32.mxu0 %vm9507_vm0, %v9506_v0 }
0x1ba9   : > { %v7653_v33 = vld [vmem:[%s9771_s18 + $0x16] ss:$0 sm:$0xff] }
0x1baa   : > { %v5581_v1 = vpop.f32.mrf.mxu1 }
0x1bab   : > { %v5582_v3 = vadd.f32 %v7644_v55, %v5581_v1  ;;  %9007 = vmatmul.mubr.msk.f32.gmra.mxu0 %vm625_vm2, %v10663_v18 }
0x1bac   : > { %v8991_v20 = vpop.f32.mrf.mxu1  ;;  %9044 = vmatprep.mubr.msk.f32.mxu0 %vm9507_vm0, %v9506_v0 }
0x1bad   : > { %9010 = vmatpush3.xpose.msk.msra.mxu1 %vm1026_vm3, %v5582_v3 }
0x1bae   : > { %9011 = vmatprep.subr.mxu1 %v9506_v0 }
0x1bb1   : > { %9012 = vmatpush3.xpose.msk.msra.mxu1 %vm1026_vm3, %v5577_v4 }
0x1bb2   : > { %9013 = vmatprep.subr.mxu1 %v9506_v0 }
0x1bb5   : > { %9014 = vmatpush3.xpose.msk.msra.mxu1 %vm1026_vm3, %v5572_v45 }
0x1bb6   : > { %9015 = vmatprep.subr.mxu1 %v9506_v0 }
0x1bb9   : > { %9016 = vmatpush3.xpose.msk.msra.mxu1 %vm1026_vm3, %v5567_v51 }
0x1bba   : > { %9017 = vmatprep.subr.mxu1 %v9506_v0 }
0x1bbd   : > { %9018 = vmatpush3.xpose.msk.msra.mxu1 %vm1026_vm3, %v5562_v8 }
0x1bbe   : > { %9059 = vmatprep.subr.mxu1 %v9506_v0 }
0x1c33   : > { %v11079_v57 = vpop.f32.mrf.mxu0 }
0x1c35   : > { %v8928_v13 = vpop.f32.mrf.mxu0 }
0x1c37   : > { %v11081_v10 = vpop.f32.mrf.mxu0 }
0x1c39   : > { %v8931_v11 = vpop.f32.mrf.mxu0 }
0x1c3b   : > { %v11083_v54 = vpop.f32.mrf.mxu0 }
0x1c3d   : > { %v8934_v59 = vpop.f32.mrf.mxu0 }
0x1c3f   : > { %v11085_v15 = vpop.f32.mrf.mxu0 }
0x1c41   : > { %v8937_v58 = vpop.f32.mrf.mxu0 }
0x1c43   : > { %v11087_v40 = vpop.f32.mrf.mxu0 }
0x1c45   : > { %v8940_v32 = vpop.f32.mrf.mxu0 }
0x1c47   : > { %v5461_v39 = vpop.f32.mrf.mxu0 }
0x1c48   : > { %v5462_v12 = vadd.f32 %v7635_v47, %v5461_v39 }
0x1c49   : > { %v8962_v6 = vpop.f32.mrf.mxu0 }
0x1c4a   : > { %9020 = vmatmul.mubr.msk.f32.vlgmr.msra.gmra.mxu1 %vm1026_vm3, %v5462_v12 }
0x1c4b   : > { %v5466_v24 = vpop.f32.mrf.mxu0  ;;  %9022 = vmatprep.mubr.msk.f32.mxu1 %vm9507_vm0, %v9506_v0 }
0x1c4c   : > { %v5467_v63 = vadd.f32 %v7635_v47, %v5466_v24 }
0x1c4d   : > { %v8965_v16 = vpop.f32.mrf.mxu0 }
0x1c4e   : > { %9023 = vmatmul.mubr.msk.f32.gmra.mxu1 %vm1026_vm3, %v5467_v63 }
0x1c4f   : > { %v5471_v61 = vpop.f32.mrf.mxu0  ;;  %9025 = vmatprep.mubr.msk.f32.mxu1 %vm9507_vm0, %v9506_v0 }
0x1c50   : > { %v5472_v9 = vadd.f32 %v7635_v47, %v5471_v61 }
0x1c51   : > { %v8968_v35 = vpop.f32.mrf.mxu0 }
0x1c52   : > { %9026 = vmatmul.mubr.msk.f32.gmra.mxu1 %vm1026_vm3, %v5472_v9 }
0x1c53   : > { %v5476_v21 = vpop.f32.mrf.mxu0  ;;  %9028 = vmatprep.mubr.msk.f32.mxu1 %vm9507_vm0, %v9506_v0 }
0x1c54   : > { %v5477_v38 = vadd.f32 %v7635_v47, %v5476_v21 }
0x1c55   : > { %v8971_v14 = vpop.f32.mrf.mxu0 }
0x1c56   : > { %9029 = vmatmul.mubr.msk.f32.gmra.mxu1 %vm1026_vm3, %v5477_v38 }
0x1c57   : > { %v5481_v17 = vpop.f32.mrf.mxu0  ;;  %9031 = vmatprep.mubr.msk.f32.mxu1 %vm9507_vm0, %v9506_v0 }
0x1c58   : > { %v5482_v2 = vadd.f32 %v7635_v47, %v5481_v17 }
0x1c59   : > { %v8974_v62 = vpop.f32.mrf.mxu0 }
0x1c5a   : > { %9032 = vmatmul.mubr.msk.f32.gmra.mxu1 %vm1026_vm3, %v5482_v2 }
0x1c5b   : > { %v5661_v22 = vpop.f32.mrf.mxu0  ;;  %9061 = vmatprep.mubr.msk.f32.mxu1 %vm9507_vm0, %v9506_v0 }
0x1c5c   : > { %v5662_v51 = vadd.f32 %v7653_v33, %v5661_v22 }
0x1c5d   : > { %v8996_v50 = vpop.f32.mrf.mxu0 }
0x1c5f   : > { %v5666_v31 = vpop.f32.mrf.mxu0 }
0x1c60   : > { %v5667_v45 = vadd.f32 %v7653_v33, %v5666_v31 }
0x1c61   : > { %v8999_v36 = vpop.f32.mrf.mxu0 }
0x1c63   : > { %v5671_v43 = vpop.f32.mrf.mxu0 }
0x1c64   : > { %v5672_v4 = vadd.f32 %v7653_v33, %v5671_v43 }
0x1c65   : > { %v9002_v46 = vpop.f32.mrf.mxu0 }
0x1c67   : > { %v5676_v37 = vpop.f32.mrf.mxu0 }
0x1c68   : > { %v5677_v20 = vadd.f32 %v7653_v33, %v5676_v37 }
0x1c69   : > { %v9005_v52 = vpop.f32.mrf.mxu0 }
0x1c6b   : > { %v5681_v55 = vpop.f32.mrf.mxu0 }
0x1c6c   : > { %v5682_v1 = vadd.f32 %v7653_v33, %v5681_v55 }
0x1c6d   : > { %v9008_v3 = vpop.f32.mrf.mxu0 }
0x1c6e   : > { %9035 = vmatpush3.msra.mxu0 %v5682_v1 }
0x1c6f   : > { %9036 = vmatprep.subr.mxu0 %v9506_v0 }
0x1c70   : > { %9037 = vmatpush3.msra.mxu0 %v5677_v20 }
0x1c71   : > { %9038 = vmatprep.subr.mxu0 %v9506_v0 }
0x1c72   : > { %9039 = vmatpush3.msra.mxu0 %v5672_v4 }
0x1c73   : > { %9040 = vmatprep.subr.mxu0 %v9506_v0 }
0x1c74   : > { %9041 = vmatpush3.msra.mxu0 %v5667_v45 }
0x1c75   : > { %9042 = vmatprep.subr.mxu0 %v9506_v0 }
0x1c76   : > { %9043 = vmatpush3.msra.mxu0 %v5662_v51 }
0x1c77   : > { %9076 = vmatprep.subr.mxu0 %v9506_v0 }
0x1d0a   : > { %v5781_v8 = vpop.f32.mrf.mxu1 }
0x1d0b   : > { %v5805_v13 = vmul.f32 0.35355338, %v5781_v8 }
0x1d0c   : > { %v9021_v11 = vpop.f32.mrf.mxu1 }
0x1d0d   : > { %v5810_v59 = vadd.f32 %v10775_v53, %v5805_v13 }
0x1d0e   : > { %v5786_v58 = vpop.f32.mrf.mxu1 }
0x1d0f   : > { %v5806_v32 = vmul.f32 0.35355338, %v5786_v58  ;;  %v5815_v47 = vsel %vm1157_vm4, %v5810_v59, -inf }
0x1d10   : > { %5816 = vmax.xlane.f32.xlu0 %v5815_v47  ;;  %v9024_v39 = vpop.f32.mrf.mxu1 }
0x1d11   : > { %v5811_v12 = vadd.f32 %v10785_v48, %v5806_v32  ;;  %v7675_v39 = vld [vmem:[%s10023_s16 + $0x30] sm:$0xff] }
0x1d12   : > { %v5791_v6 = vpop.f32.mrf.mxu1  ;;  %9060 = vmatpush3.msra.mxu1 %v7675_v39  ;;  %v7701_v39 = vld [vmem:[%s9771_s18 + $0x17] ss:$0 sm:$0xff] }
0x1d13   : > { %v5807_v24 = vmul.f32 0.35355338, %v5791_v6  ;;  %v5818_v63 = vsel %vm1157_vm4, %v5811_v12, -inf  ;;  %9093 = vmatprep.subr.mxu1 %v9506_v0 }
0x1d14   : > { %5819 = vmax.xlane.f32.xlu1 %v5818_v63  ;;  %v9027_v16 = vpop.f32.mrf.mxu1 }
0x1d15   : > { %v5812_v61 = vadd.f32 %v10795_v27, %v5807_v24 }
0x1d16   : > { %v5796_v9 = vpop.f32.mrf.mxu1 }
0x1d17   : > { %v5808_v35 = vmul.f32 0.35355338, %v5796_v9  ;;  %v5821_v53 = vsel %vm1157_vm4, %v5812_v61, -inf  ;;  %v7681_v9 = vld [vmem:[%s9662_s27 + $0x78] sm:$0xff] }
0x1d18   : > { %5822 = vmax.xlane.f32.xlu0 %v5821_v53  ;;  %v9030_v21 = vpop.f32.mrf.mxu1 }
0x1d19   : > { %v5813_v38 = vadd.f32 %v10805_v25, %v5808_v35 }
0x1d1a   : > { %v5801_v14 = vpop.f32.mrf.mxu1 }
0x1d1b   : > { %v5809_v17 = vmul.f32 0.35355338, %v5801_v14  ;;  %v5824_v48 = vsel %vm1157_vm4, %v5813_v38, -inf }
0x1d1c   : > { %5825 = vmax.xlane.f32.xlu1 %v5824_v48  ;;  %v9033_v2 = vpop.f32.mrf.mxu1 }
0x1d1d   : > { %v5814_v62 = vadd.f32 %v10812_v23, %v5809_v17 }
0x1d1f   : > { %v5827_v22 = vsel %vm1157_vm4, %v5814_v62, -inf }
0x1d20   : > { %5828 = vmax.xlane.f32.xlu0 %v5827_v22  ;;  %v7699_v22 = vld [vmem:[%s9662_s27 + $0xb8] sm:$0xff] }
0x1d99   : > { %v5817_v27 = vpop.xlane.xlu0 %5816 }
0x1d9a   : > { %v5830_v50 = vsub.f32 %v5810_v59, %v5817_v27  ;;  %v7690_v27 = vld [vmem:[%s9662_s27 + $0x98] sm:$0xff] }
0x1d9c   : > { %v5835_v31 = vmul.f32 1.442695, %v5830_v50 }
0x1d9d   : > { %v5820_v36 = vpop.xlane.xlu1 %5819 }
0x1d9e   : > { %9421 = vpow2.f32 %v5835_v31  ;;  %v5831_v43 = vsub.f32 %v5811_v12, %v5820_v36 }
0x1da0   : > { %v5837_v46 = vmul.f32 1.442695, %v5831_v43 }
0x1da1   : > { %v5823_v37 = vpop.xlane.xlu0 %5822 }
0x1da2   : > { %9423 = vpow2.f32 %v5837_v46  ;;  %v5832_v25 = vsub.f32 %v5812_v61, %v5823_v37 }
0x1da4   : > { %v5839_v52 = vmul.f32 1.442695, %v5832_v25 }
0x1da5   : > { %v5826_v33 = vpop.xlane.xlu1 %5825 }
0x1da6   : > { %9425 = vpow2.f32 %v5839_v52  ;;  %v5833_v55 = vsub.f32 %v5813_v38, %v5826_v33 }
0x1da8   : > { %v5841_v1 = vmul.f32 1.442695, %v5833_v55 }
0x1da9   : > { %v5829_v3 = vpop.xlane.xlu0 %5828 }
0x1daa   : > { %9427 = vpow2.f32 %v5841_v1  ;;  %v5834_v23 = vsub.f32 %v5814_v62, %v5829_v3 }
0x1dab   : > { %v9422_v20 = vpop.eup %9421 }
0x1dac   : > { %v5843_v4 = vmul.f32 1.442695, %v5834_v23  ;;  %v5845_v45 = vsel %vm1157_vm4, %v9422_v20, 0.0 }
0x1dad   : > { %5846 = vadd.xlane.f32.xlu1 %v5845_v45 }
0x1dae   : > { %9429 = vpow2.f32 %v5843_v4 }
0x1daf   : > { %v9424_v51 = vpop.eup %9423 }
0x1db0   : > { %v5848_v8 = vsel %vm1157_vm4, %v9424_v51, 0.0 }
0x1db1   : > { %5849 = vadd.xlane.f32.xlu0 %v5848_v8 }
0x1db3   : > { %v9426_v13 = vpop.eup %9425 }
0x1db4   : > { %v5851_v11 = vsel %vm1157_vm4, %v9426_v13, 0.0 }
0x1db5   : > { %5852 = vadd.xlane.f32.xlu1 %v5851_v11 }
0x1db7   : > { %v9428_v59 = vpop.eup %9427 }
0x1db8   : > { %v5854_v58 = vsel %vm1157_vm4, %v9428_v59, 0.0 }
0x1db9   : > { %5855 = vadd.xlane.f32.xlu0 %v5854_v58 }
0x1dbb   : > { %v9430_v32 = vpop.eup %9429 }
0x1dbc   : > { %v5857_v47 = vsel %vm1157_vm4, %v9430_v32, 0.0 }
0x1dbd   : > { %5858 = vadd.xlane.f32.xlu1 %v5857_v47 }
0x1e36   : > { %v5847_v12 = vpop.xlane.xlu1 %5846 }
0x1e37   : > { %9431 = vrcp.f32 %v5847_v12 }
0x1e3a   : > { %v5850_v6 = vpop.xlane.xlu0 %5849 }
0x1e3b   : > { %9433 = vrcp.f32 %v5850_v6 }
0x1e3e   : > { %v5853_v24 = vpop.xlane.xlu1 %5852 }
0x1e3f   : > { %9435 = vrcp.f32 %v5853_v24 }
0x1e42   : > { %v5856_v63 = vpop.xlane.xlu0 %5855 }
0x1e43   : > { %9437 = vrcp.f32 %v5856_v63 }
0x1e44   : > { %v9432_v16 = vpop.eup %9431 }
0x1e45   : > { %v5865_v61 = vmul.f32 %v9432_v16, %v9422_v20 }
0x1e46   : > { %v5859_v35 = vpop.xlane.xlu1 %5858 }
0x1e47   : > { %9439 = vrcp.f32 %v5859_v35  ;;  %9045 = vmatmul.mubr.msk.f32.vlgmr.msra.gmra.mxu0 %vm1157_vm4, %v5865_v61 }
0x1e48   : > { %v9434_v53 = vpop.eup %9433  ;;  %9047 = vmatprep.mubr.msk.f32.mxu0 %vm9507_vm0, %v9506_v0  ;;  %9077 = vmatpush3.xpose.msk.msra.mxu0 %vm625_vm2, %v7681_v9  ;;  %v5362_v9 = vadd.f32 %v11016_v44, %v11079_v57  ;;  %v5377_v44 = vadd.f32 %v11036_v60, %v11085_v15  ;;  %v7692_v15 = vld [vmem:[%s9771_s18 + $0x13] ss:$0 sm:$0xff] }
0x1e49   : > { %v5866_v21 = vmul.f32 %v9434_v53, %v9424_v51  ;;  %9110 = vmatprep.subr.mxu0 %v9506_v0 }
0x1e4b   : > { %9048 = vmatmul.mubr.msk.f32.gmra.mxu0 %vm1157_vm4, %v5866_v21 }
0x1e4c   : > { %v9436_v38 = vpop.eup %9435  ;;  %9050 = vmatprep.mubr.msk.f32.mxu0 %vm9507_vm0, %v9506_v0 }
0x1e4d   : > { %v5867_v14 = vmul.f32 %v9436_v38, %v9426_v13  ;;  %v5367_v38 = vadd.f32 %v11024_v28, %v11081_v10  ;;  %v5382_v28 = vadd.f32 %v11042_v34, %v11087_v40 }
0x1e4f   : > { %9051 = vmatmul.mubr.msk.f32.gmra.mxu0 %vm1157_vm4, %v5867_v14 }
0x1e50   : > { %v9438_v17 = vpop.eup %9437  ;;  %9053 = vmatprep.mubr.msk.f32.mxu0 %vm9507_vm0, %v9506_v0 }
0x1e51   : > { %v5868_v48 = vmul.f32 %v9438_v17, %v9428_v59 }
0x1e53   : > { %9054 = vmatmul.mubr.msk.f32.gmra.mxu0 %vm1157_vm4, %v5868_v48 }
0x1e54   : > { %v9440_v2 = vpop.eup %9439  ;;  %9056 = vmatprep.mubr.msk.f32.mxu0 %vm9507_vm0, %v9506_v0 }
0x1e55   : > { %v5869_v62 = vmul.f32 %v9440_v2, %v9430_v32  ;;  %v5372_v2 = vadd.f32 %v11030_v7, %v11083_v54 }
0x1e57   : > { %9057 = vmatmul.mubr.msk.f32.gmra.mxu0 %vm1157_vm4, %v5869_v62 }
0x1e58   : > { %9078 = vmatprep.mubr.msk.f32.mxu0 %vm9507_vm0, %v9506_v0 }
0x1e5b   : > { %9079 = vmatmul.mubr.msk.f32.vlgmr.msra.gmra.mxu0 %vm625_vm2, %v10618_v49 }
0x1e5c   : > { %9081 = vmatprep.mubr.msk.f32.mxu0 %vm9507_vm0, %v9506_v0  ;;  %9111 = vmatpush3.xpose.msk.msra.mxu0 %vm625_vm2, %v7699_v22 }
0x1e5d   : > { %9152 = vmatprep.subr.mxu0 %v9506_v0 }
0x1e5f   : > { %9082 = vmatmul.mubr.msk.f32.gmra.mxu0 %vm625_vm2, %v10629_v41 }
0x1e60   : > { %9084 = vmatprep.mubr.msk.f32.mxu0 %vm9507_vm0, %v9506_v0 }
0x1e63   : > { %9085 = vmatmul.mubr.msk.f32.gmra.mxu0 %vm625_vm2, %v10641_v5 }
0x1e64   : > { %9087 = vmatprep.mubr.msk.f32.mxu0 %vm9507_vm0, %v9506_v0 }
0x1e67   : > { %9088 = vmatmul.mubr.msk.f32.gmra.mxu0 %vm625_vm2, %v10652_v30 }
0x1e68   : > { %9090 = vmatprep.mubr.msk.f32.mxu0 %vm9507_vm0, %v9506_v0 }
0x1e6b   : > { %9091 = vmatmul.mubr.msk.f32.gmra.mxu0 %vm625_vm2, %v10663_v18 }
0x1e6c   : > { %9112 = vmatprep.mubr.msk.f32.mxu0 %vm9507_vm0, %v9506_v0 }
0x1e6f   : > { %9113 = vmatmul.mubr.msk.f32.vlgmr.msra.gmra.mxu0 %vm625_vm2, %v10618_v49 }
0x1e70   : > { %9115 = vmatprep.mubr.msk.f32.mxu0 %vm9507_vm0, %v9506_v0 }
0x1e73   : > { %9116 = vmatmul.mubr.msk.f32.gmra.mxu0 %vm625_vm2, %v10629_v41 }
0x1e74   : > { %9118 = vmatprep.mubr.msk.f32.mxu0 %vm9507_vm0, %v9506_v0 }
0x1e77   : > { %9119 = vmatmul.mubr.msk.f32.gmra.mxu0 %vm625_vm2, %v10641_v5 }
0x1e78   : > { %9121 = vmatprep.mubr.msk.f32.mxu0 %vm9507_vm0, %v9506_v0 }
0x1e7b   : > { %9122 = vmatmul.mubr.msk.f32.gmra.mxu0 %vm625_vm2, %v10652_v30 }
0x1e7c   : > { %9124 = vmatprep.mubr.msk.f32.mxu0 %vm9507_vm0, %v9506_v0 }
0x1e7f   : > { %9125 = vmatmul.mubr.msk.f32.gmra.mxu0 %vm625_vm2, %v10663_v18 }
0x1e80   : > { %9162 = vmatprep.mubr.msk.f32.mxu0 %vm9507_vm0, %v9506_v0 }
0x1f07   : > { %v5951_v50 = vpop.f32.mrf.mxu0 }
0x1f08   : > { %9062 = vmatmul.mubr.msk.f32.vlgmr.msra.gmra.mxu1 %vm1026_vm3, %v5951_v50 }
0x1f09   : > { %v9046_v31 = vpop.f32.mrf.mxu0  ;;  %9094 = vmatpush3.xpose.msk.msra.mxu1 %vm625_vm2, %v7690_v27  ;;  %9064 = vmatprep.mubr.msk.f32.mxu1 %vm9507_vm0, %v9506_v0 }
0x1f0a   : > { %9127 = vmatprep.subr.mxu1 %v9506_v0 }
0x1f0b   : > { %v5956_v36 = vpop.f32.mrf.mxu0 }
0x1f0c   : > { %9065 = vmatmul.mubr.msk.f32.gmra.mxu1 %vm1026_vm3, %v5956_v36 }
0x1f0d   : > { %v9049_v43 = vpop.f32.mrf.mxu0  ;;  %9067 = vmatprep.mubr.msk.f32.mxu1 %vm9507_vm0, %v9506_v0 }
0x1f0f   : > { %v5961_v46 = vpop.f32.mrf.mxu0 }
0x1f10   : > { %9068 = vmatmul.mubr.msk.f32.gmra.mxu1 %vm1026_vm3, %v5961_v46 }
0x1f11   : > { %v9052_v37 = vpop.f32.mrf.mxu0  ;;  %9070 = vmatprep.mubr.msk.f32.mxu1 %vm9507_vm0, %v9506_v0 }
0x1f13   : > { %v5966_v25 = vpop.f32.mrf.mxu0 }
0x1f14   : > { %9071 = vmatmul.mubr.msk.f32.gmra.mxu1 %vm1026_vm3, %v5966_v25 }
0x1f15   : > { %v9055_v52 = vpop.f32.mrf.mxu0  ;;  %9073 = vmatprep.mubr.msk.f32.mxu1 %vm9507_vm0, %v9506_v0 }
0x1f17   : > { %v5971_v33 = vpop.f32.mrf.mxu0 }
0x1f18   : > { %9074 = vmatmul.mubr.msk.f32.gmra.mxu1 %vm1026_vm3, %v5971_v33 }
0x1f19   : > { %v9058_v55 = vpop.f32.mrf.mxu0  ;;  %9095 = vmatprep.mubr.msk.f32.mxu1 %vm9507_vm0, %v9506_v0 }
0x1f1b   : > { %v11207_v1 = vpop.f32.mrf.mxu0 }
0x1f1c   : > { %9096 = vmatmul.mubr.msk.f32.vlgmr.msra.gmra.mxu1 %vm625_vm2, %v10618_v49 }
0x1f1d   : > { %v9080_v3 = vpop.f32.mrf.mxu0  ;;  %9098 = vmatprep.mubr.msk.f32.mxu1 %vm9507_vm0, %v9506_v0 }
0x1f1f   : > { %v11213_v23 = vpop.f32.mrf.mxu0 }
0x1f20   : > { %9099 = vmatmul.mubr.msk.f32.gmra.mxu1 %vm625_vm2, %v10629_v41 }
0x1f21   : > { %v9083_v20 = vpop.f32.mrf.mxu0  ;;  %9101 = vmatprep.mubr.msk.f32.mxu1 %vm9507_vm0, %v9506_v0 }
0x1f23   : > { %v11219_v4 = vpop.f32.mrf.mxu0 }
0x1f24   : > { %9102 = vmatmul.mubr.msk.f32.gmra.mxu1 %vm625_vm2, %v10641_v5 }
0x1f25   : > { %v9086_v45 = vpop.f32.mrf.mxu0  ;;  %9104 = vmatprep.mubr.msk.f32.mxu1 %vm9507_vm0, %v9506_v0 }
0x1f27   : > { %v11225_v49 = vpop.f32.mrf.mxu0 }
0x1f28   : > { %9105 = vmatmul.mubr.msk.f32.gmra.mxu1 %vm625_vm2, %v10652_v30 }
0x1f29   : > { %v9089_v41 = vpop.f32.mrf.mxu0  ;;  %9107 = vmatprep.mubr.msk.f32.mxu1 %vm9507_vm0, %v9506_v0 }
0x1f2a   : > { %v7683_v41 = vld [vmem:[%s9771_s18 + $0xf] ss:$0 sm:$0xff] }
0x1f2b   : > { %v11231_v51 = vpop.f32.mrf.mxu0 }
0x1f2c   : > { %9108 = vmatmul.mubr.msk.f32.gmra.mxu1 %vm625_vm2, %v10663_v18 }
0x1f2d   : > { %v9092_v5 = vpop.f32.mrf.mxu0  ;;  %9137 = vmatprep.mubr.msk.f32.mxu1 %vm9507_vm0, %v9506_v0 }
0x1f2f   : > { %v6363_v8 = vpop.f32.mrf.mxu0 }
0x1f30   : > { %v6364_v61 = vadd.f32 %v7701_v39, %v6363_v8  ;;  %v6164_v8 = vadd.f32 %v7683_v41, %v11207_v1  ;;  %v6179_v1 = vadd.f32 %v7683_v41, %v11225_v49 }
0x1f31   : > { %v9114_v13 = vpop.f32.mrf.mxu0 }
0x1f32   : > { %v6169_v13 = vadd.f32 %v7683_v41, %v11213_v23  ;;  %v6184_v23 = vadd.f32 %v7683_v41, %v11231_v51  ;;  %v9494_v51 = vld [vmem:[%s11442_s0 + $0x8] sm:$0xff] }
0x1f33   : > { %v6368_v11 = vpop.f32.mrf.mxu0 }
0x1f34   : > { %v6369_v16 = vadd.f32 %v7701_v39, %v6368_v11  ;;  %v6174_v11 = vadd.f32 %v7683_v41, %v11219_v4 }
0x1f35   : > { %v9117_v59 = vpop.f32.mrf.mxu0 }
0x1f37   : > { %v6373_v58 = vpop.f32.mrf.mxu0 }
0x1f38   : > { %v6374_v18 = vadd.f32 %v7701_v39, %v6373_v58 }
0x1f39   : > { %v9120_v32 = vpop.f32.mrf.mxu0 }
0x1f3a   : > { %v9493_v32 = vld [vmem:[%s11442_s0] sm:$0xff] }
0x1f3b   : > { %v6378_v30 = vpop.f32.mrf.mxu0 }
0x1f3c   : > { %v6379_v63 = vadd.f32 %v7701_v39, %v6378_v30 }
0x1f3d   : > { %v9123_v47 = vpop.f32.mrf.mxu0 }
0x1f3f   : > { %v6383_v12 = vpop.f32.mrf.mxu0 }
0x1f40   : > { %v6384_v6 = vadd.f32 %v7701_v39, %v6383_v12 }
0x1f41   : > { %v9126_v24 = vpop.f32.mrf.mxu0 }
0x1f42   : > { %9153 = vmatpush3.msra.mxu0 %v6384_v6 }
0x1f43   : > { %9154 = vmatprep.subr.mxu0 %v9506_v0 }
0x1f44   : > { %9155 = vmatpush3.msra.mxu0 %v6379_v63 }
0x1f45   : > { %9156 = vmatprep.subr.mxu0 %v9506_v0 }
0x1f46   : > { %9157 = vmatpush3.msra.mxu0 %v6374_v18 }
0x1f47   : > { %9158 = vmatprep.subr.mxu0 %v9506_v0 }
0x1f48   : > { %9159 = vmatpush3.msra.mxu0 %v6369_v16 }
0x1f49   : > { %9160 = vmatprep.subr.mxu0 %v9506_v0 }
0x1f4a   : > { %9161 = vmatpush3.msra.mxu0 %v6364_v61  ;;  %v9495_v61 = vld [vmem:[%s11442_s0 + $0x10] sm:$0xff] }
0x1f4b   : > { %9194 = vmatprep.subr.mxu0 %v9506_v0 }
0x1fc8   : > { %v6058_v35 = vpop.f32.mrf.mxu1 }
0x1fc9   : > { %v11245_v53 = vadd.f32 %v6058_v35, %v5362_v9 }
0x1fca   : > { %v9063_v21 = vpop.f32.mrf.mxu1 }
0x1fcc   : > { %v6063_v14 = vpop.f32.mrf.mxu1 }
0x1fcd   : > { %v11249_v17 = vadd.f32 %v6063_v14, %v5367_v38 }
0x1fce   : > { %v9066_v48 = vpop.f32.mrf.mxu1 }
0x1fcf   : > { %v9496_v48 = vld [vmem:[%s11442_s0 + $0x18] sm:$0xff] }
0x1fd0   : > { %v6068_v62 = vpop.f32.mrf.mxu1 }
0x1fd1   : > { %v11253_v22 = vadd.f32 %v6068_v62, %v5372_v2 }
0x1fd2   : > { %v9069_v27 = vpop.f32.mrf.mxu1 }
0x1fd4   : > { %v6073_v57 = vpop.f32.mrf.mxu1 }
0x1fd5   : > { %v11257_v50 = vadd.f32 %v6073_v57, %v5377_v44 }
0x1fd6   : > { %v9072_v31 = vpop.f32.mrf.mxu1 }
0x1fd7   : > { %v9497_v31 = vld [vmem:[%s11442_s0 + $0x20] sm:$0xff] }
0x1fd8   : > { %v6078_v10 = vpop.f32.mrf.mxu1 }
0x1fd9   : > { %v11261_v36 = vadd.f32 %v6078_v10, %v5382_v28 }
0x1fda   : > { %v9075_v43 = vpop.f32.mrf.mxu1 }
0x1fdc   : > { %v6263_v7 = vpop.f32.mrf.mxu1 }
0x1fdd   : > { %v6264_v5 = vadd.f32 %v7692_v15, %v6263_v7 }
0x1fde   : > { %v9097_v54 = vpop.f32.mrf.mxu1 }
0x1fe0   : > { %v6268_v46 = vpop.f32.mrf.mxu1 }
0x1fe1   : > { %v6269_v45 = vadd.f32 %v7692_v15, %v6268_v46 }
0x1fe2   : > { %v9100_v37 = vpop.f32.mrf.mxu1 }
0x1fe4   : > { %v6273_v25 = vpop.f32.mrf.mxu1 }
0x1fe5   : > { %v6274_v40 = vadd.f32 %v7692_v15, %v6273_v25 }
0x1fe6   : > { %v9103_v52 = vpop.f32.mrf.mxu1 }
0x1fe8   : > { %v6278_v33 = vpop.f32.mrf.mxu1 }
0x1fe9   : > { %v6279_v34 = vadd.f32 %v7692_v15, %v6278_v33 }
0x1fea   : > { %v9106_v60 = vpop.f32.mrf.mxu1 }
0x1fec   : > { %v6283_v55 = vpop.f32.mrf.mxu1 }
0x1fed   : > { %v6284_v3 = vadd.f32 %v7692_v15, %v6283_v55 }
0x1fee   : > { %v9109_v20 = vpop.f32.mrf.mxu1 }
0x1fef   : > { %9128 = vmatpush3.xpose.msk.msra.mxu1 %vm1026_vm3, %v6284_v3 }
0x1ff0   : > { %9129 = vmatprep.subr.mxu1 %v9506_v0 }
0x1ff3   : > { %9130 = vmatpush3.xpose.msk.msra.mxu1 %vm1026_vm3, %v6279_v34 }
0x1ff4   : > { %9131 = vmatprep.subr.mxu1 %v9506_v0 }
0x1ff7   : > { %9132 = vmatpush3.xpose.msk.msra.mxu1 %vm1026_vm3, %v6274_v40 }
0x1ff8   : > { %9133 = vmatprep.subr.mxu1 %v9506_v0 }
0x1ffb   : > { %9134 = vmatpush3.xpose.msk.msra.mxu1 %vm1026_vm3, %v6269_v45 }
0x1ffc   : > { %9135 = vmatprep.subr.mxu1 %v9506_v0 }
0x1fff   : > { %9136 = vmatpush3.xpose.msk.msra.mxu1 %vm1026_vm3, %v6264_v5 }
0x2000   : > { %9177 = vmatprep.subr.mxu1 %v9506_v0 }
0x2002   : > { %9138 = vmatmul.mubr.msk.f32.vlgmr.msra.gmra.mxu1 %vm1026_vm3, %v6164_v8 }
0x2003   : > { %9140 = vmatprep.mubr.msk.f32.mxu1 %vm9507_vm0, %v9506_v0 }
0x2006   : > { %9141 = vmatmul.mubr.msk.f32.gmra.mxu1 %vm1026_vm3, %v6169_v13 }
0x2007   : > { %9143 = vmatprep.mubr.msk.f32.mxu1 %vm9507_vm0, %v9506_v0 }
0x200a   : > { %9144 = vmatmul.mubr.msk.f32.gmra.mxu1 %vm1026_vm3, %v6174_v11 }
0x200b   : > { %9146 = vmatprep.mubr.msk.f32.mxu1 %vm9507_vm0, %v9506_v0 }
0x200e   : > { %9147 = vmatmul.mubr.msk.f32.gmra.mxu1 %vm1026_vm3, %v6179_v1 }
0x200f   : > { %9149 = vmatprep.mubr.msk.f32.mxu1 %vm9507_vm0, %v9506_v0 }
0x2012   : > { %9150 = vmatmul.mubr.msk.f32.gmra.mxu1 %vm1026_vm3, %v6184_v23 }
0x2013   : > { %9179 = vmatprep.mubr.msk.f32.mxu1 %vm9507_vm0, %v9506_v0 }
0x20c2   : > { %v6483_v4 = vpop.f32.mrf.mxu1 }
0x20c3   : > { %v6507_v59 = vmul.f32 0.35355338, %v6483_v4 }
0x20c4   : > { %v9139_v58 = vpop.f32.mrf.mxu1 }
0x20c5   : > { %v6512_v49 = vadd.f32 %v9493_v32, %v6507_v59  ;;  %v7723_v58 = vld [vmem:[%s10023_s16 + $0x38] sm:$0xff]  ;;  %s7326_s16 = sshll.u32 %s11459_s10, 1 }
0x20c6   : > { %v6488_v30 = vpop.f32.mrf.mxu1  ;;  %9178 = vmatpush3.msra.mxu1 %v7723_v58  ;;  %s495_s21 = scalar_lea.vmem %s11451_s9, %s7326_s16 }
0x20c7   : > { %v6508_v47 = vmul.f32 0.35355338, %v6488_v30  ;;  %v6517_v39 = vsel %vm1157_vm4, %v6512_v49, -inf  ;;  %9217 = vmatprep.subr.mxu1 %v9506_v0 }
0x20c8   : > { %6518 = vmax.xlane.f32.xlu0 %v6517_v39  ;;  %v9142_v12 = vpop.f32.mrf.mxu1 }
0x20c9   : > { %v6513_v6 = vadd.f32 %v9494_v51, %v6508_v47 }
0x20ca   : > { %v6493_v24 = vpop.f32.mrf.mxu1 }
0x20cb   : > { %v6509_v63 = vmul.f32 0.35355338, %v6493_v24  ;;  %v6520_v18 = vsel %vm1157_vm4, %v6513_v6, -inf }
0x20cc   : > { %6521 = vmax.xlane.f32.xlu1 %v6520_v18  ;;  %v9145_v16 = vpop.f32.mrf.mxu1 }
0x20cd   : > { %v6514_v9 = vadd.f32 %v9495_v61, %v6509_v63 }
0x20ce   : > { %v6498_v35 = vpop.f32.mrf.mxu1 }
0x20cf   : > { %v6510_v21 = vmul.f32 0.35355338, %v6498_v35  ;;  %v6523_v38 = vsel %vm1157_vm4, %v6514_v9, -inf }
0x20d0   : > { %6524 = vmax.xlane.f32.xlu0 %v6523_v38  ;;  %v9148_v14 = vpop.f32.mrf.mxu1 }
0x20d1   : > { %v6515_v2 = vadd.f32 %v9496_v48, %v6510_v21 }
0x20d2   : > { %v6503_v62 = vpop.f32.mrf.mxu1 }
0x20d3   : > { %v6511_v27 = vmul.f32 0.35355338, %v6503_v62  ;;  %v6526_v44 = vsel %vm1157_vm4, %v6515_v2, -inf }
0x20d4   : > { %6527 = vmax.xlane.f32.xlu1 %v6526_v44  ;;  %v9151_v57 = vpop.f32.mrf.mxu1 }
0x20d5   : > { %v6516_v28 = vadd.f32 %v9497_v31, %v6511_v27 }
0x20d7   : > { %v6529_v10 = vsel %vm1157_vm4, %v6516_v28, -inf }
0x20d8   : > { %6530 = vmax.xlane.f32.xlu0 %v6529_v10 }
0x2151   : > { %v6519_v43 = vpop.xlane.xlu0 %6518 }
0x2152   : > { %v6532_v7 = vsub.f32 %v6512_v49, %v6519_v43 }
0x2154   : > { %v6537_v54 = vmul.f32 1.442695, %v6532_v7  ;;  %v7729_v7 = vld [vmem:[%s9676_s14 + $0xb] ss:$0 sm:$0xff] }
0x2155   : > { %v6522_v46 = vpop.xlane.xlu1 %6521 }
0x2156   : > { %9441 = vpow2.f32 %v6537_v54  ;;  %v6533_v37 = vsub.f32 %v6513_v6, %v6522_v46 }
0x2158   : > { %v6539_v25 = vmul.f32 1.442695, %v6533_v37 }
0x2159   : > { %v6525_v52 = vpop.xlane.xlu0 %6524 }
0x215a   : > { %9443 = vpow2.f32 %v6539_v25  ;;  %v6534_v33 = vsub.f32 %v6514_v9, %v6525_v52 }
0x215c   : > { %v6541_v60 = vmul.f32 1.442695, %v6534_v33 }
0x215d   : > { %v6528_v15 = vpop.xlane.xlu1 %6527 }
0x215e   : > { %9445 = vpow2.f32 %v6541_v60  ;;  %v6535_v55 = vsub.f32 %v6515_v2, %v6528_v15 }
0x2160   : > { %v6543_v3 = vmul.f32 1.442695, %v6535_v55 }
0x2161   : > { %v6531_v20 = vpop.xlane.xlu0 %6530 }
0x2162   : > { %9447 = vpow2.f32 %v6543_v3  ;;  %v6536_v34 = vsub.f32 %v6516_v28, %v6531_v20 }
0x2163   : > { %v9442_v40 = vpop.eup %9441 }
0x2164   : > { %v6545_v45 = vmul.f32 1.442695, %v6536_v34  ;;  %v6547_v41 = vsel %vm1157_vm4, %v9442_v40, 0.0 }
0x2165   : > { %6548 = vadd.xlane.f32.xlu1 %v6547_v41 }
0x2166   : > { %9449 = vpow2.f32 %v6545_v45 }
0x2167   : > { %v9444_v5 = vpop.eup %9443 }
0x2168   : > { %v6550_v8 = vsel %vm1157_vm4, %v9444_v5, 0.0 }
0x2169   : > { %6551 = vadd.xlane.f32.xlu0 %v6550_v8 }
0x216b   : > { %v9446_v13 = vpop.eup %9445 }
0x216c   : > { %v6553_v11 = vsel %vm1157_vm4, %v9446_v13, 0.0 }
0x216d   : > { %6554 = vadd.xlane.f32.xlu1 %v6553_v11 }
0x216f   : > { %v9448_v1 = vpop.eup %9447 }
0x2170   : > { %v6556_v23 = vsel %vm1157_vm4, %v9448_v1, 0.0 }
0x2171   : > { %6557 = vadd.xlane.f32.xlu0 %v6556_v23 }
0x2173   : > { %v9450_v4 = vpop.eup %9449 }
0x2174   : > { %v6559_v59 = vsel %vm1157_vm4, %v9450_v4, 0.0 }
0x2175   : > { %6560 = vadd.xlane.f32.xlu1 %v6559_v59 }
0x21ee   : > { %v6549_v32 = vpop.xlane.xlu1 %6548 }
0x21ef   : > { %9451 = vrcp.f32 %v6549_v32 }
0x21f2   : > { %v6552_v49 = vpop.xlane.xlu0 %6551 }
0x21f3   : > { %9453 = vrcp.f32 %v6552_v49 }
0x21f6   : > { %v6555_v30 = vpop.xlane.xlu1 %6554 }
0x21f7   : > { %9455 = vrcp.f32 %v6555_v30 }
0x21fa   : > { %v6558_v47 = vpop.xlane.xlu0 %6557 }
0x21fb   : > { %9457 = vrcp.f32 %v6558_v47 }
0x21fc   : > { %v9452_v39 = vpop.eup %9451 }
0x21fd   : > { %v6567_v12 = vmul.f32 %v9452_v39, %v9442_v40 }
0x21fe   : > { %v6561_v51 = vpop.xlane.xlu1 %6560 }
0x21ff   : > { %9459 = vrcp.f32 %v6561_v51  ;;  %9163 = vmatmul.mubr.msk.f32.vlgmr.msra.gmra.mxu0 %vm1157_vm4, %v6567_v12 }
0x2200   : > { %v9454_v6 = vpop.eup %9453  ;;  %9165 = vmatprep.mubr.msk.f32.mxu0 %vm9507_vm0, %v9506_v0 }
0x2201   : > { %v6568_v24 = vmul.f32 %v9454_v6, %v9444_v5 }
0x2203   : > { %9166 = vmatmul.mubr.msk.f32.gmra.mxu0 %vm1157_vm4, %v6568_v24 }
0x2204   : > { %v9456_v63 = vpop.eup %9455  ;;  %9168 = vmatprep.mubr.msk.f32.mxu0 %vm9507_vm0, %v9506_v0 }
0x2205   : > { %v6569_v18 = vmul.f32 %v9456_v63, %v9446_v13 }
0x2207   : > { %9169 = vmatmul.mubr.msk.f32.gmra.mxu0 %vm1157_vm4, %v6569_v18 }
0x2208   : > { %v9458_v16 = vpop.eup %9457  ;;  %9171 = vmatprep.mubr.msk.f32.mxu0 %vm9507_vm0, %v9506_v0 }
0x2209   : > { %v6570_v61 = vmul.f32 %v9458_v16, %v9448_v1 }
0x220b   : > { %9172 = vmatmul.mubr.msk.f32.gmra.mxu0 %vm1157_vm4, %v6570_v61 }
0x220c   : > { %v9460_v9 = vpop.eup %9459  ;;  %9174 = vmatprep.mubr.msk.f32.mxu0 %vm9507_vm0, %v9506_v0 }
0x220d   : > { %v6571_v35 = vmul.f32 %v9460_v9, %v9450_v4 }
0x220f   : > { %9175 = vmatmul.mubr.msk.f32.gmra.mxu0 %vm1157_vm4, %v6571_v35 }
0x2210   : > { %9202 = vmatprep.mubr.msk.f32.mxu0 %vm9507_vm0, %v9506_v0 }
0x22bf   : > { %v6653_v21 = vpop.f32.mrf.mxu0 }
0x22c0   : > { %9180 = vmatmul.mubr.msk.f32.vlgmr.msra.gmra.mxu1 %vm1026_vm3, %v6653_v21 }
0x22c1   : > { %v9164_v38 = vpop.f32.mrf.mxu0  ;;  %9182 = vmatprep.mubr.msk.f32.mxu1 %vm9507_vm0, %v9506_v0 }
0x22c3   : > { %v6658_v14 = vpop.f32.mrf.mxu0 }
0x22c4   : > { %9183 = vmatmul.mubr.msk.f32.gmra.mxu1 %vm1026_vm3, %v6658_v14 }
0x22c5   : > { %v9167_v48 = vpop.f32.mrf.mxu0  ;;  %9185 = vmatprep.mubr.msk.f32.mxu1 %vm9507_vm0, %v9506_v0 }
0x22c6   : > { %v7735_v48 = vld [vmem:[%s10503_s15 + $0x78] sm:$0xff] }
0x22c7   : > { %v6663_v2 = vpop.f32.mrf.mxu0  ;;  %9195 = vmatpush3.msra.mxu0 %v7735_v48 }
0x22c8   : > { %9186 = vmatmul.mubr.msk.f32.gmra.mxu1 %vm1026_vm3, %v6663_v2  ;;  %9196 = vmatprep.subr.mxu0 %v9506_v0  ;;  %v7734_v2 = vld [vmem:[%s10503_s15 + $0x70] sm:$0xff] }
0x22c9   : > { %v9170_v62 = vpop.f32.mrf.mxu0  ;;  %9188 = vmatprep.mubr.msk.f32.mxu1 %vm9507_vm0, %v9506_v0  ;;  %9197 = vmatpush3.msra.mxu0 %v7734_v2 }
0x22ca   : > { %9198 = vmatprep.subr.mxu0 %v9506_v0  ;;  %v7733_v62 = vld [vmem:[%s10503_s15 + $0x68] sm:$0xff] }
0x22cb   : > { %v6668_v27 = vpop.f32.mrf.mxu0  ;;  %9199 = vmatpush3.msra.mxu0 %v7733_v62 }
0x22cc   : > { %9189 = vmatmul.mubr.msk.f32.gmra.mxu1 %vm1026_vm3, %v6668_v27  ;;  %9200 = vmatprep.subr.mxu0 %v9506_v0  ;;  %v7732_v27 = vld [vmem:[%s10503_s15 + $0x60] sm:$0xff] }
0x22cd   : > { %v9173_v44 = vpop.f32.mrf.mxu0  ;;  %9191 = vmatprep.mubr.msk.f32.mxu1 %vm9507_vm0, %v9506_v0  ;;  %9201 = vmatpush3.msra.mxu0 %v7732_v27 }
0x22cf   : > { %v6673_v57 = vpop.f32.mrf.mxu0 }
0x22d0   : > { %9192 = vmatmul.mubr.msk.f32.gmra.mxu1 %vm1026_vm3, %v6673_v57 }
0x22d1   : > { %v9176_v31 = vpop.f32.mrf.mxu0  ;;  %9233 = vmatprep.mubr.msk.f32.mxu1 %vm9507_vm0, %v9506_v0 }
0x2380   : > { %v6760_v28 = vpop.f32.mrf.mxu1 }
0x2381   : > { %v6784_v10 = vadd.f32 %v6760_v28, %v11245_v53 }
0x2382   : > { %v9181_v43 = vpop.f32.mrf.mxu1 }
0x2383   : > { %v6789_v54 = vadd.f32 %v6784_v10, %v10568_v56 }
0x2384   : > { %v6765_v46 = vpop.f32.mrf.mxu1 }
0x2385   : > { %v6785_v37 = vadd.f32 %v6765_v46, %v11249_v17  ;;  %v6799_v25 = vadd.f32 %v7729_v7, %v6789_v54 }
0x2386   : > { %v9184_v52 = vpop.f32.mrf.mxu1 }
0x2387   : > { %v6790_v33 = vadd.f32 %v6785_v37, %v10573_v42  ;;  %v6806_v60 = vsel %vm625_vm2, %v6799_v25, 0.0 }
0x2388   : > { %6807 = vadd.xlane.f32.xlu0 %v6806_v60  ;;  %v6770_v15 = vpop.f32.mrf.mxu1 }
0x2389   : > { %v6786_v55 = vadd.f32 %v6770_v15, %v11253_v22  ;;  %v6800_v3 = vadd.f32 %v7729_v7, %v6790_v33 }
0x238a   : > { %v9187_v20 = vpop.f32.mrf.mxu1 }
0x238b   : > { %v6791_v53 = vadd.f32 %v6786_v55, %v10578_v26  ;;  %v6809_v34 = vsel %vm625_vm2, %v6800_v3, 0.0  ;;  %v7730_v55 = vld [vmem:[%s9676_s14 + $0x9] ss:$0 sm:$0xff] }
0x238c   : > { %6810 = vadd.xlane.f32.xlu1 %v6809_v34  ;;  %v6775_v56 = vpop.f32.mrf.mxu1 }
0x238d   : > { %v6787_v17 = vadd.f32 %v6775_v56, %v11257_v50  ;;  %v6801_v40 = vadd.f32 %v7729_v7, %v6791_v53  ;;  %v7731_v53 = vld [vmem:[%s9676_s14 + $0xa] ss:$0 sm:$0xff] }
0x238e   : > { %v9190_v45 = vpop.f32.mrf.mxu1 }
0x238f   : > { %v6792_v42 = vadd.f32 %v6787_v17, %v10583_v29  ;;  %v6812_v41 = vsel %vm625_vm2, %v6801_v40, 0.0 }
0x2390   : > { %6813 = vadd.xlane.f32.xlu0 %v6812_v41  ;;  %v6780_v5 = vpop.f32.mrf.mxu1 }
0x2391   : > { %v6788_v22 = vadd.f32 %v6780_v5, %v11261_v36  ;;  %v6802_v8 = vadd.f32 %v7729_v7, %v6792_v42 }
0x2392   : > { %v9193_v13 = vpop.f32.mrf.mxu1 }
0x2393   : > { %v6793_v26 = vadd.f32 %v6788_v22, %v10588_v19  ;;  %v6815_v11 = vsel %vm625_vm2, %v6802_v8, 0.0 }
0x2394   : > { %6816 = vadd.xlane.f32.xlu1 %v6815_v11 }
0x2395   : > { %v11367_v1 = vadd.f32 %v7729_v7, %v6793_v26 }
0x2397   : > { %v6818_v50 = vsel %vm625_vm2, %v11367_v1, 0.0 }
0x2398   : > { %6819 = vadd.xlane.f32.xlu0 %v6818_v50 }
0x2411   : > { %v6808_v29 = vpop.xlane.xlu0 %6807 }
0x2412   : > { %v6821_v23 = vmul.f32 0.03125, %v6808_v29 }
0x2414   : > { %v6826_v4 = vsub.f32 %v6799_v25, %v6821_v23 }
0x2415   : > { %v6811_v59 = vpop.xlane.xlu1 %6810 }
0x2416   : > { %v6822_v58 = vmul.f32 0.03125, %v6811_v59  ;;  %v6831_v32 = vmul.f32 %v6826_v4, %v6826_v4 }
0x2418   : > { %v6827_v36 = vsub.f32 %v6800_v3, %v6822_v58  ;;  %v6836_v49 = vsel %vm625_vm2, %v6831_v32, 0.0  ;;  %v7749_v58 = vld [vmem:[%s10503_s15 + $0xb8] sm:$0xff]  ;;  %v7748_v32 = vld [vmem:[%s10503_s15 + $0xb0] sm:$0xff] }
0x2419   : > { %v6814_v30 = vpop.xlane.xlu0 %6813  ;;  %6837 = vadd.xlane.f32.xlu1 %v6836_v49  ;;  %9218 = vmatpush3.msra.mxu1 %v7749_v58  ;;  %v7746_v49 = vld [vmem:[%s10503_s15 + $0xa0] sm:$0xff] }
0x241a   : > { %v6823_v19 = vmul.f32 0.03125, %v6814_v30  ;;  %v6832_v47 = vmul.f32 %v6827_v36, %v6827_v36  ;;  %9219 = vmatprep.subr.mxu1 %v9506_v0  ;;  %v7745_v30 = vld [vmem:[%s10503_s15 + $0x98] sm:$0xff] }
0x241b   : > { %9220 = vmatpush3.msra.mxu1 %v7748_v32 }
0x241c   : > { %v6828_v39 = vsub.f32 %v6801_v40, %v6823_v19  ;;  %v6839_v12 = vsel %vm625_vm2, %v6832_v47, 0.0  ;;  %9221 = vmatprep.subr.mxu1 %v9506_v0  ;;  %v7744_v19 = vld [vmem:[%s10503_s15 + $0x90] sm:$0xff]  ;;  %v7743_v47 = vld [vmem:[%s10503_s15 + $0x88] sm:$0xff] }
0x241d   : > { %v6817_v51 = vpop.xlane.xlu1 %6816  ;;  %6840 = vadd.xlane.f32.xlu0 %v6839_v12  ;;  %v7736_v12 = vld [vmem:[%s9676_s14 + $0xc] ss:$0 sm:$0xff] }
0x241e   : > { %v6824_v6 = vmul.f32 0.03125, %v6817_v51  ;;  %v6833_v24 = vmul.f32 %v6828_v39, %v6828_v39 }
0x2420   : > { %v6829_v63 = vsub.f32 %v6802_v8, %v6824_v6  ;;  %v6842_v18 = vsel %vm625_vm2, %v6833_v24, 0.0 }
0x2421   : > { %6843 = vadd.xlane.f32.xlu1 %v6842_v18  ;;  %v6820_v16 = vpop.xlane.xlu0 %6819 }
0x2422   : > { %v6825_v61 = vmul.f32 0.03125, %v6820_v16  ;;  %v6834_v9 = vmul.f32 %v6829_v63, %v6829_v63 }
0x2424   : > { %v6830_v35 = vsub.f32 %v11367_v1, %v6825_v61  ;;  %v6845_v21 = vsel %vm625_vm2, %v6834_v9, 0.0 }
0x2425   : > { %6846 = vadd.xlane.f32.xlu0 %v6845_v21 }
0x2426   : > { %v6835_v38 = vmul.f32 %v6830_v35, %v6830_v35 }
0x2428   : > { %v6848_v14 = vsel %vm625_vm2, %v6835_v38, 0.0 }
0x2429   : > { %6849 = vadd.xlane.f32.xlu1 %v6848_v14 }
0x24a2   : > { %v6838_v44 = vpop.xlane.xlu1 %6837 }
0x24a3   : > { %v6851_v57 = vmul.f32 0.03125, %v6838_v44 }
0x24a5   : > { %v6856_v31 = vadd.f32 1e-06, %v6851_v57 }
0x24a6   : > { %v6841_v28 = vpop.xlane.xlu0 %6840 }
0x24a7   : > { %9461 = vrsqrt.f32 %v6856_v31  ;;  %v6852_v10 = vmul.f32 0.03125, %v6841_v28 }
0x24a9   : > { %v6857_v43 = vadd.f32 1e-06, %v6852_v10 }
0x24aa   : > { %v6844_v7 = vpop.xlane.xlu1 %6843 }
0x24ab   : > { %9463 = vrsqrt.f32 %v6857_v43  ;;  %v6853_v54 = vmul.f32 0.03125, %v6844_v7 }
0x24ad   : > { %v6858_v46 = vadd.f32 1e-06, %v6853_v54 }
0x24ae   : > { %v6847_v37 = vpop.xlane.xlu0 %6846 }
0x24af   : > { %9465 = vrsqrt.f32 %v6858_v46  ;;  %v6854_v25 = vmul.f32 0.03125, %v6847_v37 }
0x24b1   : > { %v6859_v52 = vadd.f32 1e-06, %v6854_v25 }
0x24b2   : > { %v6850_v33 = vpop.xlane.xlu1 %6849 }
0x24b3   : > { %9467 = vrsqrt.f32 %v6859_v52  ;;  %v6855_v60 = vmul.f32 0.03125, %v6850_v33 }
0x24b4   : > { %v9462_v15 = vpop.eup %9461 }
0x24b5   : > { %v6866_v3 = vmul.f32 %v9462_v15, %v6826_v4  ;;  %v6860_v20 = vadd.f32 1e-06, %v6855_v60 }
0x24b7   : > { %v6875_v34 = vmul.f32 %v7730_v55, %v6866_v3  ;;  %9469 = vrsqrt.f32 %v6860_v20 }
0x24b8   : > { %v9464_v56 = vpop.eup %9463 }
0x24b9   : > { %v6884_v17 = vadd.f32 %v7731_v53, %v6875_v34  ;;  %v6867_v40 = vmul.f32 %v9464_v56, %v6827_v36  ;;  %v7747_v36 = vld [vmem:[%s10503_s15 + $0xa8] sm:$0xff] }
0x24ba   : > { %9222 = vmatpush3.msra.mxu1 %v7747_v36 }
0x24bb   : > { %9203 = vmatmul.mubr.msk.f32.vlgmr.msra.gmra.mxu0 %vm625_vm2, %v6884_v17  ;;  %v6876_v45 = vmul.f32 %v7730_v55, %v6867_v40  ;;  %9223 = vmatprep.subr.mxu1 %v9506_v0 }
0x24bc   : > { %v9466_v42 = vpop.eup %9465  ;;  %9205 = vmatprep.mubr.msk.f32.mxu0 %vm9507_vm0, %v9506_v0  ;;  %9224 = vmatpush3.msra.mxu1 %v7746_v49 }
0x24bd   : > { %v6868_v41 = vmul.f32 %v9466_v42, %v6828_v39  ;;  %v6885_v5 = vadd.f32 %v7731_v53, %v6876_v45  ;;  %9225 = vmatprep.subr.mxu1 %v9506_v0  ;;  %v7742_v39 = vld [vmem:[%s10503_s15 + $0x80] sm:$0xff] }
0x24be   : > { %9226 = vmatpush3.msra.mxu1 %v7745_v30 }
0x24bf   : > { %9206 = vmatmul.mubr.msk.f32.gmra.mxu0 %vm625_vm2, %v6885_v5  ;;  %v6877_v22 = vmul.f32 %v7730_v55, %v6868_v41  ;;  %9227 = vmatprep.subr.mxu1 %v9506_v0 }
0x24c0   : > { %v9468_v8 = vpop.eup %9467  ;;  %9208 = vmatprep.mubr.msk.f32.mxu0 %vm9507_vm0, %v9506_v0  ;;  %9228 = vmatpush3.msra.mxu1 %v7744_v19 }
0x24c1   : > { %v6869_v13 = vmul.f32 %v9468_v8, %v6829_v63  ;;  %v6886_v26 = vadd.f32 %v7731_v53, %v6877_v22  ;;  %9229 = vmatprep.subr.mxu1 %v9506_v0 }
0x24c2   : > { %9230 = vmatpush3.msra.mxu1 %v7743_v47 }
0x24c3   : > { %9209 = vmatmul.mubr.msk.f32.gmra.mxu0 %vm625_vm2, %v6886_v26  ;;  %v6878_v11 = vmul.f32 %v7730_v55, %v6869_v13  ;;  %9231 = vmatprep.subr.mxu1 %v9506_v0 }
0x24c4   : > { %v9470_v50 = vpop.eup %9469  ;;  %9211 = vmatprep.mubr.msk.f32.mxu0 %vm9507_vm0, %v9506_v0  ;;  %9232 = vmatpush3.msra.mxu1 %v7742_v39 }
0x24c5   : > { %v6870_v29 = vmul.f32 %v9470_v50, %v6830_v35  ;;  %v6887_v23 = vadd.f32 %v7731_v53, %v6878_v11  ;;  %v7750_v50 = vld [vmem:[%s9676_s14 + $0xd] ss:$0 sm:$0xff] }
0x24c7   : > { %9212 = vmatmul.mubr.msk.f32.gmra.mxu0 %vm625_vm2, %v6887_v23  ;;  %v6879_v4 = vmul.f32 %v7730_v55, %v6870_v29 }
0x24c8   : > { %9214 = vmatprep.mubr.msk.f32.mxu0 %vm9507_vm0, %v9506_v0 }
0x24c9   : > { %v6888_v59 = vadd.f32 %v7731_v53, %v6879_v4 }
0x24cb   : > { %9215 = vmatmul.mubr.msk.f32.gmra.mxu0 %vm625_vm2, %v6888_v59 }
0x257b   : > { %v6980_v51 = vpop.f32.mrf.mxu0 }
0x257c   : > { %v6981_v6 = vadd.f32 %v7736_v12, %v6980_v51 }
0x257d   : > { %v9204_v24 = vpop.f32.mrf.mxu0 }
0x257e   : > { %v7009_v63 = vmul.f32 0.70710677, %v6981_v6  ;;  %v7004_v10 = vmul.f32 0.5, %v6981_v6  ;;  %v7757_v6 = vld [vmem:[%s9676_s14 + $0xf] ss:$0 sm:$0xff] }
0x257f   : > { %v6985_v18 = vpop.f32.mrf.mxu0 }
0x2580   : > { %9471 = verf.f32 %v7009_v63  ;;  %v6986_v16 = vadd.f32 %v7736_v12, %v6985_v18 }
0x2581   : > { %v9207_v61 = vpop.f32.mrf.mxu0 }
0x2582   : > { %v7010_v9 = vmul.f32 0.70710677, %v6986_v16  ;;  %v7005_v37 = vmul.f32 0.5, %v6986_v16 }
0x2583   : > { %v6990_v35 = vpop.f32.mrf.mxu0 }
0x2584   : > { %9473 = verf.f32 %v7010_v9  ;;  %v6991_v21 = vadd.f32 %v7736_v12, %v6990_v35 }
0x2585   : > { %v9210_v38 = vpop.f32.mrf.mxu0 }
0x2586   : > { %v7011_v14 = vmul.f32 0.70710677, %v6991_v21  ;;  %v7006_v60 = vmul.f32 0.5, %v6991_v21 }
0x2587   : > { %v6995_v48 = vpop.f32.mrf.mxu0 }
0x2588   : > { %9475 = verf.f32 %v7011_v14  ;;  %v6996_v2 = vadd.f32 %v7736_v12, %v6995_v48 }
0x2589   : > { %v9213_v62 = vpop.f32.mrf.mxu0 }
0x258a   : > { %v7012_v27 = vmul.f32 0.70710677, %v6996_v2  ;;  %v7007_v20 = vmul.f32 0.5, %v6996_v2 }
0x258b   : > { %v7000_v44 = vpop.f32.mrf.mxu0 }
0x258c   : > { %9477 = verf.f32 %v7012_v27  ;;  %v7001_v57 = vadd.f32 %v7736_v12, %v7000_v44 }
0x258d   : > { %v9472_v31 = vpop.eup %9471  ;;  %v9216_v28 = vpop.f32.mrf.mxu0 }
0x258e   : > { %v7019_v43 = vadd.f32 1.0, %v9472_v31  ;;  %v7013_v7 = vmul.f32 0.70710677, %v7001_v57  ;;  %v7008_v17 = vmul.f32 0.5, %v7001_v57 }
0x2590   : > { %v7024_v54 = vmul.f32 %v7019_v43, %v7004_v10  ;;  %9479 = verf.f32 %v7013_v7 }
0x2591   : > { %v9474_v46 = vpop.eup %9473 }
0x2592   : > { %v7020_v25 = vadd.f32 1.0, %v9474_v46  ;;  %9234 = vmatmul.mubr.msk.f32.vlgmr.msra.gmra.mxu1 %vm3777_vm5, %v7024_v54 }
0x2593   : > { %9236 = vmatprep.mubr.msk.f32.mxu1 %vm9507_vm0, %v9506_v0 }
0x2594   : > { %v7025_v52 = vmul.f32 %v7020_v25, %v7005_v37 }
0x2595   : > { %v9476_v33 = vpop.eup %9475 }
0x2596   : > { %v7021_v15 = vadd.f32 1.0, %v9476_v33  ;;  %9237 = vmatmul.mubr.msk.f32.gmra.mxu1 %vm3777_vm5, %v7025_v52 }
0x2597   : > { %9239 = vmatprep.mubr.msk.f32.mxu1 %vm9507_vm0, %v9506_v0 }
0x2598   : > { %v7026_v55 = vmul.f32 %v7021_v15, %v7006_v60 }
0x2599   : > { %v9478_v3 = vpop.eup %9477 }
0x259a   : > { %v7022_v53 = vadd.f32 1.0, %v9478_v3  ;;  %9240 = vmatmul.mubr.msk.f32.gmra.mxu1 %vm3777_vm5, %v7026_v55 }
0x259b   : > { %9242 = vmatprep.mubr.msk.f32.mxu1 %vm9507_vm0, %v9506_v0 }
0x259c   : > { %v7027_v34 = vmul.f32 %v7022_v53, %v7007_v20 }
0x259d   : > { %v9480_v56 = vpop.eup %9479 }
0x259e   : > { %v7023_v40 = vadd.f32 1.0, %v9480_v56  ;;  %9243 = vmatmul.mubr.msk.f32.gmra.mxu1 %vm3777_vm5, %v7027_v34 }
0x259f   : > { %9245 = vmatprep.mubr.msk.f32.mxu1 %vm9507_vm0, %v9506_v0 }
0x25a0   : > { %v7028_v45 = vmul.f32 %v7023_v40, %v7008_v17 }
0x25a2   : > { %9246 = vmatmul.mubr.msk.f32.gmra.mxu1 %vm3777_vm5, %v7028_v45 }
0x2652   : > { %v7123_v42 = vpop.f32.mrf.mxu1 }
0x2654   : > { %v9235_v41 = vpop.f32.mrf.mxu1 }
0x2656   : > { %v7127_v5 = vpop.f32.mrf.mxu1 }
0x2658   : > { %v9238_v22 = vpop.f32.mrf.mxu1 }
0x265a   : > { %v7131_v8 = vpop.f32.mrf.mxu1 }
0x265c   : > { %v9241_v13 = vpop.f32.mrf.mxu1 }
0x265e   : > { %v7135_v26 = vpop.f32.mrf.mxu1 }
0x2660   : > { %v9244_v11 = vpop.f32.mrf.mxu1 }
0x2662   : > { %v7139_v29 = vpop.f32.mrf.mxu1 }
0x2663   : > { %v7140_v23 = vadd.f32 %v7750_v50, %v7139_v29 }
0x2664   : > { %v9247_v4 = vpop.f32.mrf.mxu1 }
0x2665   : > { %v7143_v59 = vadd.f32 %v7140_v23, %v11367_v1  ;;  %v7756_v1 = vld [vmem:[%s9676_s14 + $0xe] ss:$0 sm:$0xff] }
0x2667   : > { %v7146_v0 = vsel %vm625_vm2, %v7143_v59, 0.0 }
0x2668   : > { %7147 = vadd.xlane.f32.xlu0 %v7146_v0 }
0x26f1   : > { %v7148_v58 = vpop.xlane.xlu0 %7147 }
0x26f2   : > { %v7149_v32 = vmul.f32 0.03125, %v7148_v58 }
0x26f4   : > { %v7150_v36 = vsub.f32 %v7143_v59, %v7149_v32 }
0x26f6   : > { %v7151_v49 = vmul.f32 %v7150_v36, %v7150_v36 }
0x26f8   : > { %v7152_v30 = vsel %vm625_vm2, %v7151_v49, 0.0 }
0x26f9   : > { %7153 = vadd.xlane.f32.xlu1 %v7152_v30 }
0x2782   : > { %v7154_v19 = vpop.xlane.xlu1 %7153 }
0x2783   : > { %v7155_v47 = vmul.f32 0.03125, %v7154_v19 }
0x2785   : > { %v7156_v39 = vadd.f32 1e-06, %v7155_v47 }
0x2787   : > { %9481 = vrsqrt.f32 %v7156_v39 }
0x2794   : > { %v9482_v12 = vpop.eup %9481 }
0x2795   : > { %v7158_v51 = vmul.f32 %v9482_v12, %v7150_v36 }
0x2797   : > { %v7163_v24 = vmul.f32 %v7756_v1, %v7158_v51 }
0x2799   : > { %v7168_v63 = vadd.f32 %v7757_v6, %v7163_v24 }
0x279b   : > { %7170 = vst.msk [vmem:[%s495_s21] sm:$0x3] %vm7169_vm6, %v7168_v63 }
0x279c PF: > { %s19_s30 = sadd.s32 1, %s9504_s30  }
0x279d   : > { %p16_p7 = scmp.ge.s32.totalorder %s19_s30, 4  }
0x279f   :  { %18 = sbr.rel (!%p16_p7) target bundleno = 1 (0x1), region = 143 }

</bundles_post_ra>
